<compile_context>
chip_gen: v6e
topology: v6e:2x2x1
jax: 0.10.0
libtpu: 0.0.40
codegen_flags: <defaults>
</compile_context>

<pallas_src>
import functools

import jax
import jax.numpy as jnp
from jax.experimental import pallas as pl
from jax.experimental.pallas import tpu as pltpu

F32 = jnp.float32
BF16 = jnp.bfloat16

TAPS_3x3 = tuple((i, j) for i in range(3) for j in range(3))
TAPS_2x2 = tuple((i, j) for i in range(2) for j in range(2))

_VMEM_LIMIT = 48 * 1024 * 1024          # headroom below v7x's 64 MiB VMEM


def _cparams(*sem):
    return pltpu.CompilerParams(dimension_semantics=sem,
                                vmem_limit_bytes=_VMEM_LIMIT)


def _const_spec(shape):
    nd = len(shape)
    return pl.BlockSpec(tuple(shape), lambda *_: (0,) * nd)


def _batch_spec(tail):
    tail = tuple(tail)
    nz = len(tail)
    return pl.BlockSpec((1,) + tail, lambda b, *_: (b,) + (0,) * nz)


def _row_tile(m, target=512):
    if m <= target:
        return m
    for t in range(target, 7, -8):
        if m % t == 0:
            return t
    return m


# ----------------------------- Pallas kernels ------------------------------

def _conv_pass1_kernel(x_ref, w_ref, b_ref, y_ref, stat_ref, *, taps, out_hw, relu):
    """Conv layer, pass 1.

    taps != None: x block is (1, Hs, Ws, Cin) (padded, stride-1 after the
        wrapper-side space-to-depth for stride-2 convs); the (kh,kw) patch
        extraction happens here, per tap, and accumulates bf16 matmuls into a
        float32 accumulator (in-kernel "im2col", never written to HBM).
    taps == None: x block is already (1, M, K) (tiny-layer fallback).

    Also emits per-block (sum, sum_sq) over rows so BatchNorm batch statistics
    stay global under batch tiling (two-pass BN).
    """
    cin = x_ref.shape[-1]
    cout = w_ref.shape[-1]
    if taps is None:
        acc = jnp.dot(x_ref[0].astype(jnp.bfloat16), w_ref[0],
                      preferred_element_type=jnp.float32)
    else:
        ho, wo = out_hw
        acc = jnp.zeros((ho * wo, cout), jnp.float32)
        for t, (ti, tj) in enumerate(taps):
            xt = x_ref[0, ti:ti + ho, tj:tj + wo, :]
            xt = xt.astype(jnp.float32).reshape(ho * wo, cin)
            acc = acc + jnp.dot(xt.astype(jnp.bfloat16), w_ref[t],
                                preferred_element_type=jnp.float32)
    acc = acc + b_ref[...]
    if relu:
        acc = jnp.maximum(acc, 0.0)
    y_ref[0] = acc.astype(y_ref.dtype)
    s1 = jnp.sum(acc, axis=0, keepdims=True)
    s2 = jnp.sum(acc * acc, axis=0, keepdims=True)
    stat_ref[0] = jnp.concatenate([s1, s2], axis=0)


def _bn_relu_kernel(y_ref, s_ref, t_ref, o_ref):
    # Pass 2 of BatchNorm: y_hat = relu(y * scale + shift), epilogue in f32.
    y = y_ref[0].astype(jnp.float32)
    o_ref[0] = jnp.maximum(y * s_ref[...] + t_ref[...], 0.0).astype(o_ref.dtype)


def _bn_mean_head_kernel(y_ref, s_ref, t_ref, w_ref, b_ref, o_ref):
    # Fused: BN apply + ReLU + global spatial mean + 1x1 conv head (mu/log_sigma).
    a = jnp.maximum(y_ref[0].astype(jnp.float32) * s_ref[...] + t_ref[...], 0.0)
    m = jnp.mean(a, axis=0, keepdims=True)                      # (1, C)
    o_ref[0] = (jnp.dot(m.astype(jnp.bfloat16), w_ref[...],
                        preferred_element_type=jnp.float32) + b_ref[...])


def _fcomb_dice_kernel(feat_ref, z1_ref, z2_ref, mask_ref,
                       wf_ref, wz_ref, b1_ref, w2_ref, b2_ref, w3_ref, b3_ref,
                       out_ref, dice_ref):
    """Fused f_combined chain for BOTH reparameterized samples + Dice sums.

    The feature-map contribution of the first 1x1 conv (feat @ Wf) is shared
    between the two samples; z only contributes a per-batch (1, C) vector.
    Sample-1 logits are stored (returned reconstruction); sample-2 logits feed
    the in-kernel softmax / Dice partial reductions (one-hot built from the
    int mask in-kernel, never materialized in HBM).
    """
    x = feat_ref[0]                                             # (TM, C) bf16
    fx = jnp.dot(x, wf_ref[...], preferred_element_type=jnp.float32)

    def head(z_ref):
        zc = jnp.dot(z_ref[0], wz_ref[...],
                     preferred_element_type=jnp.float32) + b1_ref[...]   # (1, C)
        h1 = jnp.maximum(fx + zc, 0.0)
        h2 = jnp.dot(h1.astype(jnp.bfloat16), w2_ref[...],
                     preferred_element_type=jnp.float32) + b2_ref[...]
        h2 = jnp.maximum(h2, 0.0)
        return jnp.dot(h2.astype(jnp.bfloat16), w3_ref[...],
                       preferred_element_type=jnp.float32) + b3_ref[...]

    out_ref[0] = head(z1_ref)                                   # reconstruction

    logits2 = head(z2_ref)                                      # elbo sample
    p = jax.nn.softmax(logits2, axis=-1)
    cls = jax.lax.broadcasted_iota(jnp.int32, p.shape, 1)
    t = (cls == mask_ref[0]).astype(jnp.float32)                # one-hot
    inter = jnp.sum(p * t, axis=0, keepdims=True)
    psum = jnp.sum(p, axis=0, keepdims=True)
    tsum = jnp.sum(t, axis=0, keepdims=True)
    dice_ref[0, 0] = jnp.concatenate([inter, psum, tsum], axis=0)


# ----------------------------- kernel wrappers ------------------------------

def conv_pass1(x, w_taps, bias, *, taps, out_hw, relu, out_dtype=BF16):
    B = x.shape[0]
    ho, wo = out_hw
    m = ho * wo
    cout = w_taps.shape[-1]
    w_taps = w_taps.astype(BF16)
    b2 = bias.reshape(1, cout).astype(F32)
    kernel = functools.partial(_conv_pass1_kernel, taps=taps, out_hw=out_hw,
                               relu=relu)
    y, stats = pl.pallas_call(
        kernel,
        grid=(B,),
        in_specs=[_batch_spec(x.shape[1:]),
                  _const_spec(w_taps.shape),
                  _const_spec(b2.shape)],
        out_specs=[_batch_spec((m, cout)),
                   _batch_spec((2, cout))],
        out_shape=(jax.ShapeDtypeStruct((B, m, cout), out_dtype),
                   jax.ShapeDtypeStruct((B, 2, cout), F32)),
        compiler_params=_cparams("parallel"),
    )(x, w_taps, b2)
    return y, stats


def bn_relu(y, scale, shift):
    B, m, c = y.shape
    return pl.pallas_call(
        _bn_relu_kernel,
        grid=(B,),
        in_specs=[_batch_spec((m, c)), _const_spec((1, c)), _const_spec((1, c))],
        out_specs=_batch_spec((m, c)),
        out_shape=jax.ShapeDtypeStruct((B, m, c), y.dtype),
        compiler_params=_cparams("parallel"),
    )(y, scale, shift)


def bn_relu_mean_head(y, scale, shift, head_w, head_b):
    B, m, c = y.shape
    dh = head_w.shape[-1]
    head_w = head_w.astype(BF16)
    head_b = head_b.reshape(1, dh).astype(F32)
    out = pl.pallas_call(
        _bn_mean_head_kernel,
        grid=(B,),
        in_specs=[_batch_spec((m, c)), _const_spec((1, c)), _const_spec((1, c)),
                  _const_spec(head_w.shape), _const_spec(head_b.shape)],
        out_specs=_batch_spec((1, dh)),
        out_shape=jax.ShapeDtypeStruct((B, 1, dh), F32),
        compiler_params=_cparams("parallel"),
    )(y, scale, shift, head_w, head_b)
    return out.reshape(B, dh)


def fcomb_dice(feat, z1, z2, mask, params):
    B, hw, c = feat.shape
    zd = z1.shape[-1]
    nc = params['fl_w'].shape[0]
    tm = _row_tile(hw)
    n_m = hw // tm

    wf = params['f1_w'][:, :c, 0, 0].T.astype(BF16)             # (C, C)
    wz = params['f1_w'][:, c:, 0, 0].T.astype(BF16)             # (zd, C)
    b1 = params['f1_b'].reshape(1, c).astype(F32)
    w2 = params['f2_w'][:, :, 0, 0].T.astype(BF16)              # (C, C)
    b2 = params['f2_b'].reshape(1, c).astype(F32)
    w3 = params['fl_w'][:, :, 0, 0].T.astype(BF16)              # (C, NC)
    b3 = params['fl_b'].reshape(1, nc).astype(F32)

    z1r = z1.reshape(B, 1, zd).astype(BF16)
    z2r = z2.reshape(B, 1, zd).astype(BF16)
    mask3 = mask.reshape(B, hw, 1).astype(jnp.int32)

    logits1, dice_parts = pl.pallas_call(
        _fcomb_dice_kernel,
        grid=(B, n_m),
        in_specs=[
            pl.BlockSpec((1, tm, c), lambda b, m: (b, m, 0)),
            pl.BlockSpec((1, 1, zd), lambda b, m: (b, 0, 0)),
            pl.BlockSpec((1, 1, zd), lambda b, m: (b, 0, 0)),
            pl.BlockSpec((1, tm, 1), lambda b, m: (b, m, 0)),
            _const_spec(wf.shape), _const_spec(wz.shape), _const_spec(b1.shape),
            _const_spec(w2.shape), _const_spec(b2.shape),
            _const_spec(w3.shape), _const_spec(b3.shape),
        ],
        out_specs=[
            pl.BlockSpec((1, tm, nc), lambda b, m: (b, m, 0)),
            pl.BlockSpec((1, 1, 3, nc), lambda b, m: (b, m, 0, 0)),
        ],
        out_shape=(jax.ShapeDtypeStruct((B, hw, nc), F32),
                   jax.ShapeDtypeStruct((B, n_m, 3, nc), F32)),
        compiler_params=_cparams("parallel", "parallel"),
    )(feat, z1r, z2r, mask3, wf, wz, b1, w2, b2, w3, b3)
    return logits1, dice_parts


# ----------------------------- conv plumbing (glue) -------------------------

def pad_hw(x, p):
    return jnp.pad(x, ((0, 0), (p, p), (p, p), (0, 0)))


def space_to_depth2(x):
    B, H, W, C = x.shape
    x = x.reshape(B, H // 2, 2, W // 2, 2, C).transpose(0, 1, 3, 2, 4, 5)
    return x.reshape(B, H // 2, W // 2, 4 * C)


def w_taps_3x3(w):          # (O, C, 3, 3) -> (9, C, O)
    o, c = w.shape[0], w.shape[1]
    return jnp.transpose(w, (2, 3, 1, 0)).reshape(9, c, o)


def w_taps_s2d(w):          # (O, C, 4, 4) -> (4, 4C, O), matching space_to_depth2
    o, c = w.shape[0], w.shape[1]
    a = jnp.transpose(w, (2, 3, 1, 0)).reshape(2, 2, 2, 2, c, o)   # (ti,si,tj,sj,c,o)
    a = jnp.transpose(a, (0, 2, 1, 3, 4, 5))                       # (ti,tj,si,sj,c,o)
    return a.reshape(4, 4 * c, o)


def w_flat(w):              # (O, C, kh, kw) -> (1, kh*kw*C, O), matches im2col order
    o, c, kh, kw = w.shape
    return jnp.transpose(w, (2, 3, 1, 0)).reshape(1, kh * kw * c, o)


def im2col(x, kh, kw, stride):
    """x already spatially padded.  Only used for the tiny deep encoder layers
    at toy resolution (output width < 8); a few KB of HBM."""
    B, hp, wp, c = x.shape
    ho = (hp - kh) // stride + 1
    wo = (wp - kw) // stride + 1
    cols = []
    for i in range(kh):
        for j in range(kw):
            cols.append(x[:, i:i + stride * ho:stride, j:j + stride * wo:stride, :])
    patches = jnp.stack(cols, axis=3)                              # (B,ho,wo,T,c)
    return patches.reshape(B, ho * wo, kh * kw * c), ho, wo


def bn_scale_shift(stats, gamma, beta, count, eps=1e-5):
    # Reduce per-block (sum, sum_sq) partials to the global (training-mode)
    # BatchNorm scale/shift.  Tiny O(C) math, left to XLA.
    s = jnp.sum(stats, axis=0)                                     # (2, C)
    mean = s[0] / count
    var = jnp.maximum(s[1] / count - mean * mean, 0.0)             # biased var
    scale = gamma * jax.lax.rsqrt(var + eps)
    shift = beta - mean * scale
    return scale.reshape(1, -1).astype(F32), shift.reshape(1, -1).astype(F32)


# ----------------------------- model pieces --------------------------------

def unet_forward(params, image):
    # TODO(synk): the UNET class is not defined in the reference; minimal
    # 2-layer conv stand-in returning `input_channels` feature maps at full
    # resolution (required by f_combined's channel arithmetic).
    B, H, W, _ = image.shape
    h, _ = conv_pass1(pad_hw(image, 1), w_taps_3x3(params['u1_w']),
                      params['u1_b'], taps=TAPS_3x3, out_hw=(H, W), relu=True)
    h = h.reshape(B, H, W, -1)
    feat, _ = conv_pass1(pad_hw(h, 1), w_taps_3x3(params['u2_w']),
                         params['u2_b'], taps=TAPS_3x3, out_hw=(H, W), relu=False)
    return feat                                                    # (B, H*W, C) bf16


def encoder_forward(x, conv_params, head_w_mat, head_b):
    """Stack of (Conv2d k=4 s=2 p=1 -> BatchNorm(train stats) -> ReLU), then a
    fused global-spatial-mean + 1x1 conv head giving (B, 2*z_dim)."""
    B = x.shape[0]
    n = len(conv_params)
    mls = None
    for li, (w, b, gamma, beta) in enumerate(conv_params):
        hi, wi = x.shape[1], x.shape[2]
        ho, wo = hi // 2, wi // 2
        xp = pad_hw(x, 1)
        if wo % 8 == 0:
            # fused path: stride-2 4x4 conv == stride-1 2x2 conv over the
            # space-to-depth input; taps extracted inside the kernel.
            y, stats = conv_pass1(space_to_depth2(xp), w_taps_s2d(w), b,
                                  taps=TAPS_2x2, out_hw=(ho, wo), relu=False)
        else:
            # toy-resolution deep layers only; at production sizes this branch
            # is never taken.
            patches, _, _ = im2col(xp, 4, 4, 2)
            y, stats = conv_pass1(patches.astype(BF16), w_flat(w), b,
                                  taps=None, out_hw=(ho, wo), relu=False)
        scale, shift = bn_scale_shift(stats, gamma, beta, count=B * ho * wo)
        if li < n - 1:
            x = bn_relu(y, scale, shift).reshape(B, ho, wo, -1)
        else:
            mls = bn_relu_mean_head(y, scale, shift, head_w_mat, head_b)
    return mls


def kl_diag_gauss(mu_q, logstd_q, mu_p, logstd_p):
    # kl_divergence(Independent(Normal(mu_q, exp(logstd_q)), 1),
    #               Independent(Normal(mu_p, exp(logstd_p)), 1)).mean()
    # (O(B*z_dim) scalar math; left to XLA.)
    var_q = jnp.exp(2.0 * logstd_q)
    var_p = jnp.exp(2.0 * logstd_p)
    kl = logstd_p - logstd_q + (var_q + (mu_q - mu_p) ** 2) / (2.0 * var_p) - 0.5
    return jnp.mean(jnp.sum(kl, axis=-1))


@functools.partial(jax.jit, static_argnames=("z_dim", "num_classes"))
def probabilistic_unet_forward(params, image_nhwc, mask, key, z_dim, num_classes):
    B, H, W, C = image_nhwc.shape

    # --- UNET features (stand-in) ---
    feat = unet_forward(params, image_nhwc)                        # (B, H*W, C)

    # --- priori encoder ---
    mls_p = encoder_forward(
        image_nhwc,
        [(params['p1_w'], params['p1_b'], params['p1_g'], params['p1_be']),
         (params['p2_w'], params['p2_b'], params['p2_g'], params['p2_be'])],
        params['pc_w'][:, :, 0, 0].T, params['pc_b'])
    mu_p, logstd_p = mls_p[:, :z_dim], mls_p[:, z_dim:]

    # --- variational encoder ---
    xm = jnp.concatenate(
        [image_nhwc, mask[..., None].astype(image_nhwc.dtype)], axis=-1)
    mls_q = encoder_forward(
        xm,
        [(params['v1_w'], params['v1_b'], params['v1_g'], params['v1_be']),
         (params['v2_w'], params['v2_b'], params['v2_g'], params['v2_be']),
         (params['v3_w'], params['v3_b'], params['v3_g'], params['v3_be'])],
        params['vc_w'][:, :, 0, 0].T, params['vc_b'])
    mu_q, logstd_q = mls_q[:, :z_dim], mls_q[:, z_dim:]

    # --- reparameterized samples.  Faithful to the PyTorch reference, which
    #     uses std = exp(0.5 * logstd) for sampling while the distributions
    #     (and hence the KL) use scale = exp(logstd). ---
    k1, k2 = jax.random.split(key)
    std_q = jnp.exp(0.5 * logstd_q)
    z1 = mu_q + std_q * jax.random.normal(k1, mu_q.shape, F32)     # returned recon
    z2 = mu_q + std_q * jax.random.normal(k2, mu_q.shape, F32)     # elbo recon

    # --- fused f_combined (both samples) + Dice reductions for sample 2 ---
    logits1, dice_parts = fcomb_dice(feat, z1, z2, mask, params)

    # TODO(synk): DiceLoss is not defined in the reference; using a standard
    # multi-class soft Dice on softmax probabilities.
    s = jnp.sum(dice_parts, axis=(0, 1))                           # (3, NC)
    eps = 1e-6
    dice = (2.0 * s[0] + eps) / (s[1] + s[2] + eps)
    rec_loss = 1.0 - jnp.mean(dice)

    kl = kl_diag_gauss(mu_q, logstd_q, mu_p, logstd_p)

    reconstruction = jnp.transpose(logits1.reshape(B, H, W, num_classes),
                                   (0, 3, 1, 2))                   # back to NCHW
    return rec_loss, kl, reconstruction


# ----------------------------- parameter init -------------------------------

def init_params(key, C, num_classes, F, z_dim):
    keys = iter(jax.random.split(key, 40))

    def w(shape, scale=0.05):
        return scale * jax.random.normal(next(keys), shape, jnp.float32)

    def b(shape, scale=0.02):
        return scale * jax.random.normal(next(keys), shape, jnp.float32)

    p = {}
    # UNET stand-in
    p['u1_w'] = w((F, C, 3, 3)); p['u1_b'] = b((F,))
    p['u2_w'] = w((C, F, 3, 3)); p['u2_b'] = b((C,))
    # priori
    p['p1_w'] = w((F, C, 4, 4)); p['p1_b'] = b((F,))
    p['p1_g'] = jnp.ones((F,), jnp.float32); p['p1_be'] = jnp.zeros((F,), jnp.float32)
    p['p2_w'] = w((2 * F, F, 4, 4)); p['p2_b'] = b((2 * F,))
    p['p2_g'] = jnp.ones((2 * F,), jnp.float32); p['p2_be'] = jnp.zeros((2 * F,), jnp.float32)
    p['pc_w'] = w((2 * z_dim, 2 * F, 1, 1)); p['pc_b'] = b((2 * z_dim,))
    # variational
    p['v1_w'] = w((F, C + 1, 4, 4)); p['v1_b'] = b((F,))
    p['v1_g'] = jnp.ones((F,), jnp.float32); p['v1_be'] = jnp.zeros((F,), jnp.float32)
    p['v2_w'] = w((2 * F, F, 4, 4)); p['v2_b'] = b((2 * F,))
    p['v2_g'] = jnp.ones((2 * F,), jnp.float32); p['v2_be'] = jnp.zeros((2 * F,), jnp.float32)
    p['v3_w'] = w((4 * F, 2 * F, 4, 4)); p['v3_b'] = b((4 * F,))
    p['v3_g'] = jnp.ones((4 * F,), jnp.float32); p['v3_be'] = jnp.zeros((4 * F,), jnp.float32)
    p['vc_w'] = w((2 * z_dim, 4 * F, 1, 1)); p['vc_b'] = b((2 * z_dim,))
    # f_combined (1x1 convs)
    p['f1_w'] = w((C, C + z_dim, 1, 1)); p['f1_b'] = b((C,))
    p['f2_w'] = w((C, C, 1, 1)); p['f2_b'] = b((C,))
    p['fl_w'] = w((num_classes, C, 1, 1)); p['fl_b'] = b((num_classes,))
    return p


# ----------------------------- main -----------------------------------------

if __name__ == "__main__":
    B, C, H, W = 2, 4, 16, 16
    num_classes, filters, z_dim = 3, 8, 6

    key = jax.random.PRNGKey(0)
    kp, kx, km, kz = jax.random.split(key, 4)

    params = init_params(kp, C, num_classes, filters, z_dim)

    image_nchw = jax.random.normal(kx, (B, C, H, W), jnp.float32)
    image_nhwc = jnp.transpose(image_nchw, (0, 2, 3, 1))
    mask = jax.random.randint(km, (B, H, W), 0, num_classes).astype(jnp.float32)

    rec_loss, kl, recon = probabilistic_unet_forward(
        params, image_nhwc, mask, kz, z_dim=z_dim, num_classes=num_classes)
    jax.block_until_ready((rec_loss, kl, recon))

    assert recon.shape == (B, num_classes, H, W)
    assert bool(jnp.isfinite(rec_loss)) and bool(jnp.isfinite(kl))
    print("KERNEL_OK")
</pallas_src>

<mosaic_0001>
module attributes {stable_mosaic.version = 11 : i64} {
  func.func @_conv_pass1_kernel(%arg0: i32, %arg1: memref<1x9x9x16xf32, #tpu.memory_space<vmem>>, %arg2: memref<4x16x8xbf16, #tpu.memory_space<vmem>>, %arg3: memref<1x8xf32, #tpu.memory_space<vmem>>, %arg4: memref<1x64x8xbf16, #tpu.memory_space<vmem>>, %arg5: memref<1x2x8xf32, #tpu.memory_space<vmem>>) attributes {dimension_semantics = [#tpu.dimension_semantics<parallel>], iteration_bounds = array<i64: 2>, scalar_prefetch = 0 : i64, scratch_operands = 0 : i64, tpu.core_type = #tpu.core_type<tc>, window_params = [{transform_indices = @transform_0, window_bounds = array<i64: 1, 9, 9, 16>}, {pipeline_mode = #tpu.pipeline_mode<synchronous>, transform_indices = @transform_1, window_bounds = array<i64: 4, 16, 8>}, {pipeline_mode = #tpu.pipeline_mode<synchronous>, transform_indices = @transform_2, window_bounds = array<i64: 1, 8>}, {transform_indices = @transform_3, window_bounds = array<i64: 1, 64, 8>}, {transform_indices = @transform_4, window_bounds = array<i64: 1, 2, 8>}]} {
    %cst = arith.constant 0.000000e+00 : f32
    %0 = vector.broadcast %cst : f32 to vector<64x8xf32>
    %c0 = arith.constant 0 : index
    %c0_0 = arith.constant 0 : index
    %c0_1 = arith.constant 0 : index
    %c0_2 = arith.constant 0 : index
    %1 = vector.load %arg1[%c0, %c0_0, %c0_1, %c0_2] : memref<1x9x9x16xf32, #tpu.memory_space<vmem>>, vector<1x8x8x16xf32>
    %2 = vector.shape_cast %1 : vector<1x8x8x16xf32> to vector<8x8x16xf32>
    %3 = vector.shape_cast %2 : vector<8x8x16xf32> to vector<64x16xf32>
    %4 = arith.truncf %3 : vector<64x16xf32> to vector<64x16xbf16>
    %c0_3 = arith.constant 0 : index
    %c0_4 = arith.constant 0 : index
    %c0_5 = arith.constant 0 : index
    %5 = vector.load %arg2[%c0_3, %c0_4, %c0_5] : memref<4x16x8xbf16, #tpu.memory_space<vmem>>, vector<1x16x8xbf16>
    %6 = vector.shape_cast %5 : vector<1x16x8xbf16> to vector<16x8xbf16>
    %cst_6 = arith.constant dense<0.000000e+00> : vector<64x8xf32>
    %7 = tpu.matmul %4, %6, %cst_6 {dimension_numbers = #tpu.dot_dimension_numbers<[1], [0], [0], [1], [0, 0, 1, 1], [], []>} : vector<64x16xbf16>, vector<16x8xbf16>, vector<64x8xf32> -> vector<64x8xf32>
    %8 = arith.addf %0, %7 : vector<64x8xf32>
    %c0_7 = arith.constant 0 : index
    %c0_8 = arith.constant 0 : index
    %c1 = arith.constant 1 : index
    %c0_9 = arith.constant 0 : index
    %9 = vector.load %arg1[%c0_7, %c0_8, %c1, %c0_9] : memref<1x9x9x16xf32, #tpu.memory_space<vmem>>, vector<1x8x8x16xf32>
    %10 = vector.shape_cast %9 : vector<1x8x8x16xf32> to vector<8x8x16xf32>
    %11 = vector.shape_cast %10 : vector<8x8x16xf32> to vector<64x16xf32>
    %12 = arith.truncf %11 : vector<64x16xf32> to vector<64x16xbf16>
    %c1_10 = arith.constant 1 : index
    %c0_11 = arith.constant 0 : index
    %c0_12 = arith.constant 0 : index
    %13 = vector.load %arg2[%c1_10, %c0_11, %c0_12] : memref<4x16x8xbf16, #tpu.memory_space<vmem>>, vector<1x16x8xbf16>
    %14 = vector.shape_cast %13 : vector<1x16x8xbf16> to vector<16x8xbf16>
    %cst_13 = arith.constant dense<0.000000e+00> : vector<64x8xf32>
    %15 = tpu.matmul %12, %14, %cst_13 {dimension_numbers = #tpu.dot_dimension_numbers<[1], [0], [0], [1], [0, 0, 1, 1], [], []>} : vector<64x16xbf16>, vector<16x8xbf16>, vector<64x8xf32> -> vector<64x8xf32>
    %16 = arith.addf %8, %15 : vector<64x8xf32>
    %c0_14 = arith.constant 0 : index
    %c1_15 = arith.constant 1 : index
    %c0_16 = arith.constant 0 : index
    %c0_17 = arith.constant 0 : index
    %17 = vector.load %arg1[%c0_14, %c1_15, %c0_16, %c0_17] : memref<1x9x9x16xf32, #tpu.memory_space<vmem>>, vector<1x8x8x16xf32>
    %18 = vector.shape_cast %17 : vector<1x8x8x16xf32> to vector<8x8x16xf32>
    %19 = vector.shape_cast %18 : vector<8x8x16xf32> to vector<64x16xf32>
    %20 = arith.truncf %19 : vector<64x16xf32> to vector<64x16xbf16>
    %c2 = arith.constant 2 : index
    %c0_18 = arith.constant 0 : index
    %c0_19 = arith.constant 0 : index
    %21 = vector.load %arg2[%c2, %c0_18, %c0_19] : memref<4x16x8xbf16, #tpu.memory_space<vmem>>, vector<1x16x8xbf16>
    %22 = vector.shape_cast %21 : vector<1x16x8xbf16> to vector<16x8xbf16>
    %cst_20 = arith.constant dense<0.000000e+00> : vector<64x8xf32>
    %23 = tpu.matmul %20, %22, %cst_20 {dimension_numbers = #tpu.dot_dimension_numbers<[1], [0], [0], [1], [0, 0, 1, 1], [], []>} : vector<64x16xbf16>, vector<16x8xbf16>, vector<64x8xf32> -> vector<64x8xf32>
    %24 = arith.addf %16, %23 : vector<64x8xf32>
    %c0_21 = arith.constant 0 : index
    %c1_22 = arith.constant 1 : index
    %c1_23 = arith.constant 1 : index
    %c0_24 = arith.constant 0 : index
    %25 = vector.load %arg1[%c0_21, %c1_22, %c1_23, %c0_24] : memref<1x9x9x16xf32, #tpu.memory_space<vmem>>, vector<1x8x8x16xf32>
    %26 = vector.shape_cast %25 : vector<1x8x8x16xf32> to vector<8x8x16xf32>
    %27 = vector.shape_cast %26 : vector<8x8x16xf32> to vector<64x16xf32>
    %28 = arith.truncf %27 : vector<64x16xf32> to vector<64x16xbf16>
    %c3 = arith.constant 3 : index
    %c0_25 = arith.constant 0 : index
    %c0_26 = arith.constant 0 : index
    %29 = vector.load %arg2[%c3, %c0_25, %c0_26] : memref<4x16x8xbf16, #tpu.memory_space<vmem>>, vector<1x16x8xbf16>
    %30 = vector.shape_cast %29 : vector<1x16x8xbf16> to vector<16x8xbf16>
    %cst_27 = arith.constant dense<0.000000e+00> : vector<64x8xf32>
    %31 = tpu.matmul %28, %30, %cst_27 {dimension_numbers = #tpu.dot_dimension_numbers<[1], [0], [0], [1], [0, 0, 1, 1], [], []>} : vector<64x16xbf16>, vector<16x8xbf16>, vector<64x8xf32> -> vector<64x8xf32>
    %32 = arith.addf %24, %31 : vector<64x8xf32>
    %c0_28 = arith.constant 0 : index
    %c0_29 = arith.constant 0 : index
    %33 = vector.load %arg3[%c0_28, %c0_29] : memref<1x8xf32, #tpu.memory_space<vmem>>, vector<1x8xf32>
    %34 = vector.broadcast %33 : vector<1x8xf32> to vector<64x8xf32>
    %35 = arith.addf %32, %34 : vector<64x8xf32>
    %36 = arith.truncf %35 : vector<64x8xf32> to vector<64x8xbf16>
    %c0_30 = arith.constant 0 : index
    %c0_31 = arith.constant 0 : index
    %c0_32 = arith.constant 0 : index
    %37 = vector.load %arg4[%c0_30, %c0_31, %c0_32] : memref<1x64x8xbf16, #tpu.memory_space<vmem>>, vector<1x64x8xbf16>
    %38 = vector.shape_cast %37 : vector<1x64x8xbf16> to vector<64x8xbf16>
    %39 = vector.shape_cast %36 : vector<64x8xbf16> to vector<1x64x8xbf16>
    tpu.vector_store %arg4[%c0_30, %c0_31, %c0_32], %39 {strides = array<i32>} : memref<1x64x8xbf16, #tpu.memory_space<vmem>>, vector<1x64x8xbf16>,
    %cst_33 = arith.constant dense<0.000000e+00> : vector<8xf32>
    %40 = vector.multi_reduction <add>, %35, %cst_33 [0] : vector<64x8xf32> to vector<8xf32>
    %41 = vector.shape_cast %40 : vector<8xf32> to vector<1x8xf32>
    %42 = arith.mulf %35, %35 : vector<64x8xf32>
    %cst_34 = arith.constant dense<0.000000e+00> : vector<8xf32>
    %43 = vector.multi_reduction <add>, %42, %cst_34 [0] : vector<64x8xf32> to vector<8xf32>
    %44 = vector.shape_cast %43 : vector<8xf32> to vector<1x8xf32>
    %45 = tpu.concatenate %41, %44 in 0 : vector<1x8xf32>, vector<1x8xf32> -> vector<2x8xf32>
    %c0_35 = arith.constant 0 : index
    %c0_36 = arith.constant 0 : index
    %c0_37 = arith.constant 0 : index
    %46 = vector.load %arg5[%c0_35, %c0_36, %c0_37] : memref<1x2x8xf32, #tpu.memory_space<vmem>>, vector<1x2x8xf32>
    %47 = vector.shape_cast %46 : vector<1x2x8xf32> to vector<2x8xf32>
    %48 = vector.shape_cast %45 : vector<2x8xf32> to vector<1x2x8xf32>
    tpu.vector_store %arg5[%c0_35, %c0_36, %c0_37], %48 {strides = array<i32>} : memref<1x2x8xf32, #tpu.memory_space<vmem>>, vector<1x2x8xf32>,
    return
  }
  func.func @transform_0(%arg0: i32) -> (i32, i32, i32, i32) {
    %c0_i32 = arith.constant 0 : i32
    %c0_i32_0 = arith.constant 0 : i32
    %c0_i32_1 = arith.constant 0 : i32
    %c0_i32_2 = arith.constant 0 : i32
    return %arg0, %c0_i32, %c0_i32_0, %c0_i32_1 : i32, i32, i32, i32
  }
  func.func @transform_1(%arg0: i32) -> (i32, i32, i32) {
    %c0_i32 = arith.constant 0 : i32
    %c0_i32_0 = arith.constant 0 : i32
    %c0_i32_1 = arith.constant 0 : i32
    %c0_i32_2 = arith.constant 0 : i32
    return %c0_i32, %c0_i32_0, %c0_i32_1 : i32, i32, i32
  }
  func.func @transform_2(%arg0: i32) -> (i32, i32) {
    %c0_i32 = arith.constant 0 : i32
    %c0_i32_0 = arith.constant 0 : i32
    %c0_i32_1 = arith.constant 0 : i32
    return %c0_i32, %c0_i32_0 : i32, i32
  }
  func.func @transform_3(%arg0: i32) -> (i32, i32, i32) {
    %c0_i32 = arith.constant 0 : i32
    %c0_i32_0 = arith.constant 0 : i32
    %c0_i32_1 = arith.constant 0 : i32
    return %arg0, %c0_i32, %c0_i32_0 : i32, i32, i32
  }
  func.func @transform_4(%arg0: i32) -> (i32, i32, i32) {
    %c0_i32 = arith.constant 0 : i32
    %c0_i32_0 = arith.constant 0 : i32
    %c0_i32_1 = arith.constant 0 : i32
    return %arg0, %c0_i32, %c0_i32_0 : i32, i32, i32
  }
}

module attributes {stable_mosaic.version = 11 : i64} {
  func.func @_bn_relu_kernel(%arg0: i32, %arg1: memref<1x64x8xbf16, #tpu.memory_space<vmem>>, %arg2: memref<1x8xf32, #tpu.memory_space<vmem>>, %arg3: memref<1x8xf32, #tpu.memory_space<vmem>>, %arg4: memref<1x64x8xbf16, #tpu.memory_space<vmem>>) attributes {dimension_semantics = [#tpu.dimension_semantics<parallel>], iteration_bounds = array<i64: 2>, scalar_prefetch = 0 : i64, scratch_operands = 0 : i64, tpu.core_type = #tpu.core_type<tc>, window_params = [{transform_indices = @transform_0, window_bounds = array<i64: 1, 64, 8>}, {pipeline_mode = #tpu.pipeline_mode<synchronous>, transform_indices = @transform_1, window_bounds = array<i64: 1, 8>}, {pipeline_mode = #tpu.pipeline_mode<synchronous>, transform_indices = @transform_2, window_bounds = array<i64: 1, 8>}, {transform_indices = @transform_3, window_bounds = array<i64: 1, 64, 8>}]} {
    %c0 = arith.constant 0 : index
    %c0_0 = arith.constant 0 : index
    %c0_1 = arith.constant 0 : index
    %0 = vector.load %arg1[%c0, %c0_0, %c0_1] : memref<1x64x8xbf16, #tpu.memory_space<vmem>>, vector<1x64x8xbf16>
    %1 = vector.shape_cast %0 : vector<1x64x8xbf16> to vector<64x8xbf16>
    %2 = arith.extf %1 : vector<64x8xbf16> to vector<64x8xf32>
    %c0_2 = arith.constant 0 : index
    %c0_3 = arith.constant 0 : index
    %3 = vector.load %arg2[%c0_2, %c0_3] : memref<1x8xf32, #tpu.memory_space<vmem>>, vector<1x8xf32>
    %4 = vector.broadcast %3 : vector<1x8xf32> to vector<64x8xf32>
    %5 = arith.mulf %2, %4 : vector<64x8xf32>
    %c0_4 = arith.constant 0 : index
    %c0_5 = arith.constant 0 : index
    %6 = vector.load %arg3[%c0_4, %c0_5] : memref<1x8xf32, #tpu.memory_space<vmem>>, vector<1x8xf32>
    %7 = vector.broadcast %6 : vector<1x8xf32> to vector<64x8xf32>
    %8 = arith.addf %5, %7 : vector<64x8xf32>
    %cst = arith.constant 0.000000e+00 : f32
    %9 = vector.broadcast %cst : f32 to vector<64x8xf32>
    %10 = arith.maximumf %8, %9 : vector<64x8xf32>
    %11 = arith.truncf %10 : vector<64x8xf32> to vector<64x8xbf16>
    %c0_6 = arith.constant 0 : index
    %c0_7 = arith.constant 0 : index
    %c0_8 = arith.constant 0 : index
    %12 = vector.load %arg4[%c0_6, %c0_7, %c0_8] : memref<1x64x8xbf16, #tpu.memory_space<vmem>>, vector<1x64x8xbf16>
    %13 = vector.shape_cast %12 : vector<1x64x8xbf16> to vector<64x8xbf16>
    %14 = vector.shape_cast %11 : vector<64x8xbf16> to vector<1x64x8xbf16>
    tpu.vector_store %arg4[%c0_6, %c0_7, %c0_8], %14 {strides = array<i32>} : memref<1x64x8xbf16, #tpu.memory_space<vmem>>, vector<1x64x8xbf16>,
    return
  }
  func.func @transform_0(%arg0: i32) -> (i32, i32, i32) {
    %c0_i32 = arith.constant 0 : i32
    %c0_i32_0 = arith.constant 0 : i32
    %c0_i32_1 = arith.constant 0 : i32
    return %arg0, %c0_i32, %c0_i32_0 : i32, i32, i32
  }
  func.func @transform_1(%arg0: i32) -> (i32, i32) {
    %c0_i32 = arith.constant 0 : i32
    %c0_i32_0 = arith.constant 0 : i32
    %c0_i32_1 = arith.constant 0 : i32
    return %c0_i32, %c0_i32_0 : i32, i32
  }
  func.func @transform_2(%arg0: i32) -> (i32, i32) {
    %c0_i32 = arith.constant 0 : i32
    %c0_i32_0 = arith.constant 0 : i32
    %c0_i32_1 = arith.constant 0 : i32
    return %c0_i32, %c0_i32_0 : i32, i32
  }
  func.func @transform_3(%arg0: i32) -> (i32, i32, i32) {
    %c0_i32 = arith.constant 0 : i32
    %c0_i32_0 = arith.constant 0 : i32
    %c0_i32_1 = arith.constant 0 : i32
    return %arg0, %c0_i32, %c0_i32_0 : i32, i32, i32
  }
}

module attributes {stable_mosaic.version = 11 : i64} {
  func.func @_conv_pass1_kernel(%arg0: i32, %arg1: memref<1x16x128xbf16, #tpu.memory_space<vmem>>, %arg2: memref<1x128x16xbf16, #tpu.memory_space<vmem>>, %arg3: memref<1x16xf32, #tpu.memory_space<vmem>>, %arg4: memref<1x16x16xbf16, #tpu.memory_space<vmem>>, %arg5: memref<1x2x16xf32, #tpu.memory_space<vmem>>) attributes {dimension_semantics = [#tpu.dimension_semantics<parallel>], iteration_bounds = array<i64: 2>, scalar_prefetch = 0 : i64, scratch_operands = 0 : i64, tpu.core_type = #tpu.core_type<tc>, window_params = [{transform_indices = @transform_0, window_bounds = array<i64: 1, 16, 128>}, {pipeline_mode = #tpu.pipeline_mode<synchronous>, transform_indices = @transform_1, window_bounds = array<i64: 1, 128, 16>}, {pipeline_mode = #tpu.pipeline_mode<synchronous>, transform_indices = @transform_2, window_bounds = array<i64: 1, 16>}, {transform_indices = @transform_3, window_bounds = array<i64: 1, 16, 16>}, {transform_indices = @transform_4, window_bounds = array<i64: 1, 2, 16>}]} {
    %c0 = arith.constant 0 : index
    %c0_0 = arith.constant 0 : index
    %c0_1 = arith.constant 0 : index
    %0 = vector.load %arg1[%c0, %c0_0, %c0_1] : memref<1x16x128xbf16, #tpu.memory_space<vmem>>, vector<1x16x128xbf16>
    %1 = vector.shape_cast %0 : vector<1x16x128xbf16> to vector<16x128xbf16>
    %c0_2 = arith.constant 0 : index
    %c0_3 = arith.constant 0 : index
    %c0_4 = arith.constant 0 : index
    %2 = vector.load %arg2[%c0_2, %c0_3, %c0_4] : memref<1x128x16xbf16, #tpu.memory_space<vmem>>, vector<1x128x16xbf16>
    %3 = vector.shape_cast %2 : vector<1x128x16xbf16> to vector<128x16xbf16>
    %cst = arith.constant dense<0.000000e+00> : vector<16x16xf32>
    %4 = tpu.matmul %1, %3, %cst {dimension_numbers = #tpu.dot_dimension_numbers<[1], [0], [0], [1], [0, 0, 1, 1], [], []>} : vector<16x128xbf16>, vector<128x16xbf16>, vector<16x16xf32> -> vector<16x16xf32>
    %c0_5 = arith.constant 0 : index
    %c0_6 = arith.constant 0 : index
    %5 = vector.load %arg3[%c0_5, %c0_6] : memref<1x16xf32, #tpu.memory_space<vmem>>, vector<1x16xf32>
    %6 = vector.broadcast %5 : vector<1x16xf32> to vector<16x16xf32>
    %7 = arith.addf %4, %6 : vector<16x16xf32>
    %8 = arith.truncf %7 : vector<16x16xf32> to vector<16x16xbf16>
    %c0_7 = arith.constant 0 : index
    %c0_8 = arith.constant 0 : index
    %c0_9 = arith.constant 0 : index
    %9 = vector.load %arg4[%c0_7, %c0_8, %c0_9] : memref<1x16x16xbf16, #tpu.memory_space<vmem>>, vector<1x16x16xbf16>
    %10 = vector.shape_cast %9 : vector<1x16x16xbf16> to vector<16x16xbf16>
    %11 = vector.shape_cast %8 : vector<16x16xbf16> to vector<1x16x16xbf16>
    tpu.vector_store %arg4[%c0_7, %c0_8, %c0_9], %11 {strides = array<i32>} : memref<1x16x16xbf16, #tpu.memory_space<vmem>>, vector<1x16x16xbf16>,
    %cst_10 = arith.constant dense<0.000000e+00> : vector<16xf32>
    %12 = vector.multi_reduction <add>, %7, %cst_10 [0] : vector<16x16xf32> to vector<16xf32>
    %13 = vector.shape_cast %12 : vector<16xf32> to vector<1x16xf32>
    %14 = arith.mulf %7, %7 : vector<16x16xf32>
    %cst_11 = arith.constant dense<0.000000e+00> : vector<16xf32>
    %15 = vector.multi_reduction <add>, %14, %cst_11 [0] : vector<16x16xf32> to vector<16xf32>
    %16 = vector.shape_cast %15 : vector<16xf32> to vector<1x16xf32>
    %17 = tpu.concatenate %13, %16 in 0 : vector<1x16xf32>, vector<1x16xf32> -> vector<2x16xf32>
    %c0_12 = arith.constant 0 : index
    %c0_13 = arith.constant 0 : index
    %c0_14 = arith.constant 0 : index
    %18 = vector.load %arg5[%c0_12, %c0_13, %c0_14] : memref<1x2x16xf32, #tpu.memory_space<vmem>>, vector<1x2x16xf32>
    %19 = vector.shape_cast %18 : vector<1x2x16xf32> to vector<2x16xf32>
    %20 = vector.shape_cast %17 : vector<2x16xf32> to vector<1x2x16xf32>
    tpu.vector_store %arg5[%c0_12, %c0_13, %c0_14], %20 {strides = array<i32>} : memref<1x2x16xf32, #tpu.memory_space<vmem>>, vector<1x2x16xf32>,
    return
  }
  func.func @transform_0(%arg0: i32) -> (i32, i32, i32) {
    %c0_i32 = arith.constant 0 : i32
    %c0_i32_0 = arith.constant 0 : i32
    %c0_i32_1 = arith.constant 0 : i32
    return %arg0, %c0_i32, %c0_i32_0 : i32, i32, i32
  }
  func.func @transform_1(%arg0: i32) -> (i32, i32, i32) {
    %c0_i32 = arith.constant 0 : i32
    %c0_i32_0 = arith.constant 0 : i32
    %c0_i32_1 = arith.constant 0 : i32
    %c0_i32_2 = arith.constant 0 : i32
    return %c0_i32, %c0_i32_0, %c0_i32_1 : i32, i32, i32
  }
  func.func @transform_2(%arg0: i32) -> (i32, i32) {
    %c0_i32 = arith.constant 0 : i32
    %c0_i32_0 = arith.constant 0 : i32
    %c0_i32_1 = arith.constant 0 : i32
    return %c0_i32, %c0_i32_0 : i32, i32
  }
  func.func @transform_3(%arg0: i32) -> (i32, i32, i32) {
    %c0_i32 = arith.constant 0 : i32
    %c0_i32_0 = arith.constant 0 : i32
    %c0_i32_1 = arith.constant 0 : i32
    return %arg0, %c0_i32, %c0_i32_0 : i32, i32, i32
  }
  func.func @transform_4(%arg0: i32) -> (i32, i32, i32) {
    %c0_i32 = arith.constant 0 : i32
    %c0_i32_0 = arith.constant 0 : i32
    %c0_i32_1 = arith.constant 0 : i32
    return %arg0, %c0_i32, %c0_i32_0 : i32, i32, i32
  }
}

module attributes {stable_mosaic.version = 11 : i64} {
  func.func @_bn_mean_head_kernel(%arg0: i32, %arg1: memref<1x16x16xbf16, #tpu.memory_space<vmem>>, %arg2: memref<1x16xf32, #tpu.memory_space<vmem>>, %arg3: memref<1x16xf32, #tpu.memory_space<vmem>>, %arg4: memref<16x12xbf16, #tpu.memory_space<vmem>>, %arg5: memref<1x12xf32, #tpu.memory_space<vmem>>, %arg6: memref<1x1x12xf32, #tpu.memory_space<vmem>>) attributes {dimension_semantics = [#tpu.dimension_semantics<parallel>], iteration_bounds = array<i64: 2>, scalar_prefetch = 0 : i64, scratch_operands = 0 : i64, tpu.core_type = #tpu.core_type<tc>, window_params = [{transform_indices = @transform_0, window_bounds = array<i64: 1, 16, 16>}, {pipeline_mode = #tpu.pipeline_mode<synchronous>, transform_indices = @transform_1, window_bounds = array<i64: 1, 16>}, {pipeline_mode = #tpu.pipeline_mode<synchronous>, transform_indices = @transform_2, window_bounds = array<i64: 1, 16>}, {pipeline_mode = #tpu.pipeline_mode<synchronous>, transform_indices = @transform_3, window_bounds = array<i64: 16, 12>}, {pipeline_mode = #tpu.pipeline_mode<synchronous>, transform_indices = @transform_4, window_bounds = array<i64: 1, 12>}, {transform_indices = @transform_5, window_bounds = array<i64: 1, 1, 12>}]} {
    %c0 = arith.constant 0 : index
    %c0_0 = arith.constant 0 : index
    %c0_1 = arith.constant 0 : index
    %0 = vector.load %arg1[%c0, %c0_0, %c0_1] : memref<1x16x16xbf16, #tpu.memory_space<vmem>>, vector<1x16x16xbf16>
    %1 = vector.shape_cast %0 : vector<1x16x16xbf16> to vector<16x16xbf16>
    %2 = arith.extf %1 : vector<16x16xbf16> to vector<16x16xf32>
    %c0_2 = arith.constant 0 : index
    %c0_3 = arith.constant 0 : index
    %3 = vector.load %arg2[%c0_2, %c0_3] : memref<1x16xf32, #tpu.memory_space<vmem>>, vector<1x16xf32>
    %4 = vector.broadcast %3 : vector<1x16xf32> to vector<16x16xf32>
    %5 = arith.mulf %2, %4 : vector<16x16xf32>
    %c0_4 = arith.constant 0 : index
    %c0_5 = arith.constant 0 : index
    %6 = vector.load %arg3[%c0_4, %c0_5] : memref<1x16xf32, #tpu.memory_space<vmem>>, vector<1x16xf32>
    %7 = vector.broadcast %6 : vector<1x16xf32> to vector<16x16xf32>
    %8 = arith.addf %5, %7 : vector<16x16xf32>
    %cst = arith.constant 0.000000e+00 : f32
    %9 = vector.broadcast %cst : f32 to vector<16x16xf32>
    %10 = arith.maximumf %8, %9 : vector<16x16xf32>
    %cst_6 = arith.constant dense<0.000000e+00> : vector<16xf32>
    %11 = vector.multi_reduction <add>, %10, %cst_6 [0] : vector<16x16xf32> to vector<16xf32>
    %12 = vector.shape_cast %11 : vector<16xf32> to vector<1x16xf32>
    %cst_7 = arith.constant 1.600000e+01 : f32
    %13 = vector.broadcast %cst_7 : f32 to vector<1x16xf32>
    %14 = arith.divf %12, %13 : vector<1x16xf32>
    %15 = arith.truncf %14 : vector<1x16xf32> to vector<1x16xbf16>
    %c0_8 = arith.constant 0 : index
    %c0_9 = arith.constant 0 : index
    %16 = vector.load %arg4[%c0_8, %c0_9] : memref<16x12xbf16, #tpu.memory_space<vmem>>, vector<16x12xbf16>
    %cst_10 = arith.constant dense<0.000000e+00> : vector<1x12xf32>
    %17 = tpu.matmul %15, %16, %cst_10 {dimension_numbers = #tpu.dot_dimension_numbers<[1], [0], [0], [1], [0, 0, 1, 1], [], []>} : vector<1x16xbf16>, vector<16x12xbf16>, vector<1x12xf32> -> vector<1x12xf32>
    %c0_11 = arith.constant 0 : index
    %c0_12 = arith.constant 0 : index
    %18 = vector.load %arg5[%c0_11, %c0_12] : memref<1x12xf32, #tpu.memory_space<vmem>>, vector<1x12xf32>
    %19 = arith.addf %17, %18 : vector<1x12xf32>
    %c0_13 = arith.constant 0 : index
    %c0_14 = arith.constant 0 : index
    %c0_15 = arith.constant 0 : index
    %20 = vector.load %arg6[%c0_13, %c0_14, %c0_15] : memref<1x1x12xf32, #tpu.memory_space<vmem>>, vector<1x1x12xf32>
    %21 = vector.shape_cast %20 : vector<1x1x12xf32> to vector<1x12xf32>
    %22 = vector.shape_cast %19 : vector<1x12xf32> to vector<1x1x12xf32>
    tpu.vector_store %arg6[%c0_13, %c0_14, %c0_15], %22 {strides = array<i32>} : memref<1x1x12xf32, #tpu.memory_space<vmem>>, vector<1x1x12xf32>,
    return
  }
  func.func @transform_0(%arg0: i32) -> (i32, i32, i32) {
    %c0_i32 = arith.constant 0 : i32
    %c0_i32_0 = arith.constant 0 : i32
    %c0_i32_1 = arith.constant 0 : i32
    return %arg0, %c0_i32, %c0_i32_0 : i32, i32, i32
  }
  func.func @transform_1(%arg0: i32) -> (i32, i32) {
    %c0_i32 = arith.constant 0 : i32
    %c0_i32_0 = arith.constant 0 : i32
    %c0_i32_1 = arith.constant 0 : i32
    return %c0_i32, %c0_i32_0 : i32, i32
  }
  func.func @transform_2(%arg0: i32) -> (i32, i32) {
    %c0_i32 = arith.constant 0 : i32
    %c0_i32_0 = arith.constant 0 : i32
    %c0_i32_1 = arith.constant 0 : i32
    return %c0_i32, %c0_i32_0 : i32, i32
  }
  func.func @transform_3(%arg0: i32) -> (i32, i32) {
    %c0_i32 = arith.constant 0 : i32
    %c0_i32_0 = arith.constant 0 : i32
    %c0_i32_1 = arith.constant 0 : i32
    return %c0_i32, %c0_i32_0 : i32, i32
  }
  func.func @transform_4(%arg0: i32) -> (i32, i32) {
    %c0_i32 = arith.constant 0 : i32
    %c0_i32_0 = arith.constant 0 : i32
    %c0_i32_1 = arith.constant 0 : i32
    return %c0_i32, %c0_i32_0 : i32, i32
  }
  func.func @transform_5(%arg0: i32) -> (i32, i32, i32) {
    %c0_i32 = arith.constant 0 : i32
    %c0_i32_0 = arith.constant 0 : i32
    %c0_i32_1 = arith.constant 0 : i32
    return %arg0, %c0_i32, %c0_i32_0 : i32, i32, i32
  }
}

module attributes {stable_mosaic.version = 11 : i64} {
  func.func @_conv_pass1_kernel(%arg0: i32, %arg1: memref<1x9x9x20xf32, #tpu.memory_space<vmem>>, %arg2: memref<4x20x8xbf16, #tpu.memory_space<vmem>>, %arg3: memref<1x8xf32, #tpu.memory_space<vmem>>, %arg4: memref<1x64x8xbf16, #tpu.memory_space<vmem>>, %arg5: memref<1x2x8xf32, #tpu.memory_space<vmem>>) attributes {dimension_semantics = [#tpu.dimension_semantics<parallel>], iteration_bounds = array<i64: 2>, scalar_prefetch = 0 : i64, scratch_operands = 0 : i64, tpu.core_type = #tpu.core_type<tc>, window_params = [{transform_indices = @transform_0, window_bounds = array<i64: 1, 9, 9, 20>}, {pipeline_mode = #tpu.pipeline_mode<synchronous>, transform_indices = @transform_1, window_bounds = array<i64: 4, 20, 8>}, {pipeline_mode = #tpu.pipeline_mode<synchronous>, transform_indices = @transform_2, window_bounds = array<i64: 1, 8>}, {transform_indices = @transform_3, window_bounds = array<i64: 1, 64, 8>}, {transform_indices = @transform_4, window_bounds = array<i64: 1, 2, 8>}]} {
    %cst = arith.constant 0.000000e+00 : f32
    %0 = vector.broadcast %cst : f32 to vector<64x8xf32>
    %c0 = arith.constant 0 : index
    %c0_0 = arith.constant 0 : index
    %c0_1 = arith.constant 0 : index
    %c0_2 = arith.constant 0 : index
    %1 = vector.load %arg1[%c0, %c0_0, %c0_1, %c0_2] : memref<1x9x9x20xf32, #tpu.memory_space<vmem>>, vector<1x8x8x20xf32>
    %2 = vector.shape_cast %1 : vector<1x8x8x20xf32> to vector<8x8x20xf32>
    %3 = vector.shape_cast %2 : vector<8x8x20xf32> to vector<64x20xf32>
    %4 = arith.truncf %3 : vector<64x20xf32> to vector<64x20xbf16>
    %c0_3 = arith.constant 0 : index
    %c0_4 = arith.constant 0 : index
    %c0_5 = arith.constant 0 : index
    %5 = vector.load %arg2[%c0_3, %c0_4, %c0_5] : memref<4x20x8xbf16, #tpu.memory_space<vmem>>, vector<1x20x8xbf16>
    %6 = vector.shape_cast %5 : vector<1x20x8xbf16> to vector<20x8xbf16>
    %cst_6 = arith.constant dense<0.000000e+00> : vector<64x8xf32>
    %7 = tpu.matmul %4, %6, %cst_6 {dimension_numbers = #tpu.dot_dimension_numbers<[1], [0], [0], [1], [0, 0, 1, 1], [], []>} : vector<64x20xbf16>, vector<20x8xbf16>, vector<64x8xf32> -> vector<64x8xf32>
    %8 = arith.addf %0, %7 : vector<64x8xf32>
    %c0_7 = arith.constant 0 : index
    %c0_8 = arith.constant 0 : index
    %c1 = arith.constant 1 : index
    %c0_9 = arith.constant 0 : index
    %9 = vector.load %arg1[%c0_7, %c0_8, %c1, %c0_9] : memref<1x9x9x20xf32, #tpu.memory_space<vmem>>, vector<1x8x8x20xf32>
    %10 = vector.shape_cast %9 : vector<1x8x8x20xf32> to vector<8x8x20xf32>
    %11 = vector.shape_cast %10 : vector<8x8x20xf32> to vector<64x20xf32>
    %12 = arith.truncf %11 : vector<64x20xf32> to vector<64x20xbf16>
    %c1_10 = arith.constant 1 : index
    %c0_11 = arith.constant 0 : index
    %c0_12 = arith.constant 0 : index
    %13 = vector.load %arg2[%c1_10, %c0_11, %c0_12] : memref<4x20x8xbf16, #tpu.memory_space<vmem>>, vector<1x20x8xbf16>
    %14 = vector.shape_cast %13 : vector<1x20x8xbf16> to vector<20x8xbf16>
    %cst_13 = arith.constant dense<0.000000e+00> : vector<64x8xf32>
    %15 = tpu.matmul %12, %14, %cst_13 {dimension_numbers = #tpu.dot_dimension_numbers<[1], [0], [0], [1], [0, 0, 1, 1], [], []>} : vector<64x20xbf16>, vector<20x8xbf16>, vector<64x8xf32> -> vector<64x8xf32>
    %16 = arith.addf %8, %15 : vector<64x8xf32>
    %c0_14 = arith.constant 0 : index
    %c1_15 = arith.constant 1 : index
    %c0_16 = arith.constant 0 : index
    %c0_17 = arith.constant 0 : index
    %17 = vector.load %arg1[%c0_14, %c1_15, %c0_16, %c0_17] : memref<1x9x9x20xf32, #tpu.memory_space<vmem>>, vector<1x8x8x20xf32>
    %18 = vector.shape_cast %17 : vector<1x8x8x20xf32> to vector<8x8x20xf32>
    %19 = vector.shape_cast %18 : vector<8x8x20xf32> to vector<64x20xf32>
    %20 = arith.truncf %19 : vector<64x20xf32> to vector<64x20xbf16>
    %c2 = arith.constant 2 : index
    %c0_18 = arith.constant 0 : index
    %c0_19 = arith.constant 0 : index
    %21 = vector.load %arg2[%c2, %c0_18, %c0_19] : memref<4x20x8xbf16, #tpu.memory_space<vmem>>, vector<1x20x8xbf16>
    %22 = vector.shape_cast %21 : vector<1x20x8xbf16> to vector<20x8xbf16>
    %cst_20 = arith.constant dense<0.000000e+00> : vector<64x8xf32>
    %23 = tpu.matmul %20, %22, %cst_20 {dimension_numbers = #tpu.dot_dimension_numbers<[1], [0], [0], [1], [0, 0, 1, 1], [], []>} : vector<64x20xbf16>, vector<20x8xbf16>, vector<64x8xf32> -> vector<64x8xf32>
    %24 = arith.addf %16, %23 : vector<64x8xf32>
    %c0_21 = arith.constant 0 : index
    %c1_22 = arith.constant 1 : index
    %c1_23 = arith.constant 1 : index
    %c0_24 = arith.constant 0 : index
    %25 = vector.load %arg1[%c0_21, %c1_22, %c1_23, %c0_24] : memref<1x9x9x20xf32, #tpu.memory_space<vmem>>, vector<1x8x8x20xf32>
    %26 = vector.shape_cast %25 : vector<1x8x8x20xf32> to vector<8x8x20xf32>
    %27 = vector.shape_cast %26 : vector<8x8x20xf32> to vector<64x20xf32>
    %28 = arith.truncf %27 : vector<64x20xf32> to vector<64x20xbf16>
    %c3 = arith.constant 3 : index
    %c0_25 = arith.constant 0 : index
    %c0_26 = arith.constant 0 : index
    %29 = vector.load %arg2[%c3, %c0_25, %c0_26] : memref<4x20x8xbf16, #tpu.memory_space<vmem>>, vector<1x20x8xbf16>
    %30 = vector.shape_cast %29 : vector<1x20x8xbf16> to vector<20x8xbf16>
    %cst_27 = arith.constant dense<0.000000e+00> : vector<64x8xf32>
    %31 = tpu.matmul %28, %30, %cst_27 {dimension_numbers = #tpu.dot_dimension_numbers<[1], [0], [0], [1], [0, 0, 1, 1], [], []>} : vector<64x20xbf16>, vector<20x8xbf16>, vector<64x8xf32> -> vector<64x8xf32>
    %32 = arith.addf %24, %31 : vector<64x8xf32>
    %c0_28 = arith.constant 0 : index
    %c0_29 = arith.constant 0 : index
    %33 = vector.load %arg3[%c0_28, %c0_29] : memref<1x8xf32, #tpu.memory_space<vmem>>, vector<1x8xf32>
    %34 = vector.broadcast %33 : vector<1x8xf32> to vector<64x8xf32>
    %35 = arith.addf %32, %34 : vector<64x8xf32>
    %36 = arith.truncf %35 : vector<64x8xf32> to vector<64x8xbf16>
    %c0_30 = arith.constant 0 : index
    %c0_31 = arith.constant 0 : index
    %c0_32 = arith.constant 0 : index
    %37 = vector.load %arg4[%c0_30, %c0_31, %c0_32] : memref<1x64x8xbf16, #tpu.memory_space<vmem>>, vector<1x64x8xbf16>
    %38 = vector.shape_cast %37 : vector<1x64x8xbf16> to vector<64x8xbf16>
    %39 = vector.shape_cast %36 : vector<64x8xbf16> to vector<1x64x8xbf16>
    tpu.vector_store %arg4[%c0_30, %c0_31, %c0_32], %39 {strides = array<i32>} : memref<1x64x8xbf16, #tpu.memory_space<vmem>>, vector<1x64x8xbf16>,
    %cst_33 = arith.constant dense<0.000000e+00> : vector<8xf32>
    %40 = vector.multi_reduction <add>, %35, %cst_33 [0] : vector<64x8xf32> to vector<8xf32>
    %41 = vector.shape_cast %40 : vector<8xf32> to vector<1x8xf32>
    %42 = arith.mulf %35, %35 : vector<64x8xf32>
    %cst_34 = arith.constant dense<0.000000e+00> : vector<8xf32>
    %43 = vector.multi_reduction <add>, %42, %cst_34 [0] : vector<64x8xf32> to vector<8xf32>
    %44 = vector.shape_cast %43 : vector<8xf32> to vector<1x8xf32>
    %45 = tpu.concatenate %41, %44 in 0 : vector<1x8xf32>, vector<1x8xf32> -> vector<2x8xf32>
    %c0_35 = arith.constant 0 : index
    %c0_36 = arith.constant 0 : index
    %c0_37 = arith.constant 0 : index
    %46 = vector.load %arg5[%c0_35, %c0_36, %c0_37] : memref<1x2x8xf32, #tpu.memory_space<vmem>>, vector<1x2x8xf32>
    %47 = vector.shape_cast %46 : vector<1x2x8xf32> to vector<2x8xf32>
    %48 = vector.shape_cast %45 : vector<2x8xf32> to vector<1x2x8xf32>
    tpu.vector_store %arg5[%c0_35, %c0_36, %c0_37], %48 {strides = array<i32>} : memref<1x2x8xf32, #tpu.memory_space<vmem>>, vector<1x2x8xf32>,
    return
  }
  func.func @transform_0(%arg0: i32) -> (i32, i32, i32, i32) {
    %c0_i32 = arith.constant 0 : i32
    %c0_i32_0 = arith.constant 0 : i32
    %c0_i32_1 = arith.constant 0 : i32
    %c0_i32_2 = arith.constant 0 : i32
    return %arg0, %c0_i32, %c0_i32_0, %c0_i32_1 : i32, i32, i32, i32
  }
  func.func @transform_1(%arg0: i32) -> (i32, i32, i32) {
    %c0_i32 = arith.constant 0 : i32
    %c0_i32_0 = arith.constant 0 : i32
    %c0_i32_1 = arith.constant 0 : i32
    %c0_i32_2 = arith.constant 0 : i32
    return %c0_i32, %c0_i32_0, %c0_i32_1 : i32, i32, i32
  }
  func.func @transform_2(%arg0: i32) -> (i32, i32) {
    %c0_i32 = arith.constant 0 : i32
    %c0_i32_0 = arith.constant 0 : i32
    %c0_i32_1 = arith.constant 0 : i32
    return %c0_i32, %c0_i32_0 : i32, i32
  }
  func.func @transform_3(%arg0: i32) -> (i32, i32, i32) {
    %c0_i32 = arith.constant 0 : i32
    %c0_i32_0 = arith.constant 0 : i32
    %c0_i32_1 = arith.constant 0 : i32
    return %arg0, %c0_i32, %c0_i32_0 : i32, i32, i32
  }
  func.func @transform_4(%arg0: i32) -> (i32, i32, i32) {
    %c0_i32 = arith.constant 0 : i32
    %c0_i32_0 = arith.constant 0 : i32
    %c0_i32_1 = arith.constant 0 : i32
    return %arg0, %c0_i32, %c0_i32_0 : i32, i32, i32
  }
}

module attributes {stable_mosaic.version = 11 : i64} {
  func.func @_bn_relu_kernel(%arg0: i32, %arg1: memref<1x16x16xbf16, #tpu.memory_space<vmem>>, %arg2: memref<1x16xf32, #tpu.memory_space<vmem>>, %arg3: memref<1x16xf32, #tpu.memory_space<vmem>>, %arg4: memref<1x16x16xbf16, #tpu.memory_space<vmem>>) attributes {dimension_semantics = [#tpu.dimension_semantics<parallel>], iteration_bounds = array<i64: 2>, scalar_prefetch = 0 : i64, scratch_operands = 0 : i64, tpu.core_type = #tpu.core_type<tc>, window_params = [{transform_indices = @transform_0, window_bounds = array<i64: 1, 16, 16>}, {pipeline_mode = #tpu.pipeline_mode<synchronous>, transform_indices = @transform_1, window_bounds = array<i64: 1, 16>}, {pipeline_mode = #tpu.pipeline_mode<synchronous>, transform_indices = @transform_2, window_bounds = array<i64: 1, 16>}, {transform_indices = @transform_3, window_bounds = array<i64: 1, 16, 16>}]} {
    %c0 = arith.constant 0 : index
    %c0_0 = arith.constant 0 : index
    %c0_1 = arith.constant 0 : index
    %0 = vector.load %arg1[%c0, %c0_0, %c0_1] : memref<1x16x16xbf16, #tpu.memory_space<vmem>>, vector<1x16x16xbf16>
    %1 = vector.shape_cast %0 : vector<1x16x16xbf16> to vector<16x16xbf16>
    %2 = arith.extf %1 : vector<16x16xbf16> to vector<16x16xf32>
    %c0_2 = arith.constant 0 : index
    %c0_3 = arith.constant 0 : index
    %3 = vector.load %arg2[%c0_2, %c0_3] : memref<1x16xf32, #tpu.memory_space<vmem>>, vector<1x16xf32>
    %4 = vector.broadcast %3 : vector<1x16xf32> to vector<16x16xf32>
    %5 = arith.mulf %2, %4 : vector<16x16xf32>
    %c0_4 = arith.constant 0 : index
    %c0_5 = arith.constant 0 : index
    %6 = vector.load %arg3[%c0_4, %c0_5] : memref<1x16xf32, #tpu.memory_space<vmem>>, vector<1x16xf32>
    %7 = vector.broadcast %6 : vector<1x16xf32> to vector<16x16xf32>
    %8 = arith.addf %5, %7 : vector<16x16xf32>
    %cst = arith.constant 0.000000e+00 : f32
    %9 = vector.broadcast %cst : f32 to vector<16x16xf32>
    %10 = arith.maximumf %8, %9 : vector<16x16xf32>
    %11 = arith.truncf %10 : vector<16x16xf32> to vector<16x16xbf16>
    %c0_6 = arith.constant 0 : index
    %c0_7 = arith.constant 0 : index
    %c0_8 = arith.constant 0 : index
    %12 = vector.load %arg4[%c0_6, %c0_7, %c0_8] : memref<1x16x16xbf16, #tpu.memory_space<vmem>>, vector<1x16x16xbf16>
    %13 = vector.shape_cast %12 : vector<1x16x16xbf16> to vector<16x16xbf16>
    %14 = vector.shape_cast %11 : vector<16x16xbf16> to vector<1x16x16xbf16>
    tpu.vector_store %arg4[%c0_6, %c0_7, %c0_8], %14 {strides = array<i32>} : memref<1x16x16xbf16, #tpu.memory_space<vmem>>, vector<1x16x16xbf16>,
    return
  }
  func.func @transform_0(%arg0: i32) -> (i32, i32, i32) {
    %c0_i32 = arith.constant 0 : i32
    %c0_i32_0 = arith.constant 0 : i32
    %c0_i32_1 = arith.constant 0 : i32
    return %arg0, %c0_i32, %c0_i32_0 : i32, i32, i32
  }
  func.func @transform_1(%arg0: i32) -> (i32, i32) {
    %c0_i32 = arith.constant 0 : i32
    %c0_i32_0 = arith.constant 0 : i32
    %c0_i32_1 = arith.constant 0 : i32
    return %c0_i32, %c0_i32_0 : i32, i32
  }
  func.func @transform_2(%arg0: i32) -> (i32, i32) {
    %c0_i32 = arith.constant 0 : i32
    %c0_i32_0 = arith.constant 0 : i32
    %c0_i32_1 = arith.constant 0 : i32
    return %c0_i32, %c0_i32_0 : i32, i32
  }
  func.func @transform_3(%arg0: i32) -> (i32, i32, i32) {
    %c0_i32 = arith.constant 0 : i32
    %c0_i32_0 = arith.constant 0 : i32
    %c0_i32_1 = arith.constant 0 : i32
    return %arg0, %c0_i32, %c0_i32_0 : i32, i32, i32
  }
}

module attributes {stable_mosaic.version = 11 : i64} {
  func.func @_conv_pass1_kernel(%arg0: i32, %arg1: memref<1x4x256xbf16, #tpu.memory_space<vmem>>, %arg2: memref<1x256x32xbf16, #tpu.memory_space<vmem>>, %arg3: memref<1x32xf32, #tpu.memory_space<vmem>>, %arg4: memref<1x4x32xbf16, #tpu.memory_space<vmem>>, %arg5: memref<1x2x32xf32, #tpu.memory_space<vmem>>) attributes {dimension_semantics = [#tpu.dimension_semantics<parallel>], iteration_bounds = array<i64: 2>, scalar_prefetch = 0 : i64, scratch_operands = 0 : i64, tpu.core_type = #tpu.core_type<tc>, window_params = [{transform_indices = @transform_0, window_bounds = array<i64: 1, 4, 256>}, {pipeline_mode = #tpu.pipeline_mode<synchronous>, transform_indices = @transform_1, window_bounds = array<i64: 1, 256, 32>}, {pipeline_mode = #tpu.pipeline_mode<synchronous>, transform_indices = @transform_2, window_bounds = array<i64: 1, 32>}, {transform_indices = @transform_3, window_bounds = array<i64: 1, 4, 32>}, {transform_indices = @transform_4, window_bounds = array<i64: 1, 2, 32>}]} {
    %c0 = arith.constant 0 : index
    %c0_0 = arith.constant 0 : index
    %c0_1 = arith.constant 0 : index
    %0 = vector.load %arg1[%c0, %c0_0, %c0_1] : memref<1x4x256xbf16, #tpu.memory_space<vmem>>, vector<1x4x256xbf16>
    %1 = vector.shape_cast %0 : vector<1x4x256xbf16> to vector<4x256xbf16>
    %c0_2 = arith.constant 0 : index
    %c0_3 = arith.constant 0 : index
    %c0_4 = arith.constant 0 : index
    %2 = vector.load %arg2[%c0_2, %c0_3, %c0_4] : memref<1x256x32xbf16, #tpu.memory_space<vmem>>, vector<1x256x32xbf16>
    %3 = vector.shape_cast %2 : vector<1x256x32xbf16> to vector<256x32xbf16>
    %cst = arith.constant dense<0.000000e+00> : vector<4x32xf32>
    %4 = tpu.matmul %1, %3, %cst {dimension_numbers = #tpu.dot_dimension_numbers<[1], [0], [0], [1], [0, 0, 1, 1], [], []>} : vector<4x256xbf16>, vector<256x32xbf16>, vector<4x32xf32> -> vector<4x32xf32>
    %c0_5 = arith.constant 0 : index
    %c0_6 = arith.constant 0 : index
    %5 = vector.load %arg3[%c0_5, %c0_6] : memref<1x32xf32, #tpu.memory_space<vmem>>, vector<1x32xf32>
    %6 = vector.broadcast %5 : vector<1x32xf32> to vector<4x32xf32>
    %7 = arith.addf %4, %6 : vector<4x32xf32>
    %8 = arith.truncf %7 : vector<4x32xf32> to vector<4x32xbf16>
    %c0_7 = arith.constant 0 : index
    %c0_8 = arith.constant 0 : index
    %c0_9 = arith.constant 0 : index
    %9 = vector.load %arg4[%c0_7, %c0_8, %c0_9] : memref<1x4x32xbf16, #tpu.memory_space<vmem>>, vector<1x4x32xbf16>
    %10 = vector.shape_cast %9 : vector<1x4x32xbf16> to vector<4x32xbf16>
    %11 = vector.shape_cast %8 : vector<4x32xbf16> to vector<1x4x32xbf16>
    tpu.vector_store %arg4[%c0_7, %c0_8, %c0_9], %11 {strides = array<i32>} : memref<1x4x32xbf16, #tpu.memory_space<vmem>>, vector<1x4x32xbf16>,
    %cst_10 = arith.constant dense<0.000000e+00> : vector<32xf32>
    %12 = vector.multi_reduction <add>, %7, %cst_10 [0] : vector<4x32xf32> to vector<32xf32>
    %13 = vector.shape_cast %12 : vector<32xf32> to vector<1x32xf32>
    %14 = arith.mulf %7, %7 : vector<4x32xf32>
    %cst_11 = arith.constant dense<0.000000e+00> : vector<32xf32>
    %15 = vector.multi_reduction <add>, %14, %cst_11 [0] : vector<4x32xf32> to vector<32xf32>
    %16 = vector.shape_cast %15 : vector<32xf32> to vector<1x32xf32>
    %17 = tpu.concatenate %13, %16 in 0 : vector<1x32xf32>, vector<1x32xf32> -> vector<2x32xf32>
    %c0_12 = arith.constant 0 : index
    %c0_13 = arith.constant 0 : index
    %c0_14 = arith.constant 0 : index
    %18 = vector.load %arg5[%c0_12, %c0_13, %c0_14] : memref<1x2x32xf32, #tpu.memory_space<vmem>>, vector<1x2x32xf32>
    %19 = vector.shape_cast %18 : vector<1x2x32xf32> to vector<2x32xf32>
    %20 = vector.shape_cast %17 : vector<2x32xf32> to vector<1x2x32xf32>
    tpu.vector_store %arg5[%c0_12, %c0_13, %c0_14], %20 {strides = array<i32>} : memref<1x2x32xf32, #tpu.memory_space<vmem>>, vector<1x2x32xf32>,
    return
  }
  func.func @transform_0(%arg0: i32) -> (i32, i32, i32) {
    %c0_i32 = arith.constant 0 : i32
    %c0_i32_0 = arith.constant 0 : i32
    %c0_i32_1 = arith.constant 0 : i32
    return %arg0, %c0_i32, %c0_i32_0 : i32, i32, i32
  }
  func.func @transform_1(%arg0: i32) -> (i32, i32, i32) {
    %c0_i32 = arith.constant 0 : i32
    %c0_i32_0 = arith.constant 0 : i32
    %c0_i32_1 = arith.constant 0 : i32
    %c0_i32_2 = arith.constant 0 : i32
    return %c0_i32, %c0_i32_0, %c0_i32_1 : i32, i32, i32
  }
  func.func @transform_2(%arg0: i32) -> (i32, i32) {
    %c0_i32 = arith.constant 0 : i32
    %c0_i32_0 = arith.constant 0 : i32
    %c0_i32_1 = arith.constant 0 : i32
    return %c0_i32, %c0_i32_0 : i32, i32
  }
  func.func @transform_3(%arg0: i32) -> (i32, i32, i32) {
    %c0_i32 = arith.constant 0 : i32
    %c0_i32_0 = arith.constant 0 : i32
    %c0_i32_1 = arith.constant 0 : i32
    return %arg0, %c0_i32, %c0_i32_0 : i32, i32, i32
  }
  func.func @transform_4(%arg0: i32) -> (i32, i32, i32) {
    %c0_i32 = arith.constant 0 : i32
    %c0_i32_0 = arith.constant 0 : i32
    %c0_i32_1 = arith.constant 0 : i32
    return %arg0, %c0_i32, %c0_i32_0 : i32, i32, i32
  }
}

module attributes {stable_mosaic.version = 11 : i64} {
  func.func @_bn_mean_head_kernel(%arg0: i32, %arg1: memref<1x4x32xbf16, #tpu.memory_space<vmem>>, %arg2: memref<1x32xf32, #tpu.memory_space<vmem>>, %arg3: memref<1x32xf32, #tpu.memory_space<vmem>>, %arg4: memref<32x12xbf16, #tpu.memory_space<vmem>>, %arg5: memref<1x12xf32, #tpu.memory_space<vmem>>, %arg6: memref<1x1x12xf32, #tpu.memory_space<vmem>>) attributes {dimension_semantics = [#tpu.dimension_semantics<parallel>], iteration_bounds = array<i64: 2>, scalar_prefetch = 0 : i64, scratch_operands = 0 : i64, tpu.core_type = #tpu.core_type<tc>, window_params = [{transform_indices = @transform_0, window_bounds = array<i64: 1, 4, 32>}, {pipeline_mode = #tpu.pipeline_mode<synchronous>, transform_indices = @transform_1, window_bounds = array<i64: 1, 32>}, {pipeline_mode = #tpu.pipeline_mode<synchronous>, transform_indices = @transform_2, window_bounds = array<i64: 1, 32>}, {pipeline_mode = #tpu.pipeline_mode<synchronous>, transform_indices = @transform_3, window_bounds = array<i64: 32, 12>}, {pipeline_mode = #tpu.pipeline_mode<synchronous>, transform_indices = @transform_4, window_bounds = array<i64: 1, 12>}, {transform_indices = @transform_5, window_bounds = array<i64: 1, 1, 12>}]} {
    %c0 = arith.constant 0 : index
    %c0_0 = arith.constant 0 : index
    %c0_1 = arith.constant 0 : index
    %0 = vector.load %arg1[%c0, %c0_0, %c0_1] : memref<1x4x32xbf16, #tpu.memory_space<vmem>>, vector<1x4x32xbf16>
    %1 = vector.shape_cast %0 : vector<1x4x32xbf16> to vector<4x32xbf16>
    %2 = arith.extf %1 : vector<4x32xbf16> to vector<4x32xf32>
    %c0_2 = arith.constant 0 : index
    %c0_3 = arith.constant 0 : index
    %3 = vector.load %arg2[%c0_2, %c0_3] : memref<1x32xf32, #tpu.memory_space<vmem>>, vector<1x32xf32>
    %4 = vector.broadcast %3 : vector<1x32xf32> to vector<4x32xf32>
    %5 = arith.mulf %2, %4 : vector<4x32xf32>
    %c0_4 = arith.constant 0 : index
    %c0_5 = arith.constant 0 : index
    %6 = vector.load %arg3[%c0_4, %c0_5] : memref<1x32xf32, #tpu.memory_space<vmem>>, vector<1x32xf32>
    %7 = vector.broadcast %6 : vector<1x32xf32> to vector<4x32xf32>
    %8 = arith.addf %5, %7 : vector<4x32xf32>
    %cst = arith.constant 0.000000e+00 : f32
    %9 = vector.broadcast %cst : f32 to vector<4x32xf32>
    %10 = arith.maximumf %8, %9 : vector<4x32xf32>
    %cst_6 = arith.constant dense<0.000000e+00> : vector<32xf32>
    %11 = vector.multi_reduction <add>, %10, %cst_6 [0] : vector<4x32xf32> to vector<32xf32>
    %12 = vector.shape_cast %11 : vector<32xf32> to vector<1x32xf32>
    %cst_7 = arith.constant 4.000000e+00 : f32
    %13 = vector.broadcast %cst_7 : f32 to vector<1x32xf32>
    %14 = arith.divf %12, %13 : vector<1x32xf32>
    %15 = arith.truncf %14 : vector<1x32xf32> to vector<1x32xbf16>
    %c0_8 = arith.constant 0 : index
    %c0_9 = arith.constant 0 : index
    %16 = vector.load %arg4[%c0_8, %c0_9] : memref<32x12xbf16, #tpu.memory_space<vmem>>, vector<32x12xbf16>
    %cst_10 = arith.constant dense<0.000000e+00> : vector<1x12xf32>
    %17 = tpu.matmul %15, %16, %cst_10 {dimension_numbers = #tpu.dot_dimension_numbers<[1], [0], [0], [1], [0, 0, 1, 1], [], []>} : vector<1x32xbf16>, vector<32x12xbf16>, vector<1x12xf32> -> vector<1x12xf32>
    %c0_11 = arith.constant 0 : index
    %c0_12 = arith.constant 0 : index
    %18 = vector.load %arg5[%c0_11, %c0_12] : memref<1x12xf32, #tpu.memory_space<vmem>>, vector<1x12xf32>
    %19 = arith.addf %17, %18 : vector<1x12xf32>
    %c0_13 = arith.constant 0 : index
    %c0_14 = arith.constant 0 : index
    %c0_15 = arith.constant 0 : index
    %20 = vector.load %arg6[%c0_13, %c0_14, %c0_15] : memref<1x1x12xf32, #tpu.memory_space<vmem>>, vector<1x1x12xf32>
    %21 = vector.shape_cast %20 : vector<1x1x12xf32> to vector<1x12xf32>
    %22 = vector.shape_cast %19 : vector<1x12xf32> to vector<1x1x12xf32>
    tpu.vector_store %arg6[%c0_13, %c0_14, %c0_15], %22 {strides = array<i32>} : memref<1x1x12xf32, #tpu.memory_space<vmem>>, vector<1x1x12xf32>,
    return
  }
  func.func @transform_0(%arg0: i32) -> (i32, i32, i32) {
    %c0_i32 = arith.constant 0 : i32
    %c0_i32_0 = arith.constant 0 : i32
    %c0_i32_1 = arith.constant 0 : i32
    return %arg0, %c0_i32, %c0_i32_0 : i32, i32, i32
  }
  func.func @transform_1(%arg0: i32) -> (i32, i32) {
    %c0_i32 = arith.constant 0 : i32
    %c0_i32_0 = arith.constant 0 : i32
    %c0_i32_1 = arith.constant 0 : i32
    return %c0_i32, %c0_i32_0 : i32, i32
  }
  func.func @transform_2(%arg0: i32) -> (i32, i32) {
    %c0_i32 = arith.constant 0 : i32
    %c0_i32_0 = arith.constant 0 : i32
    %c0_i32_1 = arith.constant 0 : i32
    return %c0_i32, %c0_i32_0 : i32, i32
  }
  func.func @transform_3(%arg0: i32) -> (i32, i32) {
    %c0_i32 = arith.constant 0 : i32
    %c0_i32_0 = arith.constant 0 : i32
    %c0_i32_1 = arith.constant 0 : i32
    return %c0_i32, %c0_i32_0 : i32, i32
  }
  func.func @transform_4(%arg0: i32) -> (i32, i32) {
    %c0_i32 = arith.constant 0 : i32
    %c0_i32_0 = arith.constant 0 : i32
    %c0_i32_1 = arith.constant 0 : i32
    return %c0_i32, %c0_i32_0 : i32, i32
  }
  func.func @transform_5(%arg0: i32) -> (i32, i32, i32) {
    %c0_i32 = arith.constant 0 : i32
    %c0_i32_0 = arith.constant 0 : i32
    %c0_i32_1 = arith.constant 0 : i32
    return %arg0, %c0_i32, %c0_i32_0 : i32, i32, i32
  }
}

module attributes {stable_mosaic.version = 11 : i64} {
  func.func @_conv_pass1_kernel(%arg0: i32, %arg1: memref<1x18x18x4xf32, #tpu.memory_space<vmem>>, %arg2: memref<9x4x8xbf16, #tpu.memory_space<vmem>>, %arg3: memref<1x8xf32, #tpu.memory_space<vmem>>, %arg4: memref<1x256x8xbf16, #tpu.memory_space<vmem>>, %arg5: memref<1x2x8xf32, #tpu.memory_space<vmem>>) attributes {dimension_semantics = [#tpu.dimension_semantics<parallel>], iteration_bounds = array<i64: 2>, scalar_prefetch = 0 : i64, scratch_operands = 0 : i64, tpu.core_type = #tpu.core_type<tc>, window_params = [{transform_indices = @transform_0, window_bounds = array<i64: 1, 18, 18, 4>}, {pipeline_mode = #tpu.pipeline_mode<synchronous>, transform_indices = @transform_1, window_bounds = array<i64: 9, 4, 8>}, {pipeline_mode = #tpu.pipeline_mode<synchronous>, transform_indices = @transform_2, window_bounds = array<i64: 1, 8>}, {transform_indices = @transform_3, window_bounds = array<i64: 1, 256, 8>}, {transform_indices = @transform_4, window_bounds = array<i64: 1, 2, 8>}]} {
    %cst = arith.constant 0.000000e+00 : f32
    %0 = vector.broadcast %cst : f32 to vector<256x8xf32>
    %c0 = arith.constant 0 : index
    %c0_0 = arith.constant 0 : index
    %c0_1 = arith.constant 0 : index
    %c0_2 = arith.constant 0 : index
    %1 = vector.load %arg1[%c0, %c0_0, %c0_1, %c0_2] : memref<1x18x18x4xf32, #tpu.memory_space<vmem>>, vector<1x16x16x4xf32>
    %2 = vector.shape_cast %1 : vector<1x16x16x4xf32> to vector<16x16x4xf32>
    %3 = vector.shape_cast %2 : vector<16x16x4xf32> to vector<256x4xf32>
    %4 = arith.truncf %3 : vector<256x4xf32> to vector<256x4xbf16>
    %c0_3 = arith.constant 0 : index
    %c0_4 = arith.constant 0 : index
    %c0_5 = arith.constant 0 : index
    %5 = vector.load %arg2[%c0_3, %c0_4, %c0_5] : memref<9x4x8xbf16, #tpu.memory_space<vmem>>, vector<1x4x8xbf16>
    %6 = vector.shape_cast %5 : vector<1x4x8xbf16> to vector<4x8xbf16>
    %cst_6 = arith.constant dense<0.000000e+00> : vector<256x8xf32>
    %7 = tpu.matmul %4, %6, %cst_6 {dimension_numbers = #tpu.dot_dimension_numbers<[1], [0], [0], [1], [0, 0, 1, 1], [], []>} : vector<256x4xbf16>, vector<4x8xbf16>, vector<256x8xf32> -> vector<256x8xf32>
    %8 = arith.addf %0, %7 : vector<256x8xf32>
    %c0_7 = arith.constant 0 : index
    %c0_8 = arith.constant 0 : index
    %c1 = arith.constant 1 : index
    %c0_9 = arith.constant 0 : index
    %9 = vector.load %arg1[%c0_7, %c0_8, %c1, %c0_9] : memref<1x18x18x4xf32, #tpu.memory_space<vmem>>, vector<1x16x16x4xf32>
    %10 = vector.shape_cast %9 : vector<1x16x16x4xf32> to vector<16x16x4xf32>
    %11 = vector.shape_cast %10 : vector<16x16x4xf32> to vector<256x4xf32>
    %12 = arith.truncf %11 : vector<256x4xf32> to vector<256x4xbf16>
    %c1_10 = arith.constant 1 : index
    %c0_11 = arith.constant 0 : index
    %c0_12 = arith.constant 0 : index
    %13 = vector.load %arg2[%c1_10, %c0_11, %c0_12] : memref<9x4x8xbf16, #tpu.memory_space<vmem>>, vector<1x4x8xbf16>
    %14 = vector.shape_cast %13 : vector<1x4x8xbf16> to vector<4x8xbf16>
    %cst_13 = arith.constant dense<0.000000e+00> : vector<256x8xf32>
    %15 = tpu.matmul %12, %14, %cst_13 {dimension_numbers = #tpu.dot_dimension_numbers<[1], [0], [0], [1], [0, 0, 1, 1], [], []>} : vector<256x4xbf16>, vector<4x8xbf16>, vector<256x8xf32> -> vector<256x8xf32>
    %16 = arith.addf %8, %15 : vector<256x8xf32>
    %c0_14 = arith.constant 0 : index
    %c0_15 = arith.constant 0 : index
    %c2 = arith.constant 2 : index
    %c0_16 = arith.constant 0 : index
    %17 = vector.load %arg1[%c0_14, %c0_15, %c2, %c0_16] : memref<1x18x18x4xf32, #tpu.memory_space<vmem>>, vector<1x16x16x4xf32>
    %18 = vector.shape_cast %17 : vector<1x16x16x4xf32> to vector<16x16x4xf32>
    %19 = vector.shape_cast %18 : vector<16x16x4xf32> to vector<256x4xf32>
    %20 = arith.truncf %19 : vector<256x4xf32> to vector<256x4xbf16>
    %c2_17 = arith.constant 2 : index
    %c0_18 = arith.constant 0 : index
    %c0_19 = arith.constant 0 : index
    %21 = vector.load %arg2[%c2_17, %c0_18, %c0_19] : memref<9x4x8xbf16, #tpu.memory_space<vmem>>, vector<1x4x8xbf16>
    %22 = vector.shape_cast %21 : vector<1x4x8xbf16> to vector<4x8xbf16>
    %cst_20 = arith.constant dense<0.000000e+00> : vector<256x8xf32>
    %23 = tpu.matmul %20, %22, %cst_20 {dimension_numbers = #tpu.dot_dimension_numbers<[1], [0], [0], [1], [0, 0, 1, 1], [], []>} : vector<256x4xbf16>, vector<4x8xbf16>, vector<256x8xf32> -> vector<256x8xf32>
    %24 = arith.addf %16, %23 : vector<256x8xf32>
    %c0_21 = arith.constant 0 : index
    %c1_22 = arith.constant 1 : index
    %c0_23 = arith.constant 0 : index
    %c0_24 = arith.constant 0 : index
    %25 = vector.load %arg1[%c0_21, %c1_22, %c0_23, %c0_24] : memref<1x18x18x4xf32, #tpu.memory_space<vmem>>, vector<1x16x16x4xf32>
    %26 = vector.shape_cast %25 : vector<1x16x16x4xf32> to vector<16x16x4xf32>
    %27 = vector.shape_cast %26 : vector<16x16x4xf32> to vector<256x4xf32>
    %28 = arith.truncf %27 : vector<256x4xf32> to vector<256x4xbf16>
    %c3 = arith.constant 3 : index
    %c0_25 = arith.constant 0 : index
    %c0_26 = arith.constant 0 : index
    %29 = vector.load %arg2[%c3, %c0_25, %c0_26] : memref<9x4x8xbf16, #tpu.memory_space<vmem>>, vector<1x4x8xbf16>
    %30 = vector.shape_cast %29 : vector<1x4x8xbf16> to vector<4x8xbf16>
    %cst_27 = arith.constant dense<0.000000e+00> : vector<256x8xf32>
    %31 = tpu.matmul %28, %30, %cst_27 {dimension_numbers = #tpu.dot_dimension_numbers<[1], [0], [0], [1], [0, 0, 1, 1], [], []>} : vector<256x4xbf16>, vector<4x8xbf16>, vector<256x8xf32> -> vector<256x8xf32>
    %32 = arith.addf %24, %31 : vector<256x8xf32>
    %c0_28 = arith.constant 0 : index
    %c1_29 = arith.constant 1 : index
    %c1_30 = arith.constant 1 : index
    %c0_31 = arith.constant 0 : index
    %33 = vector.load %arg1[%c0_28, %c1_29, %c1_30, %c0_31] : memref<1x18x18x4xf32, #tpu.memory_space<vmem>>, vector<1x16x16x4xf32>
    %34 = vector.shape_cast %33 : vector<1x16x16x4xf32> to vector<16x16x4xf32>
    %35 = vector.shape_cast %34 : vector<16x16x4xf32> to vector<256x4xf32>
    %36 = arith.truncf %35 : vector<256x4xf32> to vector<256x4xbf16>
    %c4 = arith.constant 4 : index
    %c0_32 = arith.constant 0 : index
    %c0_33 = arith.constant 0 : index
    %37 = vector.load %arg2[%c4, %c0_32, %c0_33] : memref<9x4x8xbf16, #tpu.memory_space<vmem>>, vector<1x4x8xbf16>
    %38 = vector.shape_cast %37 : vector<1x4x8xbf16> to vector<4x8xbf16>
    %cst_34 = arith.constant dense<0.000000e+00> : vector<256x8xf32>
    %39 = tpu.matmul %36, %38, %cst_34 {dimension_numbers = #tpu.dot_dimension_numbers<[1], [0], [0], [1], [0, 0, 1, 1], [], []>} : vector<256x4xbf16>, vector<4x8xbf16>, vector<256x8xf32> -> vector<256x8xf32>
    %40 = arith.addf %32, %39 : vector<256x8xf32>
    %c0_35 = arith.constant 0 : index
    %c1_36 = arith.constant 1 : index
    %c2_37 = arith.constant 2 : index
    %c0_38 = arith.constant 0 : index
    %41 = vector.load %arg1[%c0_35, %c1_36, %c2_37, %c0_38] : memref<1x18x18x4xf32, #tpu.memory_space<vmem>>, vector<1x16x16x4xf32>
    %42 = vector.shape_cast %41 : vector<1x16x16x4xf32> to vector<16x16x4xf32>
    %43 = vector.shape_cast %42 : vector<16x16x4xf32> to vector<256x4xf32>
    %44 = arith.truncf %43 : vector<256x4xf32> to vector<256x4xbf16>
    %c5 = arith.constant 5 : index
    %c0_39 = arith.constant 0 : index
    %c0_40 = arith.constant 0 : index
    %45 = vector.load %arg2[%c5, %c0_39, %c0_40] : memref<9x4x8xbf16, #tpu.memory_space<vmem>>, vector<1x4x8xbf16>
    %46 = vector.shape_cast %45 : vector<1x4x8xbf16> to vector<4x8xbf16>
    %cst_41 = arith.constant dense<0.000000e+00> : vector<256x8xf32>
    %47 = tpu.matmul %44, %46, %cst_41 {dimension_numbers = #tpu.dot_dimension_numbers<[1], [0], [0], [1], [0, 0, 1, 1], [], []>} : vector<256x4xbf16>, vector<4x8xbf16>, vector<256x8xf32> -> vector<256x8xf32>
    %48 = arith.addf %40, %47 : vector<256x8xf32>
    %c0_42 = arith.constant 0 : index
    %c2_43 = arith.constant 2 : index
    %c0_44 = arith.constant 0 : index
    %c0_45 = arith.constant 0 : index
    %49 = vector.load %arg1[%c0_42, %c2_43, %c0_44, %c0_45] : memref<1x18x18x4xf32, #tpu.memory_space<vmem>>, vector<1x16x16x4xf32>
    %50 = vector.shape_cast %49 : vector<1x16x16x4xf32> to vector<16x16x4xf32>
    %51 = vector.shape_cast %50 : vector<16x16x4xf32> to vector<256x4xf32>
    %52 = arith.truncf %51 : vector<256x4xf32> to vector<256x4xbf16>
    %c6 = arith.constant 6 : index
    %c0_46 = arith.constant 0 : index
    %c0_47 = arith.constant 0 : index
    %53 = vector.load %arg2[%c6, %c0_46, %c0_47] : memref<9x4x8xbf16, #tpu.memory_space<vmem>>, vector<1x4x8xbf16>
    %54 = vector.shape_cast %53 : vector<1x4x8xbf16> to vector<4x8xbf16>
    %cst_48 = arith.constant dense<0.000000e+00> : vector<256x8xf32>
    %55 = tpu.matmul %52, %54, %cst_48 {dimension_numbers = #tpu.dot_dimension_numbers<[1], [0], [0], [1], [0, 0, 1, 1], [], []>} : vector<256x4xbf16>, vector<4x8xbf16>, vector<256x8xf32> -> vector<256x8xf32>
    %56 = arith.addf %48, %55 : vector<256x8xf32>
    %c0_49 = arith.constant 0 : index
    %c2_50 = arith.constant 2 : index
    %c1_51 = arith.constant 1 : index
    %c0_52 = arith.constant 0 : index
    %57 = vector.load %arg1[%c0_49, %c2_50, %c1_51, %c0_52] : memref<1x18x18x4xf32, #tpu.memory_space<vmem>>, vector<1x16x16x4xf32>
    %58 = vector.shape_cast %57 : vector<1x16x16x4xf32> to vector<16x16x4xf32>
    %59 = vector.shape_cast %58 : vector<16x16x4xf32> to vector<256x4xf32>
    %60 = arith.truncf %59 : vector<256x4xf32> to vector<256x4xbf16>
    %c7 = arith.constant 7 : index
    %c0_53 = arith.constant 0 : index
    %c0_54 = arith.constant 0 : index
    %61 = vector.load %arg2[%c7, %c0_53, %c0_54] : memref<9x4x8xbf16, #tpu.memory_space<vmem>>, vector<1x4x8xbf16>
    %62 = vector.shape_cast %61 : vector<1x4x8xbf16> to vector<4x8xbf16>
    %cst_55 = arith.constant dense<0.000000e+00> : vector<256x8xf32>
    %63 = tpu.matmul %60, %62, %cst_55 {dimension_numbers = #tpu.dot_dimension_numbers<[1], [0], [0], [1], [0, 0, 1, 1], [], []>} : vector<256x4xbf16>, vector<4x8xbf16>, vector<256x8xf32> -> vector<256x8xf32>
    %64 = arith.addf %56, %63 : vector<256x8xf32>
    %c0_56 = arith.constant 0 : index
    %c2_57 = arith.constant 2 : index
    %c2_58 = arith.constant 2 : index
    %c0_59 = arith.constant 0 : index
    %65 = vector.load %arg1[%c0_56, %c2_57, %c2_58, %c0_59] : memref<1x18x18x4xf32, #tpu.memory_space<vmem>>, vector<1x16x16x4xf32>
    %66 = vector.shape_cast %65 : vector<1x16x16x4xf32> to vector<16x16x4xf32>
    %67 = vector.shape_cast %66 : vector<16x16x4xf32> to vector<256x4xf32>
    %68 = arith.truncf %67 : vector<256x4xf32> to vector<256x4xbf16>
    %c8 = arith.constant 8 : index
    %c0_60 = arith.constant 0 : index
    %c0_61 = arith.constant 0 : index
    %69 = vector.load %arg2[%c8, %c0_60, %c0_61] : memref<9x4x8xbf16, #tpu.memory_space<vmem>>, vector<1x4x8xbf16>
    %70 = vector.shape_cast %69 : vector<1x4x8xbf16> to vector<4x8xbf16>
    %cst_62 = arith.constant dense<0.000000e+00> : vector<256x8xf32>
    %71 = tpu.matmul %68, %70, %cst_62 {dimension_numbers = #tpu.dot_dimension_numbers<[1], [0], [0], [1], [0, 0, 1, 1], [], []>} : vector<256x4xbf16>, vector<4x8xbf16>, vector<256x8xf32> -> vector<256x8xf32>
    %72 = arith.addf %64, %71 : vector<256x8xf32>
    %c0_63 = arith.constant 0 : index
    %c0_64 = arith.constant 0 : index
    %73 = vector.load %arg3[%c0_63, %c0_64] : memref<1x8xf32, #tpu.memory_space<vmem>>, vector<1x8xf32>
    %74 = vector.broadcast %73 : vector<1x8xf32> to vector<256x8xf32>
    %75 = arith.addf %72, %74 : vector<256x8xf32>
    %cst_65 = arith.constant 0.000000e+00 : f32
    %76 = vector.broadcast %cst_65 : f32 to vector<256x8xf32>
    %77 = arith.maximumf %75, %76 : vector<256x8xf32>
    %78 = arith.truncf %77 : vector<256x8xf32> to vector<256x8xbf16>
    %c0_66 = arith.constant 0 : index
    %c0_67 = arith.constant 0 : index
    %c0_68 = arith.constant 0 : index
    %79 = vector.load %arg4[%c0_66, %c0_67, %c0_68] : memref<1x256x8xbf16, #tpu.memory_space<vmem>>, vector<1x256x8xbf16>
    %80 = vector.shape_cast %79 : vector<1x256x8xbf16> to vector<256x8xbf16>
    %81 = vector.shape_cast %78 : vector<256x8xbf16> to vector<1x256x8xbf16>
    tpu.vector_store %arg4[%c0_66, %c0_67, %c0_68], %81 {strides = array<i32>} : memref<1x256x8xbf16, #tpu.memory_space<vmem>>, vector<1x256x8xbf16>,
    %cst_69 = arith.constant dense<0.000000e+00> : vector<8xf32>
    %82 = vector.multi_reduction <add>, %77, %cst_69 [0] : vector<256x8xf32> to vector<8xf32>
    %83 = vector.shape_cast %82 : vector<8xf32> to vector<1x8xf32>
    %84 = arith.mulf %77, %77 : vector<256x8xf32>
    %cst_70 = arith.constant dense<0.000000e+00> : vector<8xf32>
    %85 = vector.multi_reduction <add>, %84, %cst_70 [0] : vector<256x8xf32> to vector<8xf32>
    %86 = vector.shape_cast %85 : vector<8xf32> to vector<1x8xf32>
    %87 = tpu.concatenate %83, %86 in 0 : vector<1x8xf32>, vector<1x8xf32> -> vector<2x8xf32>
    %c0_71 = arith.constant 0 : index
    %c0_72 = arith.constant 0 : index
    %c0_73 = arith.constant 0 : index
    %88 = vector.load %arg5[%c0_71, %c0_72, %c0_73] : memref<1x2x8xf32, #tpu.memory_space<vmem>>, vector<1x2x8xf32>
    %89 = vector.shape_cast %88 : vector<1x2x8xf32> to vector<2x8xf32>
    %90 = vector.shape_cast %87 : vector<2x8xf32> to vector<1x2x8xf32>
    tpu.vector_store %arg5[%c0_71, %c0_72, %c0_73], %90 {strides = array<i32>} : memref<1x2x8xf32, #tpu.memory_space<vmem>>, vector<1x2x8xf32>,
    return
  }
  func.func @transform_0(%arg0: i32) -> (i32, i32, i32, i32) {
    %c0_i32 = arith.constant 0 : i32
    %c0_i32_0 = arith.constant 0 : i32
    %c0_i32_1 = arith.constant 0 : i32
    %c0_i32_2 = arith.constant 0 : i32
    return %arg0, %c0_i32, %c0_i32_0, %c0_i32_1 : i32, i32, i32, i32
  }
  func.func @transform_1(%arg0: i32) -> (i32, i32, i32) {
    %c0_i32 = arith.constant 0 : i32
    %c0_i32_0 = arith.constant 0 : i32
    %c0_i32_1 = arith.constant 0 : i32
    %c0_i32_2 = arith.constant 0 : i32
    return %c0_i32, %c0_i32_0, %c0_i32_1 : i32, i32, i32
  }
  func.func @transform_2(%arg0: i32) -> (i32, i32) {
    %c0_i32 = arith.constant 0 : i32
    %c0_i32_0 = arith.constant 0 : i32
    %c0_i32_1 = arith.constant 0 : i32
    return %c0_i32, %c0_i32_0 : i32, i32
  }
  func.func @transform_3(%arg0: i32) -> (i32, i32, i32) {
    %c0_i32 = arith.constant 0 : i32
    %c0_i32_0 = arith.constant 0 : i32
    %c0_i32_1 = arith.constant 0 : i32
    return %arg0, %c0_i32, %c0_i32_0 : i32, i32, i32
  }
  func.func @transform_4(%arg0: i32) -> (i32, i32, i32) {
    %c0_i32 = arith.constant 0 : i32
    %c0_i32_0 = arith.constant 0 : i32
    %c0_i32_1 = arith.constant 0 : i32
    return %arg0, %c0_i32, %c0_i32_0 : i32, i32, i32
  }
}

module attributes {stable_mosaic.version = 11 : i64} {
  func.func @_conv_pass1_kernel(%arg0: i32, %arg1: memref<1x18x18x8xbf16, #tpu.memory_space<vmem>>, %arg2: memref<9x8x4xbf16, #tpu.memory_space<vmem>>, %arg3: memref<1x4xf32, #tpu.memory_space<vmem>>, %arg4: memref<1x256x4xbf16, #tpu.memory_space<vmem>>, %arg5: memref<1x2x4xf32, #tpu.memory_space<vmem>>) attributes {dimension_semantics = [#tpu.dimension_semantics<parallel>], iteration_bounds = array<i64: 2>, scalar_prefetch = 0 : i64, scratch_operands = 0 : i64, tpu.core_type = #tpu.core_type<tc>, window_params = [{transform_indices = @transform_0, window_bounds = array<i64: 1, 18, 18, 8>}, {pipeline_mode = #tpu.pipeline_mode<synchronous>, transform_indices = @transform_1, window_bounds = array<i64: 9, 8, 4>}, {pipeline_mode = #tpu.pipeline_mode<synchronous>, transform_indices = @transform_2, window_bounds = array<i64: 1, 4>}, {transform_indices = @transform_3, window_bounds = array<i64: 1, 256, 4>}, {transform_indices = @transform_4, window_bounds = array<i64: 1, 2, 4>}]} {
    %cst = arith.constant 0.000000e+00 : f32
    %0 = vector.broadcast %cst : f32 to vector<256x4xf32>
    %c0 = arith.constant 0 : index
    %c0_0 = arith.constant 0 : index
    %c0_1 = arith.constant 0 : index
    %c0_2 = arith.constant 0 : index
    %1 = vector.load %arg1[%c0, %c0_0, %c0_1, %c0_2] : memref<1x18x18x8xbf16, #tpu.memory_space<vmem>>, vector<1x16x16x8xbf16>
    %2 = vector.shape_cast %1 : vector<1x16x16x8xbf16> to vector<16x16x8xbf16>
    %3 = arith.extf %2 : vector<16x16x8xbf16> to vector<16x16x8xf32>
    %4 = vector.shape_cast %3 : vector<16x16x8xf32> to vector<256x8xf32>
    %5 = arith.truncf %4 : vector<256x8xf32> to vector<256x8xbf16>
    %c0_3 = arith.constant 0 : index
    %c0_4 = arith.constant 0 : index
    %c0_5 = arith.constant 0 : index
    %6 = vector.load %arg2[%c0_3, %c0_4, %c0_5] : memref<9x8x4xbf16, #tpu.memory_space<vmem>>, vector<1x8x4xbf16>
    %7 = vector.shape_cast %6 : vector<1x8x4xbf16> to vector<8x4xbf16>
    %cst_6 = arith.constant dense<0.000000e+00> : vector<256x4xf32>
    %8 = tpu.matmul %5, %7, %cst_6 {dimension_numbers = #tpu.dot_dimension_numbers<[1], [0], [0], [1], [0, 0, 1, 1], [], []>} : vector<256x8xbf16>, vector<8x4xbf16>, vector<256x4xf32> -> vector<256x4xf32>
    %9 = arith.addf %0, %8 : vector<256x4xf32>
    %c0_7 = arith.constant 0 : index
    %c0_8 = arith.constant 0 : index
    %c1 = arith.constant 1 : index
    %c0_9 = arith.constant 0 : index
    %10 = vector.load %arg1[%c0_7, %c0_8, %c1, %c0_9] : memref<1x18x18x8xbf16, #tpu.memory_space<vmem>>, vector<1x16x16x8xbf16>
    %11 = vector.shape_cast %10 : vector<1x16x16x8xbf16> to vector<16x16x8xbf16>
    %12 = arith.extf %11 : vector<16x16x8xbf16> to vector<16x16x8xf32>
    %13 = vector.shape_cast %12 : vector<16x16x8xf32> to vector<256x8xf32>
    %14 = arith.truncf %13 : vector<256x8xf32> to vector<256x8xbf16>
    %c1_10 = arith.constant 1 : index
    %c0_11 = arith.constant 0 : index
    %c0_12 = arith.constant 0 : index
    %15 = vector.load %arg2[%c1_10, %c0_11, %c0_12] : memref<9x8x4xbf16, #tpu.memory_space<vmem>>, vector<1x8x4xbf16>
    %16 = vector.shape_cast %15 : vector<1x8x4xbf16> to vector<8x4xbf16>
    %cst_13 = arith.constant dense<0.000000e+00> : vector<256x4xf32>
    %17 = tpu.matmul %14, %16, %cst_13 {dimension_numbers = #tpu.dot_dimension_numbers<[1], [0], [0], [1], [0, 0, 1, 1], [], []>} : vector<256x8xbf16>, vector<8x4xbf16>, vector<256x4xf32> -> vector<256x4xf32>
    %18 = arith.addf %9, %17 : vector<256x4xf32>
    %c0_14 = arith.constant 0 : index
    %c0_15 = arith.constant 0 : index
    %c2 = arith.constant 2 : index
    %c0_16 = arith.constant 0 : index
    %19 = vector.load %arg1[%c0_14, %c0_15, %c2, %c0_16] : memref<1x18x18x8xbf16, #tpu.memory_space<vmem>>, vector<1x16x16x8xbf16>
    %20 = vector.shape_cast %19 : vector<1x16x16x8xbf16> to vector<16x16x8xbf16>
    %21 = arith.extf %20 : vector<16x16x8xbf16> to vector<16x16x8xf32>
    %22 = vector.shape_cast %21 : vector<16x16x8xf32> to vector<256x8xf32>
    %23 = arith.truncf %22 : vector<256x8xf32> to vector<256x8xbf16>
    %c2_17 = arith.constant 2 : index
    %c0_18 = arith.constant 0 : index
    %c0_19 = arith.constant 0 : index
    %24 = vector.load %arg2[%c2_17, %c0_18, %c0_19] : memref<9x8x4xbf16, #tpu.memory_space<vmem>>, vector<1x8x4xbf16>
    %25 = vector.shape_cast %24 : vector<1x8x4xbf16> to vector<8x4xbf16>
    %cst_20 = arith.constant dense<0.000000e+00> : vector<256x4xf32>
    %26 = tpu.matmul %23, %25, %cst_20 {dimension_numbers = #tpu.dot_dimension_numbers<[1], [0], [0], [1], [0, 0, 1, 1], [], []>} : vector<256x8xbf16>, vector<8x4xbf16>, vector<256x4xf32> -> vector<256x4xf32>
    %27 = arith.addf %18, %26 : vector<256x4xf32>
    %c0_21 = arith.constant 0 : index
    %c1_22 = arith.constant 1 : index
    %c0_23 = arith.constant 0 : index
    %c0_24 = arith.constant 0 : index
    %28 = vector.load %arg1[%c0_21, %c1_22, %c0_23, %c0_24] : memref<1x18x18x8xbf16, #tpu.memory_space<vmem>>, vector<1x16x16x8xbf16>
    %29 = vector.shape_cast %28 : vector<1x16x16x8xbf16> to vector<16x16x8xbf16>
    %30 = arith.extf %29 : vector<16x16x8xbf16> to vector<16x16x8xf32>
    %31 = vector.shape_cast %30 : vector<16x16x8xf32> to vector<256x8xf32>
    %32 = arith.truncf %31 : vector<256x8xf32> to vector<256x8xbf16>
    %c3 = arith.constant 3 : index
    %c0_25 = arith.constant 0 : index
    %c0_26 = arith.constant 0 : index
    %33 = vector.load %arg2[%c3, %c0_25, %c0_26] : memref<9x8x4xbf16, #tpu.memory_space<vmem>>, vector<1x8x4xbf16>
    %34 = vector.shape_cast %33 : vector<1x8x4xbf16> to vector<8x4xbf16>
    %cst_27 = arith.constant dense<0.000000e+00> : vector<256x4xf32>
    %35 = tpu.matmul %32, %34, %cst_27 {dimension_numbers = #tpu.dot_dimension_numbers<[1], [0], [0], [1], [0, 0, 1, 1], [], []>} : vector<256x8xbf16>, vector<8x4xbf16>, vector<256x4xf32> -> vector<256x4xf32>
    %36 = arith.addf %27, %35 : vector<256x4xf32>
    %c0_28 = arith.constant 0 : index
    %c1_29 = arith.constant 1 : index
    %c1_30 = arith.constant 1 : index
    %c0_31 = arith.constant 0 : index
    %37 = vector.load %arg1[%c0_28, %c1_29, %c1_30, %c0_31] : memref<1x18x18x8xbf16, #tpu.memory_space<vmem>>, vector<1x16x16x8xbf16>
    %38 = vector.shape_cast %37 : vector<1x16x16x8xbf16> to vector<16x16x8xbf16>
    %39 = arith.extf %38 : vector<16x16x8xbf16> to vector<16x16x8xf32>
    %40 = vector.shape_cast %39 : vector<16x16x8xf32> to vector<256x8xf32>
    %41 = arith.truncf %40 : vector<256x8xf32> to vector<256x8xbf16>
    %c4 = arith.constant 4 : index
    %c0_32 = arith.constant 0 : index
    %c0_33 = arith.constant 0 : index
    %42 = vector.load %arg2[%c4, %c0_32, %c0_33] : memref<9x8x4xbf16, #tpu.memory_space<vmem>>, vector<1x8x4xbf16>
    %43 = vector.shape_cast %42 : vector<1x8x4xbf16> to vector<8x4xbf16>
    %cst_34 = arith.constant dense<0.000000e+00> : vector<256x4xf32>
    %44 = tpu.matmul %41, %43, %cst_34 {dimension_numbers = #tpu.dot_dimension_numbers<[1], [0], [0], [1], [0, 0, 1, 1], [], []>} : vector<256x8xbf16>, vector<8x4xbf16>, vector<256x4xf32> -> vector<256x4xf32>
    %45 = arith.addf %36, %44 : vector<256x4xf32>
    %c0_35 = arith.constant 0 : index
    %c1_36 = arith.constant 1 : index
    %c2_37 = arith.constant 2 : index
    %c0_38 = arith.constant 0 : index
    %46 = vector.load %arg1[%c0_35, %c1_36, %c2_37, %c0_38] : memref<1x18x18x8xbf16, #tpu.memory_space<vmem>>, vector<1x16x16x8xbf16>
    %47 = vector.shape_cast %46 : vector<1x16x16x8xbf16> to vector<16x16x8xbf16>
    %48 = arith.extf %47 : vector<16x16x8xbf16> to vector<16x16x8xf32>
    %49 = vector.shape_cast %48 : vector<16x16x8xf32> to vector<256x8xf32>
    %50 = arith.truncf %49 : vector<256x8xf32> to vector<256x8xbf16>
    %c5 = arith.constant 5 : index
    %c0_39 = arith.constant 0 : index
    %c0_40 = arith.constant 0 : index
    %51 = vector.load %arg2[%c5, %c0_39, %c0_40] : memref<9x8x4xbf16, #tpu.memory_space<vmem>>, vector<1x8x4xbf16>
    %52 = vector.shape_cast %51 : vector<1x8x4xbf16> to vector<8x4xbf16>
    %cst_41 = arith.constant dense<0.000000e+00> : vector<256x4xf32>
    %53 = tpu.matmul %50, %52, %cst_41 {dimension_numbers = #tpu.dot_dimension_numbers<[1], [0], [0], [1], [0, 0, 1, 1], [], []>} : vector<256x8xbf16>, vector<8x4xbf16>, vector<256x4xf32> -> vector<256x4xf32>
    %54 = arith.addf %45, %53 : vector<256x4xf32>
    %c0_42 = arith.constant 0 : index
    %c2_43 = arith.constant 2 : index
    %c0_44 = arith.constant 0 : index
    %c0_45 = arith.constant 0 : index
    %55 = vector.load %arg1[%c0_42, %c2_43, %c0_44, %c0_45] : memref<1x18x18x8xbf16, #tpu.memory_space<vmem>>, vector<1x16x16x8xbf16>
    %56 = vector.shape_cast %55 : vector<1x16x16x8xbf16> to vector<16x16x8xbf16>
    %57 = arith.extf %56 : vector<16x16x8xbf16> to vector<16x16x8xf32>
    %58 = vector.shape_cast %57 : vector<16x16x8xf32> to vector<256x8xf32>
    %59 = arith.truncf %58 : vector<256x8xf32> to vector<256x8xbf16>
    %c6 = arith.constant 6 : index
    %c0_46 = arith.constant 0 : index
    %c0_47 = arith.constant 0 : index
    %60 = vector.load %arg2[%c6, %c0_46, %c0_47] : memref<9x8x4xbf16, #tpu.memory_space<vmem>>, vector<1x8x4xbf16>
    %61 = vector.shape_cast %60 : vector<1x8x4xbf16> to vector<8x4xbf16>
    %cst_48 = arith.constant dense<0.000000e+00> : vector<256x4xf32>
    %62 = tpu.matmul %59, %61, %cst_48 {dimension_numbers = #tpu.dot_dimension_numbers<[1], [0], [0], [1], [0, 0, 1, 1], [], []>} : vector<256x8xbf16>, vector<8x4xbf16>, vector<256x4xf32> -> vector<256x4xf32>
    %63 = arith.addf %54, %62 : vector<256x4xf32>
    %c0_49 = arith.constant 0 : index
    %c2_50 = arith.constant 2 : index
    %c1_51 = arith.constant 1 : index
    %c0_52 = arith.constant 0 : index
    %64 = vector.load %arg1[%c0_49, %c2_50, %c1_51, %c0_52] : memref<1x18x18x8xbf16, #tpu.memory_space<vmem>>, vector<1x16x16x8xbf16>
    %65 = vector.shape_cast %64 : vector<1x16x16x8xbf16> to vector<16x16x8xbf16>
    %66 = arith.extf %65 : vector<16x16x8xbf16> to vector<16x16x8xf32>
    %67 = vector.shape_cast %66 : vector<16x16x8xf32> to vector<256x8xf32>
    %68 = arith.truncf %67 : vector<256x8xf32> to vector<256x8xbf16>
    %c7 = arith.constant 7 : index
    %c0_53 = arith.constant 0 : index
    %c0_54 = arith.constant 0 : index
    %69 = vector.load %arg2[%c7, %c0_53, %c0_54] : memref<9x8x4xbf16, #tpu.memory_space<vmem>>, vector<1x8x4xbf16>
    %70 = vector.shape_cast %69 : vector<1x8x4xbf16> to vector<8x4xbf16>
    %cst_55 = arith.constant dense<0.000000e+00> : vector<256x4xf32>
    %71 = tpu.matmul %68, %70, %cst_55 {dimension_numbers = #tpu.dot_dimension_numbers<[1], [0], [0], [1], [0, 0, 1, 1], [], []>} : vector<256x8xbf16>, vector<8x4xbf16>, vector<256x4xf32> -> vector<256x4xf32>
    %72 = arith.addf %63, %71 : vector<256x4xf32>
    %c0_56 = arith.constant 0 : index
    %c2_57 = arith.constant 2 : index
    %c2_58 = arith.constant 2 : index
    %c0_59 = arith.constant 0 : index
    %73 = vector.load %arg1[%c0_56, %c2_57, %c2_58, %c0_59] : memref<1x18x18x8xbf16, #tpu.memory_space<vmem>>, vector<1x16x16x8xbf16>
    %74 = vector.shape_cast %73 : vector<1x16x16x8xbf16> to vector<16x16x8xbf16>
    %75 = arith.extf %74 : vector<16x16x8xbf16> to vector<16x16x8xf32>
    %76 = vector.shape_cast %75 : vector<16x16x8xf32> to vector<256x8xf32>
    %77 = arith.truncf %76 : vector<256x8xf32> to vector<256x8xbf16>
    %c8 = arith.constant 8 : index
    %c0_60 = arith.constant 0 : index
    %c0_61 = arith.constant 0 : index
    %78 = vector.load %arg2[%c8, %c0_60, %c0_61] : memref<9x8x4xbf16, #tpu.memory_space<vmem>>, vector<1x8x4xbf16>
    %79 = vector.shape_cast %78 : vector<1x8x4xbf16> to vector<8x4xbf16>
    %cst_62 = arith.constant dense<0.000000e+00> : vector<256x4xf32>
    %80 = tpu.matmul %77, %79, %cst_62 {dimension_numbers = #tpu.dot_dimension_numbers<[1], [0], [0], [1], [0, 0, 1, 1], [], []>} : vector<256x8xbf16>, vector<8x4xbf16>, vector<256x4xf32> -> vector<256x4xf32>
    %81 = arith.addf %72, %80 : vector<256x4xf32>
    %c0_63 = arith.constant 0 : index
    %c0_64 = arith.constant 0 : index
    %82 = vector.load %arg3[%c0_63, %c0_64] : memref<1x4xf32, #tpu.memory_space<vmem>>, vector<1x4xf32>
    %83 = vector.broadcast %82 : vector<1x4xf32> to vector<256x4xf32>
    %84 = arith.addf %81, %83 : vector<256x4xf32>
    %85 = arith.truncf %84 : vector<256x4xf32> to vector<256x4xbf16>
    %c0_65 = arith.constant 0 : index
    %c0_66 = arith.constant 0 : index
    %c0_67 = arith.constant 0 : index
    %86 = vector.load %arg4[%c0_65, %c0_66, %c0_67] : memref<1x256x4xbf16, #tpu.memory_space<vmem>>, vector<1x256x4xbf16>
    %87 = vector.shape_cast %86 : vector<1x256x4xbf16> to vector<256x4xbf16>
    %88 = vector.shape_cast %85 : vector<256x4xbf16> to vector<1x256x4xbf16>
    tpu.vector_store %arg4[%c0_65, %c0_66, %c0_67], %88 {strides = array<i32>} : memref<1x256x4xbf16, #tpu.memory_space<vmem>>, vector<1x256x4xbf16>,
    %cst_68 = arith.constant dense<0.000000e+00> : vector<4xf32>
    %89 = vector.multi_reduction <add>, %84, %cst_68 [0] : vector<256x4xf32> to vector<4xf32>
    %90 = vector.shape_cast %89 : vector<4xf32> to vector<1x4xf32>
    %91 = arith.mulf %84, %84 : vector<256x4xf32>
    %cst_69 = arith.constant dense<0.000000e+00> : vector<4xf32>
    %92 = vector.multi_reduction <add>, %91, %cst_69 [0] : vector<256x4xf32> to vector<4xf32>
    %93 = vector.shape_cast %92 : vector<4xf32> to vector<1x4xf32>
    %94 = tpu.concatenate %90, %93 in 0 : vector<1x4xf32>, vector<1x4xf32> -> vector<2x4xf32>
    %c0_70 = arith.constant 0 : index
    %c0_71 = arith.constant 0 : index
    %c0_72 = arith.constant 0 : index
    %95 = vector.load %arg5[%c0_70, %c0_71, %c0_72] : memref<1x2x4xf32, #tpu.memory_space<vmem>>, vector<1x2x4xf32>
    %96 = vector.shape_cast %95 : vector<1x2x4xf32> to vector<2x4xf32>
    %97 = vector.shape_cast %94 : vector<2x4xf32> to vector<1x2x4xf32>
    tpu.vector_store %arg5[%c0_70, %c0_71, %c0_72], %97 {strides = array<i32>} : memref<1x2x4xf32, #tpu.memory_space<vmem>>, vector<1x2x4xf32>,
    return
  }
  func.func @transform_0(%arg0: i32) -> (i32, i32, i32, i32) {
    %c0_i32 = arith.constant 0 : i32
    %c0_i32_0 = arith.constant 0 : i32
    %c0_i32_1 = arith.constant 0 : i32
    %c0_i32_2 = arith.constant 0 : i32
    return %arg0, %c0_i32, %c0_i32_0, %c0_i32_1 : i32, i32, i32, i32
  }
  func.func @transform_1(%arg0: i32) -> (i32, i32, i32) {
    %c0_i32 = arith.constant 0 : i32
    %c0_i32_0 = arith.constant 0 : i32
    %c0_i32_1 = arith.constant 0 : i32
    %c0_i32_2 = arith.constant 0 : i32
    return %c0_i32, %c0_i32_0, %c0_i32_1 : i32, i32, i32
  }
  func.func @transform_2(%arg0: i32) -> (i32, i32) {
    %c0_i32 = arith.constant 0 : i32
    %c0_i32_0 = arith.constant 0 : i32
    %c0_i32_1 = arith.constant 0 : i32
    return %c0_i32, %c0_i32_0 : i32, i32
  }
  func.func @transform_3(%arg0: i32) -> (i32, i32, i32) {
    %c0_i32 = arith.constant 0 : i32
    %c0_i32_0 = arith.constant 0 : i32
    %c0_i32_1 = arith.constant 0 : i32
    return %arg0, %c0_i32, %c0_i32_0 : i32, i32, i32
  }
  func.func @transform_4(%arg0: i32) -> (i32, i32, i32) {
    %c0_i32 = arith.constant 0 : i32
    %c0_i32_0 = arith.constant 0 : i32
    %c0_i32_1 = arith.constant 0 : i32
    return %arg0, %c0_i32, %c0_i32_0 : i32, i32, i32
  }
}

module attributes {stable_mosaic.version = 11 : i64} {
  func.func @_fcomb_dice_kernel(%arg0: i32, %arg1: i32, %arg2: memref<1x256x4xbf16, #tpu.memory_space<vmem>>, %arg3: memref<1x1x6xbf16, #tpu.memory_space<vmem>>, %arg4: memref<1x1x6xbf16, #tpu.memory_space<vmem>>, %arg5: memref<1x256x1xi32, #tpu.memory_space<vmem>>, %arg6: memref<4x4xbf16, #tpu.memory_space<vmem>>, %arg7: memref<6x4xbf16, #tpu.memory_space<vmem>>, %arg8: memref<1x4xf32, #tpu.memory_space<vmem>>, %arg9: memref<4x4xbf16, #tpu.memory_space<vmem>>, %arg10: memref<1x4xf32, #tpu.memory_space<vmem>>, %arg11: memref<4x3xbf16, #tpu.memory_space<vmem>>, %arg12: memref<1x3xf32, #tpu.memory_space<vmem>>, %arg13: memref<1x256x3xf32, #tpu.memory_space<vmem>>, %arg14: memref<1x1x3x3xf32, #tpu.memory_space<vmem>>) attributes {dimension_semantics = [#tpu.dimension_semantics<parallel>, #tpu.dimension_semantics<parallel>], iteration_bounds = array<i64: 2, 1>, scalar_prefetch = 0 : i64, scratch_operands = 0 : i64, tpu.core_type = #tpu.core_type<tc>, window_params = [{transform_indices = @transform_0, window_bounds = array<i64: 1, 256, 4>}, {transform_indices = @transform_1, window_bounds = array<i64: 1, 1, 6>}, {transform_indices = @transform_2, window_bounds = array<i64: 1, 1, 6>}, {transform_indices = @transform_3, window_bounds = array<i64: 1, 256, 1>}, {pipeline_mode = #tpu.pipeline_mode<synchronous>, transform_indices = @transform_4, window_bounds = array<i64: 4, 4>}, {pipeline_mode = #tpu.pipeline_mode<synchronous>, transform_indices = @transform_5, window_bounds = array<i64: 6, 4>}, {pipeline_mode = #tpu.pipeline_mode<synchronous>, transform_indices = @transform_6, window_bounds = array<i64: 1, 4>}, {pipeline_mode = #tpu.pipeline_mode<synchronous>, transform_indices = @transform_7, window_bounds = array<i64: 4, 4>}, {pipeline_mode = #tpu.pipeline_mode<synchronous>, transform_indices = @transform_8, window_bounds = array<i64: 1, 4>}, {pipeline_mode = #tpu.pipeline_mode<synchronous>, transform_indices = @transform_9, window_bounds = array<i64: 4, 3>}, {pipeline_mode = #tpu.pipeline_mode<synchronous>, transform_indices = @transform_10, window_bounds = array<i64: 1, 3>}, {transform_indices = @transform_11, window_bounds = array<i64: 1, 256, 3>}, {transform_indices = @transform_12, window_bounds = array<i64: 1, 1, 3, 3>}]} {
    %c0 = arith.constant 0 : index
    %c0_0 = arith.constant 0 : index
    %c0_1 = arith.constant 0 : index
    %0 = vector.load %arg2[%c0, %c0_0, %c0_1] : memref<1x256x4xbf16, #tpu.memory_space<vmem>>, vector<1x256x4xbf16>
    %1 = vector.shape_cast %0 : vector<1x256x4xbf16> to vector<256x4xbf16>
    %c0_2 = arith.constant 0 : index
    %c0_3 = arith.constant 0 : index
    %2 = vector.load %arg6[%c0_2, %c0_3] : memref<4x4xbf16, #tpu.memory_space<vmem>>, vector<4x4xbf16>
    %cst = arith.constant dense<0.000000e+00> : vector<256x4xf32>
    %3 = tpu.matmul %1, %2, %cst {dimension_numbers = #tpu.dot_dimension_numbers<[1], [0], [0], [1], [0, 0, 1, 1], [], []>} : vector<256x4xbf16>, vector<4x4xbf16>, vector<256x4xf32> -> vector<256x4xf32>
    %c0_4 = arith.constant 0 : index
    %c0_5 = arith.constant 0 : index
    %c0_6 = arith.constant 0 : index
    %4 = vector.load %arg3[%c0_4, %c0_5, %c0_6] : memref<1x1x6xbf16, #tpu.memory_space<vmem>>, vector<1x1x6xbf16>
    %5 = vector.shape_cast %4 : vector<1x1x6xbf16> to vector<1x6xbf16>
    %c0_7 = arith.constant 0 : index
    %c0_8 = arith.constant 0 : index
    %6 = vector.load %arg7[%c0_7, %c0_8] : memref<6x4xbf16, #tpu.memory_space<vmem>>, vector<6x4xbf16>
    %cst_9 = arith.constant dense<0.000000e+00> : vector<1x4xf32>
    %7 = tpu.matmul %5, %6, %cst_9 {dimension_numbers = #tpu.dot_dimension_numbers<[1], [0], [0], [1], [0, 0, 1, 1], [], []>} : vector<1x6xbf16>, vector<6x4xbf16>, vector<1x4xf32> -> vector<1x4xf32>
    %c0_10 = arith.constant 0 : index
    %c0_11 = arith.constant 0 : index
    %8 = vector.load %arg8[%c0_10, %c0_11] : memref<1x4xf32, #tpu.memory_space<vmem>>, vector<1x4xf32>
    %9 = arith.addf %7, %8 : vector<1x4xf32>
    %10 = vector.broadcast %9 : vector<1x4xf32> to vector<256x4xf32>
    %11 = arith.addf %3, %10 : vector<256x4xf32>
    %cst_12 = arith.constant 0.000000e+00 : f32
    %12 = vector.broadcast %cst_12 : f32 to vector<256x4xf32>
    %13 = arith.maximumf %11, %12 : vector<256x4xf32>
    %14 = arith.truncf %13 : vector<256x4xf32> to vector<256x4xbf16>
    %c0_13 = arith.constant 0 : index
    %c0_14 = arith.constant 0 : index
    %15 = vector.load %arg9[%c0_13, %c0_14] : memref<4x4xbf16, #tpu.memory_space<vmem>>, vector<4x4xbf16>
    %cst_15 = arith.constant dense<0.000000e+00> : vector<256x4xf32>
    %16 = tpu.matmul %14, %15, %cst_15 {dimension_numbers = #tpu.dot_dimension_numbers<[1], [0], [0], [1], [0, 0, 1, 1], [], []>} : vector<256x4xbf16>, vector<4x4xbf16>, vector<256x4xf32> -> vector<256x4xf32>
    %c0_16 = arith.constant 0 : index
    %c0_17 = arith.constant 0 : index
    %17 = vector.load %arg10[%c0_16, %c0_17] : memref<1x4xf32, #tpu.memory_space<vmem>>, vector<1x4xf32>
    %18 = vector.broadcast %17 : vector<1x4xf32> to vector<256x4xf32>
    %19 = arith.addf %16, %18 : vector<256x4xf32>
    %cst_18 = arith.constant 0.000000e+00 : f32
    %20 = vector.broadcast %cst_18 : f32 to vector<256x4xf32>
    %21 = arith.maximumf %19, %20 : vector<256x4xf32>
    %22 = arith.truncf %21 : vector<256x4xf32> to vector<256x4xbf16>
    %c0_19 = arith.constant 0 : index
    %c0_20 = arith.constant 0 : index
    %23 = vector.load %arg11[%c0_19, %c0_20] : memref<4x3xbf16, #tpu.memory_space<vmem>>, vector<4x3xbf16>
    %cst_21 = arith.constant dense<0.000000e+00> : vector<256x3xf32>
    %24 = tpu.matmul %22, %23, %cst_21 {dimension_numbers = #tpu.dot_dimension_numbers<[1], [0], [0], [1], [0, 0, 1, 1], [], []>} : vector<256x4xbf16>, vector<4x3xbf16>, vector<256x3xf32> -> vector<256x3xf32>
    %c0_22 = arith.constant 0 : index
    %c0_23 = arith.constant 0 : index
    %25 = vector.load %arg12[%c0_22, %c0_23] : memref<1x3xf32, #tpu.memory_space<vmem>>, vector<1x3xf32>
    %26 = vector.broadcast %25 : vector<1x3xf32> to vector<256x3xf32>
    %27 = arith.addf %24, %26 : vector<256x3xf32>
    %c0_24 = arith.constant 0 : index
    %c0_25 = arith.constant 0 : index
    %c0_26 = arith.constant 0 : index
    %28 = vector.load %arg13[%c0_24, %c0_25, %c0_26] : memref<1x256x3xf32, #tpu.memory_space<vmem>>, vector<1x256x3xf32>
    %29 = vector.shape_cast %28 : vector<1x256x3xf32> to vector<256x3xf32>
    %30 = vector.shape_cast %27 : vector<256x3xf32> to vector<1x256x3xf32>
    tpu.vector_store %arg13[%c0_24, %c0_25, %c0_26], %30 {strides = array<i32>} : memref<1x256x3xf32, #tpu.memory_space<vmem>>, vector<1x256x3xf32>,
    %c0_27 = arith.constant 0 : index
    %c0_28 = arith.constant 0 : index
    %c0_29 = arith.constant 0 : index
    %31 = vector.load %arg4[%c0_27, %c0_28, %c0_29] : memref<1x1x6xbf16, #tpu.memory_space<vmem>>, vector<1x1x6xbf16>
    %32 = vector.shape_cast %31 : vector<1x1x6xbf16> to vector<1x6xbf16>
    %c0_30 = arith.constant 0 : index
    %c0_31 = arith.constant 0 : index
    %33 = vector.load %arg7[%c0_30, %c0_31] : memref<6x4xbf16, #tpu.memory_space<vmem>>, vector<6x4xbf16>
    %cst_32 = arith.constant dense<0.000000e+00> : vector<1x4xf32>
    %34 = tpu.matmul %32, %33, %cst_32 {dimension_numbers = #tpu.dot_dimension_numbers<[1], [0], [0], [1], [0, 0, 1, 1], [], []>} : vector<1x6xbf16>, vector<6x4xbf16>, vector<1x4xf32> -> vector<1x4xf32>
    %c0_33 = arith.constant 0 : index
    %c0_34 = arith.constant 0 : index
    %35 = vector.load %arg8[%c0_33, %c0_34] : memref<1x4xf32, #tpu.memory_space<vmem>>, vector<1x4xf32>
    %36 = arith.addf %34, %35 : vector<1x4xf32>
    %37 = vector.broadcast %36 : vector<1x4xf32> to vector<256x4xf32>
    %38 = arith.addf %3, %37 : vector<256x4xf32>
    %cst_35 = arith.constant 0.000000e+00 : f32
    %39 = vector.broadcast %cst_35 : f32 to vector<256x4xf32>
    %40 = arith.maximumf %38, %39 : vector<256x4xf32>
    %41 = arith.truncf %40 : vector<256x4xf32> to vector<256x4xbf16>
    %c0_36 = arith.constant 0 : index
    %c0_37 = arith.constant 0 : index
    %42 = vector.load %arg9[%c0_36, %c0_37] : memref<4x4xbf16, #tpu.memory_space<vmem>>, vector<4x4xbf16>
    %cst_38 = arith.constant dense<0.000000e+00> : vector<256x4xf32>
    %43 = tpu.matmul %41, %42, %cst_38 {dimension_numbers = #tpu.dot_dimension_numbers<[1], [0], [0], [1], [0, 0, 1, 1], [], []>} : vector<256x4xbf16>, vector<4x4xbf16>, vector<256x4xf32> -> vector<256x4xf32>
    %c0_39 = arith.constant 0 : index
    %c0_40 = arith.constant 0 : index
    %44 = vector.load %arg10[%c0_39, %c0_40] : memref<1x4xf32, #tpu.memory_space<vmem>>, vector<1x4xf32>
    %45 = vector.broadcast %44 : vector<1x4xf32> to vector<256x4xf32>
    %46 = arith.addf %43, %45 : vector<256x4xf32>
    %cst_41 = arith.constant 0.000000e+00 : f32
    %47 = vector.broadcast %cst_41 : f32 to vector<256x4xf32>
    %48 = arith.maximumf %46, %47 : vector<256x4xf32>
    %49 = arith.truncf %48 : vector<256x4xf32> to vector<256x4xbf16>
    %c0_42 = arith.constant 0 : index
    %c0_43 = arith.constant 0 : index
    %50 = vector.load %arg11[%c0_42, %c0_43] : memref<4x3xbf16, #tpu.memory_space<vmem>>, vector<4x3xbf16>
    %cst_44 = arith.constant dense<0.000000e+00> : vector<256x3xf32>
    %51 = tpu.matmul %49, %50, %cst_44 {dimension_numbers = #tpu.dot_dimension_numbers<[1], [0], [0], [1], [0, 0, 1, 1], [], []>} : vector<256x4xbf16>, vector<4x3xbf16>, vector<256x3xf32> -> vector<256x3xf32>
    %c0_45 = arith.constant 0 : index
    %c0_46 = arith.constant 0 : index
    %52 = vector.load %arg12[%c0_45, %c0_46] : memref<1x3xf32, #tpu.memory_space<vmem>>, vector<1x3xf32>
    %53 = vector.broadcast %52 : vector<1x3xf32> to vector<256x3xf32>
    %54 = arith.addf %51, %53 : vector<256x3xf32>
    %cst_47 = arith.constant dense<0xFF800000> : vector<256xf32>
    %55 = vector.multi_reduction <maximumf>, %54, %cst_47 [1] : vector<256x3xf32> to vector<256xf32>
    %cst_48 = arith.constant 0xFF800000 : f32
    %56 = vector.broadcast %cst_48 : f32 to vector<256xf32>
    %57 = arith.maximumf %56, %55 : vector<256xf32>
    %58 = vector.shape_cast %57 : vector<256xf32> to vector<256x1xf32>
    %59 = vector.broadcast %58 : vector<256x1xf32> to vector<256x3xf32>
    %60 = arith.subf %54, %59 : vector<256x3xf32>
    %61 = math.exp %60 : vector<256x3xf32>
    %cst_49 = arith.constant dense<0.000000e+00> : vector<256xf32>
    %62 = vector.multi_reduction <add>, %61, %cst_49 [1] : vector<256x3xf32> to vector<256xf32>
    %63 = vector.shape_cast %62 : vector<256xf32> to vector<256x1xf32>
    %64 = vector.broadcast %63 : vector<256x1xf32> to vector<256x3xf32>
    %65 = arith.divf %61, %64 : vector<256x3xf32>
    %66 = tpu.iota {dimensions = array<i32: 1>} : vector<256x3xi32>
    %c0_50 = arith.constant 0 : index
    %c0_51 = arith.constant 0 : index
    %c0_52 = arith.constant 0 : index
    %67 = vector.load %arg5[%c0_50, %c0_51, %c0_52] : memref<1x256x1xi32, #tpu.memory_space<vmem>>, vector<1x256x1xi32>
    %68 = vector.shape_cast %67 : vector<1x256x1xi32> to vector<256x1xi32>
    %69 = vector.broadcast %68 : vector<256x1xi32> to vector<256x3xi32>
    %70 = arith.cmpi eq, %66, %69 : vector<256x3xi32>
    %71 = arith.extui %70 : vector<256x3xi1> to vector<256x3xi32>
    %72 = arith.sitofp %71 : vector<256x3xi32> to vector<256x3xf32>
    %73 = arith.mulf %65, %72 : vector<256x3xf32>
    %cst_53 = arith.constant dense<0.000000e+00> : vector<3xf32>
    %74 = vector.multi_reduction <add>, %73, %cst_53 [0] : vector<256x3xf32> to vector<3xf32>
    %75 = vector.shape_cast %74 : vector<3xf32> to vector<1x3xf32>
    %cst_54 = arith.constant dense<0.000000e+00> : vector<3xf32>
    %76 = vector.multi_reduction <add>, %65, %cst_54 [0] : vector<256x3xf32> to vector<3xf32>
    %77 = vector.shape_cast %76 : vector<3xf32> to vector<1x3xf32>
    %cst_55 = arith.constant dense<0.000000e+00> : vector<3xf32>
    %78 = vector.multi_reduction <add>, %72, %cst_55 [0] : vector<256x3xf32> to vector<3xf32>
    %79 = vector.shape_cast %78 : vector<3xf32> to vector<1x3xf32>
    %80 = tpu.concatenate %75, %77, %79 in 0 : vector<1x3xf32>, vector<1x3xf32>, vector<1x3xf32> -> vector<3x3xf32>
    %c0_56 = arith.constant 0 : index
    %c0_57 = arith.constant 0 : index
    %c0_58 = arith.constant 0 : index
    %c0_59 = arith.constant 0 : index
    %81 = vector.load %arg14[%c0_56, %c0_57, %c0_58, %c0_59] : memref<1x1x3x3xf32, #tpu.memory_space<vmem>>, vector<1x1x3x3xf32>
    %82 = vector.shape_cast %81 : vector<1x1x3x3xf32> to vector<3x3xf32>
    %83 = vector.shape_cast %80 : vector<3x3xf32> to vector<1x1x3x3xf32>
    tpu.vector_store %arg14[%c0_56, %c0_57, %c0_58, %c0_59], %83 {strides = array<i32>} : memref<1x1x3x3xf32, #tpu.memory_space<vmem>>, vector<1x1x3x3xf32>,
    return
  }
  func.func @transform_0(%arg0: i32, %arg1: i32) -> (i32, i32, i32) {
    %c0_i32 = arith.constant 0 : i32
    %c0_i32_0 = arith.constant 0 : i32
    return %arg0, %arg1, %c0_i32 : i32, i32, i32
  }
  func.func @transform_1(%arg0: i32, %arg1: i32) -> (i32, i32, i32) {
    %c0_i32 = arith.constant 0 : i32
    %c0_i32_0 = arith.constant 0 : i32
    %c0_i32_1 = arith.constant 0 : i32
    return %arg0, %c0_i32, %c0_i32_0 : i32, i32, i32
  }
  func.func @transform_2(%arg0: i32, %arg1: i32) -> (i32, i32, i32) {
    %c0_i32 = arith.constant 0 : i32
    %c0_i32_0 = arith.constant 0 : i32
    %c0_i32_1 = arith.constant 0 : i32
    return %arg0, %c0_i32, %c0_i32_0 : i32, i32, i32
  }
  func.func @transform_3(%arg0: i32, %arg1: i32) -> (i32, i32, i32) {
    %c0_i32 = arith.constant 0 : i32
    %c0_i32_0 = arith.constant 0 : i32
    return %arg0, %arg1, %c0_i32 : i32, i32, i32
  }
  func.func @transform_4(%arg0: i32, %arg1: i32) -> (i32, i32) {
    %c0_i32 = arith.constant 0 : i32
    %c0_i32_0 = arith.constant 0 : i32
    %c0_i32_1 = arith.constant 0 : i32
    return %c0_i32, %c0_i32_0 : i32, i32
  }
  func.func @transform_5(%arg0: i32, %arg1: i32) -> (i32, i32) {
    %c0_i32 = arith.constant 0 : i32
    %c0_i32_0 = arith.constant 0 : i32
    %c0_i32_1 = arith.constant 0 : i32
    return %c0_i32, %c0_i32_0 : i32, i32
  }
  func.func @transform_6(%arg0: i32, %arg1: i32) -> (i32, i32) {
    %c0_i32 = arith.constant 0 : i32
    %c0_i32_0 = arith.constant 0 : i32
    %c0_i32_1 = arith.constant 0 : i32
    return %c0_i32, %c0_i32_0 : i32, i32
  }
  func.func @transform_7(%arg0: i32, %arg1: i32) -> (i32, i32) {
    %c0_i32 = arith.constant 0 : i32
    %c0_i32_0 = arith.constant 0 : i32
    %c0_i32_1 = arith.constant 0 : i32
    return %c0_i32, %c0_i32_0 : i32, i32
  }
  func.func @transform_8(%arg0: i32, %arg1: i32) -> (i32, i32) {
    %c0_i32 = arith.constant 0 : i32
    %c0_i32_0 = arith.constant 0 : i32
    %c0_i32_1 = arith.constant 0 : i32
    return %c0_i32, %c0_i32_0 : i32, i32
  }
  func.func @transform_9(%arg0: i32, %arg1: i32) -> (i32, i32) {
    %c0_i32 = arith.constant 0 : i32
    %c0_i32_0 = arith.constant 0 : i32
    %c0_i32_1 = arith.constant 0 : i32
    return %c0_i32, %c0_i32_0 : i32, i32
  }
  func.func @transform_10(%arg0: i32, %arg1: i32) -> (i32, i32) {
    %c0_i32 = arith.constant 0 : i32
    %c0_i32_0 = arith.constant 0 : i32
    %c0_i32_1 = arith.constant 0 : i32
    return %c0_i32, %c0_i32_0 : i32, i32
  }
  func.func @transform_11(%arg0: i32, %arg1: i32) -> (i32, i32, i32) {
    %c0_i32 = arith.constant 0 : i32
    %c0_i32_0 = arith.constant 0 : i32
    return %arg0, %arg1, %c0_i32 : i32, i32, i32
  }
  func.func @transform_12(%arg0: i32, %arg1: i32) -> (i32, i32, i32, i32) {
    %c0_i32 = arith.constant 0 : i32
    %c0_i32_0 = arith.constant 0 : i32
    %c0_i32_1 = arith.constant 0 : i32
    return %arg0, %arg1, %c0_i32, %c0_i32_0 : i32, i32, i32, i32
  }
}

</mosaic_0001>

<bundles_post_ra>
// kernel: probabilistic_unet_forward.23
= control target key start
LH: loop header
LB: loop body
LE: loop exit
PB: predicated region body
PF: predicated region fallthrough
CT: control target
= control target key end

     0   :  { %s407_s12 = smov 0   ;;  %s445_s0 = inlined_call_operand.vmem [shape: bf16[2,64,8], index: 0, kind: input, shape index: {}]   ;;  %s446_s1 = inlined_call_operand.vmem [shape: f32[1,8], index: 1, kind: input, shape index: {}]   ;;  %s447_s2 = inlined_call_operand.vmem [shape: f32[1,8], index: 2, kind: input, shape index: {}]   ;;  %s448_s3 = inlined_call_operand.vmem [shape: bf16[2,64,8], index: 3, kind: output, shape index: {}]  }
   0x1 LB: > { %s321_s13 = sadd.s32 4294967295, %s385_s12   ;;  %p325_p0 = scmp.ge.s32.totalorder %s385_s12, 1  ;;  %s385_s12 = sphi %s407_s12, %s13_s12  }
   0x2   : > { %p137_p1 = scmp.lt.s32.totalorder %s385_s12, 3 }
   0x4   : > { %p138_p2 = pnand %p325_p0, %p137_p1 }
   0x5   : > { %p161_p3 = scmp.lt.s32.totalorder (!%p138_p2), %s321_s13, 1 }
   0x6   : > { %141 = sbr.rel (%p138_p2) target bundleno = 29 (0x1d), region = 32 }
   0xb   : > { %s450_s13 = smov (!%p161_p3, %s321_s13), 1  ;;  %v330_v0 = vld [vmem:[%s446_s1] ss:$0 sm:$0xff]  ;;  %vm257_vm0 = vcmask 60416  }
   0xc   : > { %s342_s14 = sshll.u32 %s450_s13, 5  ;;  %v331_v9 = vld [vmem:[%s447_s2] ss:$0 sm:$0xff] }
   0xd   : > { %s165_s17 = scalar_lea.vmem %s445_s0, %s342_s14  ;;  %s170_s24 = scalar_lea.vmem %s448_s3, %s342_s14 }
   0xe   : > { %v353_v1 = vld [vmem:[%s165_s17] sm:$0xff]   ;;  %v368_v2 = vld [vmem:[%s165_s17 + $0x8] sm:$0xff]   ;;  %v369_v3 = vld [vmem:[%s165_s17 + $0x10] sm:$0xff]  }
   0xf   : > { %v354_v4 = vunpack.c.l.bf16 %v353_v1  ;;  %v355_v5 = vunpack.c.h.bf16 %v353_v1  ;;  %v358_v6 = vunpack.c.l.bf16 %v368_v2  ;;  %v359_v7 = vunpack.c.h.bf16 %v368_v2  ;;  %v370_v8 = vld [vmem:[%s165_s17 + $0x18] sm:$0xff]  }
  0x10   : > { %v362_v10 = vunpack.c.l.bf16 %v369_v3  ;;  %v363_v11 = vunpack.c.h.bf16 %v369_v3  ;;  %v366_v12 = vunpack.c.l.bf16 %v370_v8  ;;  %v367_v13 = vunpack.c.h.bf16 %v370_v8 }
  0x11   : > { %v194_v14 = vmul.f32 %v354_v4, %v330_v0  ;;  %v195_v15 = vmul.f32 %v355_v5, %v330_v0  ;;  %v196_v16 = vmul.f32 %v358_v6, %v330_v0  ;;  %v197_v17 = vmul.f32 %v359_v7, %v330_v0 }
  0x12   : > { %v198_v18 = vmul.f32 %v362_v10, %v330_v0  ;;  %v199_v19 = vmul.f32 %v363_v11, %v330_v0  ;;  %v200_v20 = vmul.f32 %v366_v12, %v330_v0  ;;  %v201_v21 = vmul.f32 %v367_v13, %v330_v0 }
  0x13   : > { %v209_v22 = vadd.f32 %v331_v9, %v194_v14  ;;  %v210_v23 = vadd.f32 %v331_v9, %v195_v15  ;;  %v211_v24 = vadd.f32 %v331_v9, %v196_v16  ;;  %v212_v25 = vadd.f32 %v331_v9, %v197_v17 }
  0x14   : > { %v213_v26 = vadd.f32 %v331_v9, %v198_v18  ;;  %v214_v27 = vadd.f32 %v331_v9, %v199_v19  ;;  %v215_v28 = vadd.f32 %v331_v9, %v200_v20  ;;  %v216_v29 = vadd.f32 %v331_v9, %v201_v21 }
  0x15   : > { %v217_v30 = vmax.f32 %v209_v22, 0.0  ;;  %v218_v31 = vmax.f32 %v210_v23, 0.0  ;;  %v219_v32 = vmax.f32 %v211_v24, 0.0  ;;  %v220_v33 = vmax.f32 %v212_v25, 0.0 }
  0x16   : > { %v221_v34 = vmax.f32 %v213_v26, 0.0  ;;  %v222_v35 = vmax.f32 %v214_v27, 0.0  ;;  %v223_v36 = vmax.f32 %v215_v28, 0.0  ;;  %v224_v37 = vmax.f32 %v216_v29, 0.0 }
  0x17   : > { %v344_v38 = vpack.c.bf16 %v217_v30, %v217_v30  ;;  %v345_v39 = vpack.c.bf16 %v218_v31, %v218_v31  ;;  %v346_v40 = vpack.c.bf16 %v219_v32, %v219_v32  ;;  %v347_v41 = vpack.c.bf16 %v220_v33, %v220_v33 }
  0x18   : > { %v348_v42 = vpack.c.bf16 %v221_v34, %v221_v34  ;;  %v349_v43 = vpack.c.bf16 %v222_v35, %v222_v35  ;;  %v350_v44 = vpack.c.bf16 %v223_v36, %v223_v36  ;;  %v351_v45 = vpack.c.bf16 %v224_v37, %v224_v37 }
  0x19   : > { %258 = vst.msk [vmem:[%s170_s24] sm:$0xf] %vm257_vm0, %v344_v38  ;;  %259 = vst.msk [vmem:[%s170_s24 + $0x4] sm:$0xf] %vm257_vm0, %v345_v39 }
  0x1a   : > { %260 = vst.msk [vmem:[%s170_s24 + $0x8] sm:$0xf] %vm257_vm0, %v346_v40  ;;  %261 = vst.msk [vmem:[%s170_s24 + $0xc] sm:$0xf] %vm257_vm0, %v347_v41 }
  0x1b   : > { %262 = vst.msk [vmem:[%s170_s24 + $0x10] sm:$0xf] %vm257_vm0, %v348_v42  ;;  %263 = vst.msk [vmem:[%s170_s24 + $0x14] sm:$0xf] %vm257_vm0, %v349_v43 }
  0x1c   : > { %264 = vst.msk [vmem:[%s170_s24 + $0x18] sm:$0xf] %vm257_vm0, %v350_v44  ;;  %265 = vst.msk [vmem:[%s170_s24 + $0x1c] sm:$0xf] %vm257_vm0, %v351_v45 }
  0x1d PF: > { %s13_s12 = sadd.s32 1, %s385_s12  }
  0x1e   : > { %p10_p4 = scmp.ge.s32.totalorder %s13_s12, 4  }
  0x20   :  { %12 = sbr.rel (!%p10_p4) target bundleno = 1 (0x1), region = 62 }

// kernel: probabilistic_unet_forward.22
= control target key start
LH: loop header
LB: loop body
LE: loop exit
PB: predicated region body
PF: predicated region fallthrough
CT: control target
= control target key end

     0   :  { %s993_s15 = smov 0   ;;  %s1113_s0 = inlined_call_operand.vmem [shape: f32[2,9,9,16], index: 0, kind: input, shape index: {}]   ;;  %s1114_s1 = inlined_call_operand.vmem [shape: bf16[4,16,8], index: 1, kind: input, shape index: {}]   ;;  %s1115_s2 = inlined_call_operand.vmem [shape: f32[1,8], index: 2, kind: input, shape index: {}]   ;;  %s1116_s3 = inlined_call_operand.vmem [shape: bf16[2,64,8], index: 3, kind: output, shape index: {0}]   ;;  %s1117_s4 = inlined_call_operand.vmem [shape: f32[2,2,8], index: 4, kind: output, shape index: {1}]  }
   0x1 LB: > { %s816_s16 = sadd.s32 4294967295, %s966_s15   ;;  %p820_p0 = scmp.ge.s32.totalorder %s966_s15, 1  ;;  %s966_s15 = sphi %s993_s15, %s15_s15  }
   0x2   : > { %p165_p1 = scmp.lt.s32.totalorder %s966_s15, 3 }
   0x4   : > { %p166_p2 = pnand %p820_p0, %p165_p1 }
   0x5   : > { %p195_p3 = scmp.lt.s32.totalorder (!%p166_p2), %s816_s16, 1 }
   0x6   : > { %169 = sbr.rel (%p166_p2) target bundleno = 273 (0x111), region = 32 }
   0xb   : > { %v956_v0 = vld [vmem:[%s1114_s1 + $0x8] sm:$0xff]   ;;  %v957_v1 = vld [vmem:[%s1114_s1] sm:$0xff]   ;;  %s1119_s16 = smov (!%p195_p3, %s816_s16), 1  ;;  %v958_v2 = vld [vmem:[%s1114_s1 + $0x10] sm:$0xff]   ;;  %vm245_vm0 = vcmask 130048   ;;  %vm666_vm1 = vcmask 60416  }
   0xc   : > { %907 = vmatprep.subr.bf16.mxu0 %v956_v0  ;;  %917 = vmatprep.subr.bf16.mxu1 %v957_v1  ;;  %v959_v3 = vld [vmem:[%s1114_s1 + $0x18] sm:$0xff]   ;;  %s947_s25 = smul.u32 144, %s1119_s16  ;;  %v1058_v59 = vld [vmem:[%s1115_s2] ss:$0 sm:$0xff]  ;;  %s878_s5 = sshll.u32 %s1119_s16, 5  ;;  %vm675_vm2 = vcmask 64512  }
   0xd   : > { %908 = vmatpush3.bf16.msra.mxu0 %v956_v0  ;;  %918 = vmatpush3.bf16.msra.mxu1 %v957_v1  ;;  %s1065_s8 = scalar_lea.vmem %s1116_s3, %s878_s5  ;;  %s824_s9 = sshll.u32 %s1119_s16, 1  ;;  %vm726_vm3 = vcmask 1040384   ;;  %vm728_vm4 = vcmask 58368  }
   0xe   : > { %927 = vmatprep.subr.bf16.mxu0 %v958_v2  ;;  %937 = vmatprep.subr.bf16.mxu1 %v959_v3  ;;  %s1019_s28 = scalar_lea.vmem %s1113_s0, %s947_s25  ;;  %s208_s12 = scalar_lea.vmem %s1117_s4, %s824_s9 }
   0xf   : > { %v224_v4 = vld [vmem:[%s1019_s28 + $0x1] sm:$0xff]  ;;  %v225_v5 = vld [vmem:[%s1019_s28 + $0x11] sm:$0xff] }
  0x10   : > { %v210_v6 = vld [vmem:[%s1019_s28] sm:$0xff]  ;;  %v232_v7 = vpack.c.bf16 %v225_v5, %v224_v4  ;;  %v211_v8 = vld [vmem:[%s1019_s28 + $0x10] sm:$0xff] }
  0x11   : > { %v226_v9 = vld [vmem:[%s1019_s28 + $0x21] sm:$0xff]  ;;  %v227_v10 = vld [vmem:[%s1019_s28 + $0x31] sm:$0xff]  ;;  %v218_v11 = vpack.c.bf16 %v211_v8, %v210_v6 }
  0x12   : > { %v233_v12 = vpack.c.bf16 %v227_v10, %v226_v9  ;;  %v212_v13 = vld [vmem:[%s1019_s28 + $0x20] sm:$0xff]  ;;  %v213_v14 = vld [vmem:[%s1019_s28 + $0x30] sm:$0xff]  ;;  %909 = vmatprep.mubr.msk.bf16.mxu0 %vm245_vm0, %v232_v7  ;;  %v521_v29 = vpack.c.bf16 %v226_v9, %v225_v5 }
  0x13   : > { %v228_v15 = vld [vmem:[%s1019_s28 + $0x41] sm:$0xff]  ;;  %v219_v16 = vpack.c.bf16 %v213_v14, %v212_v13  ;;  %v229_v17 = vld [vmem:[%s1019_s28 + $0x51] sm:$0xff]  ;;  %919 = vmatprep.mubr.msk.bf16.mxu1 %vm245_vm0, %v218_v11  ;;  %v415_v28 = vpack.c.bf16 %v212_v13, %v211_v8 }
  0x14   : > { %v214_v18 = vld [vmem:[%s1019_s28 + $0x40] sm:$0xff]  ;;  %v215_v19 = vld [vmem:[%s1019_s28 + $0x50] sm:$0xff]  ;;  %910 = vmatmul.mubr.msk.bf16.vlgmr.msra.gmra.mxu0 %vm245_vm0, %v233_v12  ;;  %v234_v20 = vpack.c.bf16 %v229_v17, %v228_v15  ;;  %v522_v31 = vpack.c.bf16 %v228_v15, %v227_v10 }
  0x15   : > { %v220_v21 = vpack.c.bf16 %v215_v19, %v214_v18  ;;  %920 = vmatmul.mubr.msk.bf16.vlgmr.msra.gmra.mxu1 %vm245_vm0, %v219_v16  ;;  %928 = vmatpush3.bf16.msra.mxu0 %v958_v2  ;;  %v230_v22 = vld [vmem:[%s1019_s28 + $0x61] sm:$0xff]  ;;  %v231_v23 = vld [vmem:[%s1019_s28 + $0x71] sm:$0xff]  ;;  %v416_v30 = vpack.c.bf16 %v214_v18, %v213_v14 }
  0x16   : > { %938 = vmatpush3.bf16.msra.mxu1 %v959_v3  ;;  %913 = vmatprep.mubr.msk.bf16.mxu0 %vm245_vm0, %v234_v20  ;;  %v216_v24 = vld [vmem:[%s1019_s28 + $0x60] sm:$0xff]  ;;  %v217_v25 = vld [vmem:[%s1019_s28 + $0x70] sm:$0xff]  ;;  %v235_v26 = vpack.c.bf16 %v231_v23, %v230_v22  ;;  %v523_v33 = vpack.c.bf16 %v230_v22, %v229_v17 }
  0x17   : > { %923 = vmatprep.mubr.msk.bf16.mxu1 %vm245_vm0, %v220_v21  ;;  %v221_v27 = vpack.c.bf16 %v217_v25, %v216_v24  ;;  %v417_v32 = vpack.c.bf16 %v216_v24, %v215_v19  ;;  %v844_v34 = vld [vmem:[%s1019_s28 + $0x80] sm:$0xff] }
  0x18   : > { %v859_v35 = vld [vmem:[%s1019_s28 + $0x81] sm:$0xff]  ;;  %v418_v36 = vpack.c.bf16 %v844_v34, %v217_v25 }
  0x19   : > { %v524_v37 = vpack.c.bf16 %v859_v35, %v231_v23 }
  0x1c   : > { %914 = vmatmul.mubr.msk.bf16.gmra.mxu0 %vm245_vm0, %v235_v26 }
  0x1d   : > { %924 = vmatmul.mubr.msk.bf16.gmra.mxu1 %vm245_vm0, %v221_v27  ;;  %929 = vmatprep.mubr.msk.bf16.mxu0 %vm245_vm0, %v415_v28 }
  0x1e   : > { %939 = vmatprep.mubr.msk.bf16.mxu1 %vm245_vm0, %v521_v29 }
  0x24   : > { %930 = vmatmul.mubr.msk.bf16.vlgmr.msra.gmra.mxu0 %vm245_vm0, %v416_v30 }
  0x25   : > { %940 = vmatmul.mubr.msk.bf16.vlgmr.msra.gmra.mxu1 %vm245_vm0, %v522_v31  ;;  %933 = vmatprep.mubr.msk.bf16.mxu0 %vm245_vm0, %v417_v32 }
  0x26   : > { %943 = vmatprep.mubr.msk.bf16.mxu1 %vm245_vm0, %v523_v33 }
  0x2c   : > { %934 = vmatmul.mubr.msk.bf16.gmra.mxu0 %vm245_vm0, %v418_v36 }
  0x2d   : > { %944 = vmatmul.mubr.msk.bf16.gmra.mxu1 %vm245_vm0, %v524_v37 }
  0xd4   : > { %v911_v38 = vpop.f32.mrf.mxu0 }
  0xd5   : > { %v921_v39 = vpop.f32.mrf.mxu1 }
  0xd6   : > { %v292_v40 = vpop.f32.mrf.mxu0  ;;  %v384_v53 = vadd.f32 %v921_v39, %v911_v38 }
  0xd7   : > { %v375_v41 = vpop.f32.mrf.mxu1 }
  0xd8   : > { %v912_v42 = vpop.f32.mrf.mxu0  ;;  %v376_v56 = vadd.f32 %v375_v41, %v292_v40 }
  0xd9   : > { %v922_v43 = vpop.f32.mrf.mxu1 }
  0xda   : > { %v295_v44 = vpop.f32.mrf.mxu0  ;;  %v387_v61 = vadd.f32 %v922_v43, %v912_v42 }
  0xdb   : > { %v378_v45 = vpop.f32.mrf.mxu1 }
  0xdc   : > { %v915_v46 = vpop.f32.mrf.mxu0  ;;  %v379_v6 = vadd.f32 %v378_v45, %v295_v44 }
  0xdd   : > { %v925_v47 = vpop.f32.mrf.mxu1 }
  0xde   : > { %v308_v48 = vpop.f32.mrf.mxu0  ;;  %v400_v11 = vadd.f32 %v925_v47, %v915_v46 }
  0xdf   : > { %v391_v49 = vpop.f32.mrf.mxu1 }
  0xe0   : > { %v916_v50 = vpop.f32.mrf.mxu0  ;;  %v392_v15 = vadd.f32 %v391_v49, %v308_v48 }
  0xe1   : > { %v926_v51 = vpop.f32.mrf.mxu1 }
  0xe2   : > { %v311_v52 = vpop.f32.mrf.mxu0  ;;  %v403_v22 = vadd.f32 %v926_v51, %v916_v50 }
  0xe3   : > { %v394_v54 = vpop.f32.mrf.mxu1 }
  0xe4   : > { %v931_v55 = vpop.f32.mrf.mxu0  ;;  %v395_v23 = vadd.f32 %v394_v54, %v311_v52 }
  0xe5   : > { %v507_v57 = vadd.f32 %v931_v55, %v384_v53  ;;  %v941_v58 = vpop.f32.mrf.mxu1 }
  0xe6   : > { %v474_v60 = vpop.f32.mrf.mxu0 }
  0xe7   : > { %v613_v62 = vadd.f32 %v941_v58, %v507_v57  ;;  %v505_v63 = vadd.f32 %v474_v60, %v376_v56  ;;  %v580_v0 = vpop.f32.mrf.mxu1 }
  0xe8   : > { %v932_v1 = vpop.f32.mrf.mxu0 }
  0xe9   : > { %v628_v2 = vadd.f32 %v1058_v59, %v613_v62  ;;  %v611_v3 = vadd.f32 %v580_v0, %v505_v63  ;;  %v508_v4 = vadd.f32 %v932_v1, %v387_v61  ;;  %v942_v5 = vpop.f32.mrf.mxu1 }
  0xea   : > { %v477_v7 = vpop.f32.mrf.mxu0 }
  0xeb   : > { %v881_v8 = vpack.c.bf16 %v628_v2, %v628_v2  ;;  %v626_v9 = vadd.f32 %v1058_v59, %v611_v3  ;;  %v583_v10 = vpop.f32.mrf.mxu1  ;;  %v614_v12 = vadd.f32 %v942_v5, %v508_v4  ;;  %v506_v13 = vadd.f32 %v477_v7, %v379_v6 }
  0xec   : > { %v935_v14 = vpop.f32.mrf.mxu0  ;;  %v679_v26 = vsel %vm675_vm2, %v628_v2, 0.0  ;;  %v699_v31 = vmul.f32 %v628_v2, %v628_v2 }
  0xed   : > { %669 = vst.msk [vmem:[%s1065_s8 + $0x8] sm:$0xf] %vm666_vm1, %v881_v8  ;;  %v879_v16 = vpack.c.bf16 %v626_v9, %v626_v9  ;;  %v945_v17 = vpop.f32.mrf.mxu1  ;;  %v629_v18 = vadd.f32 %v1058_v59, %v614_v12  ;;  %v612_v19 = vadd.f32 %v583_v10, %v506_v13  ;;  %v511_v20 = vadd.f32 %v935_v14, %v400_v11 }
  0xee   : > { %v490_v21 = vpop.f32.mrf.mxu0  ;;  %v697_v27 = vmul.f32 %v626_v9, %v626_v9  ;;  %v676_v35 = vsel %vm675_vm2, %v626_v9, 0.0  ;;  %v708_v52 = vsel %vm675_vm2, %v699_v31, 0.0 }
  0xef   : > { %667 = vst.msk [vmem:[%s1065_s8] sm:$0xf] %vm666_vm1, %v879_v16  ;;  %v509_v24 = vadd.f32 %v490_v21, %v392_v15  ;;  %v596_v25 = vpop.f32.mrf.mxu1  ;;  %v882_v28 = vpack.c.bf16 %v629_v18, %v629_v18  ;;  %v627_v29 = vadd.f32 %v1058_v59, %v612_v19  ;;  %v617_v32 = vadd.f32 %v945_v17, %v511_v20 }
  0xf0   : > { %v936_v30 = vpop.f32.mrf.mxu0  ;;  %v705_v45 = vsel %vm675_vm2, %v697_v27, 0.0  ;;  %v700_v46 = vmul.f32 %v629_v18, %v629_v18  ;;  %v681_v53 = vsel %vm675_vm2, %v629_v18, 0.0 }
  0xf1   : > { %v615_v33 = vadd.f32 %v596_v25, %v509_v24  ;;  %v512_v34 = vadd.f32 %v936_v30, %v403_v22  ;;  %670 = vst.msk [vmem:[%s1065_s8 + $0xc] sm:$0xf] %vm666_vm1, %v882_v28  ;;  %v880_v36 = vpack.c.bf16 %v627_v29, %v627_v29  ;;  %v677_v37 = vsel %vm675_vm2, %v627_v29, 0.0  ;;  %v946_v39 = vpop.f32.mrf.mxu1 }
  0xf2   : > { %v698_v38 = vmul.f32 %v627_v29, %v627_v29  ;;  %v493_v40 = vpop.f32.mrf.mxu0  ;;  %v678_v41 = vadd.f32 %v677_v37, %v676_v35  ;;  %v632_v42 = vadd.f32 %v1058_v59, %v617_v32  ;;  %v710_v62 = vsel %vm675_vm2, %v700_v46, 0.0 }
  0xf3   : > { %v630_v43 = vadd.f32 %v1058_v59, %v615_v33  ;;  %v618_v44 = vadd.f32 %v946_v39, %v512_v34  ;;  %668 = vst.msk [vmem:[%s1065_s8 + $0x4] sm:$0xf] %vm666_vm1, %v880_v36  ;;  %v510_v48 = vadd.f32 %v493_v40, %v395_v23  ;;  %v599_v56 = vpop.f32.mrf.mxu1 }
  0xf4   : > { %v706_v47 = vsel %vm675_vm2, %v698_v38, 0.0  ;;  %v680_v49 = vadd.f32 %v679_v26, %v678_v41  ;;  %v885_v51 = vpack.c.bf16 %v632_v42, %v632_v42  ;;  %v703_v6 = vmul.f32 %v632_v42, %v632_v42 }
  0xf5   : > { %v707_v50 = vadd.f32 %v706_v47, %v705_v45  ;;  %v883_v54 = vpack.c.bf16 %v630_v43, %v630_v43  ;;  %v701_v55 = vmul.f32 %v630_v43, %v630_v43  ;;  %v633_v60 = vadd.f32 %v1058_v59, %v618_v44 }
  0xf6   : > { %673 = vst.msk [vmem:[%s1065_s8 + $0x18] sm:$0xf] %vm666_vm1, %v885_v51  ;;  %v682_v58 = vadd.f32 %v681_v53, %v680_v49  ;;  %v616_v61 = vadd.f32 %v599_v56, %v510_v48  ;;  %v683_v63 = vsel %vm675_vm2, %v630_v43, 0.0  ;;  %v687_v11 = vsel %vm675_vm2, %v632_v42, 0.0 }
  0xf7   : > { %v709_v57 = vadd.f32 %v708_v52, %v707_v50  ;;  %671 = vst.msk [vmem:[%s1065_s8 + $0x10] sm:$0xf] %vm666_vm1, %v883_v54  ;;  %v886_v2 = vpack.c.bf16 %v633_v60, %v633_v60  ;;  %v712_v3 = vsel %vm675_vm2, %v701_v55, 0.0  ;;  %v704_v12 = vmul.f32 %v633_v60, %v633_v60 }
  0xf8   : > { %v684_v0 = vadd.f32 %v683_v63, %v682_v58  ;;  %v631_v4 = vadd.f32 %v1058_v59, %v616_v61  ;;  %v716_v59 = vsel %vm675_vm2, %v703_v6, 0.0  ;;  %v689_v16 = vsel %vm675_vm2, %v633_v60, 0.0 }
  0xf9   : > { %v711_v1 = vadd.f32 %v710_v62, %v709_v57  ;;  %674 = vst.msk [vmem:[%s1065_s8 + $0x1c] sm:$0xf] %vm666_vm1, %v886_v2  ;;  %v718_v19 = vsel %vm675_vm2, %v704_v12, 0.0 }
  0xfa   : > { %v884_v7 = vpack.c.bf16 %v631_v4, %v631_v4  ;;  %v685_v8 = vsel %vm675_vm2, %v631_v4, 0.0  ;;  %v702_v9 = vmul.f32 %v631_v4, %v631_v4 }
  0xfb   : > { %v713_v5 = vadd.f32 %v712_v3, %v711_v1  ;;  %v686_v10 = vadd.f32 %v685_v8, %v684_v0 }
  0xfc   : > { %672 = vst.msk [vmem:[%s1065_s8 + $0x14] sm:$0xf] %vm666_vm1, %v884_v7  ;;  %v714_v13 = vsel %vm675_vm2, %v702_v9, 0.0 }
  0xfd   : > { %v688_v14 = vadd.f32 %v687_v11, %v686_v10  ;;  %v715_v15 = vadd.f32 %v714_v13, %v713_v5 }
  0xff   : > { %v690_v17 = vadd.f32 %v689_v16, %v688_v14  ;;  %v717_v18 = vadd.f32 %v716_v59, %v715_v15 }
 0x101   : > { %v691_v20 = vrot.slane %v690_v17, 4  ;;  %v719_v21 = vadd.f32 %v718_v19, %v717_v18 }
 0x103   : > { %v692_v22 = vadd.f32 %v691_v20, %v690_v17  ;;  %v720_v23 = vrot.slane %v719_v21, 4 }
 0x105   : > { %v693_v24 = vrot.slane %v692_v22, 2  ;;  %v721_v25 = vadd.f32 %v720_v23, %v719_v21 }
 0x107   : > { %v694_v26 = vadd.f32 %v693_v24, %v692_v22  ;;  %v722_v27 = vrot.slane %v721_v25, 2 }
 0x109   : > { %v695_v28 = vrot.slane %v694_v26, 1  ;;  %v723_v29 = vadd.f32 %v722_v27, %v721_v25 }
 0x10b   : > { %v724_v30 = vrot.slane %v723_v29, 1  ;;  %v696_v31 = vadd.f32 %v695_v28, %v694_v26 }
 0x10d   : > { %v725_v32 = vadd.f32 %v724_v30, %v723_v29 }
 0x10f   : > { %v727_v33 = vsel %vm726_vm3, %v696_v31, %v725_v32 }
 0x110   : > { %729 = vst.msk [vmem:[%s208_s12] sm:$0x3] %vm728_vm4, %v727_v33 }
 0x111 PF: > { %s15_s15 = sadd.s32 1, %s966_s15  }
 0x112   : > { %p12_p4 = scmp.ge.s32.totalorder %s15_s15, 4  }
 0x114   :  { %14 = sbr.rel (!%p12_p4) target bundleno = 1 (0x1), region = 78 }

// kernel: probabilistic_unet_forward.24
= control target key start
LH: loop header
LB: loop body
LE: loop exit
PB: predicated region body
PF: predicated region fallthrough
CT: control target
= control target key end

     0   :  { %s563_s15 = smov 0   ;;  %s614_s0 = inlined_call_operand.vmem [shape: bf16[2,16,128], index: 0, kind: input, shape index: {}]   ;;  %s615_s1 = inlined_call_operand.vmem [shape: bf16[1,128,16], index: 1, kind: input, shape index: {}]   ;;  %s616_s2 = inlined_call_operand.vmem [shape: f32[1,16], index: 2, kind: input, shape index: {}]   ;;  %s617_s3 = inlined_call_operand.vmem [shape: bf16[2,16,16], index: 3, kind: output, shape index: {0}]   ;;  %s618_s4 = inlined_call_operand.vmem [shape: f32[2,2,16], index: 4, kind: output, shape index: {1}]  }
   0x1 LB: > { %s452_s16 = sadd.s32 4294967295, %s534_s15   ;;  %p456_p0 = scmp.ge.s32.totalorder %s534_s15, 1  ;;  %s534_s15 = sphi %s563_s15, %s15_s15  }
   0x2   : > { %p165_p1 = scmp.lt.s32.totalorder %s534_s15, 3 }
   0x4   : > { %p166_p2 = pnand %p456_p0, %p165_p1 }
   0x5   : > { %p195_p3 = scmp.lt.s32.totalorder (!%p166_p2), %s452_s16, 1 }
   0x6   : > { %169 = sbr.rel (%p166_p2) target bundleno = 262 (0x106), region = 32 }
   0xb   : > { %v519_v0 = vld [vmem:[%s615_s1 + $0x38] sm:$0xff]   ;;  %v536_v1 = vmov 0.0   ;;  %v520_v2 = vld [vmem:[%s615_s1 + $0x30] sm:$0xff]   ;;  %vm537_vm0 = vmmov 0   ;;  %s620_s16 = smov (!%p195_p3, %s452_s16), 1  ;;  %v521_v3 = vld [vmem:[%s615_s1 + $0x28] sm:$0xff]  }
   0xc   : > { %489 = vmatprep.subr.bf16.mxu0 %v536_v1  ;;  %505 = vmatprep.mubr.msk.bf16.mxu0 %vm537_vm0, %v536_v1  ;;  %s476_s23 = sshll.u32 %s620_s16, 3  ;;  %v522_v4 = vld [vmem:[%s615_s1 + $0x20] sm:$0xff]   ;;  %v523_v5 = vld [vmem:[%s615_s1 + $0x18] sm:$0xff]   ;;  %v524_v6 = vld [vmem:[%s615_s1 + $0x10] sm:$0xff]   ;;  %vm338_vm1 = vcmask 125952   ;;  %vm341_vm2 = vcmask 130048  }
   0xd   : > { %490 = vmatpush3.bf16.msra.mxu0 %v519_v0  ;;  %s199_s26 = scalar_lea.vmem %s614_s0, %s476_s23  ;;  %v525_v7 = vld [vmem:[%s615_s1 + $0x8] sm:$0xff]   ;;  %v526_v8 = vld [vmem:[%s615_s1] sm:$0xff]   ;;  %s204_s17 = scalar_lea.vmem %s617_s3, %s476_s23  ;;  %vm362_vm3 = vcmask 1040384   ;;  %vm364_vm4 = vcmask 123904  }
   0xe   : > { %491 = vmatprep.subr.bf16.mxu0 %v536_v1  ;;  %v527_v9 = vld [vmem:[%s199_s26] sm:$0xff]   ;;  %s461_s18 = sshll.u32 %s620_s16, 1 }
   0xf   : > { %v462_v10 = vld [vmem:[%s616_s2] ss:$0 sm:$0xff]  ;;  %s208_s21 = scalar_lea.vmem %s618_s4, %s461_s18 }
  0x11   : > { %492 = vmatpush3.bf16.msra.mxu0 %v520_v2 }
  0x12   : > { %493 = vmatprep.subr.bf16.mxu0 %v536_v1 }
  0x15   : > { %494 = vmatpush3.bf16.msra.mxu0 %v521_v3 }
  0x16   : > { %495 = vmatprep.subr.bf16.mxu0 %v536_v1 }
  0x19   : > { %496 = vmatpush3.bf16.msra.mxu0 %v522_v4 }
  0x1a   : > { %497 = vmatprep.subr.bf16.mxu0 %v536_v1 }
  0x1d   : > { %498 = vmatpush3.bf16.msra.mxu0 %v523_v5 }
  0x1e   : > { %499 = vmatprep.subr.bf16.mxu0 %v536_v1 }
  0x21   : > { %500 = vmatpush3.bf16.msra.mxu0 %v524_v6 }
  0x22   : > { %501 = vmatprep.subr.bf16.mxu0 %v536_v1 }
  0x25   : > { %502 = vmatpush3.bf16.msra.mxu0 %v525_v7 }
  0x26   : > { %503 = vmatprep.subr.bf16.mxu0 %v536_v1 }
  0x29   : > { %504 = vmatpush3.bf16.msra.mxu0 %v526_v8 }
  0x2c   : > { %506 = vmatmul.mubr.bf16.vlgmr.msra.gmra.mxu0 %v527_v9 }
  0xec   : > { %v323_v11 = vpop.f32.mrf.mxu0 }
  0xed   : > { %v324_v12 = vadd.f32 %v462_v10, %v323_v11 }
  0xee   : > { %v507_v13 = vpop.f32.mrf.mxu0 }
  0xef   : > { %v478_v14 = vpack.c.bf16 %v324_v12, %v324_v12  ;;  %v351_v16 = vmul.f32 %v324_v12, %v324_v12  ;;  %v342_v19 = vsel %vm341_vm2, %v324_v12, 0.0 }
  0xf0   : > { %v326_v15 = vpop.f32.mrf.mxu0 }
  0xf1   : > { %339 = vst.msk [vmem:[%s204_s17] sm:$0xf] %vm338_vm1, %v478_v14  ;;  %v327_v17 = vadd.f32 %v462_v10, %v326_v15  ;;  %v353_v24 = vsel %vm341_vm2, %v351_v16, 0.0 }
  0xf2   : > { %v508_v18 = vpop.f32.mrf.mxu0 }
  0xf3   : > { %v479_v20 = vpack.c.bf16 %v327_v17, %v327_v17  ;;  %v343_v21 = vsel %vm341_vm2, %v327_v17, 0.0  ;;  %v352_v22 = vmul.f32 %v327_v17, %v327_v17 }
  0xf4   : > { %v344_v23 = vadd.f32 %v343_v21, %v342_v19 }
  0xf5   : > { %340 = vst.msk [vmem:[%s204_s17 + $0x4] sm:$0xf] %vm338_vm1, %v479_v20  ;;  %v354_v25 = vsel %vm341_vm2, %v352_v22, 0.0 }
  0xf6   : > { %v345_v26 = vrot.slane %v344_v23, 4  ;;  %v355_v27 = vadd.f32 %v354_v25, %v353_v24 }
  0xf8   : > { %v346_v28 = vadd.f32 %v345_v26, %v344_v23  ;;  %v356_v29 = vrot.slane %v355_v27, 4 }
  0xfa   : > { %v347_v30 = vrot.slane %v346_v28, 2  ;;  %v357_v31 = vadd.f32 %v356_v29, %v355_v27 }
  0xfc   : > { %v348_v32 = vadd.f32 %v347_v30, %v346_v28  ;;  %v358_v33 = vrot.slane %v357_v31, 2 }
  0xfe   : > { %v349_v34 = vrot.slane %v348_v32, 1  ;;  %v359_v35 = vadd.f32 %v358_v33, %v357_v31 }
 0x100   : > { %v360_v36 = vrot.slane %v359_v35, 1  ;;  %v350_v37 = vadd.f32 %v349_v34, %v348_v32 }
 0x102   : > { %v361_v38 = vadd.f32 %v360_v36, %v359_v35 }
 0x104   : > { %v363_v39 = vsel %vm362_vm3, %v350_v37, %v361_v38 }
 0x105   : > { %365 = vst.msk [vmem:[%s208_s21] sm:$0x3] %vm364_vm4, %v363_v39 }
 0x106 PF: > { %s15_s15 = sadd.s32 1, %s534_s15  }
 0x107   : > { %p12_p4 = scmp.ge.s32.totalorder %s15_s15, 4  }
 0x109   :  { %14 = sbr.rel (!%p12_p4) target bundleno = 1 (0x1), region = 74 }

// kernel: probabilistic_unet_forward.25
= control target key start
LH: loop header
LB: loop body
LE: loop exit
PB: predicated region body
PF: predicated region fallthrough
CT: control target
= control target key end

     0   :  { %s437_s18 = smov 0   ;;  %s470_s0 = inlined_call_operand.vmem [shape: bf16[2,16,16], index: 0, kind: input, shape index: {}]   ;;  %s471_s1 = inlined_call_operand.vmem [shape: f32[1,16], index: 1, kind: input, shape index: {}]   ;;  %s472_s2 = inlined_call_operand.vmem [shape: f32[1,16], index: 2, kind: input, shape index: {}]   ;;  %s473_s3 = inlined_call_operand.vmem [shape: bf16[16,12], index: 3, kind: input, shape index: {}]   ;;  %s474_s4 = inlined_call_operand.vmem [shape: f32[1,12], index: 4, kind: input, shape index: {}]   ;;  %s475_s5 = inlined_call_operand.vmem [shape: f32[2,1,12], index: 5, kind: output, shape index: {}]  }
   0x1 LB: > { %s360_s19 = sadd.s32 4294967295, %s403_s18   ;;  %p364_p0 = scmp.ge.s32.totalorder %s403_s18, 1  ;;  %s403_s18 = sphi %s437_s18, %s15_s18  }
   0x2   : > { %p187_p1 = scmp.lt.s32.totalorder %s403_s18, 3 }
   0x4   : > { %p188_p2 = pnand %p364_p0, %p187_p1 }
   0x5   : > { %p213_p3 = scmp.lt.s32.totalorder (!%p188_p2), %s360_s19, 1 }
   0x6   : > { %191 = sbr.rel (%p188_p2) target bundleno = 241 (0xf1), region = 40 }
   0xb   : > { %v396_v0 = vld [vmem:[%s473_s3] sm:$0xff]   ;;  %v405_v1 = vmov 0.0   ;;  %vm406_vm0 = vmmov 0   ;;  %s477_s19 = smov (!%p213_p3, %s360_s19), 1  ;;  %vm246_vm1 = vcmask 130048   ;;  %vm311_vm2 = vcmask 90112  }
   0xc   : > { %380 = vmatprep.subr.bf16.mxu0 %v405_v1  ;;  %382 = vmatprep.mubr.msk.bf16.mxu0 %vm406_vm0, %v405_v1  ;;  %s373_s22 = sshll.u32 %s477_s19, 3  ;;  %v367_v3 = vld [vmem:[%s471_s1] ss:$0 sm:$0xff]  ;;  %s220_s9 = scalar_lea.vmem %s475_s5, %s477_s19 }
   0xd   : > { %381 = vmatpush3.bf16.msra.mxu0 %v396_v0  ;;  %s217_s25 = scalar_lea.vmem %s470_s0, %s373_s22  ;;  %v368_v6 = vld [vmem:[%s472_s2] ss:$0 sm:$0xff] }
   0xe   : > { %v375_v2 = vld [vmem:[%s217_s25] sm:$0xff]  }
   0xf   : > { %v376_v4 = vunpack.c.l.bf16 %v375_v2  ;;  %v377_v5 = vunpack.c.h.bf16 %v375_v2  ;;  %v261_v24 = vld [vmem:[%s474_s4] sm:$0x1] }
  0x11   : > { %v233_v7 = vmul.f32 %v376_v4, %v367_v3  ;;  %v234_v8 = vmul.f32 %v377_v5, %v367_v3 }
  0x13   : > { %v242_v9 = vadd.f32 %v368_v6, %v233_v7  ;;  %v243_v10 = vadd.f32 %v368_v6, %v234_v8 }
  0x15   : > { %v244_v11 = vmax.f32 %v242_v9, 0.0  ;;  %v245_v12 = vmax.f32 %v243_v10, 0.0 }
  0x17   : > { %v247_v13 = vsel %vm246_vm1, %v244_v11, 0.0  ;;  %v248_v14 = vsel %vm246_vm1, %v245_v12, 0.0 }
  0x18   : > { %v249_v15 = vadd.f32 %v248_v14, %v247_v13 }
  0x1a   : > { %v250_v16 = vrot.slane %v249_v15, 4 }
  0x1c   : > { %v251_v17 = vadd.f32 %v250_v16, %v249_v15 }
  0x1e   : > { %v252_v18 = vrot.slane %v251_v17, 2 }
  0x20   : > { %v253_v19 = vadd.f32 %v252_v18, %v251_v17 }
  0x22   : > { %v254_v20 = vrot.slane %v253_v19, 1 }
  0x24   : > { %v255_v21 = vadd.f32 %v254_v20, %v253_v19 }
  0x26   : > { %v257_v22 = vmul.f32 0.0625, %v255_v21 }
  0x28   : > { %v258_v23 = vpack.c.bf16 %v257_v22, %v257_v22 }
  0x2a   : > { %383 = vmatmul.mubr.msk.bf16.vlgmr.msra.gmra.mxu0 %vm246_vm1, %v258_v23 }
  0xea   : > { %v305_v25 = vpop.f32.mrf.mxu0 }
  0xeb   : > { %v306_v26 = vadd.f32 %v305_v25, %v261_v24 }
  0xec   : > { %v384_v27 = vpop.f32.mrf.mxu0 }
  0xed   : > { %312 = vst.msk [vmem:[%s220_s9] sm:$0x1] %vm311_vm2, %v306_v26 }
  0xee   : > { %v308_v28 = vpop.f32.mrf.mxu0 }
  0xf0   : > { %v385_v29 = vpop.f32.mrf.mxu0 }
  0xf1 PF: > { %s15_s18 = sadd.s32 1, %s403_s18  }
  0xf2   : > { %p12_p4 = scmp.ge.s32.totalorder %s15_s18, 4  }
  0xf4   :  { %14 = sbr.rel (!%p12_p4) target bundleno = 1 (0x1), region = 70 }

// kernel: probabilistic_unet_forward.18
= control target key start
LH: loop header
LB: loop body
LE: loop exit
PB: predicated region body
PF: predicated region fallthrough
CT: control target
= control target key end

     0   :  { %s320_s12 = smov 0   ;;  %s343_s0 = inlined_call_operand.vmem [shape: bf16[2,16,16], index: 0, kind: input, shape index: {}]   ;;  %s344_s1 = inlined_call_operand.vmem [shape: f32[1,16], index: 1, kind: input, shape index: {}]   ;;  %s345_s2 = inlined_call_operand.vmem [shape: f32[1,16], index: 2, kind: input, shape index: {}]   ;;  %s346_s3 = inlined_call_operand.vmem [shape: bf16[2,16,16], index: 3, kind: output, shape index: {}]  }
   0x1 LB: > { %s261_s13 = sadd.s32 4294967295, %s298_s12   ;;  %p265_p0 = scmp.ge.s32.totalorder %s298_s12, 1  ;;  %s298_s12 = sphi %s320_s12, %s13_s12  }
   0x2   : > { %p137_p1 = scmp.lt.s32.totalorder %s298_s12, 3 }
   0x4   : > { %p138_p2 = pnand %p265_p0, %p137_p1 }
   0x5   : > { %p161_p3 = scmp.lt.s32.totalorder (!%p138_p2), %s261_s13, 1 }
   0x6   : > { %141 = sbr.rel (%p138_p2) target bundleno = 26 (0x1a), region = 32 }
   0xb   : > { %s348_s13 = smov (!%p161_p3, %s261_s13), 1  ;;  %v270_v1 = vld [vmem:[%s344_s1] ss:$0 sm:$0xff]  ;;  %vm203_vm0 = vcmask 125952  }
   0xc   : > { %s276_s14 = sshll.u32 %s348_s13, 3  ;;  %v271_v4 = vld [vmem:[%s345_s2] ss:$0 sm:$0xff] }
   0xd   : > { %s165_s17 = scalar_lea.vmem %s343_s0, %s276_s14  ;;  %s170_s24 = scalar_lea.vmem %s346_s3, %s276_s14 }
   0xe   : > { %v281_v0 = vld [vmem:[%s165_s17] sm:$0xff]  }
   0xf   : > { %v282_v2 = vunpack.c.l.bf16 %v281_v0  ;;  %v283_v3 = vunpack.c.h.bf16 %v281_v0 }
  0x11   : > { %v182_v5 = vmul.f32 %v282_v2, %v270_v1  ;;  %v183_v6 = vmul.f32 %v283_v3, %v270_v1 }
  0x13   : > { %v191_v7 = vadd.f32 %v271_v4, %v182_v5  ;;  %v192_v8 = vadd.f32 %v271_v4, %v183_v6 }
  0x15   : > { %v193_v9 = vmax.f32 %v191_v7, 0.0  ;;  %v194_v10 = vmax.f32 %v192_v8, 0.0 }
  0x17   : > { %v278_v11 = vpack.c.bf16 %v193_v9, %v193_v9  ;;  %v279_v12 = vpack.c.bf16 %v194_v10, %v194_v10 }
  0x19   : > { %204 = vst.msk [vmem:[%s170_s24] sm:$0xf] %vm203_vm0, %v278_v11  ;;  %205 = vst.msk [vmem:[%s170_s24 + $0x4] sm:$0xf] %vm203_vm0, %v279_v12 }
  0x1a PF: > { %s13_s12 = sadd.s32 1, %s298_s12  }
  0x1b   : > { %p10_p4 = scmp.ge.s32.totalorder %s13_s12, 4  }
  0x1d   :  { %12 = sbr.rel (!%p10_p4) target bundleno = 1 (0x1), region = 62 }

// kernel: probabilistic_unet_forward.15
= control target key start
LH: loop header
LB: loop body
LE: loop exit
PB: predicated region body
PF: predicated region fallthrough
CT: control target
= control target key end

     0   :  { %s1049_s15 = smov 0   ;;  %s1189_s0 = inlined_call_operand.vmem [shape: f32[2,9,9,20], index: 0, kind: input, shape index: {}]   ;;  %s1190_s1 = inlined_call_operand.vmem [shape: bf16[4,20,8], index: 1, kind: input, shape index: {}]   ;;  %s1191_s2 = inlined_call_operand.vmem [shape: f32[1,8], index: 2, kind: input, shape index: {}]   ;;  %s1192_s3 = inlined_call_operand.vmem [shape: bf16[2,64,8], index: 3, kind: output, shape index: {0}]   ;;  %s1193_s4 = inlined_call_operand.vmem [shape: f32[2,2,8], index: 4, kind: output, shape index: {1}]  }
   0x1 LB: > { %s845_s16 = sadd.s32 4294967295, %s1022_s15   ;;  %p849_p0 = scmp.ge.s32.totalorder %s1022_s15, 1  ;;  %s1022_s15 = sphi %s1049_s15, %s15_s15  }
   0x2   : > { %p165_p1 = scmp.lt.s32.totalorder %s1022_s15, 3 }
   0x4   : > { %p166_p2 = pnand %p849_p0, %p165_p1 }
   0x5   : > { %p195_p3 = scmp.lt.s32.totalorder (!%p166_p2), %s845_s16, 1 }
   0x6   : > { %169 = sbr.rel (%p166_p2) target bundleno = 274 (0x112), region = 32 }
   0xb   : > { %v1008_v0 = vld [vmem:[%s1190_s1 + $0x14] ss:$0 sps:$4 sm:$0x33]   ;;  %vm263_vm0 = vcmask 1041408   ;;  %v1010_v2 = vld [vmem:[%s1190_s1 + $0xc] sm:$0xff]   ;;  %v1011_v4 = vld [vmem:[%s1190_s1] sm:$0xff]  }
   0xc   : > { %v1009_v1 = vld [vmem:[%s1190_s1 + $0x8] ss:$0 sps:$4 sm:$0x33]   ;;  %995 = vmatprep.subr.msk.bf16.mxu0 %vm263_vm0, %v1008_v0  ;;  %v265_v3 = vsel %vm263_vm0, %v1008_v0, 0  ;;  %s1195_s16 = smov (!%p195_p3, %s845_s16), 1  ;;  %vm250_vm1 = vcmask 162816  }
   0xd   : > { %996 = vmatprep.subr.msk.bf16.mxu1 %vm263_vm0, %v1009_v1  ;;  %948 = vmatpush3.bf16.msra.mxu0 %v265_v3  ;;  %v354_v5 = vsel %vm263_vm0, %v1009_v1, 0  ;;  %v1012_v6 = vld [vmem:[%s1190_s1 + $0x20] ss:$0 sps:$4 sm:$0x33]   ;;  %s999_s29 = smul.u32 144, %s1195_s16  ;;  %v1014_v15 = vld [vmem:[%s1190_s1 + $0x18] sm:$0xff]  }
   0xe   : > { %960 = vmatpush3.bf16.msra.mxu1 %v354_v5  ;;  %949 = vmatprep.subr.bf16.mxu0 %v1010_v2  ;;  %v1013_v7 = vld [vmem:[%s1190_s1 + $0x2c] ss:$0 sps:$4 sm:$0x33]   ;;  %v460_v20 = vsel %vm263_vm0, %v1012_v6, 0  ;;  %v1015_v29 = vld [vmem:[%s1190_s1 + $0x24] sm:$0xff]   ;;  %s914_s13 = sshll.u32 %s1195_s16, 5 }
   0xf   : > { %961 = vmatprep.subr.bf16.mxu1 %v1011_v4  ;;  %s1086_s6 = scalar_lea.vmem %s1189_s0, %s999_s29  ;;  %v573_v23 = vsel %vm263_vm0, %v1013_v7, 0  ;;  %v1134_v3 = vld [vmem:[%s1191_s2] ss:$0 sm:$0xff]  ;;  %s1141_s18 = scalar_lea.vmem %s1192_s3, %s914_s13  ;;  %vm695_vm2 = vcmask 60416   ;;  %vm704_vm3 = vcmask 64512   ;;  %vm755_vm4 = vcmask 1040384  }
  0x10   : > { %v225_v8 = vld [vmem:[%s1086_s6 + $0x1] sm:$0xff]  ;;  %v226_v9 = vld [vmem:[%s1086_s6 + $0x11] sm:$0xff]  ;;  %s853_s19 = sshll.u32 %s1195_s16, 1  ;;  %vm757_vm5 = vcmask 58368  }
  0x11   : > { %950 = vmatpush3.bf16.msra.mxu0 %v1010_v2  ;;  %v210_v10 = vld [vmem:[%s1086_s6] sm:$0xff]  ;;  %v233_v11 = vpack.c.bf16 %v226_v9, %v225_v8  ;;  %v211_v12 = vld [vmem:[%s1086_s6 + $0x10] sm:$0xff]  ;;  %s208_s22 = scalar_lea.vmem %s1193_s4, %s853_s19 }
  0x12   : > { %962 = vmatpush3.bf16.msra.mxu1 %v1011_v4  ;;  %997 = vmatprep.subr.msk.bf16.mxu0 %vm263_vm0, %v1012_v6  ;;  %v227_v13 = vld [vmem:[%s1086_s6 + $0x21] sm:$0xff]  ;;  %v228_v14 = vld [vmem:[%s1086_s6 + $0x31] sm:$0xff]  ;;  %v218_v16 = vpack.c.bf16 %v211_v12, %v210_v10 }
  0x13   : > { %998 = vmatprep.subr.msk.bf16.mxu1 %vm263_vm0, %v1013_v7  ;;  %v234_v17 = vpack.c.bf16 %v228_v14, %v227_v13  ;;  %v212_v18 = vld [vmem:[%s1086_s6 + $0x20] sm:$0xff]  ;;  %v213_v19 = vld [vmem:[%s1086_s6 + $0x30] sm:$0xff]  ;;  %951 = vmatprep.mubr.msk.bf16.mxu0 %vm250_vm1, %v233_v11  ;;  %v543_v37 = vpack.c.bf16 %v227_v13, %v226_v9 }
  0x14   : > { %v229_v21 = vld [vmem:[%s1086_s6 + $0x41] sm:$0xff]  ;;  %v219_v22 = vpack.c.bf16 %v213_v19, %v212_v18  ;;  %v230_v24 = vld [vmem:[%s1086_s6 + $0x51] sm:$0xff]  ;;  %963 = vmatprep.mubr.msk.bf16.mxu1 %vm250_vm1, %v218_v16  ;;  %v430_v36 = vpack.c.bf16 %v212_v18, %v211_v12 }
  0x15   : > { %v214_v25 = vld [vmem:[%s1086_s6 + $0x40] sm:$0xff]  ;;  %v215_v26 = vld [vmem:[%s1086_s6 + $0x50] sm:$0xff]  ;;  %952 = vmatmul.mubr.msk.bf16.vlgmr.msra.gmra.mxu0 %vm250_vm1, %v234_v17  ;;  %v235_v27 = vpack.c.bf16 %v230_v24, %v229_v21  ;;  %v544_v39 = vpack.c.bf16 %v229_v21, %v228_v14 }
  0x16   : > { %v220_v28 = vpack.c.bf16 %v215_v26, %v214_v25  ;;  %964 = vmatmul.mubr.msk.bf16.vlgmr.msra.gmra.mxu1 %vm250_vm1, %v219_v22  ;;  %972 = vmatpush3.bf16.msra.mxu0 %v460_v20  ;;  %v231_v30 = vld [vmem:[%s1086_s6 + $0x61] sm:$0xff]  ;;  %v232_v31 = vld [vmem:[%s1086_s6 + $0x71] sm:$0xff]  ;;  %v431_v38 = vpack.c.bf16 %v214_v25, %v213_v19 }
  0x17   : > { %984 = vmatpush3.bf16.msra.mxu1 %v573_v23  ;;  %955 = vmatprep.mubr.msk.bf16.mxu0 %vm250_vm1, %v235_v27  ;;  %v216_v32 = vld [vmem:[%s1086_s6 + $0x60] sm:$0xff]  ;;  %v217_v33 = vld [vmem:[%s1086_s6 + $0x70] sm:$0xff]  ;;  %v236_v34 = vpack.c.bf16 %v232_v31, %v231_v30  ;;  %v545_v41 = vpack.c.bf16 %v231_v30, %v230_v24 }
  0x18   : > { %967 = vmatprep.mubr.msk.bf16.mxu1 %vm250_vm1, %v220_v28  ;;  %973 = vmatprep.subr.bf16.mxu0 %v1014_v15  ;;  %v221_v35 = vpack.c.bf16 %v217_v33, %v216_v32  ;;  %v432_v40 = vpack.c.bf16 %v216_v32, %v215_v26  ;;  %v876_v42 = vld [vmem:[%s1086_s6 + $0x80] sm:$0xff] }
  0x19   : > { %985 = vmatprep.subr.bf16.mxu1 %v1015_v29  ;;  %v893_v43 = vld [vmem:[%s1086_s6 + $0x81] sm:$0xff]  ;;  %v433_v44 = vpack.c.bf16 %v876_v42, %v217_v33 }
  0x1a   : > { %974 = vmatpush3.bf16.msra.mxu0 %v1014_v15  ;;  %v546_v45 = vpack.c.bf16 %v893_v43, %v232_v31 }
  0x1b   : > { %986 = vmatpush3.bf16.msra.mxu1 %v1015_v29 }
  0x1d   : > { %956 = vmatmul.mubr.msk.bf16.gmra.mxu0 %vm250_vm1, %v236_v34 }
  0x1e   : > { %968 = vmatmul.mubr.msk.bf16.gmra.mxu1 %vm250_vm1, %v221_v35  ;;  %975 = vmatprep.mubr.msk.bf16.mxu0 %vm250_vm1, %v430_v36 }
  0x1f   : > { %987 = vmatprep.mubr.msk.bf16.mxu1 %vm250_vm1, %v543_v37 }
  0x25   : > { %976 = vmatmul.mubr.msk.bf16.vlgmr.msra.gmra.mxu0 %vm250_vm1, %v431_v38 }
  0x26   : > { %988 = vmatmul.mubr.msk.bf16.vlgmr.msra.gmra.mxu1 %vm250_vm1, %v544_v39  ;;  %979 = vmatprep.mubr.msk.bf16.mxu0 %vm250_vm1, %v432_v40 }
  0x27   : > { %991 = vmatprep.mubr.msk.bf16.mxu1 %vm250_vm1, %v545_v41 }
  0x2d   : > { %980 = vmatmul.mubr.msk.bf16.gmra.mxu0 %vm250_vm1, %v433_v44 }
  0x2e   : > { %992 = vmatmul.mubr.msk.bf16.gmra.mxu1 %vm250_vm1, %v546_v45 }
  0xd5   : > { %v953_v46 = vpop.f32.mrf.mxu0 }
  0xd6   : > { %v965_v47 = vpop.f32.mrf.mxu1 }
  0xd7   : > { %v301_v48 = vpop.f32.mrf.mxu0  ;;  %v399_v61 = vadd.f32 %v965_v47, %v953_v46 }
  0xd8   : > { %v390_v49 = vpop.f32.mrf.mxu1 }
  0xd9   : > { %v954_v50 = vpop.f32.mrf.mxu0  ;;  %v391_v0 = vadd.f32 %v390_v49, %v301_v48 }
  0xda   : > { %v966_v51 = vpop.f32.mrf.mxu1 }
  0xdb   : > { %v304_v52 = vpop.f32.mrf.mxu0  ;;  %v402_v5 = vadd.f32 %v966_v51, %v954_v50 }
  0xdc   : > { %v393_v53 = vpop.f32.mrf.mxu1 }
  0xdd   : > { %v957_v54 = vpop.f32.mrf.mxu0  ;;  %v394_v14 = vadd.f32 %v393_v53, %v304_v52 }
  0xde   : > { %v969_v55 = vpop.f32.mrf.mxu1 }
  0xdf   : > { %v317_v56 = vpop.f32.mrf.mxu0  ;;  %v415_v19 = vadd.f32 %v969_v55, %v957_v54 }
  0xe0   : > { %v406_v57 = vpop.f32.mrf.mxu1 }
  0xe1   : > { %v958_v58 = vpop.f32.mrf.mxu0  ;;  %v407_v23 = vadd.f32 %v406_v57, %v317_v56 }
  0xe2   : > { %v970_v59 = vpop.f32.mrf.mxu1 }
  0xe3   : > { %v320_v60 = vpop.f32.mrf.mxu0  ;;  %v418_v30 = vadd.f32 %v970_v59, %v958_v58 }
  0xe4   : > { %v409_v62 = vpop.f32.mrf.mxu1 }
  0xe5   : > { %v977_v63 = vpop.f32.mrf.mxu0  ;;  %v410_v31 = vadd.f32 %v409_v62, %v320_v60 }
  0xe6   : > { %v529_v1 = vadd.f32 %v977_v63, %v399_v61  ;;  %v989_v2 = vpop.f32.mrf.mxu1 }
  0xe7   : > { %v496_v4 = vpop.f32.mrf.mxu0 }
  0xe8   : > { %v642_v6 = vadd.f32 %v989_v2, %v529_v1  ;;  %v527_v7 = vadd.f32 %v496_v4, %v391_v0  ;;  %v609_v8 = vpop.f32.mrf.mxu1 }
  0xe9   : > { %v978_v9 = vpop.f32.mrf.mxu0 }
  0xea   : > { %v657_v10 = vadd.f32 %v1134_v3, %v642_v6  ;;  %v640_v11 = vadd.f32 %v609_v8, %v527_v7  ;;  %v530_v12 = vadd.f32 %v978_v9, %v402_v5  ;;  %v990_v13 = vpop.f32.mrf.mxu1 }
  0xeb   : > { %v499_v15 = vpop.f32.mrf.mxu0 }
  0xec   : > { %v917_v16 = vpack.c.bf16 %v657_v10, %v657_v10  ;;  %v655_v17 = vadd.f32 %v1134_v3, %v640_v11  ;;  %v612_v18 = vpop.f32.mrf.mxu1  ;;  %v643_v20 = vadd.f32 %v990_v13, %v530_v12  ;;  %v528_v21 = vadd.f32 %v499_v15, %v394_v14 }
  0xed   : > { %v981_v22 = vpop.f32.mrf.mxu0  ;;  %v708_v34 = vsel %vm704_vm3, %v657_v10, 0.0  ;;  %v728_v39 = vmul.f32 %v657_v10, %v657_v10 }
  0xee   : > { %698 = vst.msk [vmem:[%s1141_s18 + $0x8] sm:$0xf] %vm695_vm2, %v917_v16  ;;  %v915_v24 = vpack.c.bf16 %v655_v17, %v655_v17  ;;  %v993_v25 = vpop.f32.mrf.mxu1  ;;  %v658_v26 = vadd.f32 %v1134_v3, %v643_v20  ;;  %v641_v27 = vadd.f32 %v612_v18, %v528_v21  ;;  %v533_v28 = vadd.f32 %v981_v22, %v415_v19 }
  0xef   : > { %v512_v29 = vpop.f32.mrf.mxu0  ;;  %v726_v35 = vmul.f32 %v655_v17, %v655_v17  ;;  %v705_v43 = vsel %vm704_vm3, %v655_v17, 0.0  ;;  %v737_v60 = vsel %vm704_vm3, %v728_v39, 0.0 }
  0xf0   : > { %696 = vst.msk [vmem:[%s1141_s18] sm:$0xf] %vm695_vm2, %v915_v24  ;;  %v531_v32 = vadd.f32 %v512_v29, %v407_v23  ;;  %v625_v33 = vpop.f32.mrf.mxu1  ;;  %v918_v36 = vpack.c.bf16 %v658_v26, %v658_v26  ;;  %v656_v37 = vadd.f32 %v1134_v3, %v641_v27  ;;  %v646_v40 = vadd.f32 %v993_v25, %v533_v28 }
  0xf1   : > { %v982_v38 = vpop.f32.mrf.mxu0  ;;  %v734_v53 = vsel %vm704_vm3, %v726_v35, 0.0  ;;  %v729_v54 = vmul.f32 %v658_v26, %v658_v26  ;;  %v710_v61 = vsel %vm704_vm3, %v658_v26, 0.0 }
  0xf2   : > { %v644_v41 = vadd.f32 %v625_v33, %v531_v32  ;;  %v534_v42 = vadd.f32 %v982_v38, %v418_v30  ;;  %699 = vst.msk [vmem:[%s1141_s18 + $0xc] sm:$0xf] %vm695_vm2, %v918_v36  ;;  %v916_v44 = vpack.c.bf16 %v656_v37, %v656_v37  ;;  %v706_v45 = vsel %vm704_vm3, %v656_v37, 0.0  ;;  %v994_v47 = vpop.f32.mrf.mxu1 }
  0xf3   : > { %v727_v46 = vmul.f32 %v656_v37, %v656_v37  ;;  %v515_v48 = vpop.f32.mrf.mxu0  ;;  %v707_v49 = vadd.f32 %v706_v45, %v705_v43  ;;  %v661_v50 = vadd.f32 %v1134_v3, %v646_v40  ;;  %v739_v6 = vsel %vm704_vm3, %v729_v54, 0.0 }
  0xf4   : > { %v659_v51 = vadd.f32 %v1134_v3, %v644_v41  ;;  %v647_v52 = vadd.f32 %v994_v47, %v534_v42  ;;  %697 = vst.msk [vmem:[%s1141_s18 + $0x4] sm:$0xf] %vm695_vm2, %v916_v44  ;;  %v532_v56 = vadd.f32 %v515_v48, %v410_v31  ;;  %v628_v0 = vpop.f32.mrf.mxu1 }
  0xf5   : > { %v735_v55 = vsel %vm704_vm3, %v727_v46, 0.0  ;;  %v709_v57 = vadd.f32 %v708_v34, %v707_v49  ;;  %v921_v59 = vpack.c.bf16 %v661_v50, %v661_v50  ;;  %v732_v14 = vmul.f32 %v661_v50, %v661_v50 }
  0xf6   : > { %v736_v58 = vadd.f32 %v735_v55, %v734_v53  ;;  %v919_v62 = vpack.c.bf16 %v659_v51, %v659_v51  ;;  %v730_v63 = vmul.f32 %v659_v51, %v659_v51  ;;  %v662_v4 = vadd.f32 %v1134_v3, %v647_v52 }
  0xf7   : > { %702 = vst.msk [vmem:[%s1141_s18 + $0x18] sm:$0xf] %vm695_vm2, %v921_v59  ;;  %v711_v2 = vadd.f32 %v710_v61, %v709_v57  ;;  %v645_v5 = vadd.f32 %v628_v0, %v532_v56  ;;  %v712_v7 = vsel %vm704_vm3, %v659_v51, 0.0  ;;  %v716_v19 = vsel %vm704_vm3, %v661_v50, 0.0 }
  0xf8   : > { %v738_v1 = vadd.f32 %v737_v60, %v736_v58  ;;  %700 = vst.msk [vmem:[%s1141_s18 + $0x10] sm:$0xf] %vm695_vm2, %v919_v62  ;;  %v922_v10 = vpack.c.bf16 %v662_v4, %v662_v4  ;;  %v741_v11 = vsel %vm704_vm3, %v730_v63, 0.0  ;;  %v733_v20 = vmul.f32 %v662_v4, %v662_v4 }
  0xf9   : > { %v713_v8 = vadd.f32 %v712_v7, %v711_v2  ;;  %v660_v12 = vadd.f32 %v1134_v3, %v645_v5  ;;  %v745_v3 = vsel %vm704_vm3, %v732_v14, 0.0  ;;  %v718_v24 = vsel %vm704_vm3, %v662_v4, 0.0 }
  0xfa   : > { %v740_v9 = vadd.f32 %v739_v6, %v738_v1  ;;  %703 = vst.msk [vmem:[%s1141_s18 + $0x1c] sm:$0xf] %vm695_vm2, %v922_v10  ;;  %v747_v27 = vsel %vm704_vm3, %v733_v20, 0.0 }
  0xfb   : > { %v920_v15 = vpack.c.bf16 %v660_v12, %v660_v12  ;;  %v714_v16 = vsel %vm704_vm3, %v660_v12, 0.0  ;;  %v731_v17 = vmul.f32 %v660_v12, %v660_v12 }
  0xfc   : > { %v742_v13 = vadd.f32 %v741_v11, %v740_v9  ;;  %v715_v18 = vadd.f32 %v714_v16, %v713_v8 }
  0xfd   : > { %701 = vst.msk [vmem:[%s1141_s18 + $0x14] sm:$0xf] %vm695_vm2, %v920_v15  ;;  %v743_v21 = vsel %vm704_vm3, %v731_v17, 0.0 }
  0xfe   : > { %v717_v22 = vadd.f32 %v716_v19, %v715_v18  ;;  %v744_v23 = vadd.f32 %v743_v21, %v742_v13 }
 0x100   : > { %v719_v25 = vadd.f32 %v718_v24, %v717_v22  ;;  %v746_v26 = vadd.f32 %v745_v3, %v744_v23 }
 0x102   : > { %v720_v28 = vrot.slane %v719_v25, 4  ;;  %v748_v29 = vadd.f32 %v747_v27, %v746_v26 }
 0x104   : > { %v721_v30 = vadd.f32 %v720_v28, %v719_v25  ;;  %v749_v31 = vrot.slane %v748_v29, 4 }
 0x106   : > { %v722_v32 = vrot.slane %v721_v30, 2  ;;  %v750_v33 = vadd.f32 %v749_v31, %v748_v29 }
 0x108   : > { %v723_v34 = vadd.f32 %v722_v32, %v721_v30  ;;  %v751_v35 = vrot.slane %v750_v33, 2 }
 0x10a   : > { %v724_v36 = vrot.slane %v723_v34, 1  ;;  %v752_v37 = vadd.f32 %v751_v35, %v750_v33 }
 0x10c   : > { %v753_v38 = vrot.slane %v752_v37, 1  ;;  %v725_v39 = vadd.f32 %v724_v36, %v723_v34 }
 0x10e   : > { %v754_v40 = vadd.f32 %v753_v38, %v752_v37 }
 0x110   : > { %v756_v41 = vsel %vm755_vm4, %v725_v39, %v754_v40 }
 0x111   : > { %758 = vst.msk [vmem:[%s208_s22] sm:$0x3] %vm757_vm5, %v756_v41 }
 0x112 PF: > { %s15_s15 = sadd.s32 1, %s1022_s15  }
 0x113   : > { %p12_p4 = scmp.ge.s32.totalorder %s15_s15, 4  }
 0x115   :  { %14 = sbr.rel (!%p12_p4) target bundleno = 1 (0x1), region = 78 }

// kernel: probabilistic_unet_forward.19
= control target key start
LH: loop header
LB: loop body
LE: loop exit
PB: predicated region body
PF: predicated region fallthrough
CT: control target
= control target key end

     0   :  { %s610_s15 = smov 0   ;;  %s687_s0 = inlined_call_operand.vmem [shape: bf16[2,4,256], index: 0, kind: input, shape index: {}]   ;;  %s688_s1 = inlined_call_operand.vmem [shape: bf16[1,256,32], index: 1, kind: input, shape index: {}]   ;;  %s689_s2 = inlined_call_operand.vmem [shape: f32[1,32], index: 2, kind: input, shape index: {}]   ;;  %s690_s3 = inlined_call_operand.vmem [shape: bf16[2,4,32], index: 3, kind: output, shape index: {0}]   ;;  %s691_s4 = inlined_call_operand.vmem [shape: f32[2,2,32], index: 4, kind: output, shape index: {1}]  }
   0x1 LB: > { %s501_s16 = sadd.s32 4294967295, %s583_s15   ;;  %p505_p0 = scmp.ge.s32.totalorder %s583_s15, 1  ;;  %s583_s15 = sphi %s610_s15, %s15_s15  }
   0x2   : > { %p165_p1 = scmp.lt.s32.totalorder %s583_s15, 3 }
   0x4   : > { %p166_p2 = pnand %p505_p0, %p165_p1 }
   0x5   : > { %p194_p3 = scmp.lt.s32.totalorder (!%p166_p2), %s501_s16, 1 }
   0x6   : > { %169 = sbr.rel (%p166_p2) target bundleno = 260 (0x104), region = 32 }
   0xb   : > { %v561_v0 = vld [vmem:[%s688_s1 + $0x78] sm:$0xff]   ;;  %v563_v2 = vld [vmem:[%s688_s1 + $0x70] sm:$0xff]   ;;  %v565_v4 = vld [vmem:[%s688_s1 + $0x68] sm:$0xff]   ;;  %s693_s16 = smov (!%p194_p3, %s501_s16), 1  ;;  %vm398_vm0 = vcmask 257024   ;;  %vm396_vm1 = vcmask 254976  }
   0xc   : > { %v562_v1 = vld [vmem:[%s688_s1 + $0x38] sm:$0xff]   ;;  %531 = vmatprep.subr.bf16.mxu0 %v561_v0  ;;  %v564_v3 = vld [vmem:[%s688_s1 + $0x30] sm:$0xff]   ;;  %v566_v5 = vld [vmem:[%s688_s1 + $0x28] sm:$0xff]   ;;  %s530_s5 = sshll.u32 %s693_s16, 2  ;;  %vm414_vm2 = vcmask 1040384  }
   0xd   : > { %532 = vmatpush3.bf16.msra.mxu0 %v562_v1  ;;  %v567_v6 = vld [vmem:[%s688_s1 + $0x60] sm:$0xff]   ;;  %v569_v8 = vld [vmem:[%s688_s1 + $0x58] sm:$0xff]   ;;  %s198_s12 = scalar_lea.vmem %s687_s0, %s530_s5  ;;  %v571_v10 = vld [vmem:[%s688_s1 + $0x50] sm:$0xff]   ;;  %s508_s5 = sshll.u32 %s693_s16, 1 }
   0xe   : > { %533 = vmatprep.subr.bf16.mxu0 %v563_v2  ;;  %v568_v7 = vld [vmem:[%s688_s1 + $0x20] sm:$0xff]   ;;  %v570_v9 = vld [vmem:[%s688_s1 + $0x18] sm:$0xff]   ;;  %v572_v13 = vld [vmem:[%s688_s1 + $0x10] sm:$0xff]   ;;  %s202_s8 = scalar_lea.vmem %s690_s3, %s508_s5  ;;  %s206_s10 = scalar_lea.vmem %s691_s4, %s508_s5 }
   0xf   : > { %v511_v11 = vld.sshfl [vmem:[%s198_s12] sm:$0x33 pattern:$0x76325410]  ;;  %v573_v14 = vld [vmem:[%s688_s1 + $0x48] sm:$0xff]  }
  0x10   : > { %v256_v12 = vcombine.high %v511_v11, %v511_v11  ;;  %v574_v15 = vld [vmem:[%s688_s1 + $0x8] sm:$0xff]   ;;  %v575_v16 = vld [vmem:[%s688_s1 + $0x40] sm:$0xff]  }
  0x11   : > { %534 = vmatpush3.bf16.msra.mxu0 %v564_v3  ;;  %v576_v17 = vld [vmem:[%s688_s1] sm:$0xff]  }
  0x12   : > { %535 = vmatprep.subr.bf16.mxu0 %v565_v4  ;;  %387 = vmatprep.mubr.bf16.mxu0 %v256_v12  ;;  %v510_v19 = vld [vmem:[%s689_s2] ss:$0 sm:$0xff] }
  0x15   : > { %536 = vmatpush3.bf16.msra.mxu0 %v566_v5 }
  0x16   : > { %537 = vmatprep.subr.bf16.mxu0 %v567_v6 }
  0x19   : > { %538 = vmatpush3.bf16.msra.mxu0 %v568_v7 }
  0x1a   : > { %539 = vmatprep.subr.bf16.mxu0 %v569_v8 }
  0x1d   : > { %540 = vmatpush3.bf16.msra.mxu0 %v570_v9 }
  0x1e   : > { %541 = vmatprep.subr.bf16.mxu0 %v571_v10 }
  0x21   : > { %542 = vmatpush3.bf16.msra.mxu0 %v572_v13 }
  0x22   : > { %543 = vmatprep.subr.bf16.mxu0 %v573_v14 }
  0x25   : > { %544 = vmatpush3.bf16.msra.mxu0 %v574_v15 }
  0x26   : > { %545 = vmatprep.subr.bf16.mxu0 %v575_v16 }
  0x29   : > { %546 = vmatpush3.bf16.msra.mxu0 %v576_v17 }
  0x2c   : > { %388 = vmatmul.mubr.bf16.vlgmr.msra.gmra.mxu0 %v511_v11 }
  0xec   : > { %v547_v18 = vpop.f32.mrf.mxu0 }
  0xee   : > { %v548_v20 = vpop.f32.mrf.mxu0 }
  0xef   : > { %v549_v21 = vadd.f32 %v548_v20, %v547_v18 }
  0xf0   : > { %v550_v22 = vpop.f32.mrf.mxu0 }
  0xf1   : > { %v390_v23 = vadd.f32 %v549_v21, %v510_v19 }
  0xf2   : > { %v551_v24 = vpop.f32.mrf.mxu0 }
  0xf3   : > { %v395_v25 = vpack.c.bf16 %v390_v23, %v390_v23  ;;  %v399_v26 = vsel %vm398_vm0, %v390_v23, 0.0  ;;  %v406_v27 = vmul.f32 %v390_v23, %v390_v23 }
  0xf4   : > { %v400_v28 = vrot.slane %v399_v26, 4 }
  0xf5   : > { %397 = vst.msk [vmem:[%s202_s8] sm:$0x3] %vm396_vm1, %v395_v25  ;;  %v407_v29 = vsel %vm398_vm0, %v406_v27, 0.0 }
  0xf6   : > { %v401_v30 = vadd.f32 %v400_v28, %v399_v26  ;;  %v408_v31 = vrot.slane %v407_v29, 4 }
  0xf8   : > { %v402_v32 = vrot.slane %v401_v30, 2  ;;  %v409_v33 = vadd.f32 %v408_v31, %v407_v29 }
  0xfa   : > { %v403_v34 = vadd.f32 %v402_v32, %v401_v30  ;;  %v410_v35 = vrot.slane %v409_v33, 2 }
  0xfc   : > { %v404_v36 = vrot.slane %v403_v34, 1  ;;  %v411_v37 = vadd.f32 %v410_v35, %v409_v33 }
  0xfe   : > { %v412_v38 = vrot.slane %v411_v37, 1  ;;  %v405_v39 = vadd.f32 %v404_v36, %v403_v34 }
 0x100   : > { %v413_v40 = vadd.f32 %v412_v38, %v411_v37 }
 0x102   : > { %v415_v41 = vsel %vm414_vm2, %v405_v39, %v413_v40 }
 0x103   : > { %416 = vst.msk [vmem:[%s206_s10] sm:$0x3] %vm396_vm1, %v415_v41 }
 0x104 PF: > { %s15_s15 = sadd.s32 1, %s583_s15  }
 0x105   : > { %p12_p4 = scmp.ge.s32.totalorder %s15_s15, 4  }
 0x107   :  { %14 = sbr.rel (!%p12_p4) target bundleno = 1 (0x1), region = 74 }

// kernel: probabilistic_unet_forward.20
= control target key start
LH: loop header
LB: loop body
LE: loop exit
PB: predicated region body
PF: predicated region fallthrough
CT: control target
= control target key end

     0   :  { %s435_s18 = smov 0   ;;  %s471_s0 = inlined_call_operand.vmem [shape: bf16[2,4,32], index: 0, kind: input, shape index: {}]   ;;  %s472_s1 = inlined_call_operand.vmem [shape: f32[1,32], index: 1, kind: input, shape index: {}]   ;;  %s473_s2 = inlined_call_operand.vmem [shape: f32[1,32], index: 2, kind: input, shape index: {}]   ;;  %s474_s3 = inlined_call_operand.vmem [shape: bf16[32,12], index: 3, kind: input, shape index: {}]   ;;  %s475_s4 = inlined_call_operand.vmem [shape: f32[1,12], index: 4, kind: input, shape index: {}]   ;;  %s476_s5 = inlined_call_operand.vmem [shape: f32[2,1,12], index: 5, kind: output, shape index: {}]  }
   0x1 LB: > { %s359_s19 = sadd.s32 4294967295, %s401_s18   ;;  %p363_p0 = scmp.ge.s32.totalorder %s401_s18, 1  ;;  %s401_s18 = sphi %s435_s18, %s15_s18  }
   0x2   : > { %p186_p1 = scmp.lt.s32.totalorder %s401_s18, 3 }
   0x4   : > { %p187_p2 = pnand %p363_p0, %p186_p1 }
   0x5   : > { %p211_p3 = scmp.lt.s32.totalorder (!%p187_p2), %s359_s19, 1 }
   0x6   : > { %190 = sbr.rel (%p187_p2) target bundleno = 239 (0xef), region = 40 }
   0xb   : > { %v393_v0 = vld [vmem:[%s474_s3 + $0x8] sm:$0xff]   ;;  %v403_v1 = vmov 0.0   ;;  %v394_v2 = vld [vmem:[%s474_s3] sm:$0xff]   ;;  %vm404_vm0 = vmmov 0   ;;  %s478_s19 = smov (!%p211_p3, %s359_s19), 1  ;;  %vm238_vm1 = vcmask 257024  }
   0xc   : > { %375 = vmatprep.subr.bf16.mxu0 %v403_v1  ;;  %379 = vmatprep.mubr.msk.bf16.mxu0 %vm404_vm0, %v403_v1  ;;  %s364_s24 = sshll.u32 %s478_s19, 1  ;;  %v365_v4 = vld [vmem:[%s472_s1] ss:$0 sm:$0xff]  ;;  %vm266_vm2 = vcmask 261120   ;;  %s217_s11 = scalar_lea.vmem %s476_s5, %s478_s19  ;;  %vm310_vm3 = vcmask 90112  }
   0xd   : > { %376 = vmatpush3.bf16.msra.mxu0 %v393_v0  ;;  %s214_s27 = scalar_lea.vmem %s471_s0, %s364_s24  ;;  %v366_v6 = vld [vmem:[%s473_s2] ss:$0 sm:$0xff] }
   0xe   : > { %377 = vmatprep.subr.bf16.mxu0 %v403_v1  ;;  %v219_v3 = vld [vmem:[%s214_s27] sm:$0x3] }
   0xf   : > { %v220_v5 = vunpack.c.l.bf16 %v219_v3  ;;  %v253_v19 = vld [vmem:[%s475_s4] sm:$0x1] }
  0x11   : > { %378 = vmatpush3.bf16.msra.mxu0 %v394_v2  ;;  %v228_v7 = vmul.f32 %v365_v4, %v220_v5 }
  0x13   : > { %v236_v8 = vadd.f32 %v366_v6, %v228_v7 }
  0x15   : > { %v237_v9 = vmax.f32 %v236_v8, 0.0 }
  0x17   : > { %v239_v10 = vsel %vm238_vm1, %v237_v9, 0.0 }
  0x18   : > { %v240_v11 = vrot.slane %v239_v10, 4 }
  0x1a   : > { %v241_v12 = vadd.f32 %v240_v11, %v239_v10 }
  0x1c   : > { %v242_v13 = vrot.slane %v241_v12, 2 }
  0x1e   : > { %v243_v14 = vadd.f32 %v242_v13, %v241_v12 }
  0x20   : > { %v244_v15 = vrot.slane %v243_v14, 1 }
  0x22   : > { %v245_v16 = vadd.f32 %v244_v15, %v243_v14 }
  0x24   : > { %v247_v17 = vmul.f32 0.25, %v245_v16 }
  0x26   : > { %v248_v18 = vpack.c.bf16 %v247_v17, %v247_v17 }
  0x28   : > { %380 = vmatmul.mubr.msk.bf16.vlgmr.msra.gmra.mxu0 %vm266_vm2, %v248_v18 }
  0xe8   : > { %v304_v20 = vpop.f32.mrf.mxu0 }
  0xe9   : > { %v305_v21 = vadd.f32 %v304_v20, %v253_v19 }
  0xea   : > { %v381_v22 = vpop.f32.mrf.mxu0 }
  0xeb   : > { %311 = vst.msk [vmem:[%s217_s11] sm:$0x1] %vm310_vm3, %v305_v21 }
  0xec   : > { %v307_v23 = vpop.f32.mrf.mxu0 }
  0xee   : > { %v382_v24 = vpop.f32.mrf.mxu0 }
  0xef PF: > { %s15_s18 = sadd.s32 1, %s401_s18  }
  0xf0   : > { %p12_p4 = scmp.ge.s32.totalorder %s15_s18, 4  }
  0xf2   :  { %14 = sbr.rel (!%p12_p4) target bundleno = 1 (0x1), region = 70 }

// kernel: probabilistic_unet_forward.13
= control target key start
LH: loop header
LB: loop body
LE: loop exit
PB: predicated region body
PF: predicated region fallthrough
CT: control target
= control target key end

     0   :  { %10 = vsyncpa [#allocation3], 0  ;;  %s5567_s0 = inlined_call_operand.vmem [shape: f32[2,18,18,4], index: 0, kind: input, shape index: {}]   ;;  %s5568_s1 = inlined_call_operand.vmem [shape: bf16[9,4,8], index: 1, kind: input, shape index: {}]   ;;  %s5569_s2 = inlined_call_operand.vmem [shape: f32[1,8], index: 2, kind: input, shape index: {}]   ;;  %s5570_s3 = inlined_call_operand.vmem [shape: bf16[2,256,8], index: 3, kind: output, shape index: {0}]   ;;  %s5571_s4 = inlined_call_operand.hbm [shape: f32[2,2,8], index: 4, kind: output, shape index: {1}]  }
   0x1   :  { %12 = vsyncpa [#allocation3 + $0x1], 0  ;;  %s4329_s15 = smov 0   ;;  %s4331_s16 = smov 0  }
   0x2   :  { %s4333_s17 = smov 0   ;;  %s4335_s18 = smov 0  }
   0x3 LB: > { %s4350_s19 = sadd.s32 4294967295, %s4301_s18   ;;  %s3308_s20 = sadd.s32 4294967294, %s4301_s18   ;;  %s4301_s18 = sphi %s4335_s18, %s5577_s18   ;;  %s4297_s17 = sphi %s4333_s17, %s5576_s17   ;;  %s4293_s16 = sphi %s4331_s16, %s5575_s16   ;;  %s4289_s15 = sphi %s4329_s15, %s5574_s15  }
   0x4   : > { %s4354_s21 = sadd.s32 1, %s4301_s18   ;;  %s119_s22 = sadd.s32 1, %s4297_s17 }
   0x5   : > { %s116_s23 = ssub.s32 %s4301_s18, %s4354_s21  ;;  %p129_p0 = scmp.ne.s32.totalorder %s4297_s17, %s4293_s16 }
   0x6   : > { %p117_p1 = scmp.eq.s32.totalorder %s116_s23, 0  ;;  %p130_p2 = scmp.eq.s32.totalorder %s4350_s19, 1 }
   0x7   : > { %p135_p3 = scmp.ne.s32.totalorder %s4293_s16, %s4289_s15  ;;  %p136_p4 = scmp.eq.s32.totalorder %s3308_s20, 1 }
   0x8   : > { %s4365_s24 = scalar_select %p117_p1, %s4297_s17, %s119_s22  }
   0x9   : > { %p4367_p5 = por %p130_p2, %p129_p0  ;;  %p4371_p6 = por %p136_p4, %p135_p3 }
   0xa   : > { %p3311_p7 = scmp.ge.s32.totalorder %s4301_s18, 1  ;;  %p168_p8 = scmp.lt.s32.totalorder %s4301_s18, 3 }
   0xc   : > { %p169_p9 = pnand %p3311_p7, %p168_p8 }
   0xd   : > { %p199_p10 = scmp.lt.s32.totalorder (!%p169_p9), %s4350_s19, 1  ;;  %s196_s13 = sand.u32 (!%p169_p9), 1, %s4293_s16  }
   0xe   : > { %172 = sbr.rel (%p169_p9) target bundleno = 564 (0x234), region = 32  ;;  %s3312_s14 = sshll.u32 (!%p169_p9), %s196_s13, 1 }
   0xf   : > { %s3694_s20 = sshll.u32 (!%p169_p9), %s4350_s19, 5  ;;  %s198_s22 = scalar_lea.vmem (!%p169_p9), [#allocation2], %s3312_s14 }
  0x10   : > { %s3224_s23 = sshll.u32 (!%p169_p9), %s198_s22, 4  ;;  %s5532_s29 = scalar_lea.hbm (!%p169_p9), %s5571_s4, %s3694_s20  ;;  %s3225_s23 = int_to_ptr.vmem [resolvable:$true] %s3224_s23 }
  0x11   : > { %s3208_s30 = scalar_lea.sflag (!%p169_p9), [#allocation3], %s196_s13  ;;  %s4241_s5 = scalar_lea.vmem (!%p169_p9), %s3225_s23, 32 }
  0x12   : > { %p4242_p11 = scmp.ne.s32.totalorder (!%p169_p9), %s3225_s23, %s4241_s5 }
  0x13   : > { %v3316_v0 = vld [vmem:[%s5568_s1 + $0x2] sm:$0x3]  ;;  %vm358_vm0 = vcmask 1041408   ;;  %v258_v2 = vld [vmem:[%s5568_s1] sm:$0x3]  ;;  %s4391_s7 = scalar_select %p199_p10, %s4350_s19, 1 }
  0x14   : > { %4192 = vmatprep.subr.msk.bf16.mxu1 %vm358_vm0, %v3316_v0  ;;  %4191 = vmatprep.subr.msk.bf16.mxu0 %vm358_vm0, %v3316_v0  ;;  %v360_v1 = vsel %vm358_vm0, %v3316_v0, 0  ;;  %v3349_v3 = vld [vmem:[%s5568_s1 + $0x4] sm:$0x3]  ;;  %vm309_vm1 = vcmask 31744   ;;  %v572_v18 = vsel %vm358_vm0, %v258_v2, 0  ;;  %vm2994_vm2 = vcmask 60416   ;;  %p4243_p12 = pnand %p4242_p11, %p4367_p5 }
  0x15   : > { %4190 = vmatpush3.bf16.msra.mxu1 %v360_v1  ;;  %3884 = vmatpush3.bf16.msra.mxu0 %v360_v1  ;;  %s4201_s8 = smul.u32 432, %s4391_s7  ;;  %v834_v15 = vsel %vm358_vm0, %v3349_v3, 0  ;;  %v4433_v24 = vld [vmem:[%s5568_s1 + $0x6] sm:$0x3]  ;;  %v4438_v25 = vld [vmem:[%s5568_s1 + $0x8] sm:$0x3] }
  0x16   : > { %4193 = vmatprep.subr.msk.bf16.mxu1 %vm358_vm0, %v258_v2  ;;  %4194 = vmatprep.subr.msk.bf16.mxu0 %vm358_vm0, %v3349_v3  ;;  %s3697_s10 = sshll.u32 %s4391_s7, 7  ;;  %vm3027_vm3 = vcmask 64512   ;;  %vm3198_vm4 = vcmask 1040384   ;;  %vm3200_vm5 = vcmask 58368   ;;  %p4244_p13 = pneg %p4243_p12 }
  0x17   : > { %s4399_s11 = scalar_lea.vmem %s5567_s0, %s4201_s8  ;;  %s5323_s7 = scalar_lea.vmem %s5570_s3, %s3697_s10 }
  0x18   : > { %v259_v4 = vld [vmem:[%s4399_s11 + $0x1] sm:$0xff]  ;;  %v260_v5 = vld [vmem:[%s4399_s11 + $0x9] sm:$0xff]  ;;  %v261_v9 = vld [vmem:[%s4399_s11 + $0x19] sm:$0xff]  ;;  %s4303_s19 = smov [#allocation2]  }
  0x19   : > { %v275_v6 = vld [vmem:[%s4399_s11 + $0xc1] sm:$0xff]  ;;  %v291_v7 = vpack.c.bf16 %v260_v5, %v259_v4  ;;  %v276_v8 = vld [vmem:[%s4399_s11 + $0xc9] sm:$0xff]  ;;  %v277_v13 = vld [vmem:[%s4399_s11 + $0xd9] sm:$0xff]  ;;  %s4245_s6 = sshll.u32 %s4303_s19, 4  ;;  %s4246_s6 = int_to_ptr.vmem [resolvable:$false] %s4245_s6 }
  0x1a   : > { %v262_v10 = vld [vmem:[%s4399_s11 + $0x21] sm:$0xff]  ;;  %v4407_v11 = vpack.c.bf16 %v276_v8, %v275_v6  ;;  %v263_v16 = vld [vmem:[%s4399_s11 + $0x31] sm:$0xff]  ;;  %v264_v19 = vld [vmem:[%s4399_s11 + $0x39] sm:$0xff]  ;;  %v1423_v8 = vsel %vm358_vm0, %v4438_v25, 0  ;;  %s4247_s8 = scalar_lea.vmem %s4246_s6, 64  ;;  %p4248_p0 = scmp.lt.s32.totalorder %s3225_s23, %s4246_s6 }
  0x1b   : > { %v4409_v12 = vpack.c.bf16 %v262_v10, %v261_v9  ;;  %v278_v14 = vld [vmem:[%s4399_s11 + $0xe1] sm:$0xff]  ;;  %3885 = vmatprep.mubr.msk.bf16.mxu0 %vm309_vm1, %v291_v7  ;;  %v279_v20 = vld [vmem:[%s4399_s11 + $0xf1] sm:$0xff]  ;;  %v280_v21 = vld [vmem:[%s4399_s11 + $0xf9] sm:$0xff]  ;;  %v4426_v22 = vpack.c.bf16 %v264_v19, %v263_v16  ;;  %v1129_v10 = vsel %vm358_vm0, %v4433_v24, 0  ;;  %p4249_p1 = scmp.lt.s32.totalorder %s4247_s8, %s4241_s5 }
  0x1c   : > { %v4416_v17 = vpack.c.bf16 %v278_v14, %v277_v13  ;;  %3901 = vmatprep.mubr.msk.bf16.mxu1 %vm309_vm1, %v4407_v11  ;;  %v4428_v23 = vpack.c.bf16 %v280_v21, %v279_v20  ;;  %v265_v26 = vld [vmem:[%s4399_s11 + $0x49] sm:$0xff]  ;;  %v266_v27 = vld [vmem:[%s4399_s11 + $0x51] sm:$0xff]  ;;  %v267_v30 = vld [vmem:[%s4399_s11 + $0x61] sm:$0xff] }
  0x1d   : > { %3886 = vmatmul.mubr.msk.bf16.vlgmr.msra.gmra.mxu0 %vm309_vm1, %v4409_v12  ;;  %v281_v28 = vld [vmem:[%s4399_s11 + $0x109] sm:$0xff]  ;;  %v282_v29 = vld [vmem:[%s4399_s11 + $0x111] sm:$0xff]  ;;  %v283_v32 = vld [vmem:[%s4399_s11 + $0x121] sm:$0xff]  ;;  %v4456_v34 = vpack.c.bf16 %v266_v27, %v265_v26  ;;  %p4250_p2 = por %p4249_p1, %p4248_p0 }
  0x1e   : > { %3902 = vmatmul.mubr.msk.bf16.vlgmr.msra.gmra.mxu1 %vm309_vm1, %v4416_v17  ;;  %3952 = vmatpush3.bf16.msra.mxu0 %v834_v15  ;;  %v268_v31 = vld [vmem:[%s4399_s11 + $0x69] sm:$0xff]  ;;  %v4460_v35 = vpack.c.bf16 %v282_v29, %v281_v28  ;;  %v269_v38 = vld [vmem:[%s4399_s11 + $0x79] sm:$0xff]  ;;  %v270_v39 = vld [vmem:[%s4399_s11 + $0x81] sm:$0xff] }
  0x1f   : > { %3918 = vmatpush3.bf16.msra.mxu1 %v572_v18  ;;  %3889 = vmatprep.mubr.msk.bf16.mxu0 %vm309_vm1, %v4426_v22  ;;  %v284_v33 = vld [vmem:[%s4399_s11 + $0x129] sm:$0xff]  ;;  %v4462_v36 = vpack.c.bf16 %v268_v31, %v267_v30  ;;  %v285_v40 = vld [vmem:[%s4399_s11 + $0x139] sm:$0xff]  ;;  %v286_v41 = vld [vmem:[%s4399_s11 + $0x141] sm:$0xff]  ;;  %v4482_v46 = vpack.c.bf16 %v270_v39, %v269_v38  ;;  %p4251_p3 = pnand %p4250_p2, %p4244_p13 }
  0x20   : > { %3905 = vmatprep.mubr.msk.bf16.mxu1 %vm309_vm1, %v4428_v23  ;;  %4195 = vmatprep.subr.msk.bf16.mxu1 %vm358_vm0, %v4433_v24  ;;  %v4464_v37 = vpack.c.bf16 %v284_v33, %v283_v32  ;;  %v271_v42 = vld [vmem:[%s4399_s11 + $0x91] sm:$0xff]  ;;  %v272_v43 = vld [vmem:[%s4399_s11 + $0x99] sm:$0xff]  ;;  %v4484_v47 = vpack.c.bf16 %v286_v41, %v285_v40  ;;  %v273_v50 = vld [vmem:[%s4399_s11 + $0xa9] sm:$0xff] }
  0x21   : > { %4196 = vmatprep.subr.msk.bf16.mxu0 %vm358_vm0, %v4438_v25  ;;  %v287_v44 = vld [vmem:[%s4399_s11 + $0x151] sm:$0xff]  ;;  %v288_v45 = vld [vmem:[%s4399_s11 + $0x159] sm:$0xff]  ;;  %v4486_v48 = vpack.c.bf16 %v272_v43, %v271_v42  ;;  %v289_v52 = vld [vmem:[%s4399_s11 + $0x169] sm:$0xff] }
  0x22   : > { %v4488_v49 = vpack.c.bf16 %v288_v45, %v287_v44  ;;  %v274_v51 = vld [vmem:[%s4399_s11 + $0xb1] sm:$0xff]  ;;  %v735_v54 = vld [vmem:[%s4399_s11 + $0x2] sm:$0xff]  ;;  %v737_v62 = vld [vmem:[%s4399_s11 + $0x1a] sm:$0xff] }
  0x23   : > { %v290_v53 = vld [vmem:[%s4399_s11 + $0x171] sm:$0xff]  ;;  %v210_v56 = vld [vmem:[%s4399_s11] sm:$0xff]  ;;  %v211_v57 = vld [vmem:[%s4399_s11 + $0x8] sm:$0xff]  ;;  %v4506_v58 = vpack.c.bf16 %v274_v51, %v273_v50 }
  0x24   : > { %v736_v55 = vld [vmem:[%s4399_s11 + $0xa] sm:$0xff]  ;;  %v4508_v59 = vpack.c.bf16 %v290_v53, %v289_v52  ;;  %v242_v61 = vpack.c.bf16 %v211_v57, %v210_v56  ;;  %v738_v63 = vld [vmem:[%s4399_s11 + $0x22] sm:$0xff]  ;;  %v212_v0 = vld [vmem:[%s4399_s11 + $0x18] sm:$0xff] }
  0x25   : > { %3890 = vmatmul.mubr.msk.bf16.gmra.mxu0 %vm309_vm1, %v4456_v34  ;;  %v767_v60 = vpack.c.bf16 %v736_v55, %v735_v54  ;;  %v213_v1 = vld [vmem:[%s4399_s11 + $0x20] sm:$0xff]  ;;  %v214_v2 = vld [vmem:[%s4399_s11 + $0x30] sm:$0xff]  ;;  %v215_v3 = vld [vmem:[%s4399_s11 + $0x38] sm:$0xff]  ;;  %v4522_v4 = vpack.c.bf16 %v738_v63, %v737_v62 }
  0x26   : > { %3906 = vmatmul.mubr.msk.bf16.gmra.mxu1 %vm309_vm1, %v4460_v35  ;;  %3893 = vmatprep.mubr.msk.bf16.mxu0 %vm309_vm1, %v4462_v36  ;;  %v739_v5 = vld [vmem:[%s4399_s11 + $0x32] sm:$0xff]  ;;  %v740_v6 = vld [vmem:[%s4399_s11 + $0x3a] sm:$0xff]  ;;  %v4526_v7 = vpack.c.bf16 %v213_v1, %v212_v0  ;;  %v4530_v9 = vpack.c.bf16 %v215_v3, %v214_v2  ;;  %v4541_v14 = vld [vmem:[%s5568_s1 + $0xa] sm:$0x3] }
  0x27   : > { %3909 = vmatprep.mubr.msk.bf16.mxu1 %vm309_vm1, %v4464_v37  ;;  %v4534_v13 = vpack.c.bf16 %v740_v6, %v739_v5  ;;  %v4546_v15 = vld [vmem:[%s5568_s1 + $0xc] sm:$0x3]  ;;  %v742_v19 = vld [vmem:[%s4399_s11 + $0x52] sm:$0xff]  ;;  %v743_v21 = vld [vmem:[%s4399_s11 + $0x62] sm:$0xff] }
  0x28   : > { %v216_v16 = vld [vmem:[%s4399_s11 + $0x48] sm:$0xff]  ;;  %v217_v20 = vld [vmem:[%s4399_s11 + $0x50] sm:$0xff]  ;;  %v218_v25 = vld [vmem:[%s4399_s11 + $0x60] sm:$0xff] }
  0x29   : > { %v741_v18 = vld [vmem:[%s4399_s11 + $0x4a] sm:$0xff]  ;;  %v4568_v28 = vpack.c.bf16 %v217_v20, %v216_v16  ;;  %v220_v31 = vld [vmem:[%s4399_s11 + $0x78] sm:$0xff]  ;;  %v746_v33 = vld [vmem:[%s4399_s11 + $0x82] sm:$0xff] }
  0x2a   : > { %v744_v24 = vld [vmem:[%s4399_s11 + $0x6a] sm:$0xff]  ;;  %v4564_v27 = vpack.c.bf16 %v742_v19, %v741_v18  ;;  %v745_v32 = vld [vmem:[%s4399_s11 + $0x7a] sm:$0xff]  ;;  %v747_v39 = vld [vmem:[%s4399_s11 + $0x92] sm:$0xff] }
  0x2b   : > { %v219_v26 = vld [vmem:[%s4399_s11 + $0x68] sm:$0xff]  ;;  %v4570_v29 = vpack.c.bf16 %v744_v24, %v743_v21  ;;  %v221_v38 = vld [vmem:[%s4399_s11 + $0x80] sm:$0xff]  ;;  %v222_v41 = vld [vmem:[%s4399_s11 + $0x90] sm:$0xff]  ;;  %v4590_v43 = vpack.c.bf16 %v746_v33, %v745_v32 }
  0x2c   : > { %v4572_v30 = vpack.c.bf16 %v219_v26, %v218_v25  ;;  %v748_v40 = vld [vmem:[%s4399_s11 + $0x9a] sm:$0xff]  ;;  %v4592_v44 = vpack.c.bf16 %v221_v38, %v220_v31  ;;  %v224_v51 = vld [vmem:[%s4399_s11 + $0xa8] sm:$0xff]  ;;  %v750_v53 = vld [vmem:[%s4399_s11 + $0xb2] sm:$0xff] }
  0x2d   : > { %3894 = vmatmul.mubr.msk.bf16.gmra.mxu0 %vm309_vm1, %v4482_v46  ;;  %v223_v42 = vld [vmem:[%s4399_s11 + $0x98] sm:$0xff]  ;;  %v4594_v45 = vpack.c.bf16 %v748_v40, %v747_v39  ;;  %v749_v52 = vld [vmem:[%s4399_s11 + $0xaa] sm:$0xff]  ;;  %v751_v55 = vld [vmem:[%s4399_s11 + $0xc2] sm:$0xff] }
  0x2e   : > { %3910 = vmatmul.mubr.msk.bf16.gmra.mxu1 %vm309_vm1, %v4484_v47  ;;  %3897 = vmatprep.mubr.msk.bf16.mxu0 %vm309_vm1, %v4486_v48  ;;  %v4596_v50 = vpack.c.bf16 %v223_v42, %v222_v41  ;;  %v225_v54 = vld [vmem:[%s4399_s11 + $0xb0] sm:$0xff]  ;;  %v226_v57 = vld [vmem:[%s4399_s11 + $0xc0] sm:$0xff]  ;;  %v228_v1 = vld [vmem:[%s4399_s11 + $0xd8] sm:$0xff] }
  0x2f   : > { %3913 = vmatprep.mubr.msk.bf16.mxu1 %vm309_vm1, %v4488_v49  ;;  %v752_v56 = vld [vmem:[%s4399_s11 + $0xca] sm:$0xff]  ;;  %v4616_v62 = vpack.c.bf16 %v225_v54, %v224_v51  ;;  %v753_v2 = vld [vmem:[%s4399_s11 + $0xda] sm:$0xff]  ;;  %v754_v3 = vld [vmem:[%s4399_s11 + $0xe2] sm:$0xff] }
  0x30   : > { %v4618_v63 = vpack.c.bf16 %v752_v56, %v751_v55  ;;  %v229_v5 = vld [vmem:[%s4399_s11 + $0xe0] sm:$0xff]  ;;  %v755_v6 = vld [vmem:[%s4399_s11 + $0xf2] sm:$0xff]  ;;  %v4638_v18 = vpack.c.bf16 %v754_v3, %v753_v2  ;;  %v232_v24 = vld [vmem:[%s4399_s11 + $0x108] sm:$0xff] }
  0x31   : > { %v231_v16 = vld [vmem:[%s4399_s11 + $0xf8] sm:$0xff]  ;;  %v4640_v19 = vpack.c.bf16 %v229_v5, %v228_v1  ;;  %v757_v25 = vld [vmem:[%s4399_s11 + $0x10a] sm:$0xff]  ;;  %v759_v32 = vld [vmem:[%s4399_s11 + $0x122] sm:$0xff] }
  0x32   : > { %v758_v26 = vld [vmem:[%s4399_s11 + $0x112] sm:$0xff]  ;;  %v760_v33 = vld [vmem:[%s4399_s11 + $0x12a] sm:$0xff]  ;;  %v234_v38 = vld [vmem:[%s4399_s11 + $0x120] sm:$0xff] }
  0x33   : > { %v233_v31 = vld [vmem:[%s4399_s11 + $0x110] sm:$0xff]  ;;  %v235_v39 = vld [vmem:[%s4399_s11 + $0x128] sm:$0xff]  ;;  %v4662_v40 = vpack.c.bf16 %v758_v26, %v757_v25  ;;  %v4666_v42 = vpack.c.bf16 %v760_v33, %v759_v32  ;;  %v237_v55 = vld [vmem:[%s4399_s11 + $0x140] sm:$0xff]  ;;  %v1717_v32 = vsel %vm358_vm0, %v4541_v14, 0 }
  0x34   : > { %v4664_v41 = vpack.c.bf16 %v233_v31, %v232_v24  ;;  %v4668_v51 = vpack.c.bf16 %v235_v39, %v234_v38  ;;  %v762_v54 = vld [vmem:[%s4399_s11 + $0x142] sm:$0xff]  ;;  %v763_v56 = vld [vmem:[%s4399_s11 + $0x152] sm:$0xff]  ;;  %v2012_v31 = vsel %vm358_vm0, %v4546_v15, 0  ;;  %v3594_v33 = vld [vmem:[%s5568_s1 + $0xe] sm:$0x3] }
  0x35   : > { %3898 = vmatmul.mubr.msk.bf16.gmra.mxu0 %vm309_vm1, %v4506_v58  ;;  %v239_v1 = vld [vmem:[%s4399_s11 + $0x158] sm:$0xff]  ;;  %v241_v24 = vld [vmem:[%s4399_s11 + $0x170] sm:$0xff] }
  0x36   : > { %3914 = vmatmul.mubr.msk.bf16.gmra.mxu1 %vm309_vm1, %v4508_v59  ;;  %3953 = vmatprep.mubr.msk.bf16.mxu0 %vm309_vm1, %v767_v60  ;;  %v227_v60 = vld [vmem:[%s4399_s11 + $0xc8] sm:$0xff] }
  0x37   : > { %3919 = vmatprep.mubr.msk.bf16.mxu1 %vm309_vm1, %v242_v61  ;;  %v4614_v61 = vpack.c.bf16 %v750_v53, %v749_v52  ;;  %v4620_v0 = vpack.c.bf16 %v227_v60, %v226_v57  ;;  %v236_v52 = vld [vmem:[%s4399_s11 + $0x138] sm:$0xff]  ;;  %v238_v60 = vld [vmem:[%s4399_s11 + $0x150] sm:$0xff] }
  0x38   : > { %v761_v53 = vld [vmem:[%s4399_s11 + $0x13a] sm:$0xff]  ;;  %v4688_v3 = vpack.c.bf16 %v237_v55, %v236_v52  ;;  %v3495_v55 = vld [vmem:[%s4399_s11 + $0x18a] sm:$0xff] }
  0x39   : > { %v764_v57 = vld [vmem:[%s4399_s11 + $0x15a] sm:$0xff]  ;;  %v4686_v2 = vpack.c.bf16 %v762_v54, %v761_v53  ;;  %v3494_v54 = vld [vmem:[%s4399_s11 + $0x182] sm:$0xff] }
  0x3a   : > { %v4690_v5 = vpack.c.bf16 %v764_v57, %v763_v56  ;;  %v3544_v52 = vld [vmem:[%s4399_s11 + $0x1a0] sm:$0xff] }
  0x3d   : > { %3954 = vmatmul.mubr.msk.bf16.vlgmr.msra.gmra.mxu0 %vm309_vm1, %v4522_v4 }
  0x3e   : > { %3920 = vmatmul.mubr.msk.bf16.vlgmr.msra.gmra.mxu1 %vm309_vm1, %v4526_v7  ;;  %4020 = vmatpush3.bf16.msra.mxu0 %v1423_v8  ;;  %v756_v8 = vld [vmem:[%s4399_s11 + $0xfa] sm:$0xff] }
  0x3f   : > { %3986 = vmatpush3.bf16.msra.mxu1 %v1129_v10  ;;  %3923 = vmatprep.mubr.msk.bf16.mxu1 %vm309_vm1, %v4530_v9  ;;  %v230_v10 = vld [vmem:[%s4399_s11 + $0xf0] sm:$0xff]  ;;  %v4642_v20 = vpack.c.bf16 %v756_v8, %v755_v6  ;;  %v4692_v6 = vpack.c.bf16 %v239_v1, %v238_v60 }
  0x40   : > { %3957 = vmatprep.mubr.msk.bf16.mxu0 %vm309_vm1, %v4534_v13  ;;  %4197 = vmatprep.subr.msk.bf16.mxu1 %vm358_vm0, %v4541_v14  ;;  %v4644_v21 = vpack.c.bf16 %v231_v16, %v230_v10  ;;  %v765_v8 = vld [vmem:[%s4399_s11 + $0x16a] sm:$0xff]  ;;  %v766_v10 = vld [vmem:[%s4399_s11 + $0x172] sm:$0xff] }
  0x41   : > { %4198 = vmatprep.subr.msk.bf16.mxu0 %vm358_vm0, %v4546_v15  ;;  %v240_v16 = vld [vmem:[%s4399_s11 + $0x168] sm:$0xff]  ;;  %v4706_v25 = vpack.c.bf16 %v766_v10, %v765_v8 }
  0x42   : > { %v4708_v26 = vpack.c.bf16 %v241_v24, %v240_v16 }
  0x45   : > { %3958 = vmatmul.mubr.msk.bf16.gmra.mxu0 %vm309_vm1, %v4564_v27 }
  0x46   : > { %3924 = vmatmul.mubr.msk.bf16.gmra.mxu1 %vm309_vm1, %v4568_v28  ;;  %3961 = vmatprep.mubr.msk.bf16.mxu0 %vm309_vm1, %v4570_v29 }
  0x47   : > { %3927 = vmatprep.mubr.msk.bf16.mxu1 %vm309_vm1, %v4572_v30 }
  0x4d   : > { %3962 = vmatmul.mubr.msk.bf16.gmra.mxu0 %vm309_vm1, %v4590_v43 }
  0x4e   : > { %3928 = vmatmul.mubr.msk.bf16.gmra.mxu1 %vm309_vm1, %v4592_v44  ;;  %3965 = vmatprep.mubr.msk.bf16.mxu0 %vm309_vm1, %v4594_v45 }
  0x4f   : > { %3931 = vmatprep.mubr.msk.bf16.mxu1 %vm309_vm1, %v4596_v50 }
  0x55   : > { %3966 = vmatmul.mubr.msk.bf16.gmra.mxu0 %vm309_vm1, %v4614_v61 }
  0x56   : > { %3932 = vmatmul.mubr.msk.bf16.gmra.mxu1 %vm309_vm1, %v4616_v62  ;;  %3969 = vmatprep.mubr.msk.bf16.mxu0 %vm309_vm1, %v4618_v63 }
  0x57   : > { %3935 = vmatprep.mubr.msk.bf16.mxu1 %vm309_vm1, %v4620_v0 }
  0x5d   : > { %3970 = vmatmul.mubr.msk.bf16.gmra.mxu0 %vm309_vm1, %v4638_v18 }
  0x5e   : > { %3936 = vmatmul.mubr.msk.bf16.gmra.mxu1 %vm309_vm1, %v4640_v19  ;;  %3973 = vmatprep.mubr.msk.bf16.mxu0 %vm309_vm1, %v4642_v20 }
  0x5f   : > { %3939 = vmatprep.mubr.msk.bf16.mxu1 %vm309_vm1, %v4644_v21 }
  0x65   : > { %3974 = vmatmul.mubr.msk.bf16.gmra.mxu0 %vm309_vm1, %v4662_v40 }
  0x66   : > { %3940 = vmatmul.mubr.msk.bf16.gmra.mxu1 %vm309_vm1, %v4664_v41  ;;  %3977 = vmatprep.mubr.msk.bf16.mxu0 %vm309_vm1, %v4666_v42 }
  0x67   : > { %3943 = vmatprep.mubr.msk.bf16.mxu1 %vm309_vm1, %v4668_v51 }
  0x6d   : > { %3978 = vmatmul.mubr.msk.bf16.gmra.mxu0 %vm309_vm1, %v4686_v2 }
  0x6e   : > { %3944 = vmatmul.mubr.msk.bf16.gmra.mxu1 %vm309_vm1, %v4688_v3  ;;  %3981 = vmatprep.mubr.msk.bf16.mxu0 %vm309_vm1, %v4690_v5 }
  0x6f   : > { %3947 = vmatprep.mubr.msk.bf16.mxu1 %vm309_vm1, %v4692_v6 }
  0x75   : > { %3982 = vmatmul.mubr.msk.bf16.gmra.mxu0 %vm309_vm1, %v4706_v25 }
  0x76   : > { %3948 = vmatmul.mubr.msk.bf16.gmra.mxu1 %vm309_vm1, %v4708_v26  ;;  %4021 = vmatprep.mubr.msk.bf16.mxu0 %vm309_vm1, %v4409_v12  ;;  %v3643_v12 = vld [vmem:[%s5568_s1 + $0x10] sm:$0x3] }
  0x77   : > { %3987 = vmatprep.mubr.msk.bf16.mxu1 %vm309_vm1, %v4526_v7 }
  0x7d   : > { %4022 = vmatmul.mubr.msk.bf16.vlgmr.msra.gmra.mxu0 %vm309_vm1, %v4426_v22 }
  0x7e   : > { %3988 = vmatmul.mubr.msk.bf16.vlgmr.msra.gmra.mxu1 %vm309_vm1, %v4530_v9  ;;  %4088 = vmatpush3.bf16.msra.mxu0 %v2012_v31 }
  0x7f   : > { %4054 = vmatpush3.bf16.msra.mxu1 %v1717_v32  ;;  %3991 = vmatprep.mubr.msk.bf16.mxu1 %vm309_vm1, %v4568_v28 }
  0x80   : > { %4025 = vmatprep.mubr.msk.bf16.mxu0 %vm309_vm1, %v4456_v34  ;;  %4199 = vmatprep.subr.msk.bf16.mxu1 %vm358_vm0, %v3594_v33 }
  0x81   : > { %4200 = vmatprep.subr.msk.bf16.mxu0 %vm358_vm0, %v3643_v12 }
  0x85   : > { %4026 = vmatmul.mubr.msk.bf16.gmra.mxu0 %vm309_vm1, %v4462_v36 }
  0x86   : > { %3992 = vmatmul.mubr.msk.bf16.gmra.mxu1 %vm309_vm1, %v4572_v30  ;;  %4029 = vmatprep.mubr.msk.bf16.mxu0 %vm309_vm1, %v4482_v46 }
  0x87   : > { %3995 = vmatprep.mubr.msk.bf16.mxu1 %vm309_vm1, %v4592_v44 }
  0x8d   : > { %4030 = vmatmul.mubr.msk.bf16.gmra.mxu0 %vm309_vm1, %v4486_v48  ;;  %v2600_v48 = vsel %vm358_vm0, %v3643_v12, 0 }
  0x8e   : > { %3996 = vmatmul.mubr.msk.bf16.gmra.mxu1 %vm309_vm1, %v4596_v50  ;;  %4033 = vmatprep.mubr.msk.bf16.mxu0 %vm309_vm1, %v4506_v58 }
  0x8f   : > { %3999 = vmatprep.mubr.msk.bf16.mxu1 %vm309_vm1, %v4616_v62 }
  0x95   : > { %4034 = vmatmul.mubr.msk.bf16.gmra.mxu0 %vm309_vm1, %v4407_v11  ;;  %v3445_v11 = vld [vmem:[%s4399_s11 + $0x181] sm:$0xff] }
  0x96   : > { %4000 = vmatmul.mubr.msk.bf16.gmra.mxu1 %vm309_vm1, %v4620_v0  ;;  %4037 = vmatprep.mubr.msk.bf16.mxu0 %vm309_vm1, %v4416_v17  ;;  %v3446_v17 = vld [vmem:[%s4399_s11 + $0x189] sm:$0xff] }
  0x97   : > { %4003 = vmatprep.mubr.msk.bf16.mxu1 %vm309_vm1, %v4640_v19 }
  0x9d   : > { %4038 = vmatmul.mubr.msk.bf16.gmra.mxu0 %vm309_vm1, %v4428_v23  ;;  %v3396_v23 = vld [vmem:[%s4399_s11 + $0x180] sm:$0xff] }
  0x9e   : > { %4004 = vmatmul.mubr.msk.bf16.gmra.mxu1 %vm309_vm1, %v4644_v21  ;;  %4041 = vmatprep.mubr.msk.bf16.mxu0 %vm309_vm1, %v4460_v35  ;;  %v3397_v35 = vld [vmem:[%s4399_s11 + $0x188] sm:$0xff] }
  0x9f   : > { %4007 = vmatprep.mubr.msk.bf16.mxu1 %vm309_vm1, %v4664_v41 }
  0xa5   : > { %4042 = vmatmul.mubr.msk.bf16.gmra.mxu0 %vm309_vm1, %v4464_v37  ;;  %v4790_v37 = vpack.c.bf16 %v3446_v17, %v3445_v11 }
  0xa6   : > { %4008 = vmatmul.mubr.msk.bf16.gmra.mxu1 %vm309_vm1, %v4668_v51  ;;  %4045 = vmatprep.mubr.msk.bf16.mxu0 %vm309_vm1, %v4484_v47  ;;  %v1077_v47 = vpack.c.bf16 %v3397_v35, %v3396_v23  ;;  %v3570_v23 = vld [vmem:[%s4399_s11 + $0x91] sm:$0xff]  ;;  %v3571_v35 = vld [vmem:[%s4399_s11 + $0x99] sm:$0xff] }
  0xa7   : > { %4011 = vmatprep.mubr.msk.bf16.mxu1 %vm309_vm1, %v4688_v3 }
  0xad   : > { %4046 = vmatmul.mubr.msk.bf16.gmra.mxu0 %vm309_vm1, %v4488_v49  ;;  %v2306_v49 = vsel %vm358_vm0, %v3594_v33, 0 }
  0xae   : > { %4012 = vmatmul.mubr.msk.bf16.gmra.mxu1 %vm309_vm1, %v4692_v6  ;;  %4049 = vmatprep.mubr.msk.bf16.mxu0 %vm309_vm1, %v4508_v59 }
  0xaf   : > { %4015 = vmatprep.mubr.msk.bf16.mxu1 %vm309_vm1, %v4708_v26 }
  0xb5   : > { %4050 = vmatmul.mubr.msk.bf16.gmra.mxu0 %vm309_vm1, %v4790_v37 }
  0xb6   : > { %4016 = vmatmul.mubr.msk.bf16.gmra.mxu1 %vm309_vm1, %v1077_v47  ;;  %4089 = vmatprep.mubr.msk.bf16.mxu0 %vm309_vm1, %v4530_v9 }
  0xb7   : > { %4055 = vmatprep.mubr.msk.bf16.mxu1 %vm309_vm1, %v4522_v4 }
  0xbd   : > { %4090 = vmatmul.mubr.msk.bf16.vlgmr.msra.gmra.mxu0 %vm309_vm1, %v4568_v28 }
  0xbe   : > { %4056 = vmatmul.mubr.msk.bf16.vlgmr.msra.gmra.mxu1 %vm309_vm1, %v4534_v13  ;;  %4156 = vmatpush3.bf16.msra.mxu0 %v2600_v48 }
  0xbf   : > { %4122 = vmatpush3.bf16.msra.mxu1 %v2306_v49  ;;  %4059 = vmatprep.mubr.msk.bf16.mxu1 %vm309_vm1, %v4564_v27 }
  0xc0   : > { %4093 = vmatprep.mubr.msk.bf16.mxu0 %vm309_vm1, %v4572_v30 }
  0xc5   : > { %4094 = vmatmul.mubr.msk.bf16.gmra.mxu0 %vm309_vm1, %v4592_v44 }
  0xc6   : > { %4060 = vmatmul.mubr.msk.bf16.gmra.mxu1 %vm309_vm1, %v4570_v29  ;;  %4097 = vmatprep.mubr.msk.bf16.mxu0 %vm309_vm1, %v4596_v50 }
  0xc7   : > { %4063 = vmatprep.mubr.msk.bf16.mxu1 %vm309_vm1, %v4590_v43 }
  0xcd   : > { %4098 = vmatmul.mubr.msk.bf16.gmra.mxu0 %vm309_vm1, %v4616_v62 }
  0xce   : > { %4064 = vmatmul.mubr.msk.bf16.gmra.mxu1 %vm309_vm1, %v4594_v45  ;;  %4101 = vmatprep.mubr.msk.bf16.mxu0 %vm309_vm1, %v4620_v0 }
  0xcf   : > { %4067 = vmatprep.mubr.msk.bf16.mxu1 %vm309_vm1, %v4614_v61 }
  0xd5   : > { %4102 = vmatmul.mubr.msk.bf16.gmra.mxu0 %vm309_vm1, %v4640_v19 }
  0xd6   : > { %4068 = vmatmul.mubr.msk.bf16.gmra.mxu1 %vm309_vm1, %v4618_v63  ;;  %4105 = vmatprep.mubr.msk.bf16.mxu0 %vm309_vm1, %v4644_v21 }
  0xd7   : > { %4071 = vmatprep.mubr.msk.bf16.mxu1 %vm309_vm1, %v4638_v18 }
  0xdd   : > { %v3887_v58 = vpop.f32.mrf.mxu0  ;;  %4106 = vmatmul.mubr.msk.bf16.gmra.mxu0 %vm309_vm1, %v4664_v41 }
  0xde   : > { %v4835_v59 = vpop.f32.mrf.mxu1  ;;  %4072 = vmatmul.mubr.msk.bf16.gmra.mxu1 %vm309_vm1, %v4642_v20  ;;  %4109 = vmatprep.mubr.msk.bf16.mxu0 %vm309_vm1, %v4668_v51  ;;  %v3543_v51 = vld [vmem:[%s4399_s11 + $0x198] sm:$0xff] }
  0xdf   : > { %v396_v4 = vpop.f32.mrf.mxu0  ;;  %4075 = vmatprep.mubr.msk.bf16.mxu1 %vm309_vm1, %v4662_v40  ;;  %v1960_v60 = vpack.c.bf16 %v3544_v52, %v3543_v51 }
  0xe0   : > { %v4843_v7 = vpop.f32.mrf.mxu1 }
  0xe1   : > { %v3888_v9 = vpop.f32.mrf.mxu0 }
  0xe2   : > { %v4845_v14 = vpop.f32.mrf.mxu1 }
  0xe3   : > { %v4847_v15 = vpop.f32.mrf.mxu0 }
  0xe4   : > { %v4849_v28 = vpop.f32.mrf.mxu1 }
  0xe5   : > { %v4851_v30 = vpop.f32.mrf.mxu0  ;;  %4110 = vmatmul.mubr.msk.bf16.gmra.mxu0 %vm309_vm1, %v4688_v3  ;;  %v4898_v3 = vpack.c.bf16 %v3495_v55, %v3494_v54 }
  0xe6   : > { %v4855_v44 = vpop.f32.mrf.mxu1  ;;  %4076 = vmatmul.mubr.msk.bf16.gmra.mxu1 %vm309_vm1, %v4666_v42  ;;  %4113 = vmatprep.mubr.msk.bf16.mxu0 %vm309_vm1, %v4692_v6 }
  0xe7   : > { %v4861_v50 = vpop.f32.mrf.mxu0  ;;  %4079 = vmatprep.mubr.msk.bf16.mxu1 %vm309_vm1, %v4686_v2 }
  0xe8   : > { %v4865_v62 = vpop.f32.mrf.mxu1 }
  0xe9   : > { %v4867_v0 = vpop.f32.mrf.mxu0 }
  0xea   : > { %v4869_v19 = vpop.f32.mrf.mxu1 }
  0xeb   : > { %v4871_v21 = vpop.f32.mrf.mxu0 }
  0xec   : > { %v4873_v38 = vpop.f32.mrf.mxu1 }
  0xed   : > { %v4875_v39 = vpop.f32.mrf.mxu0  ;;  %4114 = vmatmul.mubr.msk.bf16.gmra.mxu0 %vm309_vm1, %v4708_v26 }
  0xee   : > { %v4879_v41 = vpop.f32.mrf.mxu1  ;;  %4080 = vmatmul.mubr.msk.bf16.gmra.mxu1 %vm309_vm1, %v4690_v5  ;;  %4117 = vmatprep.mubr.msk.bf16.mxu0 %vm309_vm1, %v1077_v47 }
  0xef   : > { %v4886_v53 = vpop.f32.mrf.mxu0  ;;  %4083 = vmatprep.mubr.msk.bf16.mxu1 %vm309_vm1, %v4706_v25 }
  0xf0   : > { %v4892_v56 = vpop.f32.mrf.mxu1 }
  0xf1   : > { %v4894_v57 = vpop.f32.mrf.mxu0 }
  0xf2   : > { %v4896_v1 = vpop.f32.mrf.mxu1 }
  0xf3   : > { %v4900_v6 = vpop.f32.mrf.mxu0 }
  0xf4   : > { %v4902_v8 = vpop.f32.mrf.mxu1 }
  0xf5   : > { %v4904_v10 = vpop.f32.mrf.mxu0  ;;  %4118 = vmatmul.mubr.msk.bf16.gmra.mxu0 %vm309_vm1, %v1960_v60 }
  0xf6   : > { %v4907_v16 = vpop.f32.mrf.mxu1  ;;  %4084 = vmatmul.mubr.msk.bf16.gmra.mxu1 %vm309_vm1, %v4898_v3  ;;  %4157 = vmatprep.mubr.msk.bf16.mxu0 %vm309_vm1, %v4534_v13 }
  0xf7   : > { %v4913_v24 = vpop.f32.mrf.mxu0  ;;  %4123 = vmatprep.mubr.msk.bf16.mxu1 %vm309_vm1, %v4426_v22 }
  0xf8   : > { %v4917_v25 = vpop.f32.mrf.mxu1 }
  0xf9   : > { %v4919_v26 = vpop.f32.mrf.mxu0 }
  0xfa   : > { %v4921_v31 = vpop.f32.mrf.mxu1 }
  0xfb   : > { %v4923_v32 = vpop.f32.mrf.mxu0 }
  0xfc   : > { %v4925_v33 = vpop.f32.mrf.mxu1 }
  0xfd   : > { %v3955_v12 = vpop.f32.mrf.mxu0  ;;  %4158 = vmatmul.mubr.msk.bf16.vlgmr.msra.gmra.mxu0 %vm309_vm1, %v4564_v27 }
  0xfe   : > { %v3921_v13 = vpop.f32.mrf.mxu1  ;;  %4124 = vmatmul.mubr.msk.bf16.vlgmr.msra.gmra.mxu1 %vm309_vm1, %v4456_v34  ;;  %4161 = vmatprep.mubr.msk.bf16.mxu0 %vm309_vm1, %v4570_v29  ;;  %v2243_v29 = vpack.c.bf16 %v3571_v35, %v3570_v23 }
  0xff   : > { %v617_v22 = vadd.f32 %v3921_v13, %v3887_v58  ;;  %v870_v11 = vpop.f32.mrf.mxu0  ;;  %4127 = vmatprep.mubr.msk.bf16.mxu1 %vm309_vm1, %v4462_v36  ;;  %v3572_v13 = vld [vmem:[%s4399_s11 + $0xa9] sm:$0xff] }
 0x100   : > { %v608_v17 = vpop.f32.mrf.mxu1 }
 0x101   : > { %v4937_v47 = vadd.f32 %v3955_v12, %v617_v22  ;;  %v609_v48 = vadd.f32 %v608_v17, %v396_v4  ;;  %v3956_v49 = vpop.f32.mrf.mxu0  ;;  %v3575_v17 = vld [vmem:[%s4399_s11 + $0xc9] sm:$0xff] }
 0x102   : > { %v3922_v27 = vpop.f32.mrf.mxu1 }
 0x103   : > { %v4939_v51 = vadd.f32 %v870_v11, %v609_v48  ;;  %v620_v34 = vadd.f32 %v3922_v27, %v3888_v9  ;;  %v873_v52 = vpop.f32.mrf.mxu0  ;;  %v3574_v11 = vld [vmem:[%s4399_s11 + $0xc1] sm:$0xff] }
 0x104   : > { %v611_v58 = vpop.f32.mrf.mxu1  ;;  %v2245_v27 = vpack.c.bf16 %v3575_v17, %v3574_v11 }
 0x105   : > { %v4941_v54 = vadd.f32 %v3956_v49, %v620_v34  ;;  %v612_v36 = vadd.f32 %v611_v58, %v4847_v15  ;;  %v3959_v55 = vpop.f32.mrf.mxu0  ;;  %4162 = vmatmul.mubr.msk.bf16.gmra.mxu0 %vm309_vm1, %v4590_v43  ;;  %v3573_v15 = vld [vmem:[%s4399_s11 + $0xb1] sm:$0xff] }
 0x106   : > { %v3925_v4 = vpop.f32.mrf.mxu1  ;;  %4128 = vmatmul.mubr.msk.bf16.gmra.mxu1 %vm309_vm1, %v4482_v46  ;;  %4165 = vmatprep.mubr.msk.bf16.mxu0 %vm309_vm1, %v4594_v45  ;;  %v2244_v48 = vpack.c.bf16 %v3573_v15, %v3572_v13  ;;  %v3579_v13 = vld [vmem:[%s4399_s11 + $0xf9] sm:$0xff] }
 0x107   : > { %v4950_v9 = vadd.f32 %v873_v52, %v612_v36  ;;  %v633_v60 = vadd.f32 %v3925_v4, %v4851_v30  ;;  %v886_v12 = vpop.f32.mrf.mxu0  ;;  %4131 = vmatprep.mubr.msk.bf16.mxu1 %vm309_vm1, %v2243_v29  ;;  %v3576_v4 = vld [vmem:[%s4399_s11 + $0xd9] sm:$0xff] }
 0x108   : > { %v624_v22 = vpop.f32.mrf.mxu1 }
 0x109   : > { %v4958_v43 = vadd.f32 %v3959_v55, %v633_v60  ;;  %v625_v23 = vadd.f32 %v624_v22, %v4861_v50  ;;  %v3960_v46 = vpop.f32.mrf.mxu0  ;;  %v3577_v60 = vld [vmem:[%s4399_s11 + $0xe1] sm:$0xff] }
 0x10a   : > { %v3926_v35 = vpop.f32.mrf.mxu1  ;;  %v2246_v17 = vpack.c.bf16 %v3577_v60, %v3576_v4 }
 0x10b   : > { %v4961_v45 = vadd.f32 %v886_v12, %v625_v23  ;;  %v636_v30 = vadd.f32 %v3926_v35, %v4867_v0  ;;  %v889_v49 = vpop.f32.mrf.mxu0  ;;  %v3578_v12 = vld [vmem:[%s4399_s11 + $0xf1] sm:$0xff] }
 0x10c   : > { %v627_v34 = vpop.f32.mrf.mxu1 }
 0x10d   : > { %v4964_v52 = vadd.f32 %v3960_v46, %v636_v30  ;;  %v628_v29 = vadd.f32 %v627_v34, %v4871_v21  ;;  %v3963_v58 = vpop.f32.mrf.mxu0  ;;  %4166 = vmatmul.mubr.msk.bf16.gmra.mxu0 %vm309_vm1, %v4614_v61  ;;  %v2247_v46 = vpack.c.bf16 %v3579_v13, %v3578_v12 }
 0x10e   : > { %v3929_v50 = vpop.f32.mrf.mxu1  ;;  %4132 = vmatmul.mubr.msk.bf16.gmra.mxu1 %vm309_vm1, %v2244_v48  ;;  %4169 = vmatprep.mubr.msk.bf16.mxu0 %vm309_vm1, %v4618_v63 }
 0x10f   : > { %v4972_v0 = vadd.f32 %v889_v49, %v628_v29  ;;  %v649_v36 = vadd.f32 %v3929_v50, %v4875_v39  ;;  %v902_v55 = vpop.f32.mrf.mxu0  ;;  %4135 = vmatprep.mubr.msk.bf16.mxu1 %vm309_vm1, %v2245_v27  ;;  %v3580_v29 = vld [vmem:[%s4399_s11 + $0x109] sm:$0xff]  ;;  %v3582_v50 = vld [vmem:[%s4399_s11 + $0x121] sm:$0xff] }
 0x110   : > { %v640_v21 = vpop.f32.mrf.mxu1 }
 0x111   : > { %v4980_v15 = vadd.f32 %v3963_v58, %v649_v36  ;;  %v641_v61 = vadd.f32 %v640_v21, %v4886_v53  ;;  %v3964_v22 = vpop.f32.mrf.mxu0  ;;  %v3581_v58 = vld [vmem:[%s4399_s11 + $0x111] sm:$0xff]  ;;  %v3583_v36 = vld [vmem:[%s4399_s11 + $0x129] sm:$0xff] }
 0x112   : > { %v3930_v11 = vpop.f32.mrf.mxu1  ;;  %v2248_v21 = vpack.c.bf16 %v3581_v58, %v3580_v29  ;;  %v2249_v13 = vpack.c.bf16 %v3583_v36, %v3582_v50 }
 0x113   : > { %v4983_v63 = vadd.f32 %v902_v55, %v641_v61  ;;  %v652_v39 = vadd.f32 %v3930_v11, %v4894_v57  ;;  %v905_v23 = vpop.f32.mrf.mxu0 }
 0x114   : > { %v643_v35 = vpop.f32.mrf.mxu1 }
 0x115   : > { %v4986_v48 = vadd.f32 %v3964_v22, %v652_v39  ;;  %v644_v30 = vadd.f32 %v643_v35, %v4900_v6  ;;  %v3967_v49 = vpop.f32.mrf.mxu0  ;;  %4170 = vmatmul.mubr.msk.bf16.gmra.mxu0 %vm309_vm1, %v4638_v18  ;;  %v3585_v35 = vld [vmem:[%s4399_s11 + $0x141] sm:$0xff] }
 0x116   : > { %v3933_v53 = vpop.f32.mrf.mxu1  ;;  %4136 = vmatmul.mubr.msk.bf16.gmra.mxu1 %vm309_vm1, %v2246_v17  ;;  %4173 = vmatprep.mubr.msk.bf16.mxu0 %vm309_vm1, %v4642_v20 }
 0x117   : > { %v4994_v57 = vadd.f32 %v905_v23, %v644_v30  ;;  %v665_v27 = vadd.f32 %v3933_v53, %v4904_v10  ;;  %v918_v34 = vpop.f32.mrf.mxu0  ;;  %4139 = vmatprep.mubr.msk.bf16.mxu1 %vm309_vm1, %v2247_v46  ;;  %v3584_v46 = vld [vmem:[%s4399_s11 + $0x139] sm:$0xff]  ;;  %v3586_v30 = vld [vmem:[%s4399_s11 + $0x151] sm:$0xff] }
 0x118   : > { %v656_v6 = vpop.f32.mrf.mxu1 }
 0x119   : > { %v5002_v55 = vadd.f32 %v3967_v49, %v665_v27  ;;  %v657_v18 = vadd.f32 %v656_v6, %v4913_v24  ;;  %v3968_v4 = vpop.f32.mrf.mxu0  ;;  %v3587_v49 = vld [vmem:[%s4399_s11 + $0x159] sm:$0xff] }
 0x11a   : > { %v3934_v60 = vpop.f32.mrf.mxu1  ;;  %v2251_v6 = vpack.c.bf16 %v3587_v49, %v3586_v30 }
 0x11b   : > { %v5005_v20 = vadd.f32 %v918_v34, %v657_v18  ;;  %v668_v10 = vadd.f32 %v3934_v60, %v4919_v26  ;;  %v921_v12 = vpop.f32.mrf.mxu0  ;;  %v2250_v34 = vpack.c.bf16 %v3585_v35, %v3584_v46  ;;  %v3638_v60 = vld [vmem:[%s4399_s11 + $0x172] sm:$0xff] }
 0x11c   : > { %v659_v61 = vpop.f32.mrf.mxu1 }
 0x11d   : > { %v5008_v22 = vadd.f32 %v3968_v4, %v668_v10  ;;  %v660_v11 = vadd.f32 %v659_v61, %v4923_v32  ;;  %v3971_v17 = vpop.f32.mrf.mxu0  ;;  %4174 = vmatmul.mubr.msk.bf16.gmra.mxu0 %vm309_vm1, %v4662_v40 }
 0x11e   : > { %v3937_v24 = vpop.f32.mrf.mxu1  ;;  %4140 = vmatmul.mubr.msk.bf16.gmra.mxu1 %vm309_vm1, %v2248_v21  ;;  %4177 = vmatprep.mubr.msk.bf16.mxu0 %vm309_vm1, %v4666_v42 }
 0x11f   : > { %v5016_v26 = vadd.f32 %v921_v12, %v660_v11  ;;  %v681_v39 = vadd.f32 %v3937_v24, %v4835_v59  ;;  %v934_v23 = vpop.f32.mrf.mxu0  ;;  %4143 = vmatprep.mubr.msk.bf16.mxu1 %vm309_vm1, %v2249_v13  ;;  %v3589_v13 = vld [vmem:[%s4399_s11 + $0x171] sm:$0xff] }
 0x120   : > { %v672_v32 = vpop.f32.mrf.mxu1 }
 0x121   : > { %v5024_v53 = vadd.f32 %v3971_v17, %v681_v39  ;;  %v673_v40 = vadd.f32 %v672_v32, %v4843_v7  ;;  %v3972_v27 = vpop.f32.mrf.mxu0 }
 0x122   : > { %v3938_v42 = vpop.f32.mrf.mxu1 }
 0x123   : > { %v5027_v29 = vadd.f32 %v934_v23, %v673_v40  ;;  %v684_v59 = vadd.f32 %v3938_v42, %v4845_v14  ;;  %v937_v58 = vpop.f32.mrf.mxu0  ;;  %v3637_v14 = vld [vmem:[%s4399_s11 + $0x16a] sm:$0xff]  ;;  %v3641_v40 = vld [vmem:[%s4399_s11 + $0x19a] sm:$0xff] }
 0x124   : > { %v675_v50 = vpop.f32.mrf.mxu1 }
 0x125   : > { %v5030_v36 = vadd.f32 %v3972_v27, %v684_v59  ;;  %v676_v18 = vadd.f32 %v675_v50, %v4849_v28  ;;  %v3975_v4 = vpop.f32.mrf.mxu0  ;;  %4178 = vmatmul.mubr.msk.bf16.gmra.mxu0 %vm309_vm1, %v4686_v2  ;;  %v3588_v28 = vld [vmem:[%s4399_s11 + $0x169] sm:$0xff]  ;;  %v3593_v59 = vld [vmem:[%s4399_s11 + $0x1a1] sm:$0xff] }
 0x126   : > { %v3941_v7 = vpop.f32.mrf.mxu1  ;;  %4144 = vmatmul.mubr.msk.bf16.gmra.mxu1 %vm309_vm1, %v2250_v34  ;;  %4181 = vmatprep.mubr.msk.bf16.mxu0 %vm309_vm1, %v4690_v5  ;;  %v2546_v5 = vpack.c.bf16 %v3638_v60, %v3637_v14  ;;  %v2252_v39 = vpack.c.bf16 %v3589_v13, %v3588_v28  ;;  %v3642_v27 = vld [vmem:[%s4399_s11 + $0x1a2] sm:$0xff] }
 0x127   : > { %v5040_v21 = vadd.f32 %v937_v58, %v676_v18  ;;  %v697_v10 = vadd.f32 %v3941_v7, %v4855_v44  ;;  %v950_v12 = vpop.f32.mrf.mxu0  ;;  %4147 = vmatprep.mubr.msk.bf16.mxu1 %vm309_vm1, %v2251_v6 }
 0x128   : > { %v688_v61 = vpop.f32.mrf.mxu1 }
 0x129   : > { %v5046_v11 = vadd.f32 %v3975_v4, %v697_v10  ;;  %v689_v2 = vadd.f32 %v688_v61, %v4865_v62  ;;  %v3976_v17 = vpop.f32.mrf.mxu0  ;;  %v2548_v4 = vpack.c.bf16 %v3642_v27, %v3641_v40 }
 0x12a   : > { %v3942_v24 = vpop.f32.mrf.mxu1 }
 0x12b   : > { %v5049_v23 = vadd.f32 %v950_v12, %v689_v2  ;;  %v700_v44 = vadd.f32 %v3942_v24, %v4869_v19  ;;  %v953_v46 = vpop.f32.mrf.mxu0 }
 0x12c   : > { %v691_v35 = vpop.f32.mrf.mxu1 }
 0x12d   : > { %v5052_v32 = vadd.f32 %v3976_v17, %v700_v44  ;;  %v692_v30 = vadd.f32 %v691_v35, %v4873_v38  ;;  %v3979_v49 = vpop.f32.mrf.mxu0  ;;  %4182 = vmatmul.mubr.msk.bf16.gmra.mxu0 %vm309_vm1, %v2546_v5  ;;  %v3592_v38 = vld [vmem:[%s4399_s11 + $0x199] sm:$0xff] }
 0x12e   : > { %v3945_v62 = vpop.f32.mrf.mxu1  ;;  %4148 = vmatmul.mubr.msk.bf16.gmra.mxu1 %vm309_vm1, %v2252_v39  ;;  %4185 = vmatprep.mubr.msk.bf16.mxu0 %vm309_vm1, %v4898_v3  ;;  %v2254_v7 = vpack.c.bf16 %v3593_v59, %v3592_v38 }
 0x12f   : > { %v5061_v19 = vadd.f32 %v953_v46, %v692_v30  ;;  %v713_v42 = vadd.f32 %v3945_v62, %v4879_v41  ;;  %v966_v34 = vpop.f32.mrf.mxu0  ;;  %4151 = vmatprep.mubr.msk.bf16.mxu1 %vm309_vm1, %v4790_v37 }
 0x130   : > { %v704_v58 = vpop.f32.mrf.mxu1 }
 0x131   : > { %v5068_v6 = vadd.f32 %v3979_v49, %v713_v42  ;;  %v705_v50 = vadd.f32 %v704_v58, %v4892_v56  ;;  %v3980_v18 = vpop.f32.mrf.mxu0 }
 0x132   : > { %v3946_v3 = vpop.f32.mrf.mxu1 }
 0x133   : > { %v5071_v14 = vadd.f32 %v966_v34, %v705_v50  ;;  %v716_v60 = vadd.f32 %v3946_v3, %v4896_v1  ;;  %v969_v41 = vpop.f32.mrf.mxu0 }
 0x134   : > { %v707_v10 = vpop.f32.mrf.mxu1 }
 0x135   : > { %v5074_v12 = vadd.f32 %v3980_v18, %v716_v60  ;;  %v708_v37 = vadd.f32 %v707_v10, %v4902_v8  ;;  %v3983_v28 = vpop.f32.mrf.mxu0  ;;  %4186 = vmatmul.mubr.msk.bf16.gmra.mxu0 %vm309_vm1, %v2548_v4 }
 0x136   : > { %v3949_v13 = vpop.f32.mrf.mxu1  ;;  %4152 = vmatmul.mubr.msk.bf16.gmra.mxu1 %vm309_vm1, %v2254_v7 }
 0x137   : > { %v5079_v56 = vadd.f32 %v969_v41, %v708_v37  ;;  %v729_v61 = vadd.f32 %v3949_v13, %v4907_v16  ;;  %v982_v2 = vpop.f32.mrf.mxu0 }
 0x138   : > { %v720_v17 = vpop.f32.mrf.mxu1 }
 0x139   : > { %v5082_v5 = vadd.f32 %v3983_v28, %v729_v61  ;;  %v721_v1 = vadd.f32 %v720_v17, %v4917_v25  ;;  %v3984_v24 = vpop.f32.mrf.mxu0 }
 0x13a   : > { %v3950_v39 = vpop.f32.mrf.mxu1 }
 0x13b   : > { %v5085_v44 = vadd.f32 %v982_v2, %v721_v1  ;;  %v732_v8 = vadd.f32 %v3950_v39, %v4921_v31  ;;  %v985_v46 = vpop.f32.mrf.mxu0 }
 0x13c   : > { %v723_v35 = vpop.f32.mrf.mxu1 }
 0x13d   : > { %v5088_v30 = vadd.f32 %v3984_v24, %v732_v8  ;;  %v724_v49 = vadd.f32 %v723_v35, %v4925_v33  ;;  %v4023_v62 = vpop.f32.mrf.mxu0 }
 0x13e   : > { %v3989_v16 = vpop.f32.mrf.mxu1 }
 0x13f   : > { %v5091_v40 = vadd.f32 %v985_v46, %v724_v49  ;;  %v1294_v27 = vadd.f32 %v3989_v16, %v4937_v47  ;;  %v1459_v42 = vpop.f32.mrf.mxu0 }
 0x140   : > { %v1165_v25 = vpop.f32.mrf.mxu1 }
 0x141   : > { %v5094_v34 = vadd.f32 %v4023_v62, %v1294_v27  ;;  %v1292_v38 = vadd.f32 %v1165_v25, %v4939_v51  ;;  %v4024_v59 = vpop.f32.mrf.mxu0 }
 0x142   : > { %v3990_v31 = vpop.f32.mrf.mxu1 }
 0x143   : > { %v5097_v58 = vadd.f32 %v1459_v42, %v1292_v38  ;;  %v1295_v50 = vadd.f32 %v3990_v31, %v4941_v54  ;;  %v1462_v18 = vpop.f32.mrf.mxu0 }
 0x144   : > { %v1168_v33 = vpop.f32.mrf.mxu1 }
 0x145   : > { %v5100_v4 = vadd.f32 %v4024_v59, %v1295_v50  ;;  %v1293_v3 = vadd.f32 %v1168_v33, %v4950_v9  ;;  %v4027_v7 = vpop.f32.mrf.mxu0 }
 0x146   : > { %v3993_v47 = vpop.f32.mrf.mxu1 }
 0x147   : > { %v5103_v60 = vadd.f32 %v1462_v18, %v1293_v3  ;;  %v1298_v41 = vadd.f32 %v3993_v47, %v4958_v43  ;;  %v1475_v10 = vpop.f32.mrf.mxu0 }
 0x148   : > { %v1181_v51 = vpop.f32.mrf.mxu1 }
 0x149   : > { %v5106_v37 = vadd.f32 %v4027_v7, %v1298_v41  ;;  %v1296_v28 = vadd.f32 %v1181_v51, %v4961_v45  ;;  %v4028_v13 = vpop.f32.mrf.mxu0 }
 0x14a   : > { %v3994_v54 = vpop.f32.mrf.mxu1 }
 0x14b   : > { %v5109_v61 = vadd.f32 %v1475_v10, %v1296_v28  ;;  %v1299_v2 = vadd.f32 %v3994_v54, %v4964_v52  ;;  %v1478_v17 = vpop.f32.mrf.mxu0 }
 0x14c   : > { %v1184_v9 = vpop.f32.mrf.mxu1 }
 0x14d   : > { %v5112_v1 = vadd.f32 %v4028_v13, %v1299_v2  ;;  %v1297_v24 = vadd.f32 %v1184_v9, %v4972_v0  ;;  %v4031_v39 = vpop.f32.mrf.mxu0 }
 0x14e   : > { %v3997_v43 = vpop.f32.mrf.mxu1 }
 0x14f   : > { %v5115_v8 = vadd.f32 %v1478_v17, %v1297_v24  ;;  %v1302_v46 = vadd.f32 %v3997_v43, %v4980_v15  ;;  %v1491_v35 = vpop.f32.mrf.mxu0 }
 0x150   : > { %v1197_v45 = vpop.f32.mrf.mxu1 }
 0x151   : > { %v5118_v49 = vadd.f32 %v4031_v39, %v1302_v46  ;;  %v1300_v62 = vadd.f32 %v1197_v45, %v4983_v63  ;;  %v4032_v16 = vpop.f32.mrf.mxu0 }
 0x152   : > { %v3998_v52 = vpop.f32.mrf.mxu1 }
 0x153   : > { %v5121_v27 = vadd.f32 %v1491_v35, %v1300_v62  ;;  %v1303_v42 = vadd.f32 %v3998_v52, %v4986_v48  ;;  %v1494_v25 = vpop.f32.mrf.mxu0 }
 0x154   : > { %v1200_v0 = vpop.f32.mrf.mxu1 }
 0x155   : > { %v5124_v38 = vadd.f32 %v4032_v16, %v1303_v42  ;;  %v1301_v59 = vadd.f32 %v1200_v0, %v4994_v57  ;;  %v4035_v31 = vpop.f32.mrf.mxu0 }
 0x156   : > { %v4001_v15 = vpop.f32.mrf.mxu1 }
 0x157   : > { %v5127_v50 = vadd.f32 %v1494_v25, %v1301_v59  ;;  %v1306_v18 = vadd.f32 %v4001_v15, %v5002_v55  ;;  %v1507_v33 = vpop.f32.mrf.mxu0 }
 0x158   : > { %v1213_v63 = vpop.f32.mrf.mxu1 }
 0x159   : > { %v5130_v3 = vadd.f32 %v4035_v31, %v1306_v18  ;;  %v1304_v7 = vadd.f32 %v1213_v63, %v5005_v20  ;;  %v4036_v47 = vpop.f32.mrf.mxu0 }
 0x15a   : > { %v4002_v48 = vpop.f32.mrf.mxu1 }
 0x15b   : > { %v5133_v41 = vadd.f32 %v1507_v33, %v1304_v7  ;;  %v1307_v10 = vadd.f32 %v4002_v48, %v5008_v22  ;;  %v1510_v51 = vpop.f32.mrf.mxu0 }
 0x15c   : > { %v1216_v57 = vpop.f32.mrf.mxu1 }
 0x15d   : > { %v5136_v28 = vadd.f32 %v4036_v47, %v1307_v10  ;;  %v1305_v13 = vadd.f32 %v1216_v57, %v5016_v26  ;;  %v4039_v54 = vpop.f32.mrf.mxu0 }
 0x15e   : > { %v4005_v55 = vpop.f32.mrf.mxu1 }
 0x15f   : > { %v5139_v2 = vadd.f32 %v1510_v51, %v1305_v13  ;;  %v1310_v17 = vadd.f32 %v4005_v55, %v5024_v53  ;;  %v1523_v9 = vpop.f32.mrf.mxu0 }
 0x160   : > { %v1229_v20 = vpop.f32.mrf.mxu1 }
 0x161   : > { %v5142_v24 = vadd.f32 %v4039_v54, %v1310_v17  ;;  %v1308_v39 = vadd.f32 %v1229_v20, %v5027_v29  ;;  %v4040_v43 = vpop.f32.mrf.mxu0 }
 0x162   : > { %v4006_v22 = vpop.f32.mrf.mxu1 }
 0x163   : > { %v5145_v46 = vadd.f32 %v1523_v9, %v1308_v39  ;;  %v1311_v35 = vadd.f32 %v4006_v22, %v5030_v36  ;;  %v1526_v45 = vpop.f32.mrf.mxu0 }
 0x164   : > { %v1232_v26 = vpop.f32.mrf.mxu1 }
 0x165   : > { %v5148_v62 = vadd.f32 %v4040_v43, %v1311_v35  ;;  %v1309_v16 = vadd.f32 %v1232_v26, %v5040_v21  ;;  %v4043_v52 = vpop.f32.mrf.mxu0 }
 0x166   : > { %v4009_v53 = vpop.f32.mrf.mxu1 }
 0x167   : > { %v5151_v42 = vadd.f32 %v1526_v45, %v1309_v16  ;;  %v1314_v25 = vadd.f32 %v4009_v53, %v5046_v11  ;;  %v1539_v0 = vpop.f32.mrf.mxu0 }
 0x168   : > { %v1245_v29 = vpop.f32.mrf.mxu1 }
 0x169   : > { %v5154_v59 = vadd.f32 %v4043_v52, %v1314_v25  ;;  %v1312_v31 = vadd.f32 %v1245_v29, %v5049_v23  ;;  %v4044_v15 = vpop.f32.mrf.mxu0 }
 0x16a   : > { %v4010_v36 = vpop.f32.mrf.mxu1 }
 0x16b   : > { %v5157_v18 = vadd.f32 %v1539_v0, %v1312_v31  ;;  %v1315_v33 = vadd.f32 %v4010_v36, %v5052_v32  ;;  %v1542_v63 = vpop.f32.mrf.mxu0 }
 0x16c   : > { %v1248_v21 = vpop.f32.mrf.mxu1 }
 0x16d   : > { %v5160_v7 = vadd.f32 %v4044_v15, %v1315_v33  ;;  %v1313_v47 = vadd.f32 %v1248_v21, %v5061_v19  ;;  %v4047_v48 = vpop.f32.mrf.mxu0 }
 0x16e   : > { %v4013_v11 = vpop.f32.mrf.mxu1 }
 0x16f   : > { %v5163_v10 = vadd.f32 %v1542_v63, %v1313_v47  ;;  %v1318_v51 = vadd.f32 %v4013_v11, %v5068_v6  ;;  %v1555_v57 = vpop.f32.mrf.mxu0 }
 0x170   : > { %v1261_v23 = vpop.f32.mrf.mxu1 }
 0x171   : > { %v5166_v13 = vadd.f32 %v4047_v48, %v1318_v51  ;;  %v1316_v54 = vadd.f32 %v1261_v23, %v5071_v14  ;;  %v4048_v55 = vpop.f32.mrf.mxu0 }
 0x172   : > { %v4014_v32 = vpop.f32.mrf.mxu1 }
 0x173   : > { %v5169_v17 = vadd.f32 %v1555_v57, %v1316_v54  ;;  %v1319_v9 = vadd.f32 %v4014_v32, %v5074_v12  ;;  %v1558_v20 = vpop.f32.mrf.mxu0 }
 0x174   : > { %v1264_v19 = vpop.f32.mrf.mxu1 }
 0x175   : > { %v5172_v39 = vadd.f32 %v4048_v55, %v1319_v9  ;;  %v1317_v43 = vadd.f32 %v1264_v19, %v5079_v56  ;;  %v4051_v22 = vpop.f32.mrf.mxu0 }
 0x176   : > { %v4017_v6 = vpop.f32.mrf.mxu1 }
 0x177   : > { %v5175_v35 = vadd.f32 %v1558_v20, %v1317_v43  ;;  %v1322_v45 = vadd.f32 %v4017_v6, %v5082_v5  ;;  %v1571_v26 = vpop.f32.mrf.mxu0 }
 0x178   : > { %v1277_v14 = vpop.f32.mrf.mxu1 }
 0x179   : > { %v5178_v16 = vadd.f32 %v4051_v22, %v1322_v45  ;;  %v1320_v52 = vadd.f32 %v1277_v14, %v5085_v44  ;;  %v4052_v53 = vpop.f32.mrf.mxu0 }
 0x17a   : > { %v4018_v12 = vpop.f32.mrf.mxu1 }
 0x17b   : > { %v5181_v25 = vadd.f32 %v1571_v26, %v1320_v52  ;;  %v1323_v0 = vadd.f32 %v4018_v12, %v5088_v30  ;;  %v1574_v29 = vpop.f32.mrf.mxu0 }
 0x17c   : > { %v1280_v56 = vpop.f32.mrf.mxu1 }
 0x17d   : > { %v5184_v31 = vadd.f32 %v4052_v53, %v1323_v0  ;;  %v1321_v15 = vadd.f32 %v1280_v56, %v5091_v40  ;;  %v5187_v36 = vpop.f32.mrf.mxu0 }
 0x17e   : > { %v5189_v5 = vpop.f32.mrf.mxu1 }
 0x17f   : > { %v5191_v33 = vadd.f32 %v1574_v29, %v1321_v15  ;;  %v5193_v63 = vpop.f32.mrf.mxu0 }
 0x180   : > { %v5195_v44 = vpop.f32.mrf.mxu1 }
 0x181   : > { %v5197_v21 = vpop.f32.mrf.mxu0 }
 0x182   : > { %v5199_v47 = vpop.f32.mrf.mxu1 }
 0x183   : > { %v5201_v30 = vpop.f32.mrf.mxu0 }
 0x184   : > { %v5203_v48 = vpop.f32.mrf.mxu1 }
 0x185   : > { %v5205_v11 = vpop.f32.mrf.mxu0 }
 0x186   : > { %v5207_v40 = vpop.f32.mrf.mxu1 }
 0x187   : > { %v5209_v51 = vpop.f32.mrf.mxu0 }
 0x188   : > { %v5211_v57 = vpop.f32.mrf.mxu1 }
 0x189   : > { %v5213_v23 = vpop.f32.mrf.mxu0 }
 0x18a   : > { %v5215_v54 = vpop.f32.mrf.mxu1 }
 0x18b   : > { %v5217_v55 = vpop.f32.mrf.mxu0 }
 0x18c   : > { %v5219_v32 = vpop.f32.mrf.mxu1 }
 0x18d   : > { %v4099_v9 = vpop.f32.mrf.mxu0 }
 0x18e   : > { %v4065_v20 = vpop.f32.mrf.mxu1 }
 0x18f   : > { %v1890_v19 = vadd.f32 %v4065_v20, %v5118_v49  ;;  %v2080_v43 = vpop.f32.mrf.mxu0 }
 0x190   : > { %v1785_v22 = vpop.f32.mrf.mxu1 }
 0x191   : > { %v5222_v6 = vadd.f32 %v4099_v9, %v1890_v19  ;;  %v1888_v45 = vadd.f32 %v1785_v22, %v5121_v27  ;;  %v4100_v26 = vpop.f32.mrf.mxu0 }
 0x192   : > { %v4066_v14 = vpop.f32.mrf.mxu1 }
 0x193   : > { %v5225_v52 = vadd.f32 %v2080_v43, %v1888_v45  ;;  %v1891_v53 = vadd.f32 %v4066_v14, %v5124_v38  ;;  %v2083_v12 = vpop.f32.mrf.mxu0 }
 0x194   : > { %v1788_v0 = vpop.f32.mrf.mxu1 }
 0x195   : > { %v5228_v29 = vadd.f32 %v4100_v26, %v1891_v53  ;;  %v1889_v56 = vadd.f32 %v1788_v0, %v5127_v50  ;;  %v4103_v15 = vpop.f32.mrf.mxu0 }
 0x196   : > { %v4069_v49 = vpop.f32.mrf.mxu1 }
 0x197   : > { %v5231_v20 = vadd.f32 %v2083_v12, %v1889_v56  ;;  %v1894_v9 = vadd.f32 %v4069_v49, %v5130_v3  ;;  %v2096_v19 = vpop.f32.mrf.mxu0 }
 0x198   : > { %v1801_v27 = vpop.f32.mrf.mxu1 }
 0x199   : > { %v5234_v22 = vadd.f32 %v4103_v15, %v1894_v9  ;;  %v1892_v43 = vadd.f32 %v1801_v27, %v5133_v41  ;;  %v4104_v45 = vpop.f32.mrf.mxu0 }
 0x19a   : > { %v4070_v38 = vpop.f32.mrf.mxu1 }
 0x19b   : > { %v5237_v14 = vadd.f32 %v2096_v19, %v1892_v43  ;;  %v1895_v26 = vadd.f32 %v4070_v38, %v5136_v28  ;;  %v2099_v53 = vpop.f32.mrf.mxu0 }
 0x19c   : > { %v1804_v50 = vpop.f32.mrf.mxu1 }
 0x19d   : > { %v5240_v0 = vadd.f32 %v4104_v45, %v1895_v26  ;;  %v1893_v12 = vadd.f32 %v1804_v50, %v5139_v2  ;;  %v4107_v56 = vpop.f32.mrf.mxu0 }
 0x19e   : > { %v4073_v3 = vpop.f32.mrf.mxu1 }
 0x19f   : > { %v5243_v49 = vadd.f32 %v2099_v53, %v1893_v12  ;;  %v1898_v15 = vadd.f32 %v4073_v3, %v5142_v24  ;;  %v2112_v9 = vpop.f32.mrf.mxu0 }
 0x1a0   : > { %v1817_v41 = vpop.f32.mrf.mxu1 }
 0x1a1   : > { %v5246_v27 = vadd.f32 %v4107_v56, %v1898_v15  ;;  %v1896_v19 = vadd.f32 %v1817_v41, %v5145_v46  ;;  %v4108_v43 = vpop.f32.mrf.mxu0 }
 0x1a2   : > { %v4074_v28 = vpop.f32.mrf.mxu1 }
 0x1a3   : > { %v5249_v38 = vadd.f32 %v2112_v9, %v1896_v19  ;;  %v1899_v45 = vadd.f32 %v4074_v28, %v5148_v62  ;;  %v2115_v26 = vpop.f32.mrf.mxu0 }
 0x1a4   : > { %v1820_v2 = vpop.f32.mrf.mxu1 }
 0x1a5   : > { %v5252_v50 = vadd.f32 %v4108_v43, %v1899_v45  ;;  %v1897_v53 = vadd.f32 %v1820_v2, %v5151_v42  ;;  %v4111_v12 = vpop.f32.mrf.mxu0 }
 0x1a6   : > { %v4077_v24 = vpop.f32.mrf.mxu1 }
 0x1a7   : > { %v5255_v3 = vadd.f32 %v2115_v26, %v1897_v53  ;;  %v1902_v56 = vadd.f32 %v4077_v24, %v5154_v59  ;;  %v2128_v15 = vpop.f32.mrf.mxu0 }
 0x1a8   : > { %v1833_v46 = vpop.f32.mrf.mxu1 }
 0x1a9   : > { %v5258_v41 = vadd.f32 %v4111_v12, %v1902_v56  ;;  %v1900_v9 = vadd.f32 %v1833_v46, %v5157_v18  ;;  %v4112_v19 = vpop.f32.mrf.mxu0 }
 0x1aa   : > { %v4078_v62 = vpop.f32.mrf.mxu1 }
 0x1ab   : > { %v5261_v28 = vadd.f32 %v2128_v15, %v1900_v9  ;;  %v1903_v43 = vadd.f32 %v4078_v62, %v5160_v7  ;;  %v2131_v45 = vpop.f32.mrf.mxu0 }
 0x1ac   : > { %v1836_v42 = vpop.f32.mrf.mxu1 }
 0x1ad   : > { %v5264_v2 = vadd.f32 %v4112_v19, %v1903_v43  ;;  %v1901_v26 = vadd.f32 %v1836_v42, %v5163_v10  ;;  %v4115_v53 = vpop.f32.mrf.mxu0 }
 0x1ae   : > { %v4081_v59 = vpop.f32.mrf.mxu1 }
 0x1af   : > { %v5267_v24 = vadd.f32 %v2131_v45, %v1901_v26  ;;  %v1906_v12 = vadd.f32 %v4081_v59, %v5166_v13  ;;  %v2144_v56 = vpop.f32.mrf.mxu0 }
 0x1b0   : > { %v1849_v18 = vpop.f32.mrf.mxu1 }
 0x1b1   : > { %v5270_v46 = vadd.f32 %v4115_v53, %v1906_v12  ;;  %v1904_v15 = vadd.f32 %v1849_v18, %v5169_v17  ;;  %v4116_v9 = vpop.f32.mrf.mxu0 }
 0x1b2   : > { %v4082_v7 = vpop.f32.mrf.mxu1 }
 0x1b3   : > { %v5273_v62 = vadd.f32 %v2144_v56, %v1904_v15  ;;  %v1907_v19 = vadd.f32 %v4082_v7, %v5172_v39  ;;  %v2147_v43 = vpop.f32.mrf.mxu0  ;;  %v1882_v56 = vadd.f32 %v5189_v5, %v5094_v34  ;;  %v1883_v34 = vadd.f32 %v5199_v47, %v5100_v4  ;;  %v5306_v4 = vld [vmem:[%s5569_s2] ss:$0 sm:$0xff] }
 0x1b4   : > { %v1852_v10 = vpop.f32.mrf.mxu1 }
 0x1b5   : > { %v5276_v42 = vadd.f32 %v4116_v9, %v1907_v19  ;;  %v1905_v45 = vadd.f32 %v1852_v10, %v5175_v35  ;;  %v4119_v26 = vpop.f32.mrf.mxu0  ;;  %v1880_v35 = vadd.f32 %v5195_v44, %v5097_v58  ;;  %v2177_v10 = vadd.f32 %v5187_v36, %v1882_v56 }
 0x1b6   : > { %v4085_v13 = vpop.f32.mrf.mxu1  ;;  %v1884_v56 = vadd.f32 %v5211_v57, %v5109_v61  ;;  %v1885_v57 = vadd.f32 %v5219_v32, %v5115_v8 }
 0x1b7   : > { %v5279_v59 = vadd.f32 %v2147_v43, %v1905_v45  ;;  %v1910_v53 = vadd.f32 %v4085_v13, %v5178_v16  ;;  %v2160_v12 = vpop.f32.mrf.mxu0  ;;  %v2175_v44 = vadd.f32 %v5193_v63, %v1880_v35  ;;  %v1886_v63 = vadd.f32 %v5207_v40, %v5106_v37 }
 0x1b8   : > { %v1865_v17 = vpop.f32.mrf.mxu1 }
 0x1b9   : > { %v5284_v18 = vadd.f32 %v4119_v26, %v1910_v53  ;;  %v1908_v39 = vadd.f32 %v1865_v17, %v5181_v25  ;;  %v4120_v15 = vpop.f32.mrf.mxu0  ;;  %v1881_v26 = vadd.f32 %v5203_v48, %v5103_v60  ;;  %v2181_v40 = vadd.f32 %v5205_v11, %v1886_v63 }
 0x1ba   : > { %v4086_v9 = vpop.f32.mrf.mxu1 }
 0x1bb   : > { %v5289_v7 = vadd.f32 %v2160_v12, %v1908_v39  ;;  %v1911_v19 = vadd.f32 %v4086_v9, %v5184_v31  ;;  %v2163_v43 = vpop.f32.mrf.mxu0  ;;  %v2176_v60 = vadd.f32 %v5201_v30, %v1881_v26 }
 0x1bc   : > { %v1868_v16 = vpop.f32.mrf.mxu1 }
 0x1bd   : > { %v5295_v5 = vadd.f32 %v4120_v15, %v1911_v19  ;;  %v1909_v25 = vadd.f32 %v1868_v16, %v5191_v33  ;;  %v4159_v45 = vpop.f32.mrf.mxu0  ;;  %v2178_v33 = vadd.f32 %v5197_v21, %v1883_v34  ;;  %v1887_v21 = vadd.f32 %v5215_v54, %v5112_v1 }
 0x1be   : > { %v4125_v58 = vpop.f32.mrf.mxu1  ;;  %v2179_v1 = vadd.f32 %v5209_v51, %v1884_v56 }
 0x1bf   : > { %v5301_v31 = vadd.f32 %v2163_v43, %v1909_v25  ;;  %v2471_v13 = vadd.f32 %v4125_v58, %v2177_v10  ;;  %v2636_v53 = vpop.f32.mrf.mxu0 }
 0x1c0   : > { %v2342_v36 = vpop.f32.mrf.mxu1 }
 0x1c1   : > { %v2765_v47 = vadd.f32 %v4159_v45, %v2471_v13  ;;  %v2469_v12 = vadd.f32 %v2342_v36, %v2175_v44  ;;  %v4160_v17 = vpop.f32.mrf.mxu0  ;;  %v2182_v13 = vadd.f32 %v5213_v23, %v1887_v21 }
 0x1c2   : > { %v4126_v48 = vpop.f32.mrf.mxu1 }
 0x1c3   : > { %v2804_v39 = vadd.f32 %v5306_v4, %v2765_v47  ;;  %v2763_v15 = vadd.f32 %v2636_v53, %v2469_v12  ;;  %v2472_v9 = vadd.f32 %v4126_v48, %v2178_v33  ;;  %v2639_v35 = vpop.f32.mrf.mxu0 }
 0x1c4   : > { %v2345_v19 = vpop.f32.mrf.mxu1 }
 0x1c5   : > { %v2836_v43 = vmax.f32 %v2804_v39, 0.0  ;;  %v2802_v30 = vadd.f32 %v5306_v4, %v2763_v15  ;;  %v2766_v16 = vadd.f32 %v4160_v17, %v2472_v9  ;;  %v2470_v10 = vadd.f32 %v2345_v19, %v2176_v60  ;;  %v4163_v37 = vpop.f32.mrf.mxu0 }
 0x1c6   : > { %v4129_v61 = vpop.f32.mrf.mxu1  ;;  %v2180_v17 = vadd.f32 %v5217_v55, %v1885_v57 }
 0x1c7   : > { %v3700_v54 = vpack.c.bf16 %v2836_v43, %v2836_v43  ;;  %v2834_v34 = vmax.f32 %v2802_v30, 0.0  ;;  %v2652_v25 = vpop.f32.mrf.mxu0  ;;  %v3099_v45 = vmul.f32 %v2836_v43, %v2836_v43  ;;  %v2805_v11 = vadd.f32 %v5306_v4, %v2766_v16 }
 0x1c8   : > { %v2764_v26 = vadd.f32 %v2639_v35, %v2470_v10  ;;  %v2475_v58 = vadd.f32 %v4129_v61, %v2181_v40  ;;  %v2358_v44 = vpop.f32.mrf.mxu1  ;;  %v3031_v60 = vsel %vm3027_vm3, %v2836_v43, 0.0 }
 0x1c9   : > { %2997 = vst.msk [vmem:[%s5323_s7 + $0x8] sm:$0xf] %vm2994_vm2, %v3700_v54  ;;  %v3698_v53 = vpack.c.bf16 %v2834_v34, %v2834_v34  ;;  %v3097_v36 = vmul.f32 %v2834_v34, %v2834_v34  ;;  %v4164_v51 = vpop.f32.mrf.mxu0  ;;  %v2837_v33 = vmax.f32 %v2805_v11, 0.0  ;;  %v2473_v47 = vadd.f32 %v2358_v44, %v2179_v1 }
 0x1ca   : > { %v2803_v8 = vadd.f32 %v5306_v4, %v2764_v26  ;;  %v2769_v32 = vadd.f32 %v4163_v37, %v2475_v58  ;;  %v4130_v12 = vpop.f32.mrf.mxu1  ;;  %v3132_v48 = vsel %vm3027_vm3, %v3099_v45, 0.0  ;;  %v3028_v56 = vsel %vm3027_vm3, %v2834_v34, 0.0 }
 0x1cb   : > { %2995 = vst.msk [vmem:[%s5323_s7] sm:$0xf] %vm2994_vm2, %v3698_v53  ;;  %v2476_v63 = vadd.f32 %v4130_v12, %v2182_v13  ;;  %v2655_v23 = vpop.f32.mrf.mxu0  ;;  %v3701_v39 = vpack.c.bf16 %v2837_v33, %v2837_v33  ;;  %v2767_v21 = vadd.f32 %v2652_v25, %v2473_v47  ;;  %v3129_v43 = vsel %vm3027_vm3, %v3097_v36, 0.0 }
 0x1cc   : > { %v2835_v15 = vmax.f32 %v2803_v8, 0.0  ;;  %v2361_v9 = vpop.f32.mrf.mxu1  ;;  %v2808_v35 = vadd.f32 %v5306_v4, %v2769_v32  ;;  %v3100_v25 = vmul.f32 %v2837_v33, %v2837_v33  ;;  %v3033_v44 = vsel %vm3027_vm3, %v2837_v33, 0.0 }
 0x1cd   : > { %v2770_v19 = vadd.f32 %v4164_v51, %v2476_v63  ;;  %v2474_v55 = vadd.f32 %v2361_v9, %v2180_v17  ;;  %v4167_v30 = vpop.f32.mrf.mxu0  ;;  %2998 = vst.msk [vmem:[%s5323_s7 + $0xc] sm:$0xf] %vm2994_vm2, %v3701_v39  ;;  %v2806_v57 = vadd.f32 %v5306_v4, %v2767_v21 }
 0x1ce   : > { %v3699_v16 = vpack.c.bf16 %v2835_v15, %v2835_v15  ;;  %v3029_v10 = vsel %vm3027_vm3, %v2835_v15, 0.0  ;;  %v3098_v37 = vmul.f32 %v2835_v15, %v2835_v15  ;;  %v4133_v40 = vpop.f32.mrf.mxu1  ;;  %v2840_v1 = vmax.f32 %v2808_v35, 0.0 }
 0x1cf   : > { %v3030_v61 = vadd.f32 %v3029_v10, %v3028_v56  ;;  %v2809_v54 = vadd.f32 %v5306_v4, %v2770_v19  ;;  %v2668_v34 = vpop.f32.mrf.mxu0  ;;  %v2768_v11 = vadd.f32 %v2655_v23, %v2474_v55  ;;  %v2479_v26 = vadd.f32 %v4133_v40, %v5222_v6 }
 0x1d0   : > { %2996 = vst.msk [vmem:[%s5323_s7 + $0x4] sm:$0xf] %vm2994_vm2, %v3699_v16  ;;  %v3130_v45 = vsel %vm3027_vm3, %v3098_v37, 0.0  ;;  %v2374_v58 = vpop.f32.mrf.mxu1  ;;  %v3704_v36 = vpack.c.bf16 %v2840_v1, %v2840_v1  ;;  %v3103_v8 = vmul.f32 %v2840_v1, %v2840_v1  ;;  %v2838_v32 = vmax.f32 %v2806_v57, 0.0 }
 0x1d1   : > { %v3032_v13 = vadd.f32 %v3031_v60, %v3030_v61  ;;  %v3131_v53 = vadd.f32 %v3130_v45, %v3129_v43  ;;  %v4168_v51 = vpop.f32.mrf.mxu0  ;;  %v2841_v47 = vmax.f32 %v2809_v54, 0.0  ;;  %v2807_v12 = vadd.f32 %v5306_v4, %v2768_v11 }
 0x1d2   : > { %v4134_v17 = vpop.f32.mrf.mxu1  ;;  %3001 = vst.msk [vmem:[%s5323_s7 + $0x18] sm:$0xf] %vm2994_vm2, %v3704_v36  ;;  %v2773_v56 = vadd.f32 %v4167_v30, %v2479_v26  ;;  %v2477_v6 = vadd.f32 %v2374_v58, %v5225_v52  ;;  %v3134_v33 = vsel %vm3027_vm3, %v3100_v25, 0.0  ;;  %v3702_v60 = vpack.c.bf16 %v2838_v32, %v2838_v32 }
 0x1d3   : > { %v3133_v63 = vadd.f32 %v3132_v48, %v3131_v53  ;;  %v3034_v23 = vadd.f32 %v3033_v44, %v3032_v13  ;;  %v2671_v39 = vpop.f32.mrf.mxu0  ;;  %v3035_v15 = vsel %vm3027_vm3, %v2838_v32, 0.0  ;;  %v3101_v9 = vmul.f32 %v2838_v32, %v2838_v32 }
 0x1d4   : > { %v2377_v35 = vpop.f32.mrf.mxu1  ;;  %v3039_v21 = vsel %vm3027_vm3, %v2840_v1, 0.0  ;;  %v3705_v55 = vpack.c.bf16 %v2841_v47, %v2841_v47  ;;  %v3140_v16 = vsel %vm3027_vm3, %v3103_v8, 0.0  ;;  %2999 = vst.msk [vmem:[%s5323_s7 + $0x10] sm:$0xf] %vm2994_vm2, %v3702_v60  ;;  %v2839_v30 = vmax.f32 %v2807_v12, 0.0 }
 0x1d5   : > { %v3036_v19 = vadd.f32 %v3035_v15, %v3034_v23  ;;  %v3135_v48 = vadd.f32 %v3134_v33, %v3133_v63  ;;  %v4171_v43 = vpop.f32.mrf.mxu0  ;;  %v3136_v52 = vsel %vm3027_vm3, %v3101_v9, 0.0  ;;  %v2812_v10 = vadd.f32 %v5306_v4, %v2773_v56 }
 0x1d6   : > { %v4137_v37 = vpop.f32.mrf.mxu1  ;;  %3002 = vst.msk [vmem:[%s5323_s7 + $0x1c] sm:$0xf] %vm2994_vm2, %v3705_v55  ;;  %v2771_v61 = vadd.f32 %v2668_v34, %v2477_v6  ;;  %v2480_v1 = vadd.f32 %v4134_v17, %v5228_v29  ;;  %v2478_v57 = vadd.f32 %v2377_v35, %v5231_v20  ;;  %v3104_v25 = vmul.f32 %v2841_v47, %v2841_v47 }
 0x1d7   : > { %v3137_v40 = vadd.f32 %v3136_v52, %v3135_v48  ;;  %v2684_v54 = vpop.f32.mrf.mxu0  ;;  %v3703_v45 = vpack.c.bf16 %v2839_v30, %v2839_v30  ;;  %v3037_v11 = vsel %vm3027_vm3, %v2839_v30, 0.0  ;;  %v3102_v26 = vmul.f32 %v2839_v30, %v2839_v30 }
 0x1d8   : > { %v2390_v58 = vpop.f32.mrf.mxu1  ;;  %v3038_v44 = vadd.f32 %v3037_v11, %v3036_v19  ;;  %v2844_v13 = vmax.f32 %v2812_v10, 0.0  ;;  %v2810_v53 = vadd.f32 %v5306_v4, %v2771_v61  ;;  %v2774_v36 = vadd.f32 %v4168_v51, %v2480_v1 }
 0x1d9   : > { %v4172_v8 = vpop.f32.mrf.mxu0  ;;  %3000 = vst.msk [vmem:[%s5323_s7 + $0x14] sm:$0xf] %vm2994_vm2, %v3703_v45  ;;  %v3138_v34 = vsel %vm3027_vm3, %v3102_v26, 0.0  ;;  %v2772_v29 = vadd.f32 %v2671_v39, %v2478_v57  ;;  %v2483_v20 = vadd.f32 %v4137_v37, %v5234_v22  ;;  %v2481_v32 = vadd.f32 %v2390_v58, %v5237_v14 }
 0x1da   : > { %v4138_v12 = vpop.f32.mrf.mxu1  ;;  %v3041_v17 = vsel %vm3027_vm3, %v2841_v47, 0.0  ;;  %v3040_v63 = vadd.f32 %v3039_v21, %v3038_v44  ;;  %v3139_v23 = vadd.f32 %v3138_v34, %v3137_v40  ;;  %v3708_v56 = vpack.c.bf16 %v2844_v13, %v2844_v13 }
 0x1db   : > { %v5375_v6 = vpop.f32.mrf.mxu0  ;;  %v3142_v51 = vsel %vm3027_vm3, %v3104_v25, 0.0  ;;  %v2842_v33 = vmax.f32 %v2810_v53, 0.0  ;;  %v2813_v60 = vadd.f32 %v5306_v4, %v2774_v36  ;;  %v2811_v15 = vadd.f32 %v5306_v4, %v2772_v29 }
 0x1dc   : > { %v2393_v39 = vpop.f32.mrf.mxu1  ;;  %v3141_v9 = vadd.f32 %v3140_v16, %v3139_v23  ;;  %3005 = vst.msk [vmem:[%s5323_s7 + $0x28] sm:$0xf] %vm2994_vm2, %v3708_v56  ;;  %v3042_v22 = vadd.f32 %v3041_v17, %v3040_v63  ;;  %v2777_v14 = vadd.f32 %v4171_v43, %v2483_v20  ;;  %v2775_v47 = vadd.f32 %v2684_v54, %v2481_v32 }
 0x1dd   : > { %v4175_v35 = vpop.f32.mrf.mxu0  ;;  %v3107_v21 = vmul.f32 %v2844_v13, %v2844_v13  ;;  %v3706_v19 = vpack.c.bf16 %v2842_v33, %v2842_v33  ;;  %v3043_v48 = vsel %vm3027_vm3, %v2842_v33, 0.0  ;;  %v3105_v55 = vmul.f32 %v2842_v33, %v2842_v33 }
 0x1de   : > { %v4141_v52 = vpop.f32.mrf.mxu1  ;;  %v3044_v30 = vadd.f32 %v3043_v48, %v3042_v22  ;;  %v3143_v10 = vadd.f32 %v3142_v51, %v3141_v9  ;;  %v2845_v37 = vmax.f32 %v2813_v60, 0.0  ;;  %v2843_v40 = vmax.f32 %v2811_v15, 0.0 }
 0x1df   : > { %v2700_v61 = vpop.f32.mrf.mxu0  ;;  %3003 = vst.msk [vmem:[%s5323_s7 + $0x20] sm:$0xf] %vm2994_vm2, %v3706_v19  ;;  %v3144_v16 = vsel %vm3027_vm3, %v3105_v55, 0.0  ;;  %v2816_v43 = vadd.f32 %v5306_v4, %v2777_v14  ;;  %v2814_v1 = vadd.f32 %v5306_v4, %v2775_v47  ;;  %v2484_v57 = vadd.f32 %v4138_v12, %v5240_v0 }
 0x1e0   : > { %v2406_v54 = vpop.f32.mrf.mxu1  ;;  %v3145_v25 = vadd.f32 %v3144_v16, %v3143_v10  ;;  %v3709_v45 = vpack.c.bf16 %v2845_v37, %v2845_v37  ;;  %v3108_v11 = vmul.f32 %v2845_v37, %v2845_v37  ;;  %v3707_v58 = vpack.c.bf16 %v2843_v40, %v2843_v40 }
 0x1e1   : > { %v4176_v26 = vpop.f32.mrf.mxu0  ;;  %v3045_v44 = vsel %vm3027_vm3, %v2843_v40, 0.0  ;;  %v3106_v53 = vmul.f32 %v2843_v40, %v2843_v40  ;;  %v2848_v36 = vmax.f32 %v2816_v43, 0.0  ;;  %v3047_v29 = vsel %vm3027_vm3, %v2844_v13, 0.0 }
 0x1e2   : > { %v4142_v34 = vpop.f32.mrf.mxu1  ;;  %3006 = vst.msk [vmem:[%s5323_s7 + $0x2c] sm:$0xf] %vm2994_vm2, %v3709_v45  ;;  %v3046_v20 = vadd.f32 %v3045_v44, %v3044_v30  ;;  %v2846_v32 = vmax.f32 %v2814_v1, 0.0  ;;  %v2778_v0 = vadd.f32 %v4172_v8, %v2484_v57  ;;  %v3148_v17 = vsel %vm3027_vm3, %v3107_v21, 0.0  ;;  %3004 = vst.msk [vmem:[%s5323_s7 + $0x24] sm:$0xf] %vm2994_vm2, %v3707_v58 }
 0x1e3   : > { %v2703_v12 = vpop.f32.mrf.mxu0  ;;  %v3049_v63 = vsel %vm3027_vm3, %v2845_v37, 0.0  ;;  %v3146_v23 = vsel %vm3027_vm3, %v3106_v53, 0.0  ;;  %v3712_v56 = vpack.c.bf16 %v2848_v36, %v2848_v36  ;;  %v3150_v13 = vsel %vm3027_vm3, %v3108_v11, 0.0 }
 0x1e4   : > { %v2409_v51 = vpop.f32.mrf.mxu1  ;;  %v3048_v33 = vadd.f32 %v3047_v29, %v3046_v20  ;;  %v3147_v60 = vadd.f32 %v3146_v23, %v3145_v25  ;;  %v3710_v15 = vpack.c.bf16 %v2846_v32, %v2846_v32  ;;  %v3055_v8 = vsel %vm3027_vm3, %v2848_v36, 0.0 }
 0x1e5   : > { %v5399_v9 = vpop.f32.mrf.mxu0  ;;  %3009 = vst.msk [vmem:[%s5323_s7 + $0x38] sm:$0xf] %vm2994_vm2, %v3712_v56  ;;  %v3109_v22 = vmul.f32 %v2846_v32, %v2846_v32  ;;  %v2817_v14 = vadd.f32 %v5306_v4, %v2778_v0  ;;  %v2482_v47 = vadd.f32 %v2393_v39, %v5243_v49  ;;  %v2487_v55 = vadd.f32 %v4141_v52, %v5246_v27 }
 0x1e6   : > { %v4145_v21 = vpop.f32.mrf.mxu1  ;;  %v3149_v19 = vadd.f32 %v3148_v17, %v3147_v60  ;;  %3007 = vst.msk [vmem:[%s5323_s7 + $0x30] sm:$0xf] %vm2994_vm2, %v3710_v15  ;;  %v3050_v48 = vadd.f32 %v3049_v63, %v3048_v33  ;;  %v2485_v30 = vadd.f32 %v2406_v54, %v5249_v38  ;;  %v3051_v37 = vsel %vm3027_vm3, %v2846_v32, 0.0 }
 0x1e7   : > { %v2716_v10 = vpop.f32.mrf.mxu0  ;;  %v2849_v40 = vmax.f32 %v2817_v14, 0.0  ;;  %v2776_v16 = vadd.f32 %v5375_v6, %v2482_v47  ;;  %v2488_v43 = vadd.f32 %v4142_v34, %v5252_v50  ;;  %v2781_v57 = vadd.f32 %v4175_v35, %v2487_v55 }
 0x1e8   : > { %v2422_v1 = vpop.f32.mrf.mxu1  ;;  %v3052_v49 = vadd.f32 %v3051_v37, %v3050_v48  ;;  %v3151_v39 = vadd.f32 %v3150_v13, %v3149_v19  ;;  %v2779_v25 = vadd.f32 %v2700_v61, %v2485_v30  ;;  %v3111_v11 = vmul.f32 %v2848_v36, %v2848_v36 }
 0x1e9   : > { %v5413_v45 = vpop.f32.mrf.mxu0  ;;  %v3152_v27 = vsel %vm3027_vm3, %v3109_v22, 0.0  ;;  %v3713_v38 = vpack.c.bf16 %v2849_v40, %v2849_v40  ;;  %v2815_v52 = vadd.f32 %v5306_v4, %v2776_v16  ;;  %v2820_v6 = vadd.f32 %v5306_v4, %v2781_v57 }
 0x1ea   : > { %v4146_v54 = vpop.f32.mrf.mxu1  ;;  %v3153_v58 = vadd.f32 %v3152_v27, %v3151_v39  ;;  %v2818_v50 = vadd.f32 %v5306_v4, %v2779_v25  ;;  %v2782_v44 = vadd.f32 %v4176_v26, %v2488_v43  ;;  %v3112_v35 = vmul.f32 %v2849_v40, %v2849_v40 }
 0x1eb   : > { %v5419_v53 = vpop.f32.mrf.mxu0  ;;  %3010 = vst.msk [vmem:[%s5323_s7 + $0x3c] sm:$0xf] %vm2994_vm2, %v3713_v38  ;;  %v2847_v61 = vmax.f32 %v2815_v52, 0.0  ;;  %v2486_v36 = vadd.f32 %v2409_v51, %v5255_v3  ;;  %v2491_v34 = vadd.f32 %v4145_v21, %v5258_v41  ;;  %v2852_v20 = vmax.f32 %v2820_v6, 0.0 }
 0x1ec   : > { %v2425_v29 = vpop.f32.mrf.mxu1  ;;  %v2850_v32 = vmax.f32 %v2818_v50, 0.0  ;;  %v2821_v0 = vadd.f32 %v5306_v4, %v2782_v44  ;;  %v2489_v17 = vadd.f32 %v2422_v1, %v5261_v28  ;;  %v3156_v33 = vsel %vm3027_vm3, %v3111_v11, 0.0 }
 0x1ed   : > { %v3711_v63 = vpack.c.bf16 %v2847_v61, %v2847_v61  ;;  %v3053_v26 = vsel %vm3027_vm3, %v2847_v61, 0.0  ;;  %v3110_v23 = vmul.f32 %v2847_v61, %v2847_v61  ;;  %v2780_v56 = vadd.f32 %v2703_v12, %v2486_v36  ;;  %v5430_v60 = vpop.f32.mrf.mxu0 }
 0x1ee   : > { %v4149_v13 = vpop.f32.mrf.mxu1  ;;  %v3057_v3 = vsel %vm3027_vm3, %v2849_v40, 0.0  ;;  %v3054_v41 = vadd.f32 %v3053_v26, %v3052_v49  ;;  %v3716_v51 = vpack.c.bf16 %v2852_v20, %v2852_v20  ;;  %v3158_v15 = vsel %vm3027_vm3, %v3112_v35, 0.0 }
 0x1ef   : > { %3008 = vst.msk [vmem:[%s5323_s7 + $0x34] sm:$0xf] %vm2994_vm2, %v3711_v63  ;;  %v3154_v28 = vsel %vm3027_vm3, %v3110_v23, 0.0  ;;  %v3714_v22 = vpack.c.bf16 %v2850_v32, %v2850_v32  ;;  %v3113_v14 = vmul.f32 %v2850_v32, %v2850_v32  ;;  %v3063_v19 = vsel %vm3027_vm3, %v2852_v20, 0.0  ;;  %v2732_v49 = vpop.f32.mrf.mxu0 }
 0x1f0   : > { %v2438_v47 = vpop.f32.mrf.mxu1  ;;  %v3056_v12 = vadd.f32 %v3055_v8, %v3054_v41  ;;  %v3155_v21 = vadd.f32 %v3154_v28, %v3153_v58  ;;  %3013 = vst.msk [vmem:[%s5323_s7 + $0x48] sm:$0xf] %vm2994_vm2, %v3716_v51  ;;  %v2853_v48 = vmax.f32 %v2821_v0, 0.0  ;;  %v3115_v55 = vmul.f32 %v2852_v20, %v2852_v20 }
 0x1f1   : > { %3011 = vst.msk [vmem:[%s5323_s7 + $0x40] sm:$0xf] %vm2994_vm2, %v3714_v22  ;;  %v2819_v30 = vadd.f32 %v5306_v4, %v2780_v56  ;;  %v2785_v37 = vadd.f32 %v5399_v9, %v2491_v34  ;;  %v2783_v40 = vadd.f32 %v2716_v10, %v2489_v17  ;;  %v3059_v1 = vsel %vm3027_vm3, %v2850_v32, 0.0  ;;  %v4184_v20 = vpop.f32.mrf.mxu0 }
 0x1f2   : > { %v3157_v16 = vadd.f32 %v3156_v33, %v3155_v21  ;;  %v3058_v43 = vadd.f32 %v3057_v3, %v3056_v12  ;;  %v3717_v8 = vpack.c.bf16 %v2853_v48, %v2853_v48  ;;  %v4150_v39 = vpop.f32.mrf.mxu1  ;;  %v3160_v57 = vsel %vm3027_vm3, %v3113_v14, 0.0 }
 0x1f3   : > { %v2851_v25 = vmax.f32 %v2819_v30, 0.0  ;;  %v2824_v11 = vadd.f32 %v5306_v4, %v2785_v37  ;;  %v2822_v27 = vadd.f32 %v5306_v4, %v2783_v40  ;;  %v2492_v9 = vadd.f32 %v4146_v54, %v5264_v2 }
 0x1f4   : > { %v3060_v38 = vadd.f32 %v3059_v1, %v3058_v43  ;;  %v3159_v52 = vadd.f32 %v3158_v15, %v3157_v16  ;;  %3014 = vst.msk [vmem:[%s5323_s7 + $0x4c] sm:$0xf] %vm2994_vm2, %v3717_v8  ;;  %v2490_v10 = vadd.f32 %v2425_v29, %v5267_v24  ;;  %v3116_v58 = vmul.f32 %v2853_v48, %v2853_v48  ;;  %v2441_v32 = vpop.f32.mrf.mxu1 }
 0x1f5   : > { %v3715_v6 = vpack.c.bf16 %v2851_v25, %v2851_v25  ;;  %v3061_v50 = vsel %vm3027_vm3, %v2851_v25, 0.0  ;;  %v3114_v44 = vmul.f32 %v2851_v25, %v2851_v25  ;;  %v2856_v36 = vmax.f32 %v2824_v11, 0.0 }
 0x1f6   : > { %v3161_v35 = vadd.f32 %v3160_v57, %v3159_v52  ;;  %v3062_v61 = vadd.f32 %v3061_v50, %v3060_v38  ;;  %v2854_v34 = vmax.f32 %v2822_v27, 0.0  ;;  %v2786_v2 = vadd.f32 %v5413_v45, %v2492_v9  ;;  %v4153_v51 = vpop.f32.mrf.mxu1 }
 0x1f7   : > { %3012 = vst.msk [vmem:[%s5323_s7 + $0x44] sm:$0xf] %vm2994_vm2, %v3715_v6  ;;  %v3162_v0 = vsel %vm3027_vm3, %v3114_v44, 0.0  ;;  %v2784_v24 = vadd.f32 %v5419_v53, %v2490_v10  ;;  %v2495_v54 = vadd.f32 %v4149_v13, %v5270_v46  ;;  %v3164_v29 = vsel %vm3027_vm3, %v3115_v55, 0.0  ;;  %v2735_v13 = vpop.f32.mrf.mxu0 }
 0x1f8   : > { %v3064_v17 = vadd.f32 %v3063_v19, %v3062_v61  ;;  %v3163_v63 = vadd.f32 %v3162_v0, %v3161_v35  ;;  %v3720_v26 = vpack.c.bf16 %v2856_v36, %v2856_v36  ;;  %v3065_v23 = vsel %vm3027_vm3, %v2853_v48, 0.0 }
 0x1f9   : > { %v3166_v56 = vsel %vm3027_vm3, %v3116_v58, 0.0  ;;  %v3718_v33 = vpack.c.bf16 %v2854_v34, %v2854_v34  ;;  %v3117_v3 = vmul.f32 %v2854_v34, %v2854_v34  ;;  %v2825_v53 = vadd.f32 %v5306_v4, %v2786_v2  ;;  %v4187_v8 = vpop.f32.mrf.mxu0 }
 0x1fa   : > { %v3165_v41 = vadd.f32 %v3164_v29, %v3163_v63  ;;  %3017 = vst.msk [vmem:[%s5323_s7 + $0x58] sm:$0xf] %vm2994_vm2, %v3720_v26  ;;  %v3066_v45 = vadd.f32 %v3065_v23, %v3064_v17  ;;  %v2823_v46 = vadd.f32 %v5306_v4, %v2784_v24  ;;  %v3119_v15 = vmul.f32 %v2856_v36, %v2856_v36 }
 0x1fb   : > { %3015 = vst.msk [vmem:[%s5323_s7 + $0x50] sm:$0xf] %vm2994_vm2, %v3718_v33  ;;  %v3067_v28 = vsel %vm3027_vm3, %v2854_v34, 0.0  ;;  %v2789_v22 = vadd.f32 %v5430_v60, %v2495_v54  ;;  %v2493_v14 = vadd.f32 %v2438_v47, %v5273_v62  ;;  %v2857_v19 = vmax.f32 %v2825_v53, 0.0  ;;  %v2454_v62 = vpop.f32.mrf.mxu1  ;;  %v2748_v44 = vpop.f32.mrf.mxu0 }
 0x1fc   : > { %v3068_v12 = vadd.f32 %v3067_v28, %v3066_v45  ;;  %v3167_v21 = vadd.f32 %v3166_v56, %v3165_v41  ;;  %v2855_v48 = vmax.f32 %v2823_v46, 0.0  ;;  %v3168_v55 = vsel %vm3027_vm3, %v3117_v3, 0.0 }
 0x1fd   : > { %v2828_v30 = vadd.f32 %v5306_v4, %v2789_v22  ;;  %v2787_v37 = vadd.f32 %v2732_v49, %v2493_v14  ;;  %v2496_v40 = vadd.f32 %v4150_v39, %v5276_v42  ;;  %v3721_v43 = vpack.c.bf16 %v2857_v19, %v2857_v19  ;;  %v4154_v35 = vpop.f32.mrf.mxu1  ;;  %v4188_v33 = vpop.f32.mrf.mxu0 }
 0x1fe   : > { %v3169_v16 = vadd.f32 %v3168_v55, %v3167_v21  ;;  %v3120_v1 = vmul.f32 %v2857_v19, %v2857_v19  ;;  %v2494_v60 = vadd.f32 %v2441_v32, %v5279_v59  ;;  %v3719_v47 = vpack.c.bf16 %v2855_v48, %v2855_v48 }
 0x1ff   : > { %v3069_v57 = vsel %vm3027_vm3, %v2855_v48, 0.0  ;;  %v3118_v25 = vmul.f32 %v2855_v48, %v2855_v48  ;;  %v2860_v11 = vmax.f32 %v2828_v30, 0.0  ;;  %v3071_v27 = vsel %vm3027_vm3, %v2856_v36, 0.0  ;;  %3018 = vst.msk [vmem:[%s5323_s7 + $0x5c] sm:$0xf] %vm2994_vm2, %v3721_v43  ;;  %v2751_v21 = vpop.f32.mrf.mxu0 }
 0x200   : > { %v3070_v49 = vadd.f32 %v3069_v57, %v3068_v12  ;;  %v2826_v42 = vadd.f32 %v5306_v4, %v2787_v37  ;;  %v2790_v39 = vadd.f32 %v4184_v20, %v2496_v40  ;;  %v3172_v38 = vsel %vm3027_vm3, %v3119_v15, 0.0  ;;  %3016 = vst.msk [vmem:[%s5323_s7 + $0x54] sm:$0xf] %vm2994_vm2, %v3719_v47 }
 0x201   : > { %v3073_v59 = vsel %vm3027_vm3, %v2857_v19, 0.0  ;;  %v3170_v52 = vsel %vm3027_vm3, %v3118_v25, 0.0  ;;  %v3724_v9 = vpack.c.bf16 %v2860_v11, %v2860_v11  ;;  %v3174_v61 = vsel %vm3027_vm3, %v3120_v1, 0.0 }
 0x202   : > { %v3072_v10 = vadd.f32 %v3071_v27, %v3070_v49  ;;  %v3171_v58 = vadd.f32 %v3170_v52, %v3169_v16  ;;  %v2858_v6 = vmax.f32 %v2826_v42, 0.0  ;;  %v2829_v50 = vadd.f32 %v5306_v4, %v2790_v39 }
 0x203   : > { %3021 = vst.msk [vmem:[%s5323_s7 + $0x68] sm:$0xf] %vm2994_vm2, %v3724_v9  ;;  %v2788_v36 = vadd.f32 %v2735_v13, %v2494_v60  ;;  %v2499_v34 = vadd.f32 %v4153_v51, %v5284_v18  ;;  %v2497_v20 = vadd.f32 %v2454_v62, %v5289_v7  ;;  %v2500_v18 = vadd.f32 %v4154_v35, %v5295_v5  ;;  %v2457_v7 = vpop.f32.mrf.mxu1 }
 0x204   : > { %v3173_v32 = vadd.f32 %v3172_v38, %v3171_v58  ;;  %v3722_v0 = vpack.c.bf16 %v2858_v6, %v2858_v6  ;;  %v3074_v2 = vadd.f32 %v3073_v59, %v3072_v10  ;;  %v3075_v24 = vsel %vm3027_vm3, %v2858_v6, 0.0 }
 0x205   : > { %v3121_v54 = vmul.f32 %v2858_v6, %v2858_v6  ;;  %v2861_v29 = vmax.f32 %v2829_v50, 0.0  ;;  %v2827_v17 = vadd.f32 %v5306_v4, %v2788_v36  ;;  %v2793_v63 = vadd.f32 %v4187_v8, %v2499_v34 }
 0x206   : > { %3019 = vst.msk [vmem:[%s5323_s7 + $0x60] sm:$0xf] %vm2994_vm2, %v3722_v0  ;;  %v3076_v26 = vadd.f32 %v3075_v24, %v3074_v2  ;;  %v3175_v23 = vadd.f32 %v3174_v61, %v3173_v32  ;;  %v2791_v56 = vadd.f32 %v2748_v44, %v2497_v20  ;;  %v3123_v51 = vmul.f32 %v2860_v11, %v2860_v11 }
 0x207   : > { %v3176_v3 = vsel %vm3027_vm3, %v3121_v54, 0.0  ;;  %v3725_v41 = vpack.c.bf16 %v2861_v29, %v2861_v29  ;;  %v2859_v53 = vmax.f32 %v2827_v17, 0.0  ;;  %v2832_v46 = vadd.f32 %v5306_v4, %v2793_v63 }
 0x208   : > { %v3177_v45 = vadd.f32 %v3176_v3, %v3175_v23  ;;  %v2830_v13 = vadd.f32 %v5306_v4, %v2791_v56  ;;  %v2794_v15 = vadd.f32 %v4188_v33, %v2500_v18  ;;  %v2498_v28 = vadd.f32 %v2457_v7, %v5301_v31 }
 0x209   : > { %3022 = vst.msk [vmem:[%s5323_s7 + $0x6c] sm:$0xf] %vm2994_vm2, %v3725_v41  ;;  %v3723_v22 = vpack.c.bf16 %v2859_v53, %v2859_v53  ;;  %v3077_v5 = vsel %vm3027_vm3, %v2859_v53, 0.0  ;;  %v3122_v14 = vmul.f32 %v2859_v53, %v2859_v53  ;;  %v2864_v12 = vmax.f32 %v2832_v46, 0.0 }
 0x20a   : > { %v3078_v19 = vadd.f32 %v3077_v5, %v3076_v26  ;;  %v2862_v48 = vmax.f32 %v2830_v13, 0.0  ;;  %v2833_v55 = vadd.f32 %v5306_v4, %v2794_v15  ;;  %v2792_v30 = vadd.f32 %v2751_v21, %v2498_v28 }
 0x20b   : > { %v3079_v37 = vsel %vm3027_vm3, %v2860_v11, 0.0  ;;  %v3124_v40 = vmul.f32 %v2861_v29, %v2861_v29  ;;  %3020 = vst.msk [vmem:[%s5323_s7 + $0x64] sm:$0xf] %vm2994_vm2, %v3723_v22  ;;  %v3178_v31 = vsel %vm3027_vm3, %v3122_v14, 0.0  ;;  %v3728_v16 = vpack.c.bf16 %v2864_v12, %v2864_v12 }
 0x20c   : > { %v3180_v43 = vsel %vm3027_vm3, %v3123_v51, 0.0  ;;  %v3080_v1 = vadd.f32 %v3079_v37, %v3078_v19  ;;  %v3179_v60 = vadd.f32 %v3178_v31, %v3177_v45  ;;  %v3726_v8 = vpack.c.bf16 %v2862_v48, %v2862_v48 }
 0x20d   : > { %v3081_v62 = vsel %vm3027_vm3, %v2861_v29, 0.0  ;;  %3025 = vst.msk [vmem:[%s5323_s7 + $0x78] sm:$0xf] %vm2994_vm2, %v3728_v16  ;;  %v3125_v47 = vmul.f32 %v2862_v48, %v2862_v48  ;;  %v2865_v57 = vmax.f32 %v2833_v55, 0.0  ;;  %v2831_v25 = vadd.f32 %v5306_v4, %v2792_v30 }
 0x20e   : > { %v3181_v11 = vadd.f32 %v3180_v43, %v3179_v60  ;;  %3023 = vst.msk [vmem:[%s5323_s7 + $0x70] sm:$0xf] %vm2994_vm2, %v3726_v8  ;;  %v3082_v27 = vadd.f32 %v3081_v62, %v3080_v1  ;;  %v3182_v49 = vsel %vm3027_vm3, %v3124_v40, 0.0  ;;  %v3083_v42 = vsel %vm3027_vm3, %v2862_v48, 0.0 }
 0x20f   : > { %v3729_v39 = vpack.c.bf16 %v2865_v57, %v2865_v57  ;;  %v2863_v52 = vmax.f32 %v2831_v25, 0.0  ;;  %v3127_v9 = vmul.f32 %v2864_v12, %v2864_v12  ;;  %v3184_v10 = vsel %vm3027_vm3, %v3125_v47, 0.0 }
 0x210   : > { %v3084_v38 = vadd.f32 %v3083_v42, %v3082_v27  ;;  %v3183_v59 = vadd.f32 %v3182_v49, %v3181_v11  ;;  %v3087_v35 = vsel %vm3027_vm3, %v2864_v12, 0.0  ;;  %v3128_v61 = vmul.f32 %v2865_v57, %v2865_v57 }
 0x211   : > { %3026 = vst.msk [vmem:[%s5323_s7 + $0x7c] sm:$0xf] %vm2994_vm2, %v3729_v39  ;;  %v3727_v4 = vpack.c.bf16 %v2863_v52, %v2863_v52  ;;  %v3085_v6 = vsel %vm3027_vm3, %v2863_v52, 0.0  ;;  %v3126_v50 = vmul.f32 %v2863_v52, %v2863_v52  ;;  %v3188_v32 = vsel %vm3027_vm3, %v3127_v9, 0.0 }
 0x212   : > { %v3185_v58 = vadd.f32 %v3184_v10, %v3183_v59  ;;  %v3086_v44 = vadd.f32 %v3085_v6, %v3084_v38  ;;  %v3089_v0 = vsel %vm3027_vm3, %v2865_v57, 0.0  ;;  %v3190_v54 = vsel %vm3027_vm3, %v3128_v61, 0.0 }
 0x213   : > { %3024 = vst.msk [vmem:[%s5323_s7 + $0x74] sm:$0xf] %vm2994_vm2, %v3727_v4  ;;  %v3186_v36 = vsel %vm3027_vm3, %v3126_v50, 0.0 }
 0x214   : > { %v3088_v34 = vadd.f32 %v3087_v35, %v3086_v44  ;;  %v3187_v20 = vadd.f32 %v3186_v36, %v3185_v58 }
 0x216   : > { %v3090_v2 = vadd.f32 %v3089_v0, %v3088_v34  ;;  %v3189_v24 = vadd.f32 %v3188_v32, %v3187_v20 }
 0x218   : > { %v3091_v29 = vrot.slane %v3090_v2, 4  ;;  %v3191_v17 = vadd.f32 %v3190_v54, %v3189_v24 }
 0x21a   : > { %v3092_v63 = vadd.f32 %v3091_v29, %v3090_v2  ;;  %v3192_v26 = vrot.slane %v3191_v17, 4 }
 0x21c   : > { %v3093_v23 = vrot.slane %v3092_v63, 2  ;;  %v3193_v56 = vadd.f32 %v3192_v26, %v3191_v17 }
 0x21e   : > { %v3094_v18 = vadd.f32 %v3093_v23, %v3092_v63  ;;  %v3194_v33 = vrot.slane %v3193_v56, 2 }
 0x220   : > { %v3095_v7 = vrot.slane %v3094_v18, 1  ;;  %v3195_v3 = vadd.f32 %v3194_v33, %v3193_v56 }
 0x222   : > { %v3196_v41 = vrot.slane %v3195_v3, 1  ;;  %v3096_v45 = vadd.f32 %v3095_v7, %v3094_v18 }
 0x224   : > { %v3197_v53 = vadd.f32 %v3196_v41, %v3195_v3 }
 0x226   : > { %v3199_v46 = vsel %vm3198_vm4, %v3096_v45, %v3197_v53 }
 0x227   : > { %3201 = vst.msk [vmem:[%s198_s22] sm:$0x3] %vm3200_vm5, %v3199_v46 }
 0x228   : > { %4254 = shalt.err (!%p4251_p3)
}
 0x229   : > { %s4255_s9 = scalar_lea.hbm %s5532_s29, 32  ;;  %s4259_s12 = scalar_lea.hbm %s5571_s4, 64 }
 0x22a   : > { %p4256_p4 = scmp.ne.s32.totalorder %s5532_s29, %s4255_s9  ;;  %p4260_p9 = scmp.lt.s32.totalorder %s5532_s29, %s5571_s4 }
 0x22b   : > { %p4261_p10 = scmp.lt.s32.totalorder %s4259_s12, %s4255_s9 }
 0x22c   : > { %p4257_p7 = pnand %p4256_p4, %p4367_p5 }
 0x22d   : > { %p4262_p11 = por %p4261_p10, %p4260_p9 }
 0x22e   : > { %p4258_p8 = pneg %p4257_p7 }
 0x230   : > { %p4263_p12 = pnand %p4262_p11, %p4258_p8 }
 0x232   : > { %4266 = shalt.err (!%p4263_p12)
}
 0x233   : > { %4202 = dma.vmem_to_hbm [thread:$0]  (%p4367_p5), %s3225_s23, 32, %s5532_s29, %s3208_s30  }
 0x234 PF: > { %p4208_p13 = scmp.ge.s32.totalorder %s4301_s18, 2  ;;  %s3244_s14 = sand.u32 1, %s4289_s15  }
 0x235   : > { %s3245_s20 = scalar_lea.sflag [#allocation3], %s3244_s14 }
 0x236   : > { %p4205_p0 = pnand %p4208_p13, %p4371_p6 }
 0x238   : > { %p4206_p1 = pneg %p4205_p0 }
 0x23a   : > { %4284 = dma.done.wait (%p4206_p1), %s3245_s20, 32  }
 0x23b   : > { %4286 = vsyncadd (%p4206_p1), %s3245_s20, 4294967264  ;;  %p15_p2 = scmp.ge.s32.totalorder %s4354_s21, 4   ;;  %s5574_s15 = smov %s4293_s16 }
 0x23c   : > { %s5575_s16 = smov %s4297_s17  ;;  %s5576_s17 = smov %s4365_s24 }
 0x23d   : > { %s5577_s18 = smov %s4354_s21  ;;  %17 = sbr.rel (!%p15_p2) target bundleno = 3 (0x3), region = 89 }
 0x242   :  { %3250 = vsyncpa [#allocation3], 1 }
 0x243   :  { %3252 = vsyncpa [#allocation3 + $0x1], 1 }

// kernel: probabilistic_unet_forward.21
= control target key start
LH: loop header
LB: loop body
LE: loop exit
PB: predicated region body
PF: predicated region fallthrough
CT: control target
= control target key end

     0   :  { %s3824_s21 = smov 0   ;;  %s3826_s22 = smov 0   ;;  %s5094_s0 = inlined_call_operand.vmem [shape: bf16[2,256,4], index: 0, kind: input, shape index: {}]   ;;  %s5095_s1 = inlined_call_operand.vmem [shape: bf16[2,1,6], index: 1, kind: input, shape index: {}]   ;;  %s5096_s2 = inlined_call_operand.vmem [shape: bf16[2,1,6], index: 2, kind: input, shape index: {}]   ;;  %s5097_s3 = inlined_call_operand.vmem [shape: s32[2,256,1], index: 3, kind: input, shape index: {}]   ;;  %s5098_s4 = inlined_call_operand.vmem [shape: bf16[4,4], index: 4, kind: input, shape index: {}]   ;;  %s5099_s5 = inlined_call_operand.vmem [shape: bf16[6,4], index: 5, kind: input, shape index: {}]   ;;  %s5100_s6 = inlined_call_operand.vmem [shape: f32[1,4], index: 6, kind: input, shape index: {}]   ;;  %s5101_s7 = inlined_call_operand.vmem [shape: bf16[4,4], index: 7, kind: input, shape index: {}]   ;;  %s5102_s8 = inlined_call_operand.vmem [shape: f32[1,4], index: 8, kind: input, shape index: {}]   ;;  %s5103_s9 = inlined_call_operand.vmem [shape: bf16[4,3], index: 9, kind: input, shape index: {}]   ;;  %s5104_s10 = inlined_call_operand.vmem [shape: f32[1,3], index: 10, kind: input, shape index: {}]   ;;  %s5105_s11 = inlined_call_operand.vmem [shape: f32[2,256,3], index: 11, kind: output, shape index: {0}]   ;;  %s5106_s12 = inlined_call_operand.vmem [shape: f32[2,1,3,3], index: 12, kind: output, shape index: {1}]  }
   0x1   :  { %s3828_s23 = smov 0  }
   0x2 LB: > { %s35_s24 = sadd.s32 1, %s3750_s22  ;;  %p3131_p0 = scmp.ge.s32.totalorder %s3754_s23, 1  ;;  %s3754_s23 = sphi %s3828_s23, %s23_s23   ;;  %s3750_s22 = sphi %s3826_s22, %s5158_s22   ;;  %s3746_s21 = sphi %s3824_s21, %s5157_s21  }
   0x3   : > { %p37_p1 = scmp.ge.s32.totalorder %s35_s24, 2  ;;  %p421_p2 = scmp.lt.s32.totalorder %s3754_s23, 3 }
   0x5   : > { %s5160_s24 = smov (%p37_p1, %s35_s24), 0  ;;  %p422_p3 = pnand %p3131_p0, %p421_p2 }
   0x7   : > { %425 = sbr.rel (%p422_p3) target bundleno = 1316 (0x524), region = 64 }
   0xc   : > { %v569_v0 = vld [vmem:[%s5098_s4] sm:$0x3]  ;;  %vm699_vm0 = vcmask 1041408   ;;  %p494_p4 = scmp.lt.s32.totalorder %s3746_s21, 1  ;;  %v5107_v2 = vmov 0.0   ;;  %vm650_vm1 = vcmask 31744   ;;  %v915_v44 = vlaneseq }
   0xd   : > { %3552 = vmatprep.subr.msk.bf16.mxu1 %vm699_vm0, %v569_v0  ;;  %3551 = vmatprep.subr.msk.bf16.mxu0 %vm699_vm0, %v569_v0  ;;  %v701_v1 = vsel %vm699_vm0, %v569_v0, 0  ;;  %v865_v3 = vld [vmem:[%s5099_s5] sm:$0x7]  ;;  %vm871_vm2 = vcmask 1042432   ;;  %vm3757_vm3 = vmmov 0   ;;  %vm867_vm4 = vcmask 48128  }
   0xe   : > { %3550 = vmatpush3.bf16.msra.mxu1 %v701_v1  ;;  %3368 = vmatpush3.bf16.msra.mxu0 %v701_v1  ;;  %s5162_s21 = smov (!%p494_p4, %s3746_s21), 1  ;;  %v873_v8 = vsel %vm871_vm2, %v865_v3, 0  ;;  %v999_v22 = vld [vmem:[%s5101_s7] sm:$0x3]  ;;  %v3953_v48 = vshrl.u32 %v915_v44, 7  ;;  %vm1487_vm5 = vcmask 23552  }
   0xf   : > { %3401 = vmatprep.subr.bf16.mxu1 %v5107_v2  ;;  %s3275_s27 = sshll.u32 %s5162_s21, 7  ;;  %s505_s17 = scalar_lea.vmem %s5095_s1, %s5162_s21  ;;  %v1056_v23 = vsel %vm699_vm0, %v999_v22, 0  ;;  %v866_v49 = vld [vmem:[%s5100_s6] sm:$0x1] }
  0x10   : > { %s3855_s30 = scalar_lea.vmem %s5094_s0, %s3275_s27  ;;  %v864_v20 = vld [vmem:[%s505_s17] sm:$0x1]  ;;  %v917_v53 = vsub.s32 0, %v3953_v48  ;;  %s3276_s27 = sshll.u32 %s5162_s21, 8 }
  0x11   : > { %v3586_v4 = vld [vmem:[%s3855_s30] sm:$0xff]   ;;  %v3587_v5 = vld [vmem:[%s3855_s30 + $0x50] sm:$0xff]   ;;  %v3588_v6 = vld [vmem:[%s3855_s30 + $0x8] sm:$0xff]   ;;  %s4243_s17 = scalar_lea.vmem %s5105_s11, %s3276_s27  ;;  %s3138_s26 = sshll.u32 %s5162_s21, 2 }
  0x12   : > { %3369 = vmatprep.mubr.msk.bf16.mxu0 %vm650_vm1, %v3586_v4  ;;  %3389 = vmatprep.mubr.msk.bf16.mxu1 %vm650_vm1, %v3587_v5  ;;  %v3589_v7 = vld [vmem:[%s3855_s30 + $0x58] sm:$0xff]   ;;  %v3590_v9 = vld [vmem:[%s3855_s30 + $0x10] sm:$0xff]   ;;  %v3591_v10 = vld [vmem:[%s3855_s30 + $0x60] sm:$0xff]   ;;  %s535_s29 = scalar_lea.vmem %s5106_s12, %s3138_s26 }
  0x13   : > { %3370 = vmatmul.mubr.msk.bf16.vlgmr.msra.gmra.mxu0 %vm650_vm1, %v3588_v6  ;;  %3390 = vmatmul.mubr.msk.bf16.vlgmr.msra.gmra.mxu1 %vm650_vm1, %v3589_v7  ;;  %v3592_v11 = vld [vmem:[%s3855_s30 + $0x18] sm:$0xff]   ;;  %v3593_v12 = vld [vmem:[%s3855_s30 + $0x68] sm:$0xff]   ;;  %v3594_v13 = vld [vmem:[%s3855_s30 + $0x20] sm:$0xff]  }
  0x14   : > { %3402 = vmatpush3.bf16.msra.mxu1 %v873_v8  ;;  %3373 = vmatprep.mubr.msk.bf16.mxu0 %vm650_vm1, %v3590_v9  ;;  %v3595_v14 = vld [vmem:[%s3855_s30 + $0x70] sm:$0xff]   ;;  %v3596_v15 = vld [vmem:[%s3855_s30 + $0x28] sm:$0xff]   ;;  %v3597_v16 = vld [vmem:[%s3855_s30 + $0x78] sm:$0xff]  }
  0x15   : > { %3393 = vmatprep.mubr.msk.bf16.mxu1 %vm650_vm1, %v3591_v10  ;;  %v3598_v17 = vld [vmem:[%s3855_s30 + $0x30] sm:$0xff]   ;;  %v3599_v18 = vld [vmem:[%s3855_s30 + $0x38] sm:$0xff]   ;;  %v3600_v19 = vld [vmem:[%s3855_s30 + $0x40] sm:$0xff]   ;;  %3553 = vmatprep.subr.msk.bf16.mxu1 %vm699_vm0, %v999_v22 }
  0x16   : > { %v3601_v21 = vld [vmem:[%s3855_s30 + $0x48] sm:$0xff]   ;;  %v1521_v10 = vld [vmem:[%s5099_s5] sm:$0x7]  ;;  %s508_s30 = scalar_lea.vmem %s5096_s2, %s5162_s21 }
  0x1b   : > { %3374 = vmatmul.mubr.msk.bf16.gmra.mxu0 %vm650_vm1, %v3592_v11  ;;  %3394 = vmatmul.mubr.msk.bf16.gmra.mxu1 %vm650_vm1, %v3593_v12 }
  0x1c   : > { %3377 = vmatprep.mubr.msk.bf16.mxu0 %vm650_vm1, %v3594_v13  ;;  %3397 = vmatprep.mubr.msk.bf16.mxu1 %vm650_vm1, %v3595_v14 }
  0x23   : > { %3378 = vmatmul.mubr.msk.bf16.gmra.mxu0 %vm650_vm1, %v3596_v15  ;;  %3398 = vmatmul.mubr.msk.bf16.gmra.mxu1 %vm650_vm1, %v3597_v16  ;;  %v1527_v16 = vsel %vm871_vm2, %v1521_v10, 0 }
  0x24   : > { %3381 = vmatprep.mubr.msk.bf16.mxu0 %vm650_vm1, %v3598_v17  ;;  %3403 = vmatprep.mubr.msk.bf16.mxu1 %vm3757_vm3, %v5107_v2 }
  0x2b   : > { %3382 = vmatmul.mubr.msk.bf16.gmra.mxu0 %vm650_vm1, %v3599_v18  ;;  %3404 = vmatmul.mubr.msk.bf16.vlgmr.msra.gmra.mxu1 %vm867_vm4, %v864_v20 }
  0x2c   : > { %3385 = vmatprep.mubr.msk.bf16.mxu0 %vm650_vm1, %v3600_v19  ;;  %3408 = vmatpush3.bf16.msra.mxu1 %v1056_v23 }
  0x2d   : > { %3475 = vmatprep.subr.bf16.mxu1 %v5107_v2 }
  0x33   : > { %3386 = vmatmul.mubr.msk.bf16.gmra.mxu0 %vm650_vm1, %v3601_v21 }
  0xd3   : > { %v3906_v24 = vpop.f32.mrf.mxu0  ;;  %v3908_v25 = vpop.f32.mrf.mxu1 }
  0xd5   : > { %v3910_v26 = vpop.f32.mrf.mxu0  ;;  %v3912_v27 = vpop.f32.mrf.mxu1 }
  0xd7   : > { %v3914_v28 = vpop.f32.mrf.mxu0  ;;  %v3916_v29 = vpop.f32.mrf.mxu1 }
  0xd9   : > { %v3918_v30 = vpop.f32.mrf.mxu0  ;;  %v3920_v31 = vpop.f32.mrf.mxu1 }
  0xdb   : > { %v3922_v32 = vpop.f32.mrf.mxu0  ;;  %v3924_v33 = vpop.f32.mrf.mxu1 }
  0xdd   : > { %v3926_v34 = vpop.f32.mrf.mxu0  ;;  %v3928_v35 = vpop.f32.mrf.mxu1 }
  0xdf   : > { %v3930_v36 = vpop.f32.mrf.mxu0  ;;  %v3932_v37 = vpop.f32.mrf.mxu1 }
  0xe1   : > { %v3934_v38 = vpop.f32.mrf.mxu0  ;;  %v3936_v39 = vpop.f32.mrf.mxu1 }
  0xe3   : > { %v3938_v40 = vpop.f32.mrf.mxu0  ;;  %v3940_v41 = vpop.f32.mrf.mxu1 }
  0xe5   : > { %v3942_v42 = vpop.f32.mrf.mxu0  ;;  %v3944_v43 = vpop.f32.mrf.mxu1 }
  0xe7   : > { %v3946_v45 = vpop.f32.mrf.mxu1  ;;  %v3948_v46 = vpop.f32.mrf.mxu0 }
  0xe9   : > { %v3950_v47 = vpop.f32.mrf.mxu1  ;;  %v3958_v51 = vpop.f32.mrf.mxu0 }
  0xeb   : > { %v909_v50 = vpop.f32.mrf.mxu1  ;;  %v3961_v56 = vpop.f32.mrf.mxu0 }
  0xec   : > { %v910_v52 = vadd.f32 %v909_v50, %v866_v49 }
  0xed   : > { %v3405_v54 = vpop.f32.mrf.mxu1  ;;  %v3967_v59 = vpop.f32.mrf.mxu0 }
  0xee   : > { %v3965_v57 = vrot.slane %v910_v52, %v917_v53 }
  0xef   : > { %v912_v55 = vpop.f32.mrf.mxu1  ;;  %v3981_v3 = vpop.f32.mrf.mxu0 }
  0xf0   : > { %v919_v60 = vadd.f32 %v3965_v57, %v3910_v26  ;;  %v920_v61 = vadd.f32 %v3965_v57, %v3918_v30  ;;  %v921_v62 = vadd.f32 %v3906_v24, %v3965_v57  ;;  %v922_v63 = vadd.f32 %v3914_v28, %v3965_v57 }
  0xf1   : > { %v3406_v58 = vpop.f32.mrf.mxu1  ;;  %v923_v0 = vadd.f32 %v3965_v57, %v3926_v34  ;;  %v924_v1 = vadd.f32 %v3965_v57, %v3934_v38  ;;  %v3986_v11 = vpop.f32.mrf.mxu0  ;;  %v925_v14 = vadd.f32 %v3922_v32, %v3965_v57  ;;  %v926_v15 = vadd.f32 %v3930_v36, %v3965_v57 }
  0xf2   : > { %v951_v4 = vmax.f32 %v919_v60, 0.0  ;;  %v952_v5 = vmax.f32 %v920_v61, 0.0  ;;  %v953_v6 = vmax.f32 %v921_v62, 0.0  ;;  %v954_v7 = vmax.f32 %v922_v63, 0.0 }
  0xf3   : > { %v955_v8 = vmax.f32 %v923_v0, 0.0  ;;  %v956_v9 = vmax.f32 %v924_v1, 0.0  ;;  %v927_v17 = vadd.f32 %v3965_v57, %v3942_v42  ;;  %v928_v18 = vadd.f32 %v3965_v57, %v3958_v51  ;;  %v3998_v20 = vpop.f32.mrf.mxu0 }
  0xf4   : > { %v983_v12 = vpack.c.bf16 %v952_v5, %v951_v4  ;;  %v984_v13 = vpack.c.bf16 %v954_v7, %v953_v6  ;;  %v957_v21 = vmax.f32 %v925_v14, 0.0  ;;  %v958_v22 = vmax.f32 %v926_v15, 0.0 }
  0xf5   : > { %v985_v19 = vpack.c.bf16 %v956_v9, %v955_v8  ;;  %v959_v23 = vmax.f32 %v927_v17, 0.0  ;;  %v960_v49 = vmax.f32 %v928_v18, 0.0  ;;  %v4002_v50 = vpop.f32.mrf.mxu0  ;;  %v929_v52 = vadd.f32 %v3938_v40, %v3965_v57 }
  0xf6   : > { %3409 = vmatprep.mubr.msk.bf16.mxu1 %vm650_vm1, %v983_v12  ;;  %v930_v54 = vadd.f32 %v3948_v46, %v3965_v57  ;;  %v986_v55 = vpack.c.bf16 %v958_v22, %v957_v21  ;;  %v932_v60 = vadd.f32 %v3965_v57, %v3986_v11  ;;  %v931_v62 = vadd.f32 %v3965_v57, %v3967_v59 }
  0xf7   : > { %3410 = vmatmul.mubr.msk.bf16.vlgmr.msra.gmra.mxu1 %vm650_vm1, %v984_v13  ;;  %v987_v58 = vpack.c.bf16 %v960_v49, %v959_v23  ;;  %v4010_v61 = vpop.f32.mrf.mxu0  ;;  %v961_v63 = vmax.f32 %v929_v52, 0.0  ;;  %v933_v6 = vadd.f32 %v3961_v56, %v3965_v57  ;;  %v934_v8 = vadd.f32 %v3981_v3, %v3965_v57 }
  0xf8   : > { %3476 = vmatpush3.bf16.msra.mxu1 %v1527_v16  ;;  %3413 = vmatprep.mubr.msk.bf16.mxu1 %vm650_vm1, %v985_v19  ;;  %v962_v0 = vmax.f32 %v930_v54, 0.0  ;;  %v964_v1 = vmax.f32 %v932_v60, 0.0  ;;  %v963_v5 = vmax.f32 %v931_v62, 0.0  ;;  %v935_v12 = vadd.f32 %v3965_v57, %v4002_v50 }
  0xf9   : > { %v4016_v4 = vpop.f32.mrf.mxu0  ;;  %v965_v13 = vmax.f32 %v933_v6, 0.0  ;;  %v966_v14 = vmax.f32 %v934_v8, 0.0  ;;  %v938_v18 = vadd.f32 %v4010_v61, %v3965_v57  ;;  %v939_v19 = vadd.f32 %v3965_v57, %v3912_v27 }
  0xfa   : > { %v988_v7 = vpack.c.bf16 %v962_v0, %v961_v63  ;;  %v989_v9 = vpack.c.bf16 %v964_v1, %v963_v5  ;;  %v936_v10 = vadd.f32 %v3965_v57, %v4016_v4  ;;  %v967_v16 = vmax.f32 %v935_v12, 0.0 }
  0xfb   : > { %v990_v17 = vpack.c.bf16 %v966_v14, %v965_v13  ;;  %v940_v21 = vadd.f32 %v3965_v57, %v3920_v31  ;;  %v937_v23 = vadd.f32 %v3998_v20, %v3965_v57  ;;  %v970_v49 = vmax.f32 %v938_v18, 0.0 }
  0xfc   : > { %v968_v15 = vmax.f32 %v936_v10, 0.0  ;;  %v971_v52 = vmax.f32 %v939_v19, 0.0  ;;  %v942_v60 = vadd.f32 %v3916_v29, %v3965_v57  ;;  %v943_v63 = vadd.f32 %v3965_v57, %v3928_v35 }
  0xfd   : > { %v972_v54 = vmax.f32 %v940_v21, 0.0  ;;  %v944_v0 = vadd.f32 %v3965_v57, %v3936_v39  ;;  %v946_v10 = vadd.f32 %v3932_v37, %v3965_v57  ;;  %v947_v13 = vadd.f32 %v3965_v57, %v3944_v43 }
  0xfe   : > { %v991_v22 = vpack.c.bf16 %v968_v15, %v967_v16  ;;  %v974_v6 = vmax.f32 %v942_v60, 0.0  ;;  %v948_v14 = vadd.f32 %v3965_v57, %v3950_v47  ;;  %v949_v21 = vadd.f32 %v3940_v41, %v3965_v57 }
  0xff   : > { %3414 = vmatmul.mubr.msk.bf16.gmra.mxu1 %vm650_vm1, %v986_v55  ;;  %v969_v55 = vmax.f32 %v937_v23, 0.0  ;;  %v993_v1 = vpack.c.bf16 %v972_v54, %v971_v52  ;;  %v976_v8 = vmax.f32 %v944_v0, 0.0  ;;  %v979_v18 = vmax.f32 %v947_v13, 0.0 }
 0x100   : > { %3417 = vmatprep.mubr.msk.bf16.mxu1 %vm650_vm1, %v987_v58  ;;  %v941_v58 = vadd.f32 %v3908_v25, %v3965_v57  ;;  %v980_v19 = vmax.f32 %v948_v14, 0.0  ;;  %v981_v52 = vmax.f32 %v949_v21, 0.0 }
 0x101   : > { %v992_v62 = vpack.c.bf16 %v970_v49, %v969_v55 }
 0x102   : > { %v973_v5 = vmax.f32 %v941_v58, 0.0  ;;  %v997_v49 = vpack.c.bf16 %v980_v19, %v979_v18  ;;  %v1520_v58 = vld [vmem:[%s508_s30] sm:$0x1]  ;;  %s4231_s30 = scalar_lea.vmem %s5097_s3, %s3276_s27 }
 0x104   : > { %v994_v12 = vpack.c.bf16 %v974_v6, %v973_v5  ;;  %v4085_v5 = vld [vmem:[%s5102_s8] ss:$0 sm:$0xff] }
 0x107   : > { %3418 = vmatmul.mubr.msk.bf16.gmra.mxu1 %vm650_vm1, %v988_v7  ;;  %v975_v7 = vmax.f32 %v943_v63, 0.0 }
 0x108   : > { %3421 = vmatprep.mubr.msk.bf16.mxu1 %vm650_vm1, %v989_v9  ;;  %v945_v9 = vadd.f32 %v3924_v33, %v3965_v57 }
 0x109   : > { %v995_v15 = vpack.c.bf16 %v976_v8, %v975_v7 }
 0x10a   : > { %v977_v16 = vmax.f32 %v945_v9, 0.0 }
 0x10f   : > { %3422 = vmatmul.mubr.msk.bf16.gmra.mxu1 %vm650_vm1, %v990_v17  ;;  %v978_v17 = vmax.f32 %v946_v10, 0.0 }
 0x110   : > { %3425 = vmatprep.mubr.msk.bf16.mxu1 %vm650_vm1, %v991_v22  ;;  %v950_v22 = vadd.f32 %v3946_v45, %v3965_v57  ;;  %v1267_v57 = vld [vmem:[%s5103_s9] sm:$0x3] }
 0x111   : > { %v996_v23 = vpack.c.bf16 %v978_v17, %v977_v16  ;;  %3554 = vmatprep.subr.msk.bf16.mxu0 %vm699_vm0, %v1267_v57  ;;  %v1324_v60 = vsel %vm699_vm0, %v1267_v57, 0 }
 0x112   : > { %v982_v54 = vmax.f32 %v950_v22, 0.0  ;;  %3442 = vmatpush3.bf16.msra.mxu0 %v1324_v60 }
 0x114   : > { %v998_v55 = vpack.c.bf16 %v982_v54, %v981_v52 }
 0x117   : > { %3426 = vmatmul.mubr.msk.bf16.gmra.mxu1 %vm650_vm1, %v992_v62  ;;  %v1653_v62 = vld [vmem:[%s5101_s7] sm:$0x3] }
 0x118   : > { %3429 = vmatprep.mubr.msk.bf16.mxu1 %vm650_vm1, %v993_v1  ;;  %3555 = vmatprep.subr.msk.bf16.mxu1 %vm699_vm0, %v1653_v62  ;;  %v1710_v63 = vsel %vm699_vm0, %v1653_v62, 0 }
 0x11f   : > { %3430 = vmatmul.mubr.msk.bf16.gmra.mxu1 %vm650_vm1, %v994_v12 }
 0x120   : > { %3433 = vmatprep.mubr.msk.bf16.mxu1 %vm650_vm1, %v995_v15 }
 0x127   : > { %3434 = vmatmul.mubr.msk.bf16.gmra.mxu1 %vm650_vm1, %v996_v23 }
 0x128   : > { %3437 = vmatprep.mubr.msk.bf16.mxu1 %vm650_vm1, %v997_v49 }
 0x12f   : > { %3438 = vmatmul.mubr.msk.bf16.gmra.mxu1 %vm650_vm1, %v998_v55 }
 0x130   : > { %3477 = vmatprep.mubr.msk.bf16.mxu1 %vm3757_vm3, %v5107_v2 }
 0x137   : > { %3478 = vmatmul.mubr.msk.bf16.vlgmr.msra.gmra.mxu1 %vm867_vm4, %v1520_v58 }
 0x138   : > { %3482 = vmatpush3.bf16.msra.mxu1 %v1710_v63 }
 0x1b7   : > { %v3411_v0 = vpop.f32.mrf.mxu1 }
 0x1b8   : > { %v1101_v9 = vadd.f32 %v3411_v0, %v4085_v5 }
 0x1b9   : > { %v1092_v1 = vpop.f32.mrf.mxu1 }
 0x1ba   : > { %v1093_v7 = vadd.f32 %v4085_v5, %v1092_v1  ;;  %v1221_v17 = vmax.f32 %v1101_v9, 0.0 }
 0x1bb   : > { %v3412_v6 = vpop.f32.mrf.mxu1 }
 0x1bc   : > { %v1104_v8 = vadd.f32 %v3412_v6, %v4085_v5  ;;  %v1219_v15 = vmax.f32 %v1093_v7, 0.0 }
 0x1bd   : > { %v1095_v10 = vpop.f32.mrf.mxu1 }
 0x1be   : > { %v1096_v12 = vadd.f32 %v4085_v5, %v1095_v10  ;;  %v1222_v13 = vmax.f32 %v1104_v8, 0.0 }
 0x1bf   : > { %v3415_v14 = vpop.f32.mrf.mxu1 }
 0x1c0   : > { %v1220_v16 = vmax.f32 %v1096_v12, 0.0  ;;  %v1252_v21 = vpack.c.bf16 %v1222_v13, %v1221_v17  ;;  %v1117_v52 = vadd.f32 %v3415_v14, %v4085_v5 }
 0x1c1   : > { %v1108_v18 = vpop.f32.mrf.mxu1 }
 0x1c2   : > { %v1251_v19 = vpack.c.bf16 %v1220_v16, %v1219_v15  ;;  %v1109_v23 = vadd.f32 %v4085_v5, %v1108_v18  ;;  %v1225_v63 = vmax.f32 %v1117_v52, 0.0 }
 0x1c3   : > { %v3416_v22 = vpop.f32.mrf.mxu1 }
 0x1c4   : > { %v1120_v49 = vadd.f32 %v3416_v22, %v4085_v5  ;;  %3443 = vmatprep.mubr.msk.bf16.mxu0 %vm650_vm1, %v1251_v19  ;;  %v1223_v60 = vmax.f32 %v1109_v23, 0.0 }
 0x1c5   : > { %v1111_v54 = vpop.f32.mrf.mxu1  ;;  %3444 = vmatmul.mubr.msk.bf16.vlgmr.msra.gmra.mxu0 %vm650_vm1, %v1252_v21 }
 0x1c6   : > { %v1112_v55 = vadd.f32 %v4085_v5, %v1111_v54  ;;  %v1226_v58 = vmax.f32 %v1120_v49, 0.0 }
 0x1c7   : > { %v3419_v57 = vpop.f32.mrf.mxu1 }
 0x1c8   : > { %v1224_v62 = vmax.f32 %v1112_v55, 0.0  ;;  %v1254_v6 = vpack.c.bf16 %v1226_v58, %v1225_v63  ;;  %v1133_v10 = vadd.f32 %v3419_v57, %v4085_v5 }
 0x1c9   : > { %v1124_v0 = vpop.f32.mrf.mxu1 }
 0x1ca   : > { %v1253_v1 = vpack.c.bf16 %v1224_v62, %v1223_v60  ;;  %v1125_v8 = vadd.f32 %v4085_v5, %v1124_v0  ;;  %v1229_v18 = vmax.f32 %v1133_v10, 0.0 }
 0x1cb   : > { %v3420_v7 = vpop.f32.mrf.mxu1 }
 0x1cc   : > { %v1136_v9 = vadd.f32 %v3420_v7, %v4085_v5  ;;  %3447 = vmatprep.mubr.msk.bf16.mxu0 %vm650_vm1, %v1253_v1  ;;  %v1227_v16 = vmax.f32 %v1125_v8, 0.0 }
 0x1cd   : > { %v1127_v12 = vpop.f32.mrf.mxu1  ;;  %3448 = vmatmul.mubr.msk.bf16.gmra.mxu0 %vm650_vm1, %v1254_v6 }
 0x1ce   : > { %v1128_v13 = vadd.f32 %v4085_v5, %v1127_v12  ;;  %v1230_v14 = vmax.f32 %v1136_v9, 0.0 }
 0x1cf   : > { %v3423_v15 = vpop.f32.mrf.mxu1 }
 0x1d0   : > { %v1228_v17 = vmax.f32 %v1128_v13, 0.0  ;;  %v1256_v22 = vpack.c.bf16 %v1230_v14, %v1229_v18  ;;  %v1149_v54 = vadd.f32 %v3423_v15, %v4085_v5 }
 0x1d1   : > { %v1140_v19 = vpop.f32.mrf.mxu1 }
 0x1d2   : > { %v1255_v21 = vpack.c.bf16 %v1228_v17, %v1227_v16  ;;  %v1141_v49 = vadd.f32 %v4085_v5, %v1140_v19  ;;  %v1233_v0 = vmax.f32 %v1149_v54, 0.0 }
 0x1d3   : > { %v3424_v23 = vpop.f32.mrf.mxu1 }
 0x1d4   : > { %v1152_v52 = vadd.f32 %v3424_v23, %v4085_v5  ;;  %3451 = vmatprep.mubr.msk.bf16.mxu0 %vm650_vm1, %v1255_v21  ;;  %v1231_v62 = vmax.f32 %v1141_v49, 0.0 }
 0x1d5   : > { %v1143_v55 = vpop.f32.mrf.mxu1  ;;  %3452 = vmatmul.mubr.msk.bf16.gmra.mxu0 %vm650_vm1, %v1256_v22 }
 0x1d6   : > { %v1144_v58 = vadd.f32 %v4085_v5, %v1143_v55  ;;  %v1234_v57 = vmax.f32 %v1152_v52, 0.0 }
 0x1d7   : > { %v3427_v60 = vpop.f32.mrf.mxu1 }
 0x1d8   : > { %v1232_v63 = vmax.f32 %v1144_v58, 0.0  ;;  %v1258_v7 = vpack.c.bf16 %v1234_v57, %v1233_v0  ;;  %v1165_v12 = vadd.f32 %v3427_v60, %v4085_v5 }
 0x1d9   : > { %v1156_v1 = vpop.f32.mrf.mxu1 }
 0x1da   : > { %v1257_v6 = vpack.c.bf16 %v1232_v63, %v1231_v62  ;;  %v1157_v9 = vadd.f32 %v4085_v5, %v1156_v1  ;;  %v1237_v19 = vmax.f32 %v1165_v12, 0.0 }
 0x1db   : > { %v3428_v8 = vpop.f32.mrf.mxu1 }
 0x1dc   : > { %v1168_v10 = vadd.f32 %v3428_v8, %v4085_v5  ;;  %3455 = vmatprep.mubr.msk.bf16.mxu0 %vm650_vm1, %v1257_v6  ;;  %v1235_v17 = vmax.f32 %v1157_v9, 0.0 }
 0x1dd   : > { %v1159_v13 = vpop.f32.mrf.mxu1  ;;  %3456 = vmatmul.mubr.msk.bf16.gmra.mxu0 %vm650_vm1, %v1258_v7 }
 0x1de   : > { %v1160_v14 = vadd.f32 %v4085_v5, %v1159_v13  ;;  %v1238_v15 = vmax.f32 %v1168_v10, 0.0 }
 0x1df   : > { %v3431_v16 = vpop.f32.mrf.mxu1 }
 0x1e0   : > { %v1236_v18 = vmax.f32 %v1160_v14, 0.0  ;;  %v1260_v23 = vpack.c.bf16 %v1238_v15, %v1237_v19  ;;  %v1181_v55 = vadd.f32 %v3431_v16, %v4085_v5 }
 0x1e1   : > { %v1172_v21 = vpop.f32.mrf.mxu1 }
 0x1e2   : > { %v1259_v22 = vpack.c.bf16 %v1236_v18, %v1235_v17  ;;  %v1173_v52 = vadd.f32 %v4085_v5, %v1172_v21  ;;  %v1241_v1 = vmax.f32 %v1181_v55, 0.0 }
 0x1e3   : > { %v3432_v49 = vpop.f32.mrf.mxu1 }
 0x1e4   : > { %v1184_v54 = vadd.f32 %v3432_v49, %v4085_v5  ;;  %3459 = vmatprep.mubr.msk.bf16.mxu0 %vm650_vm1, %v1259_v22  ;;  %v1239_v63 = vmax.f32 %v1173_v52, 0.0 }
 0x1e5   : > { %v1175_v58 = vpop.f32.mrf.mxu1  ;;  %3460 = vmatmul.mubr.msk.bf16.gmra.mxu0 %vm650_vm1, %v1260_v23 }
 0x1e6   : > { %v1176_v57 = vadd.f32 %v4085_v5, %v1175_v58  ;;  %v1242_v60 = vmax.f32 %v1184_v54, 0.0 }
 0x1e7   : > { %v3435_v62 = vpop.f32.mrf.mxu1 }
 0x1e8   : > { %v1240_v0 = vmax.f32 %v1176_v57, 0.0  ;;  %v1262_v8 = vpack.c.bf16 %v1242_v60, %v1241_v1  ;;  %v1197_v13 = vadd.f32 %v3435_v62, %v4085_v5 }
 0x1e9   : > { %v1188_v6 = vpop.f32.mrf.mxu1 }
 0x1ea   : > { %v1261_v7 = vpack.c.bf16 %v1240_v0, %v1239_v63  ;;  %v1189_v10 = vadd.f32 %v4085_v5, %v1188_v6  ;;  %v1245_v21 = vmax.f32 %v1197_v13, 0.0 }
 0x1eb   : > { %v3436_v9 = vpop.f32.mrf.mxu1 }
 0x1ec   : > { %v1200_v12 = vadd.f32 %v3436_v9, %v4085_v5  ;;  %3463 = vmatprep.mubr.msk.bf16.mxu0 %vm650_vm1, %v1261_v7  ;;  %v1243_v18 = vmax.f32 %v1189_v10, 0.0  ;;  %v1522_v7 = vld [vmem:[%s5100_s6] sm:$0x1] }
 0x1ed   : > { %v1191_v14 = vpop.f32.mrf.mxu1  ;;  %3464 = vmatmul.mubr.msk.bf16.gmra.mxu0 %vm650_vm1, %v1262_v8 }
 0x1ee   : > { %v1192_v15 = vadd.f32 %v4085_v5, %v1191_v14  ;;  %v1246_v16 = vmax.f32 %v1200_v12, 0.0 }
 0x1ef   : > { %v3439_v17 = vpop.f32.mrf.mxu1 }
 0x1f0   : > { %v1244_v19 = vmax.f32 %v1192_v15, 0.0  ;;  %v1264_v49 = vpack.c.bf16 %v1246_v16, %v1245_v21  ;;  %v1213_v58 = vadd.f32 %v3439_v17, %v4085_v5 }
 0x1f1   : > { %v1204_v22 = vpop.f32.mrf.mxu1 }
 0x1f2   : > { %v1263_v23 = vpack.c.bf16 %v1244_v19, %v1243_v18  ;;  %v1205_v54 = vadd.f32 %v4085_v5, %v1204_v22  ;;  %v1249_v6 = vmax.f32 %v1213_v58, 0.0 }
 0x1f3   : > { %v3440_v52 = vpop.f32.mrf.mxu1 }
 0x1f4   : > { %v1216_v55 = vadd.f32 %v3440_v52, %v4085_v5  ;;  %3467 = vmatprep.mubr.msk.bf16.mxu0 %vm650_vm1, %v1263_v23  ;;  %v1247_v0 = vmax.f32 %v1205_v54, 0.0 }
 0x1f5   : > { %v1207_v57 = vpop.f32.mrf.mxu1  ;;  %3468 = vmatmul.mubr.msk.bf16.gmra.mxu0 %vm650_vm1, %v1264_v49 }
 0x1f6   : > { %v1208_v60 = vadd.f32 %v4085_v5, %v1207_v57  ;;  %v1250_v62 = vmax.f32 %v1216_v55, 0.0 }
 0x1f7   : > { %v1563_v63 = vpop.f32.mrf.mxu1 }
 0x1f8   : > { %v1248_v1 = vmax.f32 %v1208_v60, 0.0  ;;  %v1266_v10 = vpack.c.bf16 %v1250_v62, %v1249_v6  ;;  %v1564_v13 = vadd.f32 %v1563_v63, %v1522_v7 }
 0x1f9   : > { %v3479_v8 = vpop.f32.mrf.mxu1 }
 0x1fa   : > { %v1265_v9 = vpack.c.bf16 %v1248_v1, %v1247_v0  ;;  %v4140_v15 = vrot.slane %v1564_v13, %v917_v53 }
 0x1fb   : > { %v1566_v12 = vpop.f32.mrf.mxu1 }
 0x1fc   : > { %3471 = vmatprep.mubr.msk.bf16.mxu0 %vm650_vm1, %v1265_v9  ;;  %v1573_v16 = vadd.f32 %v4140_v15, %v3910_v26  ;;  %v1574_v17 = vadd.f32 %v4140_v15, %v3918_v30  ;;  %v1575_v18 = vadd.f32 %v3906_v24, %v4140_v15  ;;  %v1576_v19 = vadd.f32 %v3914_v28, %v4140_v15 }
 0x1fd   : > { %3472 = vmatmul.mubr.msk.bf16.gmra.mxu0 %vm650_vm1, %v1266_v10  ;;  %v3480_v14 = vpop.f32.mrf.mxu1  ;;  %v1577_v21 = vadd.f32 %v4140_v15, %v3926_v34  ;;  %v1578_v48 = vadd.f32 %v4140_v15, %v3934_v38  ;;  %v1579_v24 = vadd.f32 %v3922_v32, %v4140_v15  ;;  %v1580_v28 = vadd.f32 %v3930_v36, %v4140_v15  ;;  %v1921_v36 = vld [vmem:[%s5103_s9] sm:$0x3] }
 0x1fe   : > { %v1605_v53 = vmax.f32 %v1573_v16, 0.0  ;;  %v1606_v22 = vmax.f32 %v1574_v17, 0.0  ;;  %v1607_v23 = vmax.f32 %v1575_v18, 0.0  ;;  %v1608_v49 = vmax.f32 %v1576_v19, 0.0  ;;  %3556 = vmatprep.subr.msk.bf16.mxu0 %vm699_vm0, %v1921_v36 }
 0x1ff   : > { %v1609_v26 = vmax.f32 %v1577_v21, 0.0  ;;  %v1610_v52 = vmax.f32 %v1578_v48, 0.0  ;;  %v1581_v34 = vadd.f32 %v4140_v15, %v3942_v42  ;;  %v1582_v38 = vadd.f32 %v4140_v15, %v3958_v51 }
 0x200   : > { %v1637_v54 = vpack.c.bf16 %v1606_v22, %v1605_v53  ;;  %v1638_v30 = vpack.c.bf16 %v1608_v49, %v1607_v23  ;;  %v1611_v58 = vmax.f32 %v1579_v24, 0.0  ;;  %v1612_v57 = vmax.f32 %v1580_v28, 0.0 }
 0x201   : > { %v1639_v55 = vpack.c.bf16 %v1610_v52, %v1609_v26  ;;  %v1613_v60 = vmax.f32 %v1581_v34, 0.0  ;;  %v1614_v32 = vmax.f32 %v1582_v38, 0.0  ;;  %v1978_v42 = vsel %vm699_vm0, %v1921_v36, 0 }
 0x202   : > { %3483 = vmatprep.mubr.msk.bf16.mxu1 %vm650_vm1, %v1637_v54  ;;  %v1583_v51 = vadd.f32 %v3938_v40, %v4140_v15  ;;  %v1584_v62 = vadd.f32 %v3948_v46, %v4140_v15  ;;  %v1640_v63 = vpack.c.bf16 %v1612_v57, %v1611_v58  ;;  %3516 = vmatpush3.bf16.msra.mxu0 %v1978_v42  ;;  %v4238_v42 = vld [vmem:[%s5104_s10] ss:$0 sm:$0xff] }
 0x203   : > { %3484 = vmatmul.mubr.msk.bf16.vlgmr.msra.gmra.mxu1 %vm650_vm1, %v1638_v30  ;;  %v1585_v0 = vadd.f32 %v4140_v15, %v3967_v59  ;;  %v1586_v1 = vadd.f32 %v4140_v15, %v3986_v11  ;;  %v1641_v6 = vpack.c.bf16 %v1614_v32, %v1613_v60  ;;  %v1587_v46 = vadd.f32 %v3961_v56, %v4140_v15 }
 0x204   : > { %3487 = vmatprep.mubr.msk.bf16.mxu1 %vm650_vm1, %v1639_v55  ;;  %v1615_v7 = vmax.f32 %v1583_v51, 0.0  ;;  %v1616_v8 = vmax.f32 %v1584_v62, 0.0  ;;  %v1588_v10 = vadd.f32 %v3981_v3, %v4140_v15  ;;  %v1589_v59 = vadd.f32 %v4140_v15, %v4002_v50 }
 0x205   : > { %v1617_v9 = vmax.f32 %v1585_v0, 0.0  ;;  %v1618_v40 = vmax.f32 %v1586_v1, 0.0  ;;  %v1590_v11 = vadd.f32 %v4140_v15, %v4016_v4  ;;  %v1619_v14 = vmax.f32 %v1587_v46, 0.0  ;;  %v2498_v0 = vld [vmem:[%s4231_s30 + $0x18] sm:$0xff]  ;;  %v2495_v46 = vld [vmem:[%s4231_s30] sm:$0xff] }
 0x206   : > { %v1642_v12 = vpack.c.bf16 %v1616_v8, %v1615_v7  ;;  %v1620_v16 = vmax.f32 %v1588_v10, 0.0  ;;  %v1621_v17 = vmax.f32 %v1589_v59, 0.0  ;;  %v1591_v56 = vadd.f32 %v3998_v20, %v4140_v15  ;;  %v2499_v8 = vld [vmem:[%s4231_s30 + $0x20] sm:$0xff] }
 0x207   : > { %v1643_v13 = vpack.c.bf16 %v1618_v40, %v1617_v9  ;;  %v1622_v18 = vmax.f32 %v1590_v11, 0.0  ;;  %v1592_v3 = vadd.f32 %v4010_v61, %v4140_v15  ;;  %v1593_v50 = vadd.f32 %v4140_v15, %v3912_v27  ;;  %v2500_v11 = vld [vmem:[%s4231_s30 + $0x28] sm:$0xff] }
 0x208   : > { %v1644_v19 = vpack.c.bf16 %v1620_v16, %v1619_v14  ;;  %v1594_v4 = vadd.f32 %v4140_v15, %v3920_v31  ;;  %v1623_v48 = vmax.f32 %v1591_v56, 0.0  ;;  %v1595_v20 = vadd.f32 %v3908_v25, %v4140_v15 }
 0x209   : > { %v1645_v21 = vpack.c.bf16 %v1622_v18, %v1621_v17  ;;  %v1624_v53 = vmax.f32 %v1592_v3, 0.0  ;;  %v1625_v22 = vmax.f32 %v1593_v50, 0.0  ;;  %v1596_v61 = vadd.f32 %v3916_v29, %v4140_v15  ;;  %v2501_v17 = vld [vmem:[%s4231_s30 + $0x30] sm:$0xff]  ;;  %v2504_v50 = vld [vmem:[%s4231_s30 + $0x48] sm:$0xff] }
 0x20a   : > { %v1626_v23 = vmax.f32 %v1594_v4, 0.0  ;;  %v1597_v27 = vadd.f32 %v4140_v15, %v3928_v35  ;;  %v1598_v31 = vadd.f32 %v4140_v15, %v3936_v39  ;;  %v1627_v52 = vmax.f32 %v1595_v20, 0.0 }
 0x20b   : > { %3488 = vmatmul.mubr.msk.bf16.gmra.mxu1 %vm650_vm1, %v1640_v63  ;;  %v1646_v49 = vpack.c.bf16 %v1624_v53, %v1623_v48  ;;  %v1628_v54 = vmax.f32 %v1596_v61, 0.0  ;;  %v1599_v25 = vadd.f32 %v3924_v33, %v4140_v15  ;;  %v1600_v29 = vadd.f32 %v3932_v37, %v4140_v15  ;;  %v2506_v48 = vld [vmem:[%s4231_s30 + $0x58] sm:$0xff] }
 0x20c   : > { %3491 = vmatprep.mubr.msk.bf16.mxu1 %vm650_vm1, %v1641_v6  ;;  %v1647_v26 = vpack.c.bf16 %v1626_v23, %v1625_v22  ;;  %v1629_v30 = vmax.f32 %v1597_v27, 0.0  ;;  %v1630_v24 = vmax.f32 %v1598_v31, 0.0  ;;  %v1601_v35 = vadd.f32 %v4140_v15, %v3944_v43  ;;  %v2503_v23 = vld [vmem:[%s4231_s30 + $0x40] sm:$0xff] }
 0x20d   : > { %v1648_v28 = vpack.c.bf16 %v1628_v54, %v1627_v52  ;;  %v1602_v39 = vadd.f32 %v4140_v15, %v3950_v47  ;;  %v1631_v38 = vmax.f32 %v1599_v25, 0.0  ;;  %v1632_v55 = vmax.f32 %v1600_v29, 0.0  ;;  %v2507_v29 = vld [vmem:[%s4231_s30 + $0x60] sm:$0xff] }
 0x20e   : > { %v1649_v34 = vpack.c.bf16 %v1630_v24, %v1629_v30  ;;  %v1633_v58 = vmax.f32 %v1601_v35, 0.0  ;;  %v1603_v37 = vadd.f32 %v3940_v41, %v4140_v15  ;;  %v1604_v57 = vadd.f32 %v3946_v45, %v4140_v15  ;;  %v2496_v45 = vld [vmem:[%s4231_s30 + $0x8] sm:$0xff]  ;;  %v2497_v15 = vld [vmem:[%s4231_s30 + $0x10] sm:$0xff]  ;;  %v2510_v30 = vld [vmem:[%s4231_s30 + $0x78] sm:$0xff] }
 0x20f   : > { %v1634_v33 = vmax.f32 %v1602_v39, 0.0  ;;  %v1650_v43 = vpack.c.bf16 %v1632_v55, %v1631_v38  ;;  %v3758_v41 = vmov 0   ;;  %v2512_v39 = vld [vmem:[%s4231_s30 + $0x88] sm:$0xff]  ;;  %v2509_v55 = vld [vmem:[%s4231_s30 + $0x70] sm:$0xff] }
 0x210   : > { %v1635_v47 = vmax.f32 %v1603_v37, 0.0  ;;  %v1636_v32 = vmax.f32 %v1604_v57, 0.0  ;;  %3585 = vset.pattern.permute.xlu1 %v3758_v41  ;;  %3584 = vset.pattern.permute.xlu0 %v3758_v41  ;;  %v2514_v37 = vld [vmem:[%s4231_s30 + $0x98] sm:$0xff] }
 0x211   : > { %v1651_v60 = vpack.c.bf16 %v1634_v33, %v1633_v58  ;;  %2531 = vperm.xlu1 %3585, %v2496_v45   ;;  %2528 = vperm.xlu0 %3584, %v2495_v46  }
 0x212   : > { %v1652_v36 = vpack.c.bf16 %v1636_v32, %v1635_v47 }
 0x213   : > { %3492 = vmatmul.mubr.msk.bf16.gmra.mxu1 %vm650_vm1, %v1642_v12 }
 0x214   : > { %3495 = vmatprep.mubr.msk.bf16.mxu1 %vm650_vm1, %v1643_v13 }
 0x215   : > { %2534 = vperm.xlu1 %3585, %v2497_v15   ;;  %2555 = vperm.xlu0 %3584, %v2504_v50   ;;  %v2513_v15 = vld [vmem:[%s4231_s30 + $0x90] sm:$0xff] }
 0x219   : > { %2537 = vperm.xlu1 %3585, %v2498_v0   ;;  %2561 = vperm.xlu0 %3584, %v2506_v48  }
 0x21b   : > { %3496 = vmatmul.mubr.msk.bf16.gmra.mxu1 %vm650_vm1, %v1644_v19  ;;  %v2502_v19 = vld [vmem:[%s4231_s30 + $0x38] sm:$0xff] }
 0x21c   : > { %3499 = vmatprep.mubr.msk.bf16.mxu1 %vm650_vm1, %v1645_v21 }
 0x21d   : > { %2540 = vperm.xlu1 %3585, %v2499_v8  }
 0x221   : > { %2543 = vperm.xlu1 %3585, %v2500_v11   ;;  %v2522_v11 = vld [vmem:[%s4231_s30 + $0xd8] sm:$0xff] }
 0x223   : > { %3500 = vmatmul.mubr.msk.bf16.gmra.mxu1 %vm650_vm1, %v1646_v49  ;;  %v2508_v49 = vld [vmem:[%s4231_s30 + $0x68] sm:$0xff] }
 0x224   : > { %3503 = vmatprep.mubr.msk.bf16.mxu1 %vm650_vm1, %v1647_v26  ;;  %v2505_v26 = vld [vmem:[%s4231_s30 + $0x50] sm:$0xff]  ;;  %2567 = vperm.xlu0 %3584, %v2508_v49  }
 0x225   : > { %2546 = vperm.xlu1 %3585, %v2501_v17  }
 0x228   : > { %2573 = vperm.xlu0 %3584, %v2510_v30  }
 0x229   : > { %2549 = vperm.xlu1 %3585, %v2502_v19   ;;  %v2521_v19 = vld [vmem:[%s4231_s30 + $0xd0] sm:$0xff] }
 0x22b   : > { %3504 = vmatmul.mubr.msk.bf16.gmra.mxu1 %vm650_vm1, %v1648_v28 }
 0x22c   : > { %3507 = vmatprep.mubr.msk.bf16.mxu1 %vm650_vm1, %v1649_v34  ;;  %2579 = vperm.xlu0 %3584, %v2512_v39  }
 0x22d   : > { %2552 = vperm.xlu1 %3585, %v2503_v23  }
 0x230   : > { %2585 = vperm.xlu0 %3584, %v2514_v37  }
 0x231   : > { %2558 = vperm.xlu1 %3585, %v2505_v26  }
 0x233   : > { %3508 = vmatmul.mubr.msk.bf16.gmra.mxu1 %vm650_vm1, %v1650_v43 }
 0x234   : > { %3511 = vmatprep.mubr.msk.bf16.mxu1 %vm650_vm1, %v1651_v60  ;;  %v2511_v60 = vld [vmem:[%s4231_s30 + $0x80] sm:$0xff] }
 0x235   : > { %2564 = vperm.xlu1 %3585, %v2507_v29  }
 0x239   : > { %2570 = vperm.xlu1 %3585, %v2509_v55  }
 0x23b   : > { %3512 = vmatmul.mubr.msk.bf16.gmra.mxu1 %vm650_vm1, %v1652_v36  ;;  %v2516_v36 = vld [vmem:[%s4231_s30 + $0xa8] sm:$0xff] }
 0x23c   : > { %2591 = vperm.xlu0 %3584, %v2516_v36  }
 0x23d   : > { %2576 = vperm.xlu1 %3585, %v2511_v60  }
 0x241   : > { %2582 = vperm.xlu1 %3585, %v2513_v15  }
 0x285   : > { %v3445_v51 = vpop.f32.mrf.mxu0 }
 0x286   : > { %v1369_v62 = vadd.f32 %v3445_v51, %v4238_v42 }
 0x287   : > { %v1360_v63 = vpop.f32.mrf.mxu0 }
 0x288   : > { %1490 = vst.msk [vmem:[%s4243_s17 + $0x10] sm:$0xff] %vm1487_vm5, %v1369_v62  ;;  %v1361_v1 = vadd.f32 %v4238_v42, %v1360_v63  ;;  %v2518_v63 = vld [vmem:[%s4231_s30 + $0xb8] sm:$0xff] }
 0x289   : > { %v3446_v6 = vpop.f32.mrf.mxu0  ;;  %2597 = vperm.xlu0 %3584, %v2518_v63  }
 0x28a   : > { %1488 = vst.msk [vmem:[%s4243_s17] sm:$0xff] %vm1487_vm5, %v1361_v1  ;;  %v1372_v7 = vadd.f32 %v3446_v6, %v4238_v42  ;;  %v2515_v6 = vld [vmem:[%s4231_s30 + $0xa0] sm:$0xff] }
 0x28b   : > { %v1363_v9 = vpop.f32.mrf.mxu0  ;;  %2588 = vperm.xlu1 %3585, %v2515_v6  }
 0x28c   : > { %1491 = vst.msk [vmem:[%s4243_s17 + $0x18] sm:$0xff] %vm1487_vm5, %v1372_v7  ;;  %v1364_v40 = vadd.f32 %v4238_v42, %v1363_v9  ;;  %v2520_v9 = vld [vmem:[%s4231_s30 + $0xc8] sm:$0xff] }
 0x28d   : > { %v3449_v10 = vpop.f32.mrf.mxu0  ;;  %2603 = vperm.xlu0 %3584, %v2520_v9  }
 0x28e   : > { %1489 = vst.msk [vmem:[%s4243_s17 + $0x8] sm:$0xff] %vm1487_vm5, %v1364_v40  ;;  %v1385_v12 = vadd.f32 %v3449_v10, %v4238_v42  ;;  %v2517_v10 = vld [vmem:[%s4231_s30 + $0xb0] sm:$0xff] }
 0x28f   : > { %v1376_v59 = vpop.f32.mrf.mxu0  ;;  %2594 = vperm.xlu1 %3585, %v2517_v10  }
 0x290   : > { %1494 = vst.msk [vmem:[%s4243_s17 + $0x30] sm:$0xff] %vm1487_vm5, %v1385_v12  ;;  %v1377_v13 = vadd.f32 %v4238_v42, %v1376_v59 }
 0x291   : > { %v3450_v14 = vpop.f32.mrf.mxu0  ;;  %2609 = vperm.xlu0 %3584, %v2522_v11  }
 0x292   : > { %1492 = vst.msk [vmem:[%s4243_s17 + $0x20] sm:$0xff] %vm1487_vm5, %v1377_v13  ;;  %v1388_v16 = vadd.f32 %v3450_v14, %v4238_v42 }
 0x293   : > { %v1379_v18 = vpop.f32.mrf.mxu0 }
 0x294   : > { %1495 = vst.msk [vmem:[%s4243_s17 + $0x38] sm:$0xff] %vm1487_vm5, %v1388_v16  ;;  %v1380_v56 = vadd.f32 %v4238_v42, %v1379_v18  ;;  %v2519_v16 = vld [vmem:[%s4231_s30 + $0xc0] sm:$0xff] }
 0x295   : > { %v3453_v3 = vpop.f32.mrf.mxu0  ;;  %2600 = vperm.xlu1 %3585, %v2519_v16  }
 0x296   : > { %1493 = vst.msk [vmem:[%s4243_s17 + $0x28] sm:$0xff] %vm1487_vm5, %v1380_v56  ;;  %v1401_v4 = vadd.f32 %v3453_v3, %v4238_v42 }
 0x297   : > { %v1392_v21 = vpop.f32.mrf.mxu0 }
 0x298   : > { %1498 = vst.msk [vmem:[%s4243_s17 + $0x50] sm:$0xff] %vm1487_vm5, %v1401_v4  ;;  %v1393_v53 = vadd.f32 %v4238_v42, %v1392_v21 }
 0x299   : > { %v3454_v22 = vpop.f32.mrf.mxu0  ;;  %2606 = vperm.xlu1 %3585, %v2521_v19  }
 0x29a   : > { %1496 = vst.msk [vmem:[%s4243_s17 + $0x40] sm:$0xff] %vm1487_vm5, %v1393_v53  ;;  %v1404_v20 = vadd.f32 %v3454_v22, %v4238_v42 }
 0x29b   : > { %v1395_v61 = vpop.f32.mrf.mxu0 }
 0x29c   : > { %1499 = vst.msk [vmem:[%s4243_s17 + $0x58] sm:$0xff] %vm1487_vm5, %v1404_v20  ;;  %v1396_v27 = vadd.f32 %v4238_v42, %v1395_v61 }
 0x29d   : > { %v3457_v31 = vpop.f32.mrf.mxu0 }
 0x29e   : > { %1497 = vst.msk [vmem:[%s4243_s17 + $0x48] sm:$0xff] %vm1487_vm5, %v1396_v27  ;;  %v1417_v52 = vadd.f32 %v3457_v31, %v4238_v42 }
 0x29f   : > { %v1408_v54 = vpop.f32.mrf.mxu0 }
 0x2a0   : > { %1502 = vst.msk [vmem:[%s4243_s17 + $0x70] sm:$0xff] %vm1487_vm5, %v1417_v52  ;;  %v1409_v24 = vadd.f32 %v4238_v42, %v1408_v54 }
 0x2a1   : > { %v3458_v25 = vpop.f32.mrf.mxu0 }
 0x2a2   : > { %1500 = vst.msk [vmem:[%s4243_s17 + $0x60] sm:$0xff] %vm1487_vm5, %v1409_v24  ;;  %v1420_v28 = vadd.f32 %v3458_v25, %v4238_v42 }
 0x2a3   : > { %v1411_v35 = vpop.f32.mrf.mxu0 }
 0x2a4   : > { %1503 = vst.msk [vmem:[%s4243_s17 + $0x78] sm:$0xff] %vm1487_vm5, %v1420_v28  ;;  %v1412_v34 = vadd.f32 %v4238_v42, %v1411_v35 }
 0x2a5   : > { %v3461_v38 = vpop.f32.mrf.mxu0 }
 0x2a6   : > { %1501 = vst.msk [vmem:[%s4243_s17 + $0x68] sm:$0xff] %vm1487_vm5, %v1412_v34  ;;  %v1433_v58 = vadd.f32 %v3461_v38, %v4238_v42 }
 0x2a7   : > { %v1424_v33 = vpop.f32.mrf.mxu0 }
 0x2a8   : > { %1506 = vst.msk [vmem:[%s4243_s17 + $0x90] sm:$0xff] %vm1487_vm5, %v1433_v58  ;;  %v1425_v57 = vadd.f32 %v4238_v42, %v1424_v33 }
 0x2a9   : > { %v3462_v43 = vpop.f32.mrf.mxu0 }
 0x2aa   : > { %1504 = vst.msk [vmem:[%s4243_s17 + $0x80] sm:$0xff] %vm1487_vm5, %v1425_v57  ;;  %v1436_v47 = vadd.f32 %v3462_v43, %v4238_v42 }
 0x2ab   : > { %v1427_v32 = vpop.f32.mrf.mxu0 }
 0x2ac   : > { %1507 = vst.msk [vmem:[%s4243_s17 + $0x98] sm:$0xff] %vm1487_vm5, %v1436_v47  ;;  %v1428_v41 = vadd.f32 %v4238_v42, %v1427_v32 }
 0x2ad   : > { %v3465_v45 = vpop.f32.mrf.mxu0 }
 0x2ae   : > { %1505 = vst.msk [vmem:[%s4243_s17 + $0x88] sm:$0xff] %vm1487_vm5, %v1428_v41  ;;  %v1449_v51 = vadd.f32 %v3465_v45, %v4238_v42 }
 0x2af   : > { %v1440_v62 = vpop.f32.mrf.mxu0 }
 0x2b0   : > { %1510 = vst.msk [vmem:[%s4243_s17 + $0xb0] sm:$0xff] %vm1487_vm5, %v1449_v51  ;;  %v1441_v0 = vadd.f32 %v4238_v42, %v1440_v62 }
 0x2b1   : > { %v3466_v1 = vpop.f32.mrf.mxu0 }
 0x2b2   : > { %1508 = vst.msk [vmem:[%s4243_s17 + $0xa0] sm:$0xff] %vm1487_vm5, %v1441_v0  ;;  %v1452_v7 = vadd.f32 %v3466_v1, %v4238_v42 }
 0x2b3   : > { %v1443_v8 = vpop.f32.mrf.mxu0 }
 0x2b4   : > { %1511 = vst.msk [vmem:[%s4243_s17 + $0xb8] sm:$0xff] %vm1487_vm5, %v1452_v7  ;;  %v1444_v40 = vadd.f32 %v4238_v42, %v1443_v8 }
 0x2b5   : > { %v3469_v46 = vpop.f32.mrf.mxu0 }
 0x2b6   : > { %1509 = vst.msk [vmem:[%s4243_s17 + $0xa8] sm:$0xff] %vm1487_vm5, %v1444_v40  ;;  %v1465_v12 = vadd.f32 %v3469_v46, %v4238_v42 }
 0x2b7   : > { %v1456_v59 = vpop.f32.mrf.mxu0 }
 0x2b8   : > { %1514 = vst.msk [vmem:[%s4243_s17 + $0xd0] sm:$0xff] %vm1487_vm5, %v1465_v12  ;;  %v1457_v13 = vadd.f32 %v4238_v42, %v1456_v59 }
 0x2b9   : > { %v3470_v14 = vpop.f32.mrf.mxu0 }
 0x2ba   : > { %1512 = vst.msk [vmem:[%s4243_s17 + $0xc0] sm:$0xff] %vm1487_vm5, %v1457_v13  ;;  %v1468_v17 = vadd.f32 %v3470_v14, %v4238_v42 }
 0x2bb   : > { %v1459_v18 = vpop.f32.mrf.mxu0 }
 0x2bc   : > { %1515 = vst.msk [vmem:[%s4243_s17 + $0xd8] sm:$0xff] %vm1487_vm5, %v1468_v17  ;;  %v1460_v56 = vadd.f32 %v4238_v42, %v1459_v18 }
 0x2bd   : > { %v3473_v3 = vpop.f32.mrf.mxu0 }
 0x2be   : > { %1513 = vst.msk [vmem:[%s4243_s17 + $0xc8] sm:$0xff] %vm1487_vm5, %v1460_v56  ;;  %v1481_v50 = vadd.f32 %v3473_v3, %v4238_v42 }
 0x2bf   : > { %v1472_v4 = vpop.f32.mrf.mxu0 }
 0x2c0   : > { %1518 = vst.msk [vmem:[%s4243_s17 + $0xf0] sm:$0xff] %vm1487_vm5, %v1481_v50  ;;  %v1473_v21 = vadd.f32 %v4238_v42, %v1472_v4 }
 0x2c1   : > { %v3474_v48 = vpop.f32.mrf.mxu0 }
 0x2c2   : > { %1516 = vst.msk [vmem:[%s4243_s17 + $0xe0] sm:$0xff] %vm1487_vm5, %v1473_v21  ;;  %v1484_v53 = vadd.f32 %v3474_v48, %v4238_v42 }
 0x2c3   : > { %v1475_v22 = vpop.f32.mrf.mxu0  ;;  %v3485_v20 = vpop.f32.mrf.mxu1 }
 0x2c4   : > { %1519 = vst.msk [vmem:[%s4243_s17 + $0xf8] sm:$0xff] %vm1487_vm5, %v1484_v53  ;;  %v1476_v23 = vadd.f32 %v4238_v42, %v1475_v22  ;;  %v1755_v26 = vadd.f32 %v3485_v20, %v4085_v5 }
 0x2c5   : > { %v1746_v61 = vpop.f32.mrf.mxu1 }
 0x2c6   : > { %1517 = vst.msk [vmem:[%s4243_s17 + $0xe8] sm:$0xff] %vm1487_vm5, %v1476_v23  ;;  %v1747_v27 = vadd.f32 %v4085_v5, %v1746_v61  ;;  %v1875_v28 = vmax.f32 %v1755_v26, 0.0 }
 0x2c7   : > { %v3486_v49 = vpop.f32.mrf.mxu1 }
 0x2c8   : > { %v1758_v31 = vadd.f32 %v3486_v49, %v4085_v5  ;;  %v1873_v25 = vmax.f32 %v1747_v27, 0.0 }
 0x2c9   : > { %v1749_v52 = vpop.f32.mrf.mxu1 }
 0x2ca   : > { %v1750_v54 = vadd.f32 %v4085_v5, %v1749_v52  ;;  %v1876_v30 = vmax.f32 %v1758_v31, 0.0 }
 0x2cb   : > { %v3489_v24 = vpop.f32.mrf.mxu1 }
 0x2cc   : > { %v1874_v29 = vmax.f32 %v1750_v54, 0.0  ;;  %v1906_v34 = vpack.c.bf16 %v1876_v30, %v1875_v28  ;;  %v1771_v33 = vadd.f32 %v3489_v24, %v4085_v5 }
 0x2cd   : > { %v1762_v35 = vpop.f32.mrf.mxu1 }
 0x2ce   : > { %v1905_v39 = vpack.c.bf16 %v1874_v29, %v1873_v25  ;;  %v1763_v55 = vadd.f32 %v4085_v5, %v1762_v35  ;;  %v1879_v36 = vmax.f32 %v1771_v33, 0.0  ;;  %v2532_v35 = vpop.permute.xlu1 %2531 }
 0x2cf   : > { %v3490_v38 = vpop.f32.mrf.mxu1 }
 0x2d0   : > { %v1774_v58 = vadd.f32 %v3490_v38, %v4085_v5  ;;  %3517 = vmatprep.mubr.msk.bf16.mxu0 %vm650_vm1, %v1905_v39  ;;  %v1877_v47 = vmax.f32 %v1763_v55, 0.0 }
 0x2d1   : > { %v1765_v37 = vpop.f32.mrf.mxu1  ;;  %3518 = vmatmul.mubr.msk.bf16.vlgmr.msra.gmra.mxu0 %vm650_vm1, %v1906_v34 }
 0x2d2   : > { %v1766_v57 = vadd.f32 %v4085_v5, %v1765_v37  ;;  %v1880_v43 = vmax.f32 %v1774_v58, 0.0 }
 0x2d3   : > { %v3493_v60 = vpop.f32.mrf.mxu1 }
 0x2d4   : > { %v1878_v32 = vmax.f32 %v1766_v57, 0.0  ;;  %v1908_v15 = vpack.c.bf16 %v1880_v43, %v1879_v36  ;;  %v1787_v0 = vadd.f32 %v3493_v60, %v4085_v5  ;;  %v2535_v57 = vpop.permute.xlu1 %2534 }
 0x2d5   : > { %v1778_v41 = vpop.f32.mrf.mxu1 }
 0x2d6   : > { %v1907_v45 = vpack.c.bf16 %v1878_v32, %v1877_v47  ;;  %v1779_v62 = vadd.f32 %v4085_v5, %v1778_v41  ;;  %v1883_v46 = vmax.f32 %v1787_v0, 0.0  ;;  %v4402_v47 = vand.u32 127, %v915_v44 }
 0x2d7   : > { %v3494_v51 = vpop.f32.mrf.mxu1 }
 0x2d8   : > { %v1790_v63 = vadd.f32 %v3494_v51, %v4085_v5  ;;  %3521 = vmatprep.mubr.msk.bf16.mxu0 %vm650_vm1, %v1907_v45  ;;  %v1881_v9 = vmax.f32 %v1779_v62, 0.0  ;;  %v2538_v51 = vpop.permute.xlu1 %2537  ;;  %vm2624_vm6 = vcmp.eq.s32.totalorder %v4402_v47, %v2532_v35  ;;  %vm2625_vm7 = vcmp.eq.s32.totalorder %v4402_v47, %v2535_v57 }
 0x2d9   : > { %v1781_v1 = vpop.f32.mrf.mxu1  ;;  %3522 = vmatmul.mubr.msk.bf16.gmra.mxu0 %vm650_vm1, %v1908_v15  ;;  %vm2626_vm8 = vcmp.eq.s32.totalorder %v4402_v47, %v2538_v51 }
 0x2da   : > { %v1782_v6 = vadd.f32 %v4085_v5, %v1781_v1  ;;  %v1884_v7 = vmax.f32 %v1790_v63, 0.0 }
 0x2db   : > { %v3497_v8 = vpop.f32.mrf.mxu1 }
 0x2dc   : > { %v1882_v40 = vmax.f32 %v1782_v6, 0.0  ;;  %v1910_v59 = vpack.c.bf16 %v1884_v7, %v1883_v46  ;;  %v1803_v16 = vadd.f32 %v3497_v8, %v4085_v5  ;;  %v4413_v8 = vsel %vm2624_vm6, 1.0, %v5107_v2 }
 0x2dd   : > { %v1794_v10 = vpop.f32.mrf.mxu1 }
 0x2de   : > { %v1909_v12 = vpack.c.bf16 %v1882_v40, %v1881_v9  ;;  %v1795_v13 = vadd.f32 %v4085_v5, %v1794_v10  ;;  %v1887_v4 = vmax.f32 %v1803_v16, 0.0  ;;  %v2541_v9 = vpop.permute.xlu1 %2540  ;;  %v4416_v10 = vsel %vm2625_vm7, 1.0, %v5107_v2 }
 0x2df   : > { %v3498_v11 = vpop.f32.mrf.mxu1  ;;  %vm2627_vm10 = vcmp.eq.s32.totalorder %v4402_v47, %v2541_v9 }
 0x2e0   : > { %v1806_v14 = vadd.f32 %v3498_v11, %v4085_v5  ;;  %3525 = vmatprep.mubr.msk.bf16.mxu0 %vm650_vm1, %v1909_v12  ;;  %v1885_v19 = vmax.f32 %v1795_v13, 0.0  ;;  %v2529_v12 = vpop.permute.xlu0 %2528 }
 0x2e1   : > { %v1797_v17 = vpop.f32.mrf.mxu1  ;;  %3526 = vmatmul.mubr.msk.bf16.gmra.mxu0 %vm650_vm1, %v1910_v59  ;;  %vm2623_vm9 = vcmp.eq.s32.totalorder %v4402_v47, %v2529_v12 }
 0x2e2   : > { %v1798_v18 = vadd.f32 %v4085_v5, %v1797_v17  ;;  %v1888_v56 = vmax.f32 %v1806_v14, 0.0  ;;  %v2892_v17 = vsel %vm1487_vm5, %v4416_v10, 0.0 }
 0x2e3   : > { %v3501_v3 = vpop.f32.mrf.mxu1 }
 0x2e4   : > { %v1886_v50 = vmax.f32 %v1798_v18, 0.0  ;;  %v1912_v53 = vpack.c.bf16 %v1888_v56, %v1887_v4  ;;  %v1819_v61 = vadd.f32 %v3501_v3, %v4085_v5  ;;  %v4426_v18 = vsel %vm2626_vm8, 1.0, %v5107_v2  ;;  %v2544_v3 = vpop.permute.xlu1 %2543 }
 0x2e5   : > { %v1810_v21 = vpop.f32.mrf.mxu1  ;;  %v4429_v56 = vsel %vm2623_vm9, 1.0, %v5107_v2  ;;  %vm2628_vm11 = vcmp.eq.s32.totalorder %v4402_v47, %v2544_v3 }
 0x2e6   : > { %v1911_v48 = vpack.c.bf16 %v1886_v50, %v1885_v19  ;;  %v1811_v23 = vadd.f32 %v4085_v5, %v1810_v21  ;;  %v1891_v30 = vmax.f32 %v1819_v61, 0.0  ;;  %v3730_v19 = vld [vmem:[%s5102_s8] ss:$0 sm:$0xff]  ;;  %v2889_v21 = vsel %vm1487_vm5, %v4429_v56, 0.0 }
 0x2e7   : > { %v3502_v22 = vpop.f32.mrf.mxu1  ;;  %v2894_v61 = vsel %vm1487_vm5, %v4426_v18, 0.0 }
 0x2e8   : > { %v1822_v20 = vadd.f32 %v3502_v22, %v4085_v5  ;;  %3529 = vmatprep.mubr.msk.bf16.mxu0 %vm650_vm1, %v1911_v48  ;;  %v1889_v52 = vmax.f32 %v1811_v23, 0.0  ;;  %v4442_v22 = vsel %vm2627_vm10, 1.0, %v5107_v2 }
 0x2e9   : > { %v1813_v49 = vpop.f32.mrf.mxu1  ;;  %3530 = vmatmul.mubr.msk.bf16.gmra.mxu0 %vm650_vm1, %v1912_v53 }
 0x2ea   : > { %v1814_v27 = vadd.f32 %v4085_v5, %v1813_v49  ;;  %v1892_v31 = vmax.f32 %v1822_v20, 0.0 }
 0x2eb   : > { %v3505_v26 = vpop.f32.mrf.mxu1 }
 0x2ec   : > { %v1890_v54 = vmax.f32 %v1814_v27, 0.0  ;;  %v1914_v29 = vpack.c.bf16 %v1892_v31, %v1891_v30  ;;  %v1835_v38 = vadd.f32 %v3505_v26, %v4085_v5  ;;  %v4447_v31 = vsel %vm2628_vm11, 1.0, %v5107_v2  ;;  %v2547_v26 = vpop.permute.xlu1 %2546 }
 0x2ed   : > { %v1826_v24 = vpop.f32.mrf.mxu1  ;;  %v2896_v30 = vsel %vm1487_vm5, %v4442_v22, 0.0  ;;  %vm2629_vm12 = vcmp.eq.s32.totalorder %v4402_v47, %v2547_v26 }
 0x2ee   : > { %v1913_v25 = vpack.c.bf16 %v1890_v54, %v1889_v52  ;;  %v1827_v39 = vadd.f32 %v4085_v5, %v1826_v24  ;;  %v1895_v32 = vmax.f32 %v1835_v38, 0.0 }
 0x2ef   : > { %v3506_v28 = vpop.f32.mrf.mxu1 }
 0x2f0   : > { %v1838_v34 = vadd.f32 %v3506_v28, %v4085_v5  ;;  %3533 = vmatprep.mubr.msk.bf16.mxu0 %vm650_vm1, %v1913_v25  ;;  %v1893_v43 = vmax.f32 %v1827_v39, 0.0  ;;  %v2556_v28 = vpop.permute.xlu0 %2555  ;;  %v2898_v39 = vsel %vm1487_vm5, %v4447_v31, 0.0 }
 0x2f1   : > { %v1829_v55 = vpop.f32.mrf.mxu1  ;;  %3534 = vmatmul.mubr.msk.bf16.gmra.mxu0 %vm650_vm1, %v1914_v29  ;;  %v4453_v29 = vsel %vm2629_vm12, 1.0, %v5107_v2  ;;  %vm2632_vm14 = vcmp.eq.s32.totalorder %v4402_v47, %v2556_v28 }
 0x2f2   : > { %v1830_v58 = vadd.f32 %v4085_v5, %v1829_v55  ;;  %v1896_v33 = vmax.f32 %v1838_v34, 0.0  ;;  %v2550_v55 = vpop.permute.xlu1 %2549 }
 0x2f3   : > { %v3509_v37 = vpop.f32.mrf.mxu1  ;;  %vm2630_vm13 = vcmp.eq.s32.totalorder %v4402_v47, %v2550_v55 }
 0x2f4   : > { %v1894_v60 = vmax.f32 %v1830_v58, 0.0  ;;  %v1916_v45 = vpack.c.bf16 %v1896_v33, %v1895_v32  ;;  %v1851_v0 = vadd.f32 %v3509_v37, %v4085_v5  ;;  %v2900_v58 = vsel %vm1487_vm5, %v4453_v29, 0.0  ;;  %v2562_v57 = vpop.permute.xlu0 %2561 }
 0x2f5   : > { %v1842_v36 = vpop.f32.mrf.mxu1  ;;  %v4464_v37 = vsel %vm2630_vm13, 1.0, %v5107_v2  ;;  %vm2634_vm2 = vcmp.eq.s32.totalorder %v4402_v47, %v2562_v57 }
 0x2f6   : > { %v1915_v41 = vpack.c.bf16 %v1894_v60, %v1893_v43  ;;  %v1843_v62 = vadd.f32 %v4085_v5, %v1842_v36  ;;  %v1899_v59 = vmax.f32 %v1851_v0, 0.0  ;;  %v2902_v43 = vsel %vm1487_vm5, %v4464_v37, 0.0  ;;  %v2553_v32 = vpop.permute.xlu1 %2552 }
 0x2f7   : > { %v3510_v15 = vpop.f32.mrf.mxu1  ;;  %v4469_v36 = vsel %vm2632_vm14, 1.0, %v5107_v2  ;;  %vm2631_vm15 = vcmp.eq.s32.totalorder %v4402_v47, %v2553_v32  ;;  %v4481_v0 = vsel %vm2634_vm2, 1.0, %v5107_v2 }
 0x2f8   : > { %v1854_v63 = vadd.f32 %v3510_v15, %v4085_v5  ;;  %3537 = vmatprep.mubr.msk.bf16.mxu0 %vm650_vm1, %v1915_v41  ;;  %v1897_v40 = vmax.f32 %v1843_v62, 0.0  ;;  %v2906_v51 = vsel %vm1487_vm5, %v4469_v36, 0.0  ;;  %v2568_v9 = vpop.permute.xlu0 %2567 }
 0x2f9   : > { %v1845_v1 = vpop.f32.mrf.mxu1  ;;  %3538 = vmatmul.mubr.msk.bf16.gmra.mxu0 %vm650_vm1, %v1916_v45  ;;  %v4474_v45 = vsel %vm2631_vm15, 1.0, %v5107_v2  ;;  %vm2636_vm3 = vcmp.eq.s32.totalorder %v4402_v47, %v2568_v9 }
 0x2fa   : > { %v1846_v44 = vadd.f32 %v4085_v5, %v1845_v1  ;;  %v1900_v6 = vmax.f32 %v1854_v63, 0.0  ;;  %v2890_v5 = vsel %vm1487_vm5, %v4413_v8, 0.0  ;;  %v2904_v15 = vsel %vm1487_vm5, %v4474_v45, 0.0  ;;  %v2559_v63 = vpop.permute.xlu1 %2558 }
 0x2fb   : > { %v3513_v7 = vpop.f32.mrf.mxu1  ;;  %v2891_v23 = vadd.f32 %v2890_v5, %v2889_v21  ;;  %v4494_v12 = vsel %vm2636_vm3, 1.0, %v5107_v2 }
 0x2fc   : > { %v1898_v46 = vmax.f32 %v1846_v44, 0.0  ;;  %v1918_v14 = vpack.c.bf16 %v1900_v6, %v1899_v59  ;;  %v1867_v48 = vadd.f32 %v3730_v19, %v3513_v7  ;;  %v2910_v7 = vsel %vm1487_vm5, %v4481_v0, 0.0 }
 0x2fd   : > { %v1858_v11 = vpop.f32.mrf.mxu1  ;;  %v2893_v27 = vadd.f32 %v2892_v17, %v2891_v23  ;;  %v2914_v5 = vsel %vm1487_vm5, %v4494_v12, 0.0 }
 0x2fe   : > { %v1917_v13 = vpack.c.bf16 %v1898_v46, %v1897_v40  ;;  %v1859_v50 = vadd.f32 %v3730_v19, %v1858_v11  ;;  %v1903_v24 = vmax.f32 %v1867_v48, 0.0  ;;  %v2565_v46 = vpop.permute.xlu1 %2564 }
 0x2ff   : > { %v3514_v16 = vpop.f32.mrf.mxu1  ;;  %v2895_v25 = vadd.f32 %v2894_v61, %v2893_v27  ;;  %vm2635_vm4 = vcmp.eq.s32.totalorder %v4402_v47, %v2565_v46 }
 0x300   : > { %v1870_v4 = vadd.f32 %v3730_v19, %v3514_v16  ;;  %3541 = vmatprep.mubr.msk.bf16.mxu0 %vm650_vm1, %v1917_v13  ;;  %v1901_v52 = vmax.f32 %v1859_v50, 0.0  ;;  %v4497_v11 = vsel %vm2635_vm4, 1.0, %v5107_v2 }
 0x301   : > { %v1861_v53 = vpop.f32.mrf.mxu1  ;;  %3542 = vmatmul.mubr.msk.bf16.gmra.mxu0 %vm650_vm1, %v1918_v14  ;;  %v2897_v38 = vadd.f32 %v2896_v30, %v2895_v25  ;;  %v2912_v13 = vsel %vm1487_vm5, %v4497_v11, 0.0  ;;  %v2574_v14 = vpop.permute.xlu0 %2573 }
 0x302   : > { %v1862_v20 = vadd.f32 %v3730_v19, %v1861_v53  ;;  %v1904_v49 = vmax.f32 %v1870_v4, 0.0  ;;  %v2571_v17 = vpop.permute.xlu1 %2570  ;;  %vm2638_vm6 = vcmp.eq.s32.totalorder %v4402_v47, %v2574_v14 }
 0x303   : > { %v2899_v33 = vadd.f32 %v2898_v39, %v2897_v38  ;;  %vm2637_vm7 = vcmp.eq.s32.totalorder %v4402_v47, %v2571_v17  ;;  %v4506_v3 = vsel %vm2638_vm6, 1.0, %v5107_v2 }
 0x304   : > { %v1902_v54 = vmax.f32 %v1862_v20, 0.0  ;;  %v1920_v34 = vpack.c.bf16 %v1904_v49, %v1903_v24  ;;  %v4509_v50 = vsel %vm2637_vm7, 1.0, %v5107_v2  ;;  %v2918_v21 = vsel %vm1487_vm5, %v4506_v3, 0.0 }
 0x305   : > { %v2901_v60 = vadd.f32 %v2900_v58, %v2899_v33  ;;  %v2916_v4 = vsel %vm1487_vm5, %v4509_v50, 0.0  ;;  %v2580_v48 = vpop.permute.xlu0 %2579 }
 0x306   : > { %v1919_v35 = vpack.c.bf16 %v1902_v54, %v1901_v52  ;;  %v2577_v23 = vpop.permute.xlu1 %2576  ;;  %vm2640_vm8 = vcmp.eq.s32.totalorder %v4402_v47, %v2580_v48 }
 0x307   : > { %v2903_v41 = vadd.f32 %v2902_v43, %v2901_v60  ;;  %vm2639_vm9 = vcmp.eq.s32.totalorder %v4402_v47, %v2577_v23  ;;  %v4518_v20 = vsel %vm2640_vm8, 1.0, %v5107_v2 }
 0x308   : > { %3545 = vmatprep.mubr.msk.bf16.mxu0 %vm650_vm1, %v1919_v35  ;;  %5124 = vst [vmem:[#allocation2_spill] sm:$0xff] %v4518_v20  ;;  %v4521_v49 = vsel %vm2639_vm9, 1.0, %v5107_v2  ;;  %v2922_v26 = vsel %vm1487_vm5, %v4518_v20, 0.0 }
 0x309   : > { %3546 = vmatmul.mubr.msk.bf16.gmra.mxu0 %vm650_vm1, %v1920_v34  ;;  %v2905_v62 = vadd.f32 %v2904_v15, %v2903_v41  ;;  %vm2633_vm1 = vcmp.eq.s32.totalorder %v4402_v47, %v2559_v63  ;;  %5125 = vst [vmem:[#allocation3_spill] sm:$0xff] %v4521_v49  ;;  %v2920_v27 = vsel %vm1487_vm5, %v4521_v49, 0.0  ;;  %v2586_v52 = vpop.permute.xlu0 %2585 }
 0x30a   : > { %v4485_v44 = vsel %vm2633_vm1, 1.0, %v5107_v2  ;;  %v2583_v30 = vpop.permute.xlu1 %2582  ;;  %vm2642_vm10 = vcmp.eq.s32.totalorder %v4402_v47, %v2586_v52 }
 0x30b   : > { %v2907_v1 = vadd.f32 %v2906_v51, %v2905_v62  ;;  %v2908_v6 = vsel %vm1487_vm5, %v4485_v44, 0.0  ;;  %vm2641_vm11 = vcmp.eq.s32.totalorder %v4402_v47, %v2583_v30  ;;  %v4530_v24 = vsel %vm2642_vm10, 1.0, %v5107_v2 }
 0x30c   : > { %5126 = vst [vmem:[#allocation4_spill] sm:$0xff] %v4530_v24  ;;  %v4533_v28 = vsel %vm2641_vm11, 1.0, %v5107_v2  ;;  %v2926_v39 = vsel %vm1487_vm5, %v4530_v24, 0.0  ;;  %vm2958_vm10 = vcmask 1040384  }
 0x30d   : > { %v2909_v40 = vadd.f32 %v2908_v6, %v2907_v1  ;;  %5127 = vst [vmem:[#allocation5_spill] sm:$0xff] %v4533_v28  ;;  %v2924_v35 = vsel %vm1487_vm5, %v4533_v28, 0.0  ;;  %v2592_v34 = vpop.permute.xlu0 %2591 }
 0x30e   : > { %v2589_v55 = vpop.permute.xlu1 %2588  ;;  %vm2644_vm12 = vcmp.eq.s32.totalorder %v4402_v47, %v2592_v34 }
 0x30f   : > { %v2911_v59 = vadd.f32 %v2910_v7, %v2909_v40  ;;  %vm2643_vm13 = vcmp.eq.s32.totalorder %v4402_v47, %v2589_v55  ;;  %v4542_v58 = vsel %vm2644_vm12, 1.0, %v5107_v2 }
 0x310   : > { %5128 = vst [vmem:[#allocation6_spill] sm:$0xff] %v4542_v58  ;;  %v4545_v57 = vsel %vm2643_vm13, 1.0, %v5107_v2  ;;  %v2930_v60 = vsel %vm1487_vm5, %v4542_v58, 0.0 }
 0x311   : > { %v2913_v16 = vadd.f32 %v2912_v13, %v2911_v59  ;;  %5129 = vst [vmem:[#allocation7_spill] sm:$0xff] %v4545_v57  ;;  %v2928_v43 = vsel %vm1487_vm5, %v4545_v57, 0.0  ;;  %v2598_v32 = vpop.permute.xlu0 %2597 }
 0x312   : > { %v2595_v15 = vpop.permute.xlu1 %2594  ;;  %vm2646_vm14 = vcmp.eq.s32.totalorder %v4402_v47, %v2598_v32 }
 0x313   : > { %v2915_v19 = vadd.f32 %v2914_v5, %v2913_v16  ;;  %vm2645_vm15 = vcmp.eq.s32.totalorder %v4402_v47, %v2595_v15  ;;  %v4554_v51 = vsel %vm2646_vm14, 1.0, %v5107_v2 }
 0x314   : > { %5130 = vst [vmem:[#allocation8_spill] sm:$0xff] %v4554_v51  ;;  %v4557_v63 = vsel %vm2645_vm15, 1.0, %v5107_v2  ;;  %v2934_v6 = vsel %vm1487_vm5, %v4554_v51, 0.0 }
 0x315   : > { %v2917_v53 = vadd.f32 %v2916_v4, %v2915_v19  ;;  %5131 = vst [vmem:[#allocation9_spill] sm:$0xff] %v4557_v63  ;;  %v2932_v1 = vsel %vm1487_vm5, %v4557_v63, 0.0  ;;  %v2604_v7 = vpop.permute.xlu0 %2603 }
 0x316   : > { %v2601_v40 = vpop.permute.xlu1 %2600  ;;  %vm2648_vm2 = vcmp.eq.s32.totalorder %v4402_v47, %v2604_v7 }
 0x317   : > { %v2919_v61 = vadd.f32 %v2918_v21, %v2917_v53  ;;  %vm2647_vm1 = vcmp.eq.s32.totalorder %v4402_v47, %v2601_v40  ;;  %v4566_v46 = vsel %vm2648_vm2, 1.0, %v5107_v2 }
 0x318   : > { %5132 = vst [vmem:[#allocation10_spill] sm:$0xff] %v4566_v46  ;;  %v4569_v13 = vsel %vm2647_vm1, 1.0, %v5107_v2  ;;  %v2938_v14 = vsel %vm1487_vm5, %v4566_v46, 0.0 }
 0x319   : > { %v2921_v54 = vadd.f32 %v2920_v27, %v2919_v61  ;;  %5133 = vst [vmem:[#allocation11_spill] sm:$0xff] %v4569_v13  ;;  %v2936_v5 = vsel %vm1487_vm5, %v4569_v13, 0.0 }
 0x31a   : > { %v4737_v58 = vpop.permute.xlu1 %2606 }
 0x31b   : > { %v2923_v25 = vadd.f32 %v2922_v26, %v2921_v54  ;;  %vm2649_vm4 = vcmp.eq.s32.totalorder %v4402_v47, %v4737_v58 }
 0x31d   : > { %v2925_v38 = vadd.f32 %v2924_v35, %v2923_v25 }
 0x31f   : > { %v2927_v33 = vadd.f32 %v2926_v39, %v2925_v38 }
 0x321   : > { %v2929_v41 = vadd.f32 %v2928_v43, %v2927_v33 }
 0x323   : > { %v2931_v62 = vadd.f32 %v2930_v60, %v2929_v41 }
 0x325   : > { %v2933_v9 = vadd.f32 %v2932_v1, %v2931_v62 }
 0x327   : > { %v2935_v59 = vadd.f32 %v2934_v6, %v2933_v9 }
 0x329   : > { %v2937_v16 = vadd.f32 %v2936_v5, %v2935_v59 }
 0x32b   : > { %v4575_v17 = vadd.f32 %v2938_v14, %v2937_v16 }
 0x32d   : > { %5134 = vst [vmem:[#allocation12_spill] sm:$0xff] %v4575_v17 }
 0x391   : > { %v3519_v19 = vpop.f32.mrf.mxu0 }
 0x392   : > { %v4578_v4 = vadd.f32 %v3519_v19, %v4238_v42 }
 0x393   : > { %v2014_v21 = vpop.f32.mrf.mxu0 }
 0x394   : > { %v4581_v48 = vadd.f32 %v4238_v42, %v2014_v21  ;;  %v2147_v53 = vsel %vm1487_vm5, %v4578_v4, -inf }
 0x395   : > { %2148 = vmax.xlane.f32.xlu1 %v2147_v53  ;;  %v3520_v23 = vpop.f32.mrf.mxu0 }
 0x396   : > { %v4586_v61 = vadd.f32 %v3520_v23, %v4238_v42  ;;  %v2141_v27 = vsel %vm1487_vm5, %v4581_v48, -inf }
 0x397   : > { %v2017_v26 = vpop.f32.mrf.mxu0  ;;  %2142 = vmax.xlane.f32.xlu0 %v2141_v27 }
 0x398   : > { %v4591_v52 = vadd.f32 %v4238_v42, %v2017_v26  ;;  %v2150_v54 = vsel %vm1487_vm5, %v4586_v61, -inf }
 0x399   : > { %2151 = vmax.xlane.f32.xlu1 %v2150_v54  ;;  %v3523_v30 = vpop.f32.mrf.mxu0 }
 0x39a   : > { %v4596_v25 = vadd.f32 %v3523_v30, %v4238_v42  ;;  %v2144_v35 = vsel %vm1487_vm5, %v4591_v52, -inf }
 0x39b   : > { %v2030_v39 = vpop.f32.mrf.mxu0  ;;  %2145 = vmax.xlane.f32.xlu0 %v2144_v35 }
 0x39c   : > { %v4601_v38 = vadd.f32 %v4238_v42, %v2030_v39  ;;  %v2159_v33 = vsel %vm1487_vm5, %v4596_v25, -inf }
 0x39d   : > { %v3524_v34 = vpop.f32.mrf.mxu0 }
 0x39e   : > { %v4604_v55 = vadd.f32 %v3524_v34, %v4238_v42  ;;  %v2153_v62 = vsel %vm1487_vm5, %v4601_v38, -inf }
 0x39f   : > { %v2033_v43 = vpop.f32.mrf.mxu0  ;;  %2160 = vmax.xlane.f32.xlu0 %v2159_v33 }
 0x3a0   : > { %v4609_v60 = vadd.f32 %v4238_v42, %v2033_v43  ;;  %v2162_v32 = vsel %vm1487_vm5, %v4604_v55, -inf }
 0x3a1   : > { %2163 = vmax.xlane.f32.xlu1 %v2162_v32  ;;  %v3527_v41 = vpop.f32.mrf.mxu0 }
 0x3a2   : > { %v4614_v15 = vadd.f32 %v3527_v41, %v4238_v42  ;;  %v2156_v6 = vsel %vm1487_vm5, %v4609_v60, -inf }
 0x3a3   : > { %v2046_v1 = vpop.f32.mrf.mxu0  ;;  %2154 = vmax.xlane.f32.xlu0 %v2153_v62 }
 0x3a4   : > { %v4621_v9 = vadd.f32 %v4238_v42, %v2046_v1  ;;  %v2171_v59 = vsel %vm1487_vm5, %v4614_v15, -inf }
 0x3a5   : > { %v3528_v7 = vpop.f32.mrf.mxu0  ;;  %2157 = vmax.xlane.f32.xlu1 %v2156_v6 }
 0x3a6   : > { %v4624_v40 = vadd.f32 %v3528_v7, %v4238_v42  ;;  %v2165_v53 = vsel %vm1487_vm5, %v4621_v9, -inf }
 0x3a7   : > { %v2049_v5 = vpop.f32.mrf.mxu0  ;;  %2172 = vmax.xlane.f32.xlu0 %v2171_v59 }
 0x3a8   : > { %v4629_v14 = vadd.f32 %v4238_v42, %v2049_v5  ;;  %v2174_v16 = vsel %vm1487_vm5, %v4624_v40, -inf }
 0x3a9   : > { %v3531_v19 = vpop.f32.mrf.mxu0  ;;  %2175 = vmax.xlane.f32.xlu1 %v2174_v16 }
 0x3aa   : > { %v4634_v21 = vadd.f32 %v3531_v19, %v4238_v42  ;;  %v2168_v27 = vsel %vm1487_vm5, %v4629_v14, -inf }
 0x3ab   : > { %v2062_v23 = vpop.f32.mrf.mxu0  ;;  %2166 = vmax.xlane.f32.xlu0 %v2165_v53 }
 0x3ac   : > { %v4641_v54 = vadd.f32 %v4238_v42, %v2062_v23  ;;  %v2183_v35 = vsel %vm1487_vm5, %v4634_v21, -inf }
 0x3ad   : > { %v3532_v26 = vpop.f32.mrf.mxu0  ;;  %2169 = vmax.xlane.f32.xlu1 %v2168_v27 }
 0x3ae   : > { %v4644_v30 = vadd.f32 %v3532_v26, %v4238_v42  ;;  %v2177_v41 = vsel %vm1487_vm5, %v4641_v54, -inf }
 0x3af   : > { %v2065_v39 = vpop.f32.mrf.mxu0  ;;  %2184 = vmax.xlane.f32.xlu0 %v2183_v35 }
 0x3b0   : > { %v4649_v34 = vadd.f32 %v4238_v42, %v2065_v39  ;;  %v2186_v33 = vsel %vm1487_vm5, %v4644_v30, -inf }
 0x3b1   : > { %v3535_v43 = vpop.f32.mrf.mxu0  ;;  %2187 = vmax.xlane.f32.xlu1 %v2186_v33 }
 0x3b2   : > { %v4654_v32 = vadd.f32 %v3535_v43, %v4238_v42  ;;  %v2180_v1 = vsel %vm1487_vm5, %v4649_v34, -inf }
 0x3b3   : > { %v2078_v62 = vpop.f32.mrf.mxu0  ;;  %2178 = vmax.xlane.f32.xlu0 %v2177_v41 }
 0x3b4   : > { %v4661_v7 = vadd.f32 %v4238_v42, %v2078_v62  ;;  %v2195_v5 = vsel %vm1487_vm5, %v4654_v32, -inf }
 0x3b5   : > { %v3536_v6 = vpop.f32.mrf.mxu0  ;;  %2181 = vmax.xlane.f32.xlu1 %v2180_v1 }
 0x3b6   : > { %v4664_v59 = vadd.f32 %v3536_v6, %v4238_v42  ;;  %v2189_v26 = vsel %vm1487_vm5, %v4661_v7, -inf }
 0x3b7   : > { %v2081_v16 = vpop.f32.mrf.mxu0  ;;  %2196 = vmax.xlane.f32.xlu0 %v2195_v5 }
 0x3b8   : > { %v4669_v19 = vadd.f32 %v4238_v42, %v2081_v16  ;;  %v2198_v53 = vsel %vm1487_vm5, %v4664_v59, -inf }
 0x3b9   : > { %v3539_v23 = vpop.f32.mrf.mxu0  ;;  %2199 = vmax.xlane.f32.xlu1 %v2198_v53 }
 0x3ba   : > { %v4674_v27 = vadd.f32 %v3539_v23, %v4238_v42  ;;  %v2192_v39 = vsel %vm1487_vm5, %v4669_v19, -inf }
 0x3bb   : > { %v2094_v35 = vpop.f32.mrf.mxu0  ;;  %2190 = vmax.xlane.f32.xlu0 %v2189_v26 }
 0x3bc   : > { %v4681_v43 = vadd.f32 %v4238_v42, %v2094_v35  ;;  %v2207_v62 = vsel %vm1487_vm5, %v4674_v27, -inf }
 0x3bd   : > { %v3540_v33 = vpop.f32.mrf.mxu0  ;;  %2193 = vmax.xlane.f32.xlu1 %v2192_v39 }
 0x3be   : > { %v4684_v41 = vadd.f32 %v3540_v33, %v4238_v42  ;;  %v2201_v23 = vsel %vm1487_vm5, %v4681_v43, -inf }
 0x3bf   : > { %v2097_v1 = vpop.f32.mrf.mxu0  ;;  %2208 = vmax.xlane.f32.xlu0 %v2207_v62 }
 0x3c0   : > { %v4689_v6 = vadd.f32 %v4238_v42, %v2097_v1  ;;  %v2210_v5 = vsel %vm1487_vm5, %v4684_v41, -inf }
 0x3c1   : > { %v3543_v16 = vpop.f32.mrf.mxu0  ;;  %2211 = vmax.xlane.f32.xlu1 %v2210_v5 }
 0x3c2   : > { %v4694_v53 = vadd.f32 %v3543_v16, %v4238_v42  ;;  %v2204_v35 = vsel %vm1487_vm5, %v4689_v6, -inf  ;;  %v3731_v16 = vld [vmem:[%s5104_s10] ss:$0 sm:$0xff] }
 0x3c3   : > { %v2110_v26 = vpop.f32.mrf.mxu0  ;;  %2202 = vmax.xlane.f32.xlu0 %v2201_v23 }
 0x3c4   : > { %v4701_v33 = vadd.f32 %v4238_v42, %v2110_v26  ;;  %v2219_v1 = vsel %vm1487_vm5, %v4694_v53, -inf }
 0x3c5   : > { %v3544_v39 = vpop.f32.mrf.mxu0  ;;  %2205 = vmax.xlane.f32.xlu1 %v2204_v35 }
 0x3c6   : > { %v4704_v62 = vadd.f32 %v3544_v39, %v4238_v42  ;;  %v2213_v42 = vsel %vm1487_vm5, %v4701_v33, -inf }
 0x3c7   : > { %v2113_v5 = vpop.f32.mrf.mxu0  ;;  %2220 = vmax.xlane.f32.xlu0 %v2219_v1 }
 0x3c8   : > { %v4711_v23 = vadd.f32 %v3731_v16, %v2113_v5  ;;  %v2222_v35 = vsel %vm1487_vm5, %v4704_v62, -inf }
 0x3c9   : > { %v3547_v2 = vpop.f32.mrf.mxu0  ;;  %2223 = vmax.xlane.f32.xlu1 %v2222_v35 }
 0x3ca   : > { %v4715_v26 = vadd.f32 %v3731_v16, %v3547_v2  ;;  %v2216_v1 = vsel %vm1487_vm5, %v4711_v23, -inf }
 0x3cb   : > { %v2126_v39 = vpop.f32.mrf.mxu0  ;;  %2214 = vmax.xlane.f32.xlu0 %v2213_v42 }
 0x3cc   : > { %v4721_v5 = vadd.f32 %v3731_v16, %v2126_v39  ;;  %v2231_v2 = vsel %vm1487_vm5, %v4715_v26, -inf }
 0x3cd   : > { %v3548_v46 = vpop.f32.mrf.mxu0  ;;  %2217 = vmax.xlane.f32.xlu1 %v2216_v1  ;;  %v2524_v1 = vld [vmem:[%s4231_s30 + $0xe8] sm:$0xff] }
 0x3ce   : > { %v4723_v13 = vadd.f32 %v3731_v16, %v3548_v46  ;;  %v2225_v63 = vsel %vm1487_vm5, %v4721_v5, -inf  ;;  %v2523_v46 = vld [vmem:[%s4231_s30 + $0xe0] sm:$0xff] }
 0x3cf   : > { %v2129_v35 = vpop.f32.mrf.mxu0  ;;  %2232 = vmax.xlane.f32.xlu0 %v2231_v2 }
 0x3d0   : > { %v4727_v51 = vadd.f32 %v3731_v16, %v2129_v35  ;;  %v2234_v42 = vsel %vm1487_vm5, %v4723_v13, -inf  ;;  %v4739_v16 = vpop.permute.xlu0 %2609 }
 0x3d1   : > { %2235 = vmax.xlane.f32.xlu1 %v2234_v42  ;;  %vm2650_vm3 = vcmp.eq.s32.totalorder %v4402_v47, %v4739_v16 }
 0x3d2   : > { %v2228_v39 = vsel %vm1487_vm5, %v4727_v51, -inf }
 0x3d3   : > { %2226 = vmax.xlane.f32.xlu0 %v2225_v63 }
 0x3d5   : > { %2229 = vmax.xlane.f32.xlu1 %v2228_v39 }
 0x3e6   : > { %2612 = vperm.xlu1 %3585, %v2523_v46  }
 0x3e9   : > { %2615 = vperm.xlu0 %3584, %v2524_v1  }
 0x41e   : > { %v2149_v2 = vpop.xlane.xlu1 %2148 }
 0x41f   : > { %v2239_v35 = vsub.f32 %v4578_v4, %v2149_v2 }
 0x420   : > { %v2143_v42 = vpop.xlane.xlu0 %2142 }
 0x421   : > { %v2273_v57 = vmul.f32 1.442695, %v2239_v35  ;;  %v2237_v24 = vsub.f32 %v4581_v48, %v2143_v42 }
 0x422   : > { %v2152_v63 = vpop.xlane.xlu1 %2151 }
 0x423   : > { %3602 = vpow2.f32 %v2273_v57  ;;  %v2269_v20 = vmul.f32 1.442695, %v2237_v24  ;;  %v2240_v39 = vsub.f32 %v4586_v61, %v2152_v63 }
 0x424   : > { %v2146_v49 = vpop.xlane.xlu0 %2145 }
 0x425   : > { %3604 = vpow2.f32 %v2269_v20  ;;  %v2275_v46 = vmul.f32 1.442695, %v2240_v39  ;;  %v2238_v1 = vsub.f32 %v4591_v52, %v2146_v49 }
 0x427   : > { %3606 = vpow2.f32 %v2275_v46  ;;  %v2271_v28 = vmul.f32 1.442695, %v2238_v1 }
 0x428   : > { %v2161_v17 = vpop.xlane.xlu0 %2160 }
 0x429   : > { %3608 = vpow2.f32 %v2271_v28  ;;  %v2243_v4 = vsub.f32 %v4596_v25, %v2161_v17 }
 0x42a   : > { %v2164_v2 = vpop.xlane.xlu1 %2163 }
 0x42b   : > { %v2281_v35 = vmul.f32 1.442695, %v2243_v4  ;;  %v2244_v48 = vsub.f32 %v4604_v55, %v2164_v2 }
 0x42c   : > { %v2155_v42 = vpop.xlane.xlu0 %2154 }
 0x42d   : > { %3610 = vpow2.f32 %v2281_v35  ;;  %v2283_v24 = vmul.f32 1.442695, %v2244_v48  ;;  %v2241_v57 = vsub.f32 %v4601_v38, %v2155_v42 }
 0x42e   : > { %v2158_v61 = vpop.xlane.xlu1 %2157 }
 0x42f   : > { %3612 = vpow2.f32 %v2283_v24  ;;  %v2277_v20 = vmul.f32 1.442695, %v2241_v57  ;;  %v2242_v49 = vsub.f32 %v4609_v60, %v2158_v61 }
 0x430   : > { %v4749_v52 = vpop.eup %3602  ;;  %v2173_v63 = vpop.xlane.xlu0 %2172 }
 0x431   : > { %3614 = vpow2.f32 %v2277_v20  ;;  %v2279_v28 = vmul.f32 1.442695, %v2242_v49  ;;  %v2247_v17 = vsub.f32 %v4614_v15, %v2173_v63  ;;  %v2339_v25 = vsel %vm1487_vm5, %v4749_v52, 0.0 }
 0x432   : > { %v4754_v55 = vpop.eup %3604  ;;  %v2176_v39 = vpop.xlane.xlu1 %2175  ;;  %2340 = vadd.xlane.f32.xlu0 %v2339_v25 }
 0x433   : > { %3616 = vpow2.f32 %v2279_v28  ;;  %v2289_v38 = vmul.f32 1.442695, %v2247_v17  ;;  %v2248_v46 = vsub.f32 %v4624_v40, %v2176_v39  ;;  %v2333_v4 = vsel %vm1487_vm5, %v4754_v55, 0.0 }
 0x434   : > { %v4757_v1 = vpop.eup %3606  ;;  %v2167_v60 = vpop.xlane.xlu0 %2166 }
 0x435   : > { %3618 = vpow2.f32 %v2289_v38  ;;  %v2291_v2 = vmul.f32 1.442695, %v2248_v46  ;;  %v2245_v15 = vsub.f32 %v4621_v9, %v2167_v60  ;;  %v2342_v35 = vsel %vm1487_vm5, %v4757_v1, 0.0 }
 0x436   : > { %v4764_v48 = vpop.eup %3608  ;;  %2343 = vadd.xlane.f32.xlu1 %v2342_v35  ;;  %v2170_v42 = vpop.xlane.xlu1 %2169  ;;  %2334 = vadd.xlane.f32.xlu0 %v2333_v4 }
 0x437   : > { %3620 = vpow2.f32 %v2291_v2  ;;  %v2285_v40 = vmul.f32 1.442695, %v2245_v15  ;;  %v2246_v24 = vsub.f32 %v4629_v14, %v2170_v42  ;;  %v2336_v9 = vsel %vm1487_vm5, %v4764_v48, 0.0 }
 0x438   : > { %v2185_v57 = vpop.xlane.xlu0 %2184 }
 0x439   : > { %3622 = vpow2.f32 %v2285_v40  ;;  %v2287_v61 = vmul.f32 1.442695, %v2246_v24  ;;  %v2251_v20 = vsub.f32 %v4634_v21, %v2185_v57 }
 0x43a   : > { %v4770_v49 = vpop.eup %3610  ;;  %v2188_v63 = vpop.xlane.xlu1 %2187  ;;  %2337 = vadd.xlane.f32.xlu1 %v2336_v9 }
 0x43b   : > { %3624 = vpow2.f32 %v2287_v61  ;;  %v2297_v28 = vmul.f32 1.442695, %v2251_v20  ;;  %v2252_v17 = vsub.f32 %v4644_v30, %v2188_v63  ;;  %v2351_v25 = vsel %vm1487_vm5, %v4770_v49, 0.0 }
 0x43c   : > { %v4775_v14 = vpop.eup %3612  ;;  %2352 = vadd.xlane.f32.xlu0 %v2351_v25  ;;  %v2179_v39 = vpop.xlane.xlu0 %2178 }
 0x43d   : > { %3626 = vpow2.f32 %v2297_v28  ;;  %v2299_v21 = vmul.f32 1.442695, %v2252_v17  ;;  %v2249_v38 = vsub.f32 %v4641_v54, %v2179_v39  ;;  %v2354_v46 = vsel %vm1487_vm5, %v4775_v14, 0.0 }
 0x43e   : > { %v4780_v60 = vpop.eup %3614  ;;  %v2182_v4 = vpop.xlane.xlu1 %2181  ;;  %2355 = vadd.xlane.f32.xlu1 %v2354_v46 }
 0x43f   : > { %3628 = vpow2.f32 %v2299_v21  ;;  %v2293_v30 = vmul.f32 1.442695, %v2249_v38  ;;  %v2250_v2 = vsub.f32 %v4649_v34, %v2182_v4  ;;  %v2345_v15 = vsel %vm1487_vm5, %v4780_v60, 0.0 }
 0x440   : > { %v4785_v35 = vpop.eup %3616  ;;  %2346 = vadd.xlane.f32.xlu0 %v2345_v15  ;;  %v2197_v42 = vpop.xlane.xlu0 %2196 }
 0x441   : > { %3630 = vpow2.f32 %v2293_v30  ;;  %v2295_v54 = vmul.f32 1.442695, %v2250_v2  ;;  %v2255_v40 = vsub.f32 %v4654_v32, %v2197_v42  ;;  %v2348_v24 = vsel %vm1487_vm5, %v4785_v35, 0.0 }
 0x442   : > { %v4790_v57 = vpop.eup %3618  ;;  %v2200_v61 = vpop.xlane.xlu1 %2199  ;;  %2349 = vadd.xlane.f32.xlu1 %v2348_v24 }
 0x443   : > { %3632 = vpow2.f32 %v2295_v54  ;;  %v2305_v34 = vmul.f32 1.442695, %v2255_v40  ;;  %v2256_v20 = vsub.f32 %v4664_v59, %v2200_v61  ;;  %v2363_v9 = vsel %vm1487_vm5, %v4790_v57, 0.0 }
 0x444   : > { %v4795_v63 = vpop.eup %3620  ;;  %2364 = vadd.xlane.f32.xlu0 %v2363_v9  ;;  %v2191_v28 = vpop.xlane.xlu0 %2190 }
 0x445   : > { %3634 = vpow2.f32 %v2305_v34  ;;  %v2307_v32 = vmul.f32 1.442695, %v2256_v20  ;;  %v2253_v17 = vsub.f32 %v4661_v7, %v2191_v28  ;;  %v2366_v25 = vsel %vm1487_vm5, %v4795_v63, 0.0 }
 0x446   : > { %v4800_v39 = vpop.eup %3622  ;;  %v2194_v21 = vpop.xlane.xlu1 %2193  ;;  %2367 = vadd.xlane.f32.xlu1 %v2366_v25 }
 0x447   : > { %3636 = vpow2.f32 %v2307_v32  ;;  %v2301_v59 = vmul.f32 1.442695, %v2253_v17  ;;  %v2254_v38 = vsub.f32 %v4669_v19, %v2194_v21  ;;  %v2357_v46 = vsel %vm1487_vm5, %v4800_v39, 0.0 }
 0x448   : > { %v4805_v4 = vpop.eup %3624  ;;  %2358 = vadd.xlane.f32.xlu0 %v2357_v46  ;;  %v2209_v30 = vpop.xlane.xlu0 %2208 }
 0x449   : > { %3638 = vpow2.f32 %v2301_v59  ;;  %v2303_v7 = vmul.f32 1.442695, %v2254_v38  ;;  %v2259_v2 = vsub.f32 %v4674_v27, %v2209_v30  ;;  %v2360_v15 = vsel %vm1487_vm5, %v4805_v4, 0.0 }
 0x44a   : > { %v4810_v42 = vpop.eup %3626  ;;  %v2212_v54 = vpop.xlane.xlu1 %2211  ;;  %2361 = vadd.xlane.f32.xlu1 %v2360_v15 }
 0x44b   : > { %3640 = vpow2.f32 %v2303_v7  ;;  %v2313_v19 = vmul.f32 1.442695, %v2259_v2  ;;  %v2260_v40 = vsub.f32 %v4684_v41, %v2212_v54  ;;  %v2375_v24 = vsel %vm1487_vm5, %v4810_v42, 0.0 }
 0x44c   : > { %v4815_v61 = vpop.eup %3628  ;;  %2376 = vadd.xlane.f32.xlu0 %v2375_v24  ;;  %v2203_v34 = vpop.xlane.xlu0 %2202 }
 0x44d   : > { %3642 = vpow2.f32 %v2313_v19  ;;  %v2315_v27 = vmul.f32 1.442695, %v2260_v40  ;;  %v2257_v20 = vsub.f32 %v4681_v43, %v2203_v34  ;;  %v2378_v9 = vsel %vm1487_vm5, %v4815_v61, 0.0 }
 0x44e   : > { %v4820_v28 = vpop.eup %3630  ;;  %v2206_v32 = vpop.xlane.xlu1 %2205  ;;  %2379 = vadd.xlane.f32.xlu1 %v2378_v9 }
 0x44f   : > { %3644 = vpow2.f32 %v2315_v27  ;;  %v2309_v41 = vmul.f32 1.442695, %v2257_v20  ;;  %v2258_v17 = vsub.f32 %v4689_v6, %v2206_v32  ;;  %v2369_v25 = vsel %vm1487_vm5, %v4820_v28, 0.0 }
 0x450   : > { %v4825_v21 = vpop.eup %3632  ;;  %2370 = vadd.xlane.f32.xlu0 %v2369_v25  ;;  %v2221_v59 = vpop.xlane.xlu0 %2220 }
 0x451   : > { %3646 = vpow2.f32 %v2309_v41  ;;  %v2311_v43 = vmul.f32 1.442695, %v2258_v17  ;;  %v2263_v38 = vsub.f32 %v4694_v53, %v2221_v59  ;;  %v2372_v46 = vsel %vm1487_vm5, %v4825_v21, 0.0 }
 0x452   : > { %v4830_v30 = vpop.eup %3634  ;;  %v2224_v7 = vpop.xlane.xlu1 %2223  ;;  %2373 = vadd.xlane.f32.xlu1 %v2372_v46 }
 0x453   : > { %3648 = vpow2.f32 %v2311_v43  ;;  %v2321_v6 = vmul.f32 1.442695, %v2263_v38  ;;  %v2264_v2 = vsub.f32 %v4704_v62, %v2224_v7  ;;  %v2387_v15 = vsel %vm1487_vm5, %v4830_v30, 0.0 }
 0x454   : > { %v4835_v54 = vpop.eup %3636  ;;  %2388 = vadd.xlane.f32.xlu0 %v2387_v15  ;;  %v2215_v19 = vpop.xlane.xlu0 %2214 }
 0x455   : > { %3650 = vpow2.f32 %v2321_v6  ;;  %v2323_v53 = vmul.f32 1.442695, %v2264_v2  ;;  %v2261_v40 = vsub.f32 %v4701_v33, %v2215_v19  ;;  %v2390_v24 = vsel %vm1487_vm5, %v4835_v54, 0.0 }
 0x456   : > { %v4840_v34 = vpop.eup %3638  ;;  %v2218_v27 = vpop.xlane.xlu1 %2217  ;;  %2391 = vadd.xlane.f32.xlu1 %v2390_v24 }
 0x457   : > { %3652 = vpow2.f32 %v2323_v53  ;;  %v2317_v62 = vmul.f32 1.442695, %v2261_v40  ;;  %v2262_v20 = vsub.f32 %v4711_v23, %v2218_v27  ;;  %v2381_v9 = vsel %vm1487_vm5, %v4840_v34, 0.0 }
 0x458   : > { %v4845_v32 = vpop.eup %3640  ;;  %2382 = vadd.xlane.f32.xlu0 %v2381_v9  ;;  %v2233_v41 = vpop.xlane.xlu0 %2232 }
 0x459   : > { %3654 = vpow2.f32 %v2317_v62  ;;  %v2319_v33 = vmul.f32 1.442695, %v2262_v20  ;;  %v2267_v17 = vsub.f32 %v4715_v26, %v2233_v41  ;;  %v2384_v25 = vsel %vm1487_vm5, %v4845_v32, 0.0 }
 0x45a   : > { %v4850_v59 = vpop.eup %3642  ;;  %v2236_v43 = vpop.xlane.xlu1 %2235  ;;  %2385 = vadd.xlane.f32.xlu1 %v2384_v25 }
 0x45b   : > { %3656 = vpow2.f32 %v2319_v33  ;;  %v2329_v23 = vmul.f32 1.442695, %v2267_v17  ;;  %v2268_v38 = vsub.f32 %v4723_v13, %v2236_v43  ;;  %v2399_v46 = vsel %vm1487_vm5, %v4850_v59, 0.0 }
 0x45c   : > { %v4855_v7 = vpop.eup %3644  ;;  %2400 = vadd.xlane.f32.xlu0 %v2399_v46  ;;  %v2227_v6 = vpop.xlane.xlu0 %2226 }
 0x45d   : > { %3658 = vpow2.f32 %v2329_v23  ;;  %v2331_v26 = vmul.f32 1.442695, %v2268_v38  ;;  %v2265_v2 = vsub.f32 %v4721_v5, %v2227_v6  ;;  %v2402_v15 = vsel %vm1487_vm5, %v4855_v7, 0.0 }
 0x45e   : > { %v4860_v19 = vpop.eup %3646  ;;  %v2230_v53 = vpop.xlane.xlu1 %2229  ;;  %2403 = vadd.xlane.f32.xlu1 %v2402_v15 }
 0x45f   : > { %3660 = vpow2.f32 %v2331_v26  ;;  %v2325_v13 = vmul.f32 1.442695, %v2265_v2  ;;  %v2266_v40 = vsub.f32 %v4727_v51, %v2230_v53  ;;  %v2393_v24 = vsel %vm1487_vm5, %v4860_v19, 0.0 }
 0x460   : > { %v4865_v27 = vpop.eup %3648  ;;  %2394 = vadd.xlane.f32.xlu0 %v2393_v24 }
 0x461   : > { %3662 = vpow2.f32 %v2325_v13  ;;  %v2327_v62 = vmul.f32 1.442695, %v2266_v40  ;;  %v2396_v5 = vsel %vm1487_vm5, %v4865_v27, 0.0  ;;  %v2525_v13 = vld [vmem:[%s4231_s30 + $0xf0] sm:$0xff]  ;;  %v2526_v40 = vld [vmem:[%s4231_s30 + $0xf8] sm:$0xff] }
 0x462   : > { %v4869_v20 = vpop.eup %3650  ;;  %2397 = vadd.xlane.f32.xlu1 %v2396_v5 }
 0x463   : > { %3664 = vpow2.f32 %v2327_v62  ;;  %v2411_v9 = vsel %vm1487_vm5, %v4869_v20, 0.0  ;;  %v4905_v62 = vpop.permute.xlu1 %2612 }
 0x464   : > { %v4873_v41 = vpop.eup %3652  ;;  %2412 = vadd.xlane.f32.xlu0 %v2411_v9  ;;  %v4903_v24 = vpop.permute.xlu0 %2615  ;;  %vm2651_vm6 = vcmp.eq.s32.totalorder %v4402_v47, %v4905_v62 }
 0x465   : > { %v2414_v51 = vsel %vm1487_vm5, %v4873_v41, 0.0  ;;  %vm2652_vm7 = vcmp.eq.s32.totalorder %v4402_v47, %v4903_v24 }
 0x466   : > { %v4877_v33 = vpop.eup %3654  ;;  %2415 = vadd.xlane.f32.xlu1 %v2414_v51 }
 0x467   : > { %v2405_v17 = vsel %vm1487_vm5, %v4877_v33, 0.0 }
 0x468   : > { %v4881_v25 = vpop.eup %3656  ;;  %2406 = vadd.xlane.f32.xlu0 %v2405_v17 }
 0x469   : > { %5135 = vst [vmem:[#allocation13_spill] sm:$0xff] %v4881_v25  ;;  %v2408_v43 = vsel %vm1487_vm5, %v4881_v25, 0.0 }
 0x46a   : > { %v4885_v23 = vpop.eup %3658  ;;  %2409 = vadd.xlane.f32.xlu1 %v2408_v43 }
 0x46b   : > { %5136 = vst [vmem:[#allocation14_spill] sm:$0xff] %v4885_v23  ;;  %v2423_v38 = vsel %vm1487_vm5, %v4885_v23, 0.0 }
 0x46c   : > { %v4889_v46 = vpop.eup %3660  ;;  %2424 = vadd.xlane.f32.xlu0 %v2423_v38 }
 0x46d   : > { %5137 = vst [vmem:[#allocation15_spill] sm:$0xff] %v4889_v46  ;;  %v2426_v6 = vsel %vm1487_vm5, %v4889_v46, 0.0 }
 0x46e   : > { %v4893_v26 = vpop.eup %3662  ;;  %2427 = vadd.xlane.f32.xlu1 %v2426_v6 }
 0x46f   : > { %5138 = vst [vmem:[#allocation16_spill] sm:$0xff] %v4893_v26  ;;  %v2417_v2 = vsel %vm1487_vm5, %v4893_v26, 0.0 }
 0x470   : > { %v4897_v15 = vpop.eup %3664  ;;  %2418 = vadd.xlane.f32.xlu0 %v2417_v2 }
 0x471   : > { %5139 = vst [vmem:[#allocation17_spill] sm:$0xff] %v4897_v15  ;;  %v2420_v53 = vsel %vm1487_vm5, %v4897_v15, 0.0 }
 0x472   : > { %2421 = vadd.xlane.f32.xlu1 %v2420_v53 }
 0x483   : > { %2618 = vperm.xlu1 %3585, %v2525_v13  }
 0x486   : > { %2621 = vperm.xlu0 %3584, %v2526_v40  }
 0x4bb   : > { %v2341_v5 = vpop.xlane.xlu0 %2340 }
 0x4bc   : > { %3666 = vrcp.f32 %v2341_v5 }
 0x4bf   : > { %v2344_v9 = vpop.xlane.xlu1 %2343  ;;  %v2335_v51 = vpop.xlane.xlu0 %2334 }
 0x4c0   : > { %3668 = vrcp.f32 %v2335_v51 }
 0x4c1   : > { %3670 = vrcp.f32 %v2344_v9 }
 0x4c3   : > { %v2338_v17 = vpop.xlane.xlu1 %2337 }
 0x4c4   : > { %3672 = vrcp.f32 %v2338_v17 }
 0x4c5   : > { %v2353_v43 = vpop.xlane.xlu0 %2352 }
 0x4c6   : > { %3674 = vrcp.f32 %v2353_v43 }
 0x4c7   : > { %v2356_v38 = vpop.xlane.xlu1 %2355 }
 0x4c8   : > { %3676 = vrcp.f32 %v2356_v38 }
 0x4c9   : > { %v2347_v6 = vpop.xlane.xlu0 %2346  ;;  %v3667_v53 = vpop.eup %3666 }
 0x4ca   : > { %3678 = vrcp.f32 %v2347_v6  ;;  %v2434_v5 = vmul.f32 %v3667_v53, %v4749_v52 }
 0x4cb   : > { %v2350_v2 = vpop.xlane.xlu1 %2349 }
 0x4cc   : > { %3680 = vrcp.f32 %v2350_v2  ;;  %v2721_v2 = vmul.f32 %v4416_v10, %v2434_v5 }
 0x4cd   : > { %v2365_v13 = vpop.xlane.xlu0 %2364  ;;  %v3669_v40 = vpop.eup %3668 }
 0x4ce   : > { %v3671_v46 = vpop.eup %3670  ;;  %v2430_v15 = vmul.f32 %v3669_v40, %v4754_v55  ;;  %3682 = vrcp.f32 %v2365_v13 }
 0x4cf   : > { %v2368_v9 = vpop.xlane.xlu1 %2367  ;;  %v2436_v43 = vmul.f32 %v3671_v46, %v4757_v1  ;;  %v2823_v1 = vsel %vm1487_vm5, %v2434_v5, 0.0 }
 0x4d0   : > { %3684 = vrcp.f32 %v2368_v9  ;;  %v2719_v38 = vmul.f32 %v4429_v56, %v2430_v15  ;;  %v2820_v26 = vsel %vm1487_vm5, %v2430_v15, 0.0  ;;  %v2754_v15 = vsel %vm1487_vm5, %v2721_v2, 0.0 }
 0x4d1   : > { %v3673_v51 = vpop.eup %3672  ;;  %v2359_v17 = vpop.xlane.xlu0 %2358  ;;  %v2722_v56 = vmul.f32 %v4426_v18, %v2436_v43 }
 0x4d2   : > { %v2432_v6 = vmul.f32 %v3673_v51, %v4764_v48  ;;  %3686 = vrcp.f32 %v2359_v17  ;;  %v2751_v48 = vsel %vm1487_vm5, %v2719_v38, 0.0 }
 0x4d3   : > { %v2362_v23 = vpop.xlane.xlu1 %2361  ;;  %v3675_v53 = vpop.eup %3674  ;;  %v2756_v25 = vsel %vm1487_vm5, %v2722_v56, 0.0 }
 0x4d4   : > { %v2720_v52 = vmul.f32 %v4413_v8, %v2432_v6  ;;  %v2821_v55 = vsel %vm1487_vm5, %v2432_v6, 0.0  ;;  %3688 = vrcp.f32 %v2362_v23  ;;  %v2825_v23 = vsel %vm1487_vm5, %v2436_v43, 0.0 }
 0x4d5   : > { %v2822_v13 = vadd.f32 %v2821_v55, %v2820_v26  ;;  %v2377_v40 = vpop.xlane.xlu0 %2376  ;;  %v3677_v9 = vpop.eup %3676  ;;  %v2442_v26 = vmul.f32 %v3675_v53, %v4770_v49 }
 0x4d6   : > { %v2752_v10 = vsel %vm1487_vm5, %v2720_v52, 0.0  ;;  %3690 = vrcp.f32 %v2377_v40  ;;  %v2444_v18 = vmul.f32 %v3677_v9, %v4775_v14 }
 0x4d7   : > { %v3679_v46 = vpop.eup %3678  ;;  %v2753_v51 = vadd.f32 %v2752_v10, %v2751_v48  ;;  %v2824_v8 = vadd.f32 %v2823_v1, %v2822_v13  ;;  %v2380_v17 = vpop.xlane.xlu1 %2379  ;;  %v2725_v14 = vmul.f32 %v4453_v29, %v2442_v26 }
 0x4d8   : > { %v2438_v6 = vmul.f32 %v3679_v46, %v4780_v60  ;;  %3692 = vrcp.f32 %v2380_v17  ;;  %v2726_v56 = vmul.f32 %v4464_v37, %v2444_v18  ;;  %v5140_v37 = vmov 0.0  }
 0x4d9   : > { %v3681_v5 = vpop.eup %3680  ;;  %v2755_v55 = vadd.f32 %v2754_v15, %v2753_v51  ;;  %v2826_v38 = vadd.f32 %v2825_v23, %v2824_v8  ;;  %v2371_v52 = vpop.xlane.xlu0 %2370  ;;  %v4945_v23 = vsel %vm2650_vm3, 1.0, %v5140_v37 }
 0x4da   : > { %v2723_v2 = vmul.f32 %v4442_v22, %v2438_v6  ;;  %v2827_v13 = vsel %vm1487_vm5, %v2438_v6, 0.0  ;;  %v2440_v43 = vmul.f32 %v3681_v5, %v4785_v35  ;;  %3694 = vrcp.f32 %v2371_v52 }
 0x4db   : > { %v2757_v49 = vadd.f32 %v2756_v25, %v2755_v55  ;;  %v2828_v60 = vadd.f32 %v2827_v13, %v2826_v38  ;;  %v2374_v53 = vpop.xlane.xlu1 %2373  ;;  %v3683_v40 = vpop.eup %3682  ;;  %v2831_v25 = vsel %vm1487_vm5, %v2442_v26, 0.0  ;;  %v2762_v6 = vsel %vm1487_vm5, %v2725_v14, 0.0 }
 0x4dc   : > { %v2758_v9 = vsel %vm1487_vm5, %v2723_v2, 0.0  ;;  %v2724_v1 = vmul.f32 %v4447_v31, %v2440_v43  ;;  %v2829_v22 = vsel %vm1487_vm5, %v2440_v43, 0.0  ;;  %3696 = vrcp.f32 %v2374_v53 }
 0x4dd   : > { %v2759_v48 = vadd.f32 %v2758_v9, %v2757_v49  ;;  %v2830_v35 = vadd.f32 %v2829_v22, %v2828_v60  ;;  %v2389_v10 = vpop.xlane.xlu0 %2388  ;;  %v3685_v46 = vpop.eup %3684  ;;  %v2450_v31 = vmul.f32 %v3683_v40, %v4790_v57  ;;  %v2833_v5 = vsel %vm1487_vm5, %v2444_v18, 0.0 }
 0x4de   : > { %v2760_v29 = vsel %vm1487_vm5, %v2724_v1, 0.0  ;;  %3698 = vrcp.f32 %v2389_v10  ;;  %v2764_v38 = vsel %vm1487_vm5, %v2726_v56, 0.0  ;;  %v2452_v57 = vmul.f32 %v3685_v46, %v4795_v63 }
 0x4df   : > { %v3687_v15 = vpop.eup %3686  ;;  %v2761_v51 = vadd.f32 %v2760_v29, %v2759_v48  ;;  %v2832_v8 = vadd.f32 %v2831_v25, %v2830_v35  ;;  %v2392_v17 = vpop.xlane.xlu1 %2391  ;;  %v2729_v60 = vmul.f32 %v4485_v44, %v2450_v31  ;;  %v4967_v56 = vsel %vm1487_vm5, %v4945_v23, 0.0 }
 0x4e0   : > { %v2446_v26 = vmul.f32 %v3687_v15, %v4800_v39  ;;  %3700 = vrcp.f32 %v2392_v17  ;;  %v2730_v48 = vmul.f32 %v4481_v0, %v2452_v57  ;;  %v2841_v15 = vsel %vm1487_vm5, %v2452_v57, 0.0 }
 0x4e1   : > { %v3689_v55 = vpop.eup %3688  ;;  %v2763_v52 = vadd.f32 %v2762_v6, %v2761_v51  ;;  %v2834_v2 = vadd.f32 %v2833_v5, %v2832_v8  ;;  %v2383_v13 = vpop.xlane.xlu0 %2382  ;;  %v2770_v58 = vsel %vm1487_vm5, %v2729_v60, 0.0 }
 0x4e2   : > { %v2727_v43 = vmul.f32 %v4474_v45, %v2446_v26  ;;  %v2835_v16 = vsel %vm1487_vm5, %v2446_v26, 0.0  ;;  %v2448_v49 = vmul.f32 %v3689_v55, %v4805_v4  ;;  %3702 = vrcp.f32 %v2383_v13 }
 0x4e3   : > { %v2765_v18 = vadd.f32 %v2764_v38, %v2763_v52  ;;  %v2836_v53 = vadd.f32 %v2835_v16, %v2834_v2  ;;  %v2386_v39 = vpop.xlane.xlu1 %2385  ;;  %v3691_v9 = vpop.eup %3690  ;;  %v4963_v45 = vsel %vm2649_vm4, 1.0, %v5140_v37  ;;  %v4985_v55 = vsel %vm2651_vm6, 1.0, %v5140_v37 }
 0x4e4   : > { %v2766_v40 = vsel %vm1487_vm5, %v2727_v43, 0.0  ;;  %v2728_v14 = vmul.f32 %v4469_v36, %v2448_v49  ;;  %v2837_v63 = vsel %vm1487_vm5, %v2448_v49, 0.0  ;;  %3704 = vrcp.f32 %v2386_v39 }
 0x4e5   : > { %v2767_v4 = vadd.f32 %v2766_v40, %v2765_v18  ;;  %v2838_v44 = vadd.f32 %v2837_v63, %v2836_v53  ;;  %v2401_v1 = vpop.xlane.xlu0 %2400  ;;  %v3693_v22 = vpop.eup %3692  ;;  %v2839_v36 = vsel %vm1487_vm5, %v2450_v31, 0.0  ;;  %v2458_v51 = vmul.f32 %v3691_v9, %v4810_v42  ;;  %v5141_v18 = vld [vmem:[#allocation12_spill] sm:$0xff] }
 0x4e6   : > { %v2768_v35 = vsel %vm1487_vm5, %v2728_v14, 0.0  ;;  %v2460_v8 = vmul.f32 %v3693_v22, %v4815_v61  ;;  %3706 = vrcp.f32 %v2401_v1  ;;  %v2940_v26 = vsel %vm1487_vm5, %v4963_v45, 0.0 }
 0x4e7   : > { %v2769_v10 = vadd.f32 %v2768_v35, %v2767_v4  ;;  %v2840_v46 = vadd.f32 %v2839_v36, %v2838_v44  ;;  %v2404_v25 = vpop.xlane.xlu1 %2403  ;;  %v3695_v29 = vpop.eup %3694  ;;  %v2772_v42 = vsel %vm1487_vm5, %v2730_v48, 0.0  ;;  %v2733_v13 = vmul.f32 %v4509_v50, %v2458_v51 }
 0x4e8   : > { %v2454_v17 = vmul.f32 %v3695_v29, %v4820_v28  ;;  %3708 = vrcp.f32 %v2404_v25  ;;  %v2734_v43 = vmul.f32 %v4506_v3, %v2460_v8  ;;  %v2944_v53 = vsel %vm1487_vm5, %v4985_v55, 0.0  ;;  %v5142_v25 = vld [vmem:[#allocation5_spill] sm:$0xff] }
 0x4e9   : > { %v2771_v31 = vadd.f32 %v2770_v58, %v2769_v10  ;;  %v2842_v0 = vadd.f32 %v2841_v15, %v2840_v46  ;;  %v2395_v6 = vpop.xlane.xlu0 %2394  ;;  %v3697_v5 = vpop.eup %3696  ;;  %v5002_v50 = vsel %vm2652_vm7, 1.0, %v5140_v37  ;;  %v2847_v3 = vsel %vm1487_vm5, %v2458_v51, 0.0  ;;  %v5143_v51 = vld [vmem:[#allocation3_spill] sm:$0xff] }
 0x4ea   : > { %3710 = vrcp.f32 %v2395_v6  ;;  %v2731_v38 = vmul.f32 %v4497_v11, %v2454_v17  ;;  %v2843_v28 = vsel %vm1487_vm5, %v2454_v17, 0.0  ;;  %v2456_v52 = vmul.f32 %v3697_v5, %v4825_v21  ;;  %v5144_v5 = vld [vmem:[#allocation2_spill] sm:$0xff] }
 0x4eb   : > { %v2773_v61 = vadd.f32 %v2772_v42, %v2771_v31  ;;  %v2398_v57 = vpop.xlane.xlu1 %2397  ;;  %v3699_v2 = vpop.eup %3698  ;;  %v2844_v62 = vadd.f32 %v2843_v28, %v2842_v0  ;;  %v2941_v21 = vadd.f32 %v2940_v26, %v5141_v18  ;;  %v2778_v4 = vsel %vm1487_vm5, %v2733_v13, 0.0 }
 0x4ec   : > { %3712 = vrcp.f32 %v2398_v57  ;;  %v2774_v16 = vsel %vm1487_vm5, %v2731_v38, 0.0  ;;  %v2732_v49 = vmul.f32 %v4494_v12, %v2456_v52  ;;  %v2845_v11 = vsel %vm1487_vm5, %v2456_v52, 0.0 }
 0x4ed   : > { %v2413_v60 = vpop.xlane.xlu0 %2412  ;;  %v2775_v39 = vadd.f32 %v2774_v16, %v2773_v61  ;;  %v2846_v24 = vadd.f32 %v2845_v11, %v2844_v62  ;;  %v3701_v40 = vpop.eup %3700  ;;  %v2466_v12 = vmul.f32 %v3699_v2, %v4830_v30  ;;  %v2780_v36 = vsel %vm1487_vm5, %v2734_v43, 0.0  ;;  %v5145_v16 = vld [vmem:[#allocation4_spill] sm:$0xff] }
 0x4ee   : > { %v2776_v14 = vsel %vm1487_vm5, %v2732_v49, 0.0  ;;  %3714 = vrcp.f32 %v2413_v60  ;;  %v2849_v48 = vsel %vm1487_vm5, %v2460_v8, 0.0  ;;  %v2468_v15 = vmul.f32 %v3701_v40, %v4835_v54 }
 0x4ef   : > { %v2416_v63 = vpop.xlane.xlu1 %2415  ;;  %v3703_v9 = vpop.eup %3702  ;;  %v2777_v44 = vadd.f32 %v2776_v14, %v2775_v39  ;;  %v2848_v1 = vadd.f32 %v2847_v3, %v2846_v24  ;;  %v2737_v29 = vmul.f32 %v5142_v25, %v2466_v12  ;;  %v2943_v61 = vadd.f32 %v4967_v56, %v2941_v21 }
 0x4f0   : > { %v2462_v35 = vmul.f32 %v3703_v9, %v4840_v34  ;;  %3716 = vrcp.f32 %v2416_v63  ;;  %v2946_v62 = vsel %vm1487_vm5, %v5002_v50, 0.0  ;;  %v2855_v43 = vsel %vm1487_vm5, %v2466_v12, 0.0 }
 0x4f1   : > { %v3705_v22 = vpop.eup %3704  ;;  %v2407_v58 = vpop.xlane.xlu0 %2406  ;;  %v2779_v10 = vadd.f32 %v2778_v4, %v2777_v44  ;;  %v2850_v46 = vadd.f32 %v2849_v48, %v2848_v1  ;;  %v2945_v13 = vadd.f32 %v2944_v53, %v2943_v61  ;;  %v2738_v49 = vmul.f32 %v5145_v16, %v2468_v15  ;;  %v5146_v4 = vld [vmem:[#allocation7_spill] sm:$0xff] }
 0x4f2   : > { %v2464_v30 = vmul.f32 %v3705_v22, %v4845_v32  ;;  %3718 = vrcp.f32 %v2407_v58  ;;  %v2735_v31 = vmul.f32 %v5143_v51, %v2462_v35  ;;  %v2851_v0 = vsel %vm1487_vm5, %v2462_v35, 0.0  ;;  %v5148_v58 = vld [vmem:[#allocation9_spill] sm:$0xff] }
 0x4f3   : > { %v2410_v17 = vpop.xlane.xlu1 %2409  ;;  %v2781_v6 = vadd.f32 %v2780_v36, %v2779_v10  ;;  %v2852_v8 = vadd.f32 %v2851_v0, %v2850_v46  ;;  %v3707_v42 = vpop.eup %3706  ;;  %v2786_v56 = vsel %vm1487_vm5, %v2737_v29, 0.0  ;;  %v2857_v60 = vsel %vm1487_vm5, %v2468_v15, 0.0  ;;  %v5149_v46 = vld [vmem:[#allocation8_spill] sm:$0xff] }
 0x4f4   : > { %v2736_v34 = vmul.f32 %v5144_v5, %v2464_v30  ;;  %v2853_v26 = vsel %vm1487_vm5, %v2464_v30, 0.0  ;;  %v2782_v32 = vsel %vm1487_vm5, %v2735_v31, 0.0  ;;  %3720 = vrcp.f32 %v2410_v17 }
 0x4f5   : > { %v2425_v38 = vpop.xlane.xlu0 %2424  ;;  %v3709_v28 = vpop.eup %3708  ;;  %v2783_v54 = vadd.f32 %v2782_v32, %v2781_v6  ;;  %v2854_v57 = vadd.f32 %v2853_v26, %v2852_v8  ;;  %v2474_v24 = vmul.f32 %v3707_v42, %v4850_v59  ;;  %v2788_v9 = vsel %vm1487_vm5, %v2738_v49, 0.0 }
 0x4f6   : > { %v2784_v52 = vsel %vm1487_vm5, %v2736_v34, 0.0  ;;  %v2476_v40 = vmul.f32 %v3709_v28, %v4855_v7  ;;  %3722 = vrcp.f32 %v2425_v38  ;;  %v5147_v7 = vld [vmem:[#allocation6_spill] sm:$0xff]  ;;  %v2947_v0 = vadd.f32 %v2946_v62, %v2945_v13  ;;  %v5151_v62 = vld [vmem:[#allocation13_spill] sm:$0xff] }
 0x4f7   : > { %v3711_v2 = vpop.eup %3710  ;;  %v2428_v11 = vpop.xlane.xlu1 %2427  ;;  %v2785_v18 = vadd.f32 %v2784_v52, %v2783_v54  ;;  %v2856_v21 = vadd.f32 %v2855_v43, %v2854_v57  ;;  %v2741_v10 = vmul.f32 %v5148_v58, %v2474_v24  ;;  %v2863_v17 = vsel %vm1487_vm5, %v2474_v24, 0.0  ;;  %v5150_v57 = vld [vmem:[#allocation11_spill] sm:$0xff]  ;;  %v5155_v58 = vld [vmem:[#allocation17_spill] sm:$0xff] }
 0x4f8   : > { %v2470_v53 = vmul.f32 %v3711_v2, %v4860_v19  ;;  %3724 = vrcp.f32 %v2428_v11  ;;  %v2865_v8 = vsel %vm1487_vm5, %v2476_v40, 0.0 }
 0x4f9   : > { %v3713_v39 = vpop.eup %3712  ;;  %v2419_v3 = vpop.xlane.xlu0 %2418  ;;  %v2787_v14 = vadd.f32 %v2786_v56, %v2785_v18  ;;  %v2858_v12 = vadd.f32 %v2857_v60, %v2856_v21  ;;  %v2794_v42 = vsel %vm1487_vm5, %v2741_v10, 0.0 }
 0x4fa   : > { %v2472_v63 = vmul.f32 %v3713_v39, %v4865_v27  ;;  %v2739_v44 = vmul.f32 %v5146_v4, %v2470_v53  ;;  %v2859_v1 = vsel %vm1487_vm5, %v2470_v53, 0.0  ;;  %3726 = vrcp.f32 %v2419_v3 }
 0x4fb   : > { %v2422_v22 = vpop.xlane.xlu1 %2421  ;;  %v2789_v59 = vadd.f32 %v2788_v9, %v2787_v14  ;;  %v2860_v36 = vadd.f32 %v2859_v1, %v2858_v12  ;;  %v3715_v35 = vpop.eup %3714  ;;  %v2742_v27 = vmul.f32 %v5149_v46, %v2476_v40  ;;  %v5153_v1 = vld [vmem:[#allocation16_spill] sm:$0xff] }
 0x4fc   : > { %v2740_v48 = vmul.f32 %v5147_v7, %v2472_v63  ;;  %v2861_v19 = vsel %vm1487_vm5, %v2472_v63, 0.0  ;;  %v2790_v30 = vsel %vm1487_vm5, %v2739_v44, 0.0  ;;  %3728 = vrcp.f32 %v2422_v22 }
 0x4fd   : > { %v3717_v25 = vpop.eup %3716  ;;  %v2791_v29 = vadd.f32 %v2790_v30, %v2789_v59  ;;  %v2862_v51 = vadd.f32 %v2861_v19, %v2860_v36  ;;  %v2796_v61 = vsel %vm1487_vm5, %v2742_v27, 0.0  ;;  %v2482_v32 = vmul.f32 %v3715_v35, %v4869_v20  ;;  %v5154_v36 = vld [vmem:[#allocation14_spill] sm:$0xff] }
 0x4fe   : > { %v2792_v15 = vsel %vm1487_vm5, %v2740_v48, 0.0  ;;  %v2484_v54 = vmul.f32 %v3717_v25, %v4873_v41  ;;  %v5152_v41 = vld [vmem:[#allocation10_spill] sm:$0xff] }
 0x4ff   : > { %v3719_v31 = vpop.eup %3718  ;;  %v2619_v6 = vpop.permute.xlu1 %2618  ;;  %v2793_v5 = vadd.f32 %v2792_v15, %v2791_v29  ;;  %v2864_v34 = vadd.f32 %v2863_v17, %v2862_v51  ;;  %v2745_v24 = vmul.f32 %v4963_v45, %v2482_v32  ;;  %v2871_v12 = vsel %vm1487_vm5, %v2482_v32, 0.0  ;;  %v5156_v29 = vld [vmem:[#allocation15_spill] sm:$0xff] }
 0x500   : > { %v2478_v26 = vmul.f32 %v3719_v31, %v4877_v33  ;;  %vm2653_vm8 = vcmp.eq.s32.totalorder %v4402_v47, %v2619_v6  ;;  %v2873_v44 = vsel %vm1487_vm5, %v2484_v54, 0.0 }
 0x501   : > { %v2622_v38 = vpop.permute.xlu0 %2621  ;;  %v3721_v28 = vpop.eup %3720  ;;  %v2866_v52 = vadd.f32 %v2865_v8, %v2864_v34  ;;  %v3271_v33 = vsel %vm2653_vm8, 1.0, %v5140_v37  ;;  %v2795_v16 = vadd.f32 %v2794_v42, %v2793_v5  ;;  %v2802_v48 = vsel %vm1487_vm5, %v2745_v24, 0.0 }
 0x502   : > { %v2743_v2 = vmul.f32 %v5150_v57, %v2478_v26  ;;  %v2867_v13 = vsel %vm1487_vm5, %v2478_v26, 0.0  ;;  %v2480_v43 = vmul.f32 %v3721_v28, %v5151_v62  ;;  %vm2654_vm9 = vcmp.eq.s32.totalorder %v4402_v47, %v2622_v38 }
 0x503   : > { %v2868_v49 = vadd.f32 %v2867_v13, %v2866_v52  ;;  %v2948_v11 = vsel %vm1487_vm5, %v3271_v33, 0.0  ;;  %v3272_v56 = vsel %vm2654_vm9, 1.0, %v5140_v37  ;;  %v2797_v21 = vadd.f32 %v2796_v61, %v2795_v16  ;;  %v3723_v39 = vpop.eup %3722 }
 0x504   : > { %v2798_v20 = vsel %vm1487_vm5, %v2743_v2, 0.0  ;;  %v2744_v60 = vmul.f32 %v5152_v41, %v2480_v43  ;;  %v2869_v18 = vsel %vm1487_vm5, %v2480_v43, 0.0  ;;  %v2949_v53 = vadd.f32 %v2948_v11, %v2947_v0 }
 0x505   : > { %v2870_v40 = vadd.f32 %v2869_v18, %v2868_v49  ;;  %v3725_v3 = vpop.eup %3724  ;;  %v2799_v14 = vadd.f32 %v2798_v20, %v2797_v21  ;;  %v2950_v63 = vsel %vm1487_vm5, %v3272_v56, 0.0  ;;  %v2746_v37 = vmul.f32 %v4945_v23, %v2484_v54 }
 0x506   : > { %v2800_v47 = vsel %vm1487_vm5, %v2744_v60, 0.0  ;;  %v2490_v7 = vmul.f32 %v3723_v39, %v5154_v36  ;;  %v2951_v35 = vadd.f32 %v2950_v63, %v2949_v53  ;;  %v2492_v15 = vmul.f32 %v3725_v3, %v5156_v29 }
 0x507   : > { %v3727_v9 = vpop.eup %3726  ;;  %v2872_v4 = vadd.f32 %v2871_v12, %v2870_v40  ;;  %v2801_v59 = vadd.f32 %v2800_v47, %v2799_v14  ;;  %v2804_v30 = vsel %vm1487_vm5, %v2746_v37, 0.0 }
 0x508   : > { %v2486_v22 = vmul.f32 %v3727_v9, %v5153_v1  ;;  %v2749_v6 = vmul.f32 %v3271_v33, %v2490_v7  ;;  %v2952_v5 = vrot.slane %v2951_v35, 4  ;;  %v2879_v26 = vsel %vm1487_vm5, %v2490_v7, 0.0 }
 0x509   : > { %v3729_v45 = vpop.eup %3728  ;;  %v2874_v19 = vadd.f32 %v2873_v44, %v2872_v4  ;;  %v2803_v27 = vadd.f32 %v2802_v48, %v2801_v59  ;;  %v2750_v61 = vmul.f32 %v3272_v56, %v2492_v15  ;;  %v2881_v38 = vsel %vm1487_vm5, %v2492_v15, 0.0 }
 0x50a   : > { %v2488_v10 = vmul.f32 %v3729_v45, %v5155_v58  ;;  %v2747_v46 = vmul.f32 %v4985_v55, %v2486_v22  ;;  %v2875_v23 = vsel %vm1487_vm5, %v2486_v22, 0.0  ;;  %v2810_v28 = vsel %vm1487_vm5, %v2749_v6, 0.0 }
 0x50b   : > { %v2876_v25 = vadd.f32 %v2875_v23, %v2874_v19  ;;  %v2805_v0 = vadd.f32 %v2804_v30, %v2803_v27  ;;  %v2812_v2 = vsel %vm1487_vm5, %v2750_v61, 0.0 }
 0x50c   : > { %v2877_v51 = vsel %vm1487_vm5, %v2488_v10, 0.0  ;;  %v2748_v31 = vmul.f32 %v5002_v50, %v2488_v10  ;;  %v2806_v17 = vsel %vm1487_vm5, %v2747_v46, 0.0  ;;  %v2953_v50 = vadd.f32 %v2952_v5, %v2951_v35 }
 0x50d   : > { %v2878_v8 = vadd.f32 %v2877_v51, %v2876_v25  ;;  %v2807_v34 = vadd.f32 %v2806_v17, %v2805_v0 }
 0x50e   : > { %v2808_v55 = vsel %vm1487_vm5, %v2748_v31, 0.0  ;;  %v2954_v43 = vrot.slane %v2953_v50, 2  ;;  %vm2961_vm5 = vcmask 18432  }
 0x50f   : > { %v2880_v42 = vadd.f32 %v2879_v26, %v2878_v8  ;;  %v2809_v32 = vadd.f32 %v2808_v55, %v2807_v34 }
 0x510   : > { %v2955_v11 = vadd.f32 %v2954_v43, %v2953_v50 }
 0x511   : > { %v2882_v54 = vadd.f32 %v2881_v38, %v2880_v42  ;;  %v2811_v52 = vadd.f32 %v2810_v28, %v2809_v32 }
 0x512   : > { %v2956_v18 = vrot.slane %v2955_v11, 1 }
 0x513   : > { %v2883_v57 = vrot.slane %v2882_v54, 4  ;;  %v2813_v13 = vadd.f32 %v2812_v2, %v2811_v52 }
 0x514   : > { %v2957_v40 = vadd.f32 %v2956_v18, %v2955_v11 }
 0x515   : > { %v2884_v62 = vadd.f32 %v2883_v57, %v2882_v54  ;;  %v2814_v33 = vrot.slane %v2813_v13, 4 }
 0x517   : > { %v2885_v16 = vrot.slane %v2884_v62, 2  ;;  %v2815_v49 = vadd.f32 %v2814_v33, %v2813_v13 }
 0x519   : > { %v2886_v20 = vadd.f32 %v2885_v16, %v2884_v62  ;;  %v2816_v56 = vrot.slane %v2815_v49, 2 }
 0x51b   : > { %v2887_v41 = vrot.slane %v2886_v20, 1  ;;  %v2817_v60 = vadd.f32 %v2816_v56, %v2815_v49 }
 0x51d   : > { %v2818_v21 = vrot.slane %v2817_v60, 1  ;;  %v2888_v39 = vadd.f32 %v2887_v41, %v2886_v20 }
 0x51f   : > { %v2819_v24 = vadd.f32 %v2818_v21, %v2817_v60 }
 0x521   : > { %v2959_v53 = vsel %vm2958_vm10, %v2819_v24, %v2888_v39 }
 0x522   : > { %v2960_v3 = vsel %vm699_vm0, %v2959_v53, %v2957_v40 }
 0x523   : > { %2962 = vst.msk [vmem:[%s535_s29] sm:$0x7] %vm2961_vm5, %v2960_v3 }
 0x524 PF: > { %s23_s23 = sadd.s32 1, %s3754_s23   ;;  %s5157_s21 = smov %s3750_s22 }
 0x525   : > { %p20_p5 = scmp.ge.s32.totalorder %s23_s23, 4   ;;  %s5158_s22 = smov %s5160_s24 }
 0x527   :  { %22 = sbr.rel (!%p20_p5) target bundleno = 2 (0x2), region = 115 }

// kernel: probabilistic_unet_forward.14
= control target key start
LH: loop header
LB: loop body
LE: loop exit
PB: predicated region body
PF: predicated region fallthrough
CT: control target
= control target key end

     0   :  { %10 = vsyncpa [#allocation3], 0  ;;  %s7830_s0 = inlined_call_operand.vmem [shape: bf16[2,18,18,8], index: 0, kind: input, shape index: {}]   ;;  %s7831_s1 = inlined_call_operand.vmem [shape: bf16[9,8,4], index: 1, kind: input, shape index: {}]   ;;  %s7832_s2 = inlined_call_operand.vmem [shape: f32[1,4], index: 2, kind: input, shape index: {}]   ;;  %s7833_s3 = inlined_call_operand.vmem [shape: bf16[2,256,4], index: 3, kind: output, shape index: {0}]   ;;  %s7834_s4 = inlined_call_operand.hbm [shape: f32[2,2,4], index: 4, kind: output, shape index: {1}]  }
   0x1   :  { %12 = vsyncpa [#allocation3 + $0x1], 0  ;;  %s5579_s15 = smov 0   ;;  %s5581_s16 = smov 0  }
   0x2   :  { %s5583_s17 = smov 0   ;;  %s5585_s18 = smov 0  }
   0x3 LB: > { %s5600_s19 = sadd.s32 4294967295, %s5551_s18   ;;  %s4366_s20 = sadd.s32 4294967294, %s5551_s18   ;;  %s5551_s18 = sphi %s5585_s18, %s8037_s18   ;;  %s5547_s17 = sphi %s5583_s17, %s8036_s17   ;;  %s5543_s16 = sphi %s5581_s16, %s8035_s16   ;;  %s5539_s15 = sphi %s5579_s15, %s8034_s15  }
   0x4   : > { %s5604_s21 = sadd.s32 1, %s5551_s18   ;;  %s119_s22 = sadd.s32 1, %s5547_s17 }
   0x5   : > { %s116_s23 = ssub.s32 %s5551_s18, %s5604_s21  ;;  %p129_p0 = scmp.ne.s32.totalorder %s5547_s17, %s5543_s16 }
   0x6   : > { %p117_p1 = scmp.eq.s32.totalorder %s116_s23, 0  ;;  %p130_p2 = scmp.eq.s32.totalorder %s5600_s19, 1 }
   0x7   : > { %p135_p3 = scmp.ne.s32.totalorder %s5543_s16, %s5539_s15  ;;  %p136_p4 = scmp.eq.s32.totalorder %s4366_s20, 1 }
   0x8   : > { %s5615_s24 = scalar_select %p117_p1, %s5547_s17, %s119_s22  }
   0x9   : > { %p5617_p5 = por %p130_p2, %p129_p0  ;;  %p5621_p6 = por %p136_p4, %p135_p3 }
   0xa   : > { %p4369_p7 = scmp.ge.s32.totalorder %s5551_s18, 1  ;;  %p168_p8 = scmp.lt.s32.totalorder %s5551_s18, 3 }
   0xc   : > { %p169_p9 = pnand %p4369_p7, %p168_p8 }
   0xe   : > { %172 = sbr.rel (%p169_p9) target bundleno = 574 (0x23e), region = 32 }
  0x13   : > { %v4390_v0 = vld [vmem:[%s7831_s1 + $0x4] sm:$0xf]  ;;  %vm551_vm0 = vcmask 1043456   ;;  %p199_p10 = scmp.lt.s32.totalorder %s5600_s19, 1  ;;  %v290_v2 = vld [vmem:[%s7831_s1] sm:$0xf] }
  0x14   : > { %5378 = vmatprep.subr.msk.bf16.mxu1 %vm551_vm0, %v4390_v0  ;;  %5377 = vmatprep.subr.msk.bf16.mxu0 %vm551_vm0, %v4390_v0  ;;  %v553_v1 = vsel %vm551_vm0, %v4390_v0, 0  ;;  %v4423_v3 = vld [vmem:[%s7831_s1 + $0x8] sm:$0xf]  ;;  %vm371_vm1 = vcmask 1046528   ;;  %vm502_vm2 = vcmask 64512   ;;  %v765_v24 = vsel %vm551_vm0, %v290_v2, 0 }
  0x15   : > { %5376 = vmatpush3.bf16.msra.mxu1 %v553_v1  ;;  %5070 = vmatpush3.bf16.msra.mxu0 %v553_v1  ;;  %s5641_s7 = scalar_select %p199_p10, %s5600_s19, 1  ;;  %v1156_v30 = vsel %vm551_vm0, %v4423_v3, 0  ;;  %vm976_vm3 = vcmask 1045504   ;;  %vm4052_vm4 = vcmask 27648   ;;  %vm4085_vm5 = vcmask 31744  }
  0x16   : > { %5379 = vmatprep.subr.msk.bf16.mxu1 %vm551_vm0, %v290_v2  ;;  %5380 = vmatprep.subr.msk.bf16.mxu0 %vm551_vm0, %v4423_v3  ;;  %s196_s13 = sand.u32 1, %s5543_s16   ;;  %s4800_s20 = sshll.u32 %s5600_s19, 5  ;;  %vm4256_vm6 = vcmask 1040384   ;;  %vm4258_vm7 = vcmask 25600  }
  0x17   : > { %s5387_s8 = smul.u32 216, %s5641_s7  ;;  %s4803_s10 = sshll.u32 %s5641_s7, 7 }
  0x18   : > { %s7589_s12 = scalar_lea.vmem %s7833_s3, %s4803_s10  ;;  %s4370_s14 = sshll.u32 %s196_s13, 1 }
  0x19   : > { %s5649_s11 = scalar_lea.vmem %s7830_s0, %s5387_s8  ;;  %s198_s22 = scalar_lea.vmem [#allocation2], %s4370_s14 }
  0x1a   : > { %v5652_v4 = vld [vmem:[%s5649_s11] sm:$0xff]   ;;  %v291_v5 = vld [vmem:[%s5649_s11 + $0x8] sm:$0x1]  ;;  %v5665_v12 = vld [vmem:[%s5649_s11 + $0xc] sm:$0xff]   ;;  %s4282_s23 = sshll.u32 %s198_s22, 4  ;;  %s7795_s29 = scalar_lea.hbm %s7834_s4, %s4800_s20  ;;  %s4283_s23 = int_to_ptr.vmem [resolvable:$true] %s4282_s23 }
  0x1b   : > { %v5656_v6 = vld [vmem:[%s5649_s11 + $0x60] sm:$0xff]   ;;  %v242_v7 = vunpack.c.l.bf16 %v5652_v4  ;;  %v243_v8 = vunpack.c.h.bf16 %v5652_v4  ;;  %v307_v9 = vunpack.c.l.bf16 %v291_v5  ;;  %v5662_v11 = vld [vmem:[%s5649_s11 + $0x68] sm:$0x1]  ;;  %v244_v15 = vunpack.c.l.bf16 %v5665_v12  ;;  %v292_v23 = vld [vmem:[%s5649_s11 + $0x14] sm:$0x1]  ;;  %s4266_s30 = scalar_lea.sflag [#allocation3], %s196_s13 }
  0x1c   : > { %v258_v10 = vunpack.c.l.bf16 %v5656_v6  ;;  %v259_v13 = vunpack.c.h.bf16 %v5656_v6  ;;  %v315_v14 = vunpack.c.l.bf16 %v5662_v11  ;;  %v245_v19 = vunpack.c.h.bf16 %v5665_v12  ;;  %v5682_v28 = vld [vmem:[%s5649_s11 + $0x6c] sm:$0xff]   ;;  %v5685_v29 = vld [vmem:[%s5649_s11 + $0x74] sm:$0x1]  ;;  %v5693_v35 = vld [vmem:[%s5649_s11 + $0x18] sm:$0xff]   ;;  %s5491_s5 = scalar_lea.vmem %s4283_s23, 32  ;;  %s5553_s19 = smov [#allocation2]  }
  0x1d   : > { %v372_v16 = vrot.slane %v242_v7, 1  ;;  %v373_v17 = vrot.slane %v243_v8, 1  ;;  %v375_v18 = vrot.slane %v307_v9, 1  ;;  %v5679_v27 = vrot.slane %v243_v8, 2  ;;  %v5702_v44 = vld [vmem:[%s5649_s11 + $0x20] sm:$0x1]  ;;  %p5492_p11 = scmp.ne.s32.totalorder %s4283_s23, %s5491_s5 }
  0x1e   : > { %v412_v20 = vrot.slane %v258_v10, 1  ;;  %v413_v21 = vrot.slane %v259_v13, 1  ;;  %v415_v22 = vrot.slane %v315_v14, 1  ;;  %v5688_v32 = vrot.slane %v307_v9, 2  ;;  %v5705_v45 = vld [vmem:[%s5649_s11 + $0x78] sm:$0xff]   ;;  %v5724_v59 = vld [vmem:[%s5649_s11 + $0x24] sm:$0xff]  }
  0x1f   : > { %v374_v25 = vsel %vm371_vm1, %v372_v16, %v373_v17  ;;  %v376_v26 = vsel %vm371_vm1, %v373_v17, %v375_v18  ;;  %v308_v37 = vunpack.c.l.bf16 %v292_v23  ;;  %v377_v38 = vrot.slane %v244_v15, 1  ;;  %v5718_v54 = vld [vmem:[%s5649_s11 + $0x80] sm:$0x1]  ;;  %v5731_v0 = vld [vmem:[%s5649_s11 + $0x2c] sm:$0x1]  ;;  %v5738_v7 = vld [vmem:[%s5649_s11 + $0x84] sm:$0xff]   ;;  %p5493_p12 = pnand %p5492_p11, %p5617_p5 }
  0x20   : > { %v484_v31 = vpack.c.bf16 %v376_v26, %v374_v25  ;;  %v414_v33 = vsel %vm371_vm1, %v412_v20, %v413_v21  ;;  %v416_v34 = vsel %vm371_vm1, %v413_v21, %v415_v22  ;;  %v378_v39 = vrot.slane %v245_v19, 1  ;;  %v5743_v8 = vld [vmem:[%s7831_s1 + $0x10] sm:$0xf]  ;;  %v5752_v17 = vld [vmem:[%s7831_s1 + $0xc] sm:$0xf]  ;;  %s5495_s6 = sshll.u32 %s5553_s19, 4  ;;  %s5496_s6 = int_to_ptr.vmem [resolvable:$false] %s5495_s6 }
  0x21   : > { %v492_v36 = vpack.c.bf16 %v416_v34, %v414_v33  ;;  %v5696_v40 = vrot.slane %v245_v19, 2  ;;  %v260_v41 = vunpack.c.l.bf16 %v5682_v28  ;;  %v7844_v42 = vunpack.c.h.bf16 %v5682_v28  ;;  %v5762_v22 = vld [vmem:[%s5649_s11 + $0x8c] sm:$0x1]  ;;  %p5494_p13 = pneg %p5493_p12  ;;  %s5497_s8 = scalar_lea.vmem %s5496_s6, 64 }
  0x22   : > { %5071 = vmatprep.mubr.msk.bf16.mxu0 %vm502_vm2, %v484_v31  ;;  %v7843_v43 = vunpack.c.l.bf16 %v5685_v29  ;;  %v379_v46 = vsel %vm371_vm1, %v377_v38, %v378_v39  ;;  %v380_v47 = vrot.slane %v308_v37, 1  ;;  %v5709_v48 = vrot.slane %v308_v37, 2  ;;  %v5768_v31 = vld [vmem:[%s5649_s11 + $0x30] sm:$0xff]   ;;  %v5778_v37 = vld [vmem:[%s5649_s11 + $0x38] sm:$0x1]  ;;  %p5498_p0 = scmp.lt.s32.totalorder %s4283_s23, %s5496_s6  ;;  %p5499_p1 = scmp.lt.s32.totalorder %s5497_s8, %s5491_s5 }
  0x23   : > { %5087 = vmatprep.mubr.msk.bf16.mxu1 %vm502_vm2, %v492_v36  ;;  %v246_v49 = vunpack.c.l.bf16 %v5693_v35  ;;  %v417_v50 = vrot.slane %v260_v41, 1  ;;  %v418_v51 = vrot.slane %v7844_v42, 1  ;;  %v247_v53 = vunpack.c.h.bf16 %v5693_v35  ;;  %v5781_v38 = vld [vmem:[%s5649_s11 + $0x90] sm:$0xff]  }
  0x24   : > { %v420_v52 = vrot.slane %v7843_v43, 1  ;;  %v381_v55 = vsel %vm371_vm1, %v378_v39, %v380_v47  ;;  %v309_v56 = vunpack.c.l.bf16 %v5702_v44  ;;  %v262_v58 = vunpack.c.l.bf16 %v5705_v45  ;;  %p5500_p2 = por %p5499_p1, %p5498_p0 }
  0x25   : > { %v382_v57 = vrot.slane %v246_v49, 1  ;;  %v485_v60 = vpack.c.bf16 %v381_v55, %v379_v46  ;;  %v419_v61 = vsel %vm371_vm1, %v417_v50, %v418_v51  ;;  %v383_v63 = vrot.slane %v247_v53, 1  ;;  %v5794_v55 = vld [vmem:[%s5649_s11 + $0x98] sm:$0x1] }
  0x26   : > { %v421_v62 = vsel %vm371_vm1, %v418_v51, %v420_v52  ;;  %v385_v2 = vrot.slane %v309_v56, 1  ;;  %v7839_v3 = vunpack.c.h.bf16 %v5705_v45  ;;  %v7837_v5 = vunpack.c.l.bf16 %v5718_v54  ;;  %p5501_p3 = pnand %p5500_p2, %p5494_p13 }
  0x27   : > { %v493_v1 = vpack.c.bf16 %v421_v62, %v419_v61  ;;  %5072 = vmatmul.mubr.msk.bf16.vlgmr.msra.gmra.mxu0 %vm502_vm2, %v485_v60  ;;  %v384_v9 = vsel %vm371_vm1, %v382_v57, %v383_v63  ;;  %v422_v10 = vrot.slane %v262_v58, 1  ;;  %v248_v15 = vunpack.c.l.bf16 %v5724_v59  ;;  %v5802_v62 = vld [vmem:[%s5649_s11 + $0x3c] sm:$0xff]  }
  0x28   : > { %v249_v16 = vunpack.c.h.bf16 %v5724_v59  ;;  %5138 = vmatpush3.bf16.msra.mxu0 %v1156_v30  ;;  %v386_v18 = vsel %vm371_vm1, %v383_v63, %v385_v2  ;;  %v423_v19 = vrot.slane %v7839_v3, 1  ;;  %v425_v20 = vrot.slane %v7837_v5, 1  ;;  %v5805_v63 = vld [vmem:[%s5649_s11 + $0x44] sm:$0x1]  ;;  %v5873_v3 = vld [vmem:[%s5649_s11 + $0x5c] sm:$0x1] }
  0x29   : > { %5088 = vmatmul.mubr.msk.bf16.vlgmr.msra.gmra.mxu1 %vm502_vm2, %v493_v1  ;;  %v310_v21 = vunpack.c.l.bf16 %v5731_v0  ;;  %v486_v23 = vpack.c.bf16 %v386_v18, %v384_v9  ;;  %v387_v25 = vrot.slane %v248_v15, 1  ;;  %v264_v30 = vunpack.c.l.bf16 %v5738_v7  ;;  %5382 = vmatprep.subr.msk.bf16.mxu0 %vm551_vm0, %v5743_v8  ;;  %v5812_v15 = vld [vmem:[%s5649_s11 + $0x9c] sm:$0xff]   ;;  %v5956_v0 = vld [vmem:[%s7831_s1 + $0x18] sm:$0xf] }
  0x2a   : > { %5104 = vmatpush3.bf16.msra.mxu1 %v765_v24  ;;  %v388_v26 = vrot.slane %v249_v16, 1  ;;  %v424_v33 = vsel %vm371_vm1, %v422_v10, %v423_v19  ;;  %v426_v34 = vsel %vm371_vm1, %v423_v19, %v425_v20  ;;  %v7842_v36 = vunpack.c.h.bf16 %v5738_v7 }
  0x2b   : > { %v390_v24 = vrot.slane %v310_v21, 1  ;;  %5381 = vmatprep.subr.msk.bf16.mxu1 %vm551_vm0, %v5752_v17  ;;  %5075 = vmatprep.mubr.msk.bf16.mxu0 %vm502_vm2, %v486_v23  ;;  %v494_v39 = vpack.c.bf16 %v426_v34, %v424_v33  ;;  %v7841_v46 = vunpack.c.l.bf16 %v5762_v22  ;;  %v427_v47 = vrot.slane %v264_v30, 1 }
  0x2c   : > { %v389_v41 = vsel %vm371_vm1, %v387_v25, %v388_v26  ;;  %v428_v50 = vrot.slane %v7842_v36, 1  ;;  %v250_v51 = vunpack.c.l.bf16 %v5768_v31  ;;  %v251_v52 = vunpack.c.h.bf16 %v5768_v31 }
  0x2d   : > { %v391_v49 = vsel %vm371_vm1, %v388_v26, %v390_v24  ;;  %5091 = vmatprep.mubr.msk.bf16.mxu1 %vm502_vm2, %v494_v39  ;;  %v430_v58 = vrot.slane %v7841_v46, 1  ;;  %v311_v60 = vunpack.c.l.bf16 %v5778_v37  ;;  %v266_v61 = vunpack.c.l.bf16 %v5781_v38 }
  0x2e   : > { %v487_v57 = vpack.c.bf16 %v391_v49, %v389_v41  ;;  %v429_v1 = vsel %vm371_vm1, %v427_v47, %v428_v50  ;;  %v392_v2 = vrot.slane %v250_v51, 1  ;;  %v393_v9 = vrot.slane %v251_v52, 1  ;;  %v5829_v47 = vld [vmem:[%s5649_s11 + $0xa4] sm:$0x1]  ;;  %v5832_v49 = vld [vmem:[%s5649_s11 + $0x48] sm:$0xff]  }
  0x2f   : > { %v7836_v10 = vunpack.c.h.bf16 %v5781_v38  ;;  %v431_v18 = vsel %vm371_vm1, %v428_v50, %v430_v58  ;;  %v395_v19 = vrot.slane %v311_v60, 1  ;;  %v7835_v20 = vunpack.c.l.bf16 %v5794_v55 }
  0x30   : > { %5076 = vmatmul.mubr.msk.bf16.gmra.mxu0 %vm502_vm2, %v487_v57  ;;  %v432_v23 = vrot.slane %v266_v61, 1  ;;  %v495_v25 = vpack.c.bf16 %v431_v18, %v429_v1  ;;  %v394_v26 = vsel %vm371_vm1, %v392_v2, %v393_v9  ;;  %v252_v33 = vunpack.c.l.bf16 %v5802_v62  ;;  %v5844_v18 = vld [vmem:[%s5649_s11 + $0x50] sm:$0x1] }
  0x31   : > { %v433_v30 = vrot.slane %v7836_v10, 1  ;;  %v396_v34 = vsel %vm371_vm1, %v393_v9, %v395_v19  ;;  %v435_v24 = vrot.slane %v7835_v20, 1  ;;  %v253_v39 = vunpack.c.h.bf16 %v5802_v62 }
  0x32   : > { %v7849_v41 = vunpack.c.l.bf16 %v5805_v63  ;;  %5092 = vmatmul.mubr.msk.bf16.gmra.mxu1 %vm502_vm2, %v495_v25  ;;  %v488_v50 = vpack.c.bf16 %v396_v34, %v394_v26  ;;  %v397_v57 = vrot.slane %v252_v33, 1  ;;  %v268_v58 = vunpack.c.l.bf16 %v5812_v15  ;;  %v5853_v33 = vld [vmem:[%s5649_s11 + $0xb0] sm:$0x1] }
  0x33   : > { %v434_v51 = vsel %vm371_vm1, %v432_v23, %v433_v30  ;;  %v436_v61 = vsel %vm371_vm1, %v433_v30, %v435_v24  ;;  %v398_v1 = vrot.slane %v253_v39, 1  ;;  %v7838_v9 = vunpack.c.h.bf16 %v5812_v15  ;;  %v5850_v30 = vld [vmem:[%s5649_s11 + $0xa8] sm:$0xff]  }
  0x34   : > { %v400_v2 = vrot.slane %v7849_v41, 1  ;;  %5079 = vmatprep.mubr.msk.bf16.mxu0 %vm502_vm2, %v488_v50  ;;  %v496_v19 = vpack.c.bf16 %v436_v61, %v434_v51  ;;  %v7840_v23 = vunpack.c.l.bf16 %v5829_v47  ;;  %v437_v25 = vrot.slane %v268_v58, 1  ;;  %v5861_v51 = vld [vmem:[%s5649_s11 + $0x54] sm:$0xff]  }
  0x35   : > { %v254_v26 = vunpack.c.l.bf16 %v5832_v49  ;;  %v399_v34 = vsel %vm371_vm1, %v397_v57, %v398_v1  ;;  %v438_v20 = vrot.slane %v7838_v9, 1  ;;  %v7846_v50 = vunpack.c.h.bf16 %v5832_v49 }
  0x36   : > { %v401_v24 = vsel %vm371_vm1, %v398_v1, %v400_v2  ;;  %5095 = vmatprep.mubr.msk.bf16.mxu1 %vm502_vm2, %v496_v19  ;;  %v440_v61 = vrot.slane %v7840_v23, 1  ;;  %v7845_v10 = vunpack.c.l.bf16 %v5844_v18  ;;  %v270_v2 = vunpack.c.l.bf16 %v5850_v30 }
  0x37   : > { %v489_v58 = vpack.c.bf16 %v401_v24, %v399_v34  ;;  %v402_v5 = vrot.slane %v254_v26, 1  ;;  %v439_v57 = vsel %vm371_vm1, %v437_v25, %v438_v20  ;;  %v403_v1 = vrot.slane %v7846_v50, 1  ;;  %v5882_v24 = vld [vmem:[%s5649_s11 + $0xb4] sm:$0xff]   ;;  %v928_v50 = vld [vmem:[%s5649_s11] sm:$0xe] }
  0x38   : > { %v7847_v9 = vunpack.c.h.bf16 %v5850_v30  ;;  %v441_v19 = vsel %vm371_vm1, %v438_v20, %v440_v61  ;;  %v405_v26 = vrot.slane %v7845_v10, 1  ;;  %v7848_v34 = vunpack.c.l.bf16 %v5853_v33 }
  0x39   : > { %5080 = vmatmul.mubr.msk.bf16.gmra.mxu0 %vm502_vm2, %v489_v58  ;;  %v256_v25 = vunpack.c.l.bf16 %v5861_v51  ;;  %v497_v23 = vpack.c.bf16 %v441_v19, %v439_v57  ;;  %v404_v46 = vsel %vm371_vm1, %v402_v5, %v403_v1  ;;  %v442_v36 = vrot.slane %v270_v2, 1  ;;  %v5888_v58 = vld [vmem:[%s5649_s11 + $0xbc] sm:$0x1] }
  0x3a   : > { %v443_v43 = vrot.slane %v7847_v9, 1  ;;  %v406_v20 = vsel %vm371_vm1, %v403_v1, %v405_v26  ;;  %v445_v61 = vrot.slane %v7848_v34, 1  ;;  %v7850_v42 = vunpack.c.h.bf16 %v5861_v51  ;;  %v929_v9 = vld [vmem:[%s5649_s11 + $0xc] sm:$0xe] }
  0x3b   : > { %v7851_v10 = vunpack.c.l.bf16 %v5873_v3  ;;  %5096 = vmatmul.mubr.msk.bf16.gmra.mxu1 %vm502_vm2, %v497_v23  ;;  %v490_v57 = vpack.c.bf16 %v406_v20, %v404_v46  ;;  %v407_v2 = vrot.slane %v256_v25, 1  ;;  %v272_v19 = vunpack.c.l.bf16 %v5882_v24 }
  0x3c   : > { %v444_v5 = vsel %vm371_vm1, %v442_v36, %v443_v43  ;;  %v446_v1 = vsel %vm371_vm1, %v443_v43, %v445_v61  ;;  %v408_v26 = vrot.slane %v7850_v42, 1  ;;  %v273_v41 = vunpack.c.h.bf16 %v5882_v24  ;;  %v930_v42 = vld [vmem:[%s5649_s11 + $0x18] sm:$0xe] }
  0x3d   : > { %v410_v34 = vrot.slane %v7851_v10, 1  ;;  %5083 = vmatprep.mubr.msk.bf16.mxu0 %vm502_vm2, %v490_v57  ;;  %v498_v46 = vpack.c.bf16 %v446_v1, %v444_v5  ;;  %v322_v36 = vunpack.c.l.bf16 %v5888_v58  ;;  %v447_v23 = vrot.slane %v272_v19, 1 }
  0x3e   : > { %v409_v25 = vsel %vm371_vm1, %v407_v2, %v408_v26  ;;  %v448_v20 = vrot.slane %v273_v41, 1  ;;  %v944_v61 = vunpack.c.l.bf16 %v928_v50  ;;  %v945_v5 = vunpack.c.l.bf16 %v929_v9  ;;  %v931_v2 = vld [vmem:[%s5649_s11 + $0x24] sm:$0xe] }
  0x3f   : > { %v411_v43 = vsel %vm371_vm1, %v408_v26, %v410_v34  ;;  %5099 = vmatprep.mubr.msk.bf16.mxu1 %vm502_vm2, %v498_v46  ;;  %v450_v57 = vrot.slane %v322_v36, 1  ;;  %v981_v34 = vsel %vm976_vm3, %v5679_v27, %v5688_v32  ;;  %v986_v50 = vsel %vm976_vm3, %v5696_v40, %v5709_v48 }
  0x40   : > { %v491_v10 = vpack.c.bf16 %v411_v43, %v409_v25  ;;  %v449_v19 = vsel %vm371_vm1, %v447_v23, %v448_v20  ;;  %v977_v1 = vrot.slane %v944_v61, 2  ;;  %v982_v46 = vrot.slane %v945_v5, 2  ;;  %v932_v61 = vld [vmem:[%s5649_s11 + $0x30] sm:$0xe] }
  0x41   : > { %v451_v26 = vsel %vm371_vm1, %v448_v20, %v450_v57  ;;  %v946_v25 = vunpack.c.l.bf16 %v930_v42  ;;  %v988_v9 = vrot.slane %v247_v53, 2  ;;  %v990_v32 = vrot.slane %v309_v56, 2 }
  0x42   : > { %5084 = vmatmul.mubr.msk.bf16.gmra.mxu0 %vm502_vm2, %v491_v10  ;;  %v499_v23 = vpack.c.bf16 %v451_v26, %v449_v19  ;;  %v979_v43 = vsel %vm976_vm3, %v977_v1, %v5679_v27  ;;  %v984_v10 = vsel %vm976_vm3, %v982_v46, %v5696_v40  ;;  %v947_v57 = vunpack.c.l.bf16 %v931_v2  ;;  %v933_v1 = vld [vmem:[%s5649_s11 + $0x3c] sm:$0xe] }
  0x43   : > { %v1089_v48 = vpack.c.bf16 %v981_v34, %v979_v43  ;;  %v987_v20 = vrot.slane %v946_v25, 2  ;;  %v1090_v42 = vpack.c.bf16 %v986_v50, %v984_v10  ;;  %v991_v53 = vsel %vm976_vm3, %v988_v9, %v990_v32  ;;  %v934_v34 = vld [vmem:[%s5649_s11 + $0x48] sm:$0xe]  ;;  %v936_v25 = vld [vmem:[%s5649_s11 + $0x60] sm:$0xe] }
  0x44   : > { %5100 = vmatmul.mubr.msk.bf16.gmra.mxu1 %vm502_vm2, %v499_v23  ;;  %v993_v27 = vrot.slane %v249_v16, 2  ;;  %v992_v56 = vrot.slane %v947_v57, 2  ;;  %v995_v40 = vrot.slane %v310_v21, 2  ;;  %v948_v5 = vunpack.c.l.bf16 %v932_v61 }
  0x45   : > { %5105 = vmatprep.mubr.msk.bf16.mxu1 %vm502_vm2, %v5652_v4  ;;  %5139 = vmatprep.mubr.msk.bf16.mxu0 %vm502_vm2, %v1089_v48  ;;  %v989_v44 = vsel %vm976_vm3, %v987_v20, %v988_v9  ;;  %v2001_v50 = vsel %vm551_vm0, %v5743_v8, 0  ;;  %v998_v4 = vrot.slane %v251_v52, 2  ;;  %v1000_v2 = vrot.slane %v311_v60, 2  ;;  %v935_v20 = vld [vmem:[%s5649_s11 + $0x54] sm:$0xe] }
  0x46   : > { %v1091_v19 = vpack.c.bf16 %v991_v53, %v989_v44  ;;  %v997_v16 = vrot.slane %v948_v5, 2  ;;  %v994_v21 = vsel %vm976_vm3, %v992_v56, %v993_v27  ;;  %v996_v26 = vsel %vm976_vm3, %v993_v27, %v995_v40  ;;  %v939_v44 = vld [vmem:[%s5649_s11 + $0x84] sm:$0xe] }
  0x47   : > { %v949_v8 = vunpack.c.l.bf16 %v933_v1  ;;  %v1018_v46 = vrot.slane %v259_v13, 2  ;;  %v1020_v37 = vrot.slane %v315_v14, 2  ;;  %v1483_v52 = vsel %vm551_vm0, %v5752_v17, 0  ;;  %v5974_v13 = vld [vmem:[%s7831_s1 + $0x14] sm:$0xf] }
  0x48   : > { %v950_v60 = vunpack.c.l.bf16 %v934_v34  ;;  %v999_v9 = vsel %vm976_vm3, %v997_v16, %v998_v4  ;;  %v1001_v23 = vsel %vm976_vm3, %v998_v4, %v1000_v2  ;;  %v1092_v11 = vpack.c.bf16 %v996_v26, %v994_v21  ;;  %v937_v17 = vld [vmem:[%s5649_s11 + $0x6c] sm:$0xe] }
  0x49   : > { %v1003_v14 = vrot.slane %v253_v39, 2  ;;  %v1002_v43 = vrot.slane %v949_v8, 2  ;;  %v7884_v32 = vunpack.c.l.bf16 %v5805_v63  ;;  %v7885_v48 = vunpack.c.h.bf16 %v5832_v49 }
  0x4a   : > { %5140 = vmatmul.mubr.msk.bf16.vlgmr.msra.gmra.mxu0 %vm502_vm2, %v1090_v42  ;;  %v952_v57 = vunpack.c.l.bf16 %v936_v25  ;;  %v1093_v42 = vpack.c.bf16 %v1001_v23, %v999_v9  ;;  %v7886_v53 = vunpack.c.l.bf16 %v5844_v18  ;;  %v1021_v39 = vsel %vm976_vm3, %v1018_v46, %v1020_v37 }
  0x4b   : > { %5206 = vmatpush3.bf16.msra.mxu0 %v2001_v50  ;;  %5143 = vmatprep.mubr.msk.bf16.mxu0 %vm502_vm2, %v1091_v19  ;;  %v1005_v61 = vrot.slane %v7884_v32, 2  ;;  %v1008_v10 = vrot.slane %v7885_v48, 2  ;;  %v953_v56 = vunpack.c.l.bf16 %v937_v17  ;;  %v7887_v63 = vunpack.c.h.bf16 %v5682_v28 }
  0x4c   : > { %5384 = vmatprep.subr.msk.bf16.mxu0 %vm551_vm0, %v5956_v0  ;;  %5106 = vmatmul.mubr.msk.bf16.vlgmr.msra.gmra.mxu1 %vm502_vm2, %v5665_v12  ;;  %v1007_v12 = vrot.slane %v950_v60, 2  ;;  %v1010_v27 = vrot.slane %v7886_v53, 2  ;;  %v7888_v5 = vunpack.c.l.bf16 %v5685_v29  ;;  %v1004_v1 = vsel %vm976_vm3, %v1002_v43, %v1003_v14 }
  0x4d   : > { %5172 = vmatpush3.bf16.msra.mxu1 %v1483_v52  ;;  %5109 = vmatprep.mubr.msk.bf16.mxu1 %vm502_vm2, %v5693_v35  ;;  %v1017_v35 = vrot.slane %v952_v57, 2  ;;  %v1023_v40 = vrot.slane %v7887_v63, 2  ;;  %v1006_v18 = vsel %vm976_vm3, %v1003_v14, %v1005_v61  ;;  %v1022_v50 = vrot.slane %v953_v56, 2  ;;  %v938_v14 = vld [vmem:[%s5649_s11 + $0x78] sm:$0xe] }
  0x4e   : > { %5383 = vmatprep.subr.msk.bf16.mxu1 %vm551_vm0, %v5974_v13  ;;  %v1025_v19 = vrot.slane %v7888_v5, 2  ;;  %v1011_v16 = vsel %vm976_vm3, %v1008_v10, %v1010_v27  ;;  %v951_v4 = vunpack.c.l.bf16 %v935_v20  ;;  %v1009_v29 = vsel %vm976_vm3, %v1007_v12, %v1008_v10  ;;  %v940_v57 = vld [vmem:[%s5649_s11 + $0x90] sm:$0xe]  ;;  %v942_v63 = vld [vmem:[%s5649_s11 + $0xa8] sm:$0xe] }
  0x4f   : > { %v1019_v34 = vsel %vm976_vm3, %v1017_v35, %v1018_v46  ;;  %v6011_v26 = vsel %vm976_vm3, %v1022_v50, %v1023_v40  ;;  %v955_v8 = vunpack.c.l.bf16 %v939_v44  ;;  %v7889_v37 = vunpack.c.h.bf16 %v5738_v7  ;;  %v941_v35 = vld [vmem:[%s5649_s11 + $0x9c] sm:$0xe] }
  0x50   : > { %v1097_v2 = vpack.c.bf16 %v1021_v39, %v1019_v34  ;;  %v6007_v21 = vsel %vm976_vm3, %v1023_v40, %v1025_v19  ;;  %v7890_v60 = vunpack.c.l.bf16 %v5762_v22  ;;  %v1094_v9 = vpack.c.bf16 %v1006_v18, %v1004_v1  ;;  %v943_v40 = vld [vmem:[%s5649_s11 + $0xb4] sm:$0xe]  ;;  %v6065_v34 = vld [vmem:[%s5649_s11 + $0xc] sm:$0xff]  }
  0x51   : > { %v1033_v46 = vrot.slane %v7889_v37, 2  ;;  %v1098_v52 = vpack.c.bf16 %v6007_v21, %v6011_v26  ;;  %v7891_v23 = vunpack.c.h.bf16 %v5861_v51  ;;  %v1032_v17 = vrot.slane %v955_v8, 2 }
  0x52   : > { %5144 = vmatmul.mubr.msk.bf16.gmra.mxu0 %vm502_vm2, %v1092_v11  ;;  %v1035_v25 = vrot.slane %v7890_v60, 2  ;;  %v1095_v43 = vpack.c.bf16 %v1011_v16, %v1009_v29  ;;  %v1012_v32 = vrot.slane %v951_v4, 2  ;;  %v7893_v12 = vunpack.c.h.bf16 %v5705_v45 }
  0x53   : > { %5147 = vmatprep.mubr.msk.bf16.mxu0 %vm502_vm2, %v1093_v42  ;;  %v1013_v11 = vrot.slane %v7891_v23, 2  ;;  %v6032_v22 = vsel %vm976_vm3, %v1032_v17, %v1033_v46  ;;  %v7894_v27 = vunpack.c.l.bf16 %v5718_v54  ;;  %v956_v56 = vunpack.c.l.bf16 %v940_v57 }
  0x54   : > { %5110 = vmatmul.mubr.msk.bf16.gmra.mxu1 %vm502_vm2, %v5724_v59  ;;  %v7892_v59 = vunpack.c.l.bf16 %v5873_v3  ;;  %v6029_v48 = vsel %vm976_vm3, %v1033_v46, %v1035_v25  ;;  %v1028_v53 = vrot.slane %v7893_v12, 2  ;;  %v957_v19 = vunpack.c.l.bf16 %v941_v35  ;;  %v6075_v46 = vld [vmem:[%s5649_s11 + $0x18] sm:$0xff]  }
  0x55   : > { %5113 = vmatprep.mubr.msk.bf16.mxu1 %vm502_vm2, %v5768_v31  ;;  %v954_v31 = vunpack.c.l.bf16 %v938_v14  ;;  %v1100_v10 = vpack.c.bf16 %v6029_v48, %v6032_v22  ;;  %v1014_v3 = vsel %vm976_vm3, %v1012_v32, %v1013_v11  ;;  %v1030_v39 = vrot.slane %v7894_v27, 2  ;;  %v6086_v14 = vld [vmem:[%s5649_s11 + $0x20] sm:$0x1] }
  0x56   : > { %v1015_v61 = vrot.slane %v7892_v59, 2  ;;  %v958_v1 = vunpack.c.l.bf16 %v942_v63  ;;  %v959_v18 = vunpack.c.l.bf16 %v943_v40  ;;  %v1037_v16 = vrot.slane %v956_v56, 2  ;;  %v6142_v63 = vld [vmem:[%s5649_s11 + $0x2c] sm:$0x1] }
  0x57   : > { %v1027_v42 = vrot.slane %v954_v31, 2  ;;  %v1031_v54 = vsel %vm976_vm3, %v1028_v53, %v1030_v39  ;;  %v7895_v4 = vunpack.c.h.bf16 %v5781_v38  ;;  %v7896_v8 = vunpack.c.l.bf16 %v5794_v55 }
  0x58   : > { %v1016_v20 = vsel %vm976_vm3, %v1013_v11, %v1015_v61  ;;  %v7898_v25 = vunpack.c.l.bf16 %v5829_v47  ;;  %v7899_v23 = vunpack.c.h.bf16 %v5850_v30  ;;  %v7900_v55 = vunpack.c.l.bf16 %v5853_v33 }
  0x59   : > { %v1096_v44 = vpack.c.bf16 %v1016_v20, %v1014_v3  ;;  %v1029_v5 = vsel %vm976_vm3, %v1027_v42, %v1028_v53  ;;  %v1038_v29 = vrot.slane %v7895_v4, 2  ;;  %v1040_v37 = vrot.slane %v7896_v8, 2  ;;  %v6103_v20 = vld [vmem:[%s5649_s11 + $0x24] sm:$0xff]   ;;  %v6168_v4 = vld [vmem:[%s5649_s11 + $0x3c] sm:$0xff]  }
  0x5a   : > { %5148 = vmatmul.mubr.msk.bf16.gmra.mxu0 %vm502_vm2, %v1094_v9  ;;  %v1099_v50 = vpack.c.bf16 %v1031_v54, %v1029_v5  ;;  %v1045_v9 = vrot.slane %v7898_v25, 2  ;;  %v1048_v11 = vrot.slane %v7899_v23, 2  ;;  %v1050_v17 = vrot.slane %v7900_v55, 2  ;;  %v6146_v5 = vld [vmem:[%s5649_s11 + $0x30] sm:$0xff]   ;;  %v6174_v8 = vld [vmem:[%s5649_s11 + $0x48] sm:$0xff]  }
  0x5b   : > { %5151 = vmatprep.mubr.msk.bf16.mxu0 %vm502_vm2, %v1095_v43  ;;  %v7865_v43 = vunpack.c.h.bf16 %v6065_v34  ;;  %v1047_v47 = vrot.slane %v958_v1, 2  ;;  %v1052_v59 = vrot.slane %v959_v18, 2  ;;  %v1053_v61 = vrot.slane %v273_v41, 2  ;;  %v6153_v1 = vld [vmem:[%s5649_s11 + $0x38] sm:$0x1] }
  0x5c   : > { %5114 = vmatmul.mubr.msk.bf16.gmra.mxu1 %vm502_vm2, %v5802_v62  ;;  %v6054_v62 = vsel %vm551_vm0, %v5974_v13, 0  ;;  %v6068_v13 = vld [vmem:[%s5649_s11 + $0x14] sm:$0x1]  ;;  %v1055_v31 = vrot.slane %v322_v36, 2  ;;  %v4838_v3 = vunpack.c.l.bf16 %v6075_v46  ;;  %v7853_v33 = vunpack.c.l.bf16 %v6086_v14 }
  0x5d   : > { %5117 = vmatprep.mubr.msk.bf16.mxu1 %vm502_vm2, %v5832_v49  ;;  %v6061_v49 = vsel %vm551_vm0, %v5956_v0, 0  ;;  %v1042_v0 = vrot.slane %v957_v19, 2  ;;  %v7859_v32 = vunpack.c.l.bf16 %v6068_v13  ;;  %v1039_v57 = vsel %vm976_vm3, %v1037_v16, %v1038_v29  ;;  %v6183_v25 = vld [vmem:[%s5649_s11 + $0x54] sm:$0xff]  }
  0x5e   : > { %v1041_v42 = vsel %vm976_vm3, %v1038_v29, %v1040_v37  ;;  %v6118_v58 = vsel %vm976_vm3, %v1048_v11, %v1050_v17  ;;  %v1823_v53 = vrot.slane %v7865_v43, 1  ;;  %v6126_v39 = vsel %vm976_vm3, %v1047_v47, %v1048_v11  ;;  %v6171_v29 = vld [vmem:[%s5649_s11 + $0x44] sm:$0x1]  ;;  %v6197_v17 = vld [vmem:[%s5649_s11 + $0x5c] sm:$0x1] }
  0x5f   : > { %v1825_v27 = vrot.slane %v7859_v32, 1  ;;  %v6129_v21 = vsel %vm976_vm3, %v1052_v59, %v1053_v61  ;;  %v6132_v26 = vsel %vm976_vm3, %v1053_v61, %v1055_v31  ;;  %v1830_v56 = vrot.slane %v7853_v33, 1  ;;  %v6204_v31 = vld [vmem:[%s5649_s11 + $0x60] sm:$0xff]   ;;  %v6229_v33 = vld [vmem:[%s5649_s11 + $0x6c] sm:$0xff]  }
  0x60   : > { %v7852_v40 = vunpack.c.h.bf16 %v6103_v20  ;;  %v1101_v54 = vpack.c.bf16 %v1041_v42, %v1039_v57  ;;  %v1103_v18 = vpack.c.bf16 %v6118_v58, %v6126_v39  ;;  %v7855_v55 = vunpack.c.l.bf16 %v6153_v1 }
  0x61   : > { %v6165_v16 = vsel %vm371_vm1, %v1823_v53, %v1825_v27  ;;  %v7858_v47 = vunpack.c.h.bf16 %v6168_v4  ;;  %v7860_v59 = vunpack.c.l.bf16 %v6171_v29  ;;  %v4846_v61 = vunpack.c.l.bf16 %v6174_v8 }
  0x62   : > { %5152 = vmatmul.mubr.msk.bf16.gmra.mxu0 %vm502_vm2, %v1096_v44  ;;  %v1827_v44 = vrot.slane %v4838_v3, 1  ;;  %v1833_v11 = vrot.slane %v7852_v40, 1  ;;  %v6207_v3 = vld [vmem:[%s5649_s11 + $0x68] sm:$0x1]  ;;  %v7861_v57 = vunpack.c.h.bf16 %v6174_v8  ;;  %v7864_v22 = vunpack.c.l.bf16 %v6197_v17 }
  0x63   : > { %5155 = vmatprep.mubr.msk.bf16.mxu0 %vm502_vm2, %v1097_v2  ;;  %v7897_v2 = vunpack.c.h.bf16 %v5812_v15  ;;  %v7866_v40 = vunpack.c.l.bf16 %v6207_v3 }
  0x64   : > { %5118 = vmatmul.mubr.msk.bf16.gmra.mxu1 %vm502_vm2, %v5861_v51  ;;  %v1726_v51 = vunpack.c.l.bf16 %v6065_v34 }
  0x65   : > { %v1043_v60 = vrot.slane %v7897_v2, 2  ;;  %5121 = vmatprep.mubr.msk.bf16.mxu1 %vm502_vm2, %v5656_v6  ;;  %v7857_v6 = vunpack.c.h.bf16 %v6075_v46  ;;  %v7854_v2 = vunpack.c.h.bf16 %v6146_v5 }
  0x66   : > { %v1822_v36 = vrot.slane %v1726_v51, 1  ;;  %v1738_v51 = vunpack.c.l.bf16 %v6168_v4 }
  0x67   : > { %v6108_v12 = vsel %vm976_vm3, %v1042_v0, %v1043_v60  ;;  %v6111_v41 = vsel %vm976_vm3, %v1043_v60, %v1045_v9  ;;  %v6137_v35 = vrot.slane %v7857_v6, 1  ;;  %v4842_v0 = vunpack.c.l.bf16 %v6146_v5  ;;  %v6180_v60 = vld [vmem:[%s5649_s11 + $0x50] sm:$0x1] }
  0x68   : > { %v1102_v19 = vpack.c.bf16 %v6111_v41, %v6108_v12  ;;  %v7862_v42 = vunpack.c.l.bf16 %v6180_v60  ;;  %v1838_v48 = vrot.slane %v7854_v2, 1  ;;  %v1845_v2 = vrot.slane %v7860_v59, 1 }
  0x69   : > { %7901 = vst [vmem:[#allocation5_spill] sm:$0xff] %v6137_v35  ;;  %v6187_v9 = vsel %vm371_vm1, %v1827_v44, %v6137_v35  ;;  %v6191_v23 = vsel %vm371_vm1, %v6137_v35, %v1830_v56  ;;  %v4850_v44 = vunpack.c.l.bf16 %v6204_v31  ;;  %v7869_v56 = vunpack.c.h.bf16 %v6204_v31  ;;  %v4572_v35 = vld [vmem:[%s5649_s11 + $0x24] sm:$0xe] }
  0x6a   : > { %5156 = vmatmul.mubr.msk.bf16.gmra.mxu0 %vm502_vm2, %v1098_v52  ;;  %v1732_v52 = vunpack.c.l.bf16 %v6103_v20  ;;  %7902 = vst [vmem:[#allocation6_spill] sm:$0xff] %v6187_v9  ;;  %v1848_v6 = vrot.slane %v7861_v57, 1  ;;  %v1750_v59 = vunpack.c.l.bf16 %v6229_v33 }
  0x6b   : > { %5159 = vmatprep.mubr.msk.bf16.mxu0 %vm502_vm2, %v1099_v50  ;;  %v1857_v50 = vrot.slane %v4850_v44, 1  ;;  %v1858_v57 = vrot.slane %v7869_v56, 1  ;;  %v6390_v56 = vld [vmem:[%s5649_s11 + $0xbc] sm:$0x1] }
  0x6c   : > { %5122 = vmatmul.mubr.msk.bf16.gmra.mxu1 %vm502_vm2, %v5682_v28  ;;  %v6162_v28 = vsel %vm371_vm1, %v1822_v36, %v1823_v53  ;;  %v1832_v37 = vrot.slane %v1732_v52, 1  ;;  %v1744_v36 = vunpack.c.l.bf16 %v6183_v25  ;;  %v7863_v53 = vunpack.c.h.bf16 %v6183_v25 }
  0x6d   : > { %5125 = vmatprep.mubr.msk.bf16.mxu1 %vm502_vm2, %v5705_v45  ;;  %v7856_v45 = vunpack.c.l.bf16 %v6142_v63  ;;  %v1837_v52 = vrot.slane %v4842_v0, 1  ;;  %v1843_v0 = vrot.slane %v7858_v47, 1  ;;  %v1862_v41 = vrot.slane %v1750_v59, 1 }
  0x6e   : > { %v1853_v47 = vrot.slane %v7863_v53, 1  ;;  %v6249_v32 = vsel %vm371_vm1, %v1832_v37, %v1833_v11  ;;  %v6261_v53 = vld [vmem:[%s5649_s11 + $0x78] sm:$0xff]  }
  0x6f   : > { %v1835_v27 = vrot.slane %v7856_v45, 1  ;;  %v6238_v45 = vld [vmem:[%s5649_s11 + $0x74] sm:$0x1] }
  0x71   : > { %v6264_v37 = vsel %vm371_vm1, %v1833_v11, %v1835_v27 }
  0x72   : > { %5160 = vmatmul.mubr.msk.bf16.gmra.mxu0 %vm502_vm2, %v1100_v10  ;;  %v1840_v10 = vrot.slane %v7855_v55, 1  ;;  %v1847_v55 = vrot.slane %v4846_v61, 1  ;;  %v1855_v61 = vrot.slane %v7864_v22, 1  ;;  %v6267_v22 = vsel %vm371_vm1, %v1837_v52, %v1838_v48 }
  0x73   : > { %5163 = vmatprep.mubr.msk.bf16.mxu0 %vm502_vm2, %v1101_v54  ;;  %v1842_v54 = vrot.slane %v1738_v51, 1  ;;  %v1852_v51 = vrot.slane %v1744_v36, 1  ;;  %v1860_v36 = vrot.slane %v7866_v40, 1  ;;  %v6280_v40 = vsel %vm371_vm1, %v1843_v0, %v1845_v2 }
  0x74   : > { %5126 = vmatmul.mubr.msk.bf16.gmra.mxu1 %vm502_vm2, %v5738_v7  ;;  %v1850_v7 = vrot.slane %v7862_v42, 1  ;;  %v7867_v42 = vunpack.c.l.bf16 %v6238_v45  ;;  %v6270_v43 = vsel %vm371_vm1, %v1838_v48, %v1840_v10  ;;  %v6283_v11 = vsel %vm371_vm1, %v1847_v55, %v1848_v6  ;;  %v6327_v10 = vld [vmem:[%s5649_s11 + $0x8c] sm:$0x1] }
  0x75   : > { %5129 = vmatprep.mubr.msk.bf16.mxu1 %vm502_vm2, %v5781_v38  ;;  %v7868_v38 = vunpack.c.h.bf16 %v6229_v33  ;;  %v6273_v44 = vsel %vm371_vm1, %v1842_v54, %v1843_v0  ;;  %v6289_v52 = vsel %vm371_vm1, %v1852_v51, %v1853_v47  ;;  %v6296_v12 = vsel %vm371_vm1, %v1853_v47, %v1855_v61  ;;  %v6314_v47 = vld [vmem:[%s5649_s11 + $0x84] sm:$0xff]   ;;  %v6339_v0 = vld [vmem:[%s5649_s11 + $0x90] sm:$0xff]   ;;  %v4570_v51 = vld [vmem:[%s5649_s11 + $0xc] sm:$0xe] }
  0x76   : > { %v6286_v27 = vsel %vm371_vm1, %v1848_v6, %v1850_v7  ;;  %v4854_v2 = vunpack.c.l.bf16 %v6261_v53  ;;  %v6302_v6 = vld [vmem:[%s5649_s11 + $0x80] sm:$0x1]  ;;  %v6305_v55 = vsel %vm371_vm1, %v1857_v50, %v1858_v57  ;;  %v6308_v58 = vsel %vm371_vm1, %v1858_v57, %v1860_v36  ;;  %v6342_v7 = vld [vmem:[%s5649_s11 + $0x98] sm:$0x1]  ;;  %v6357_v54 = vld [vmem:[%s5649_s11 + $0xa4] sm:$0x1] }
  0x77   : > { %7903 = vst [vmem:[#allocation7_spill] sm:$0xff] %v6305_v55  ;;  %7904 = vst [vmem:[#allocation8_spill] sm:$0xff] %v6308_v58  ;;  %v1865_v39 = vrot.slane %v7867_v42, 1  ;;  %v1934_v50 = vpack.c.bf16 %v6165_v16, %v6162_v28  ;;  %v6354_v28 = vld [vmem:[%s5649_s11 + $0x9c] sm:$0xff]   ;;  %v6370_v16 = vld [vmem:[%s5649_s11 + $0xa8] sm:$0xff]   ;;  %v2212_v57 = vunpack.c.l.bf16 %v4570_v51  ;;  %v7909_v51 = vunpack.c.l.bf16 %v6068_v13 }
  0x78   : > { %v6350_v36 = vrot.slane %v4854_v2, 1  ;;  %v6373_v42 = vld [vmem:[%s5649_s11 + $0xb0] sm:$0x1] }
  0x7a   : > { %5164 = vmatmul.mubr.msk.bf16.gmra.mxu0 %vm502_vm2, %v1102_v19  ;;  %v1863_v19 = vrot.slane %v7868_v38, 1  ;;  %7905 = vst [vmem:[#allocation9_spill] sm:$0xff] %v6350_v36  ;;  %v5443_v38 = vld [vmem:[%s5649_s11 + $0xc] sm:$0xff]   ;;  %v7910_v36 = vunpack.c.h.bf16 %v6075_v46 }
  0x7b   : > { %5167 = vmatprep.mubr.msk.bf16.mxu0 %vm502_vm2, %v1103_v18  ;;  %v7870_v18 = vunpack.c.h.bf16 %v6261_v53 }
  0x7c   : > { %5130 = vmatmul.mubr.msk.bf16.gmra.mxu1 %vm502_vm2, %v5812_v15  ;;  %v6348_v61 = vsel %vm371_vm1, %v1862_v41, %v1863_v19  ;;  %v4571_v15 = vld [vmem:[%s5649_s11 + $0x18] sm:$0xe]  ;;  %v6361_v48 = vsel %vm371_vm1, %v1863_v19, %v1865_v39  ;;  %v7908_v41 = vpack.c.bf16 %v6132_v26, %v6129_v21  ;;  %v6393_v19 = vld [vmem:[%s5649_s11 + $0xc0] sm:$0xff]   ;;  %v6405_v2 = vrot.slane %v7910_v36, 2 }
  0x7d   : > { %5133 = vmatprep.mubr.msk.bf16.mxu1 %vm502_vm2, %v5850_v30  ;;  %v6365_v30 = vrot.slane %v7870_v18, 1  ;;  %v6379_v39 = vld [vmem:[%s5649_s11 + $0xb4] sm:$0xff]   ;;  %v7907_v18 = vunpack.c.h.bf16 %v6065_v34  ;;  %v2247_v34 = vrot.slane %v7909_v51, 2  ;;  %v4573_v51 = vld [vmem:[%s5649_s11 + $0x30] sm:$0xe] }
  0x7e   : > { %7911 = vst [vmem:[#allocation11_spill] sm:$0xff] %v6405_v2 }
  0x7f   : > { %7906 = vst [vmem:[#allocation10_spill] sm:$0xff] %v6365_v30  ;;  %v2245_v59 = vrot.slane %v7907_v18, 2  ;;  %v6396_v30 = vld [vmem:[%s5649_s11 + $0xc8] sm:$0x1]  ;;  %v2213_v18 = vunpack.c.l.bf16 %v4571_v15  ;;  %v7912_v15 = vunpack.c.l.bf16 %v6086_v14  ;;  %v2215_v14 = vunpack.c.l.bf16 %v4573_v51 }
  0x81   : > { %v6410_v58 = vsel %vm976_vm3, %v2245_v59, %v2247_v34  ;;  %v2249_v13 = vrot.slane %v2213_v18, 2  ;;  %v4574_v34 = vld [vmem:[%s5649_s11 + $0x3c] sm:$0xe]  ;;  %v2259_v51 = vrot.slane %v2215_v14, 2 }
  0x82   : > { %5168 = vmatmul.mubr.msk.bf16.gmra.mxu0 %vm502_vm2, %v7908_v41  ;;  %v2244_v41 = vrot.slane %v2212_v57, 2  ;;  %v4575_v57 = vld [vmem:[%s5649_s11 + $0x48] sm:$0xe] }
  0x83   : > { %5207 = vmatprep.mubr.msk.bf16.mxu0 %vm502_vm2, %v1934_v50  ;;  %v2252_v50 = vrot.slane %v7912_v15, 2  ;;  %v6429_v18 = vsel %vm976_vm3, %v2249_v13, %v6405_v2  ;;  %v2214_v15 = vunpack.c.l.bf16 %v4572_v35  ;;  %v7916_v13 = vunpack.c.h.bf16 %v6146_v5 }
  0x84   : > { %5134 = vmatmul.mubr.msk.bf16.gmra.mxu1 %vm502_vm2, %v5882_v24  ;;  %v6421_v55 = vsel %vm976_vm3, %v2244_v41, %v2245_v59  ;;  %v7914_v41 = vunpack.c.h.bf16 %v6103_v20  ;;  %v6450_v20 = vld [vmem:[%s7831_s1 + $0x20] sm:$0xf]  ;;  %v7961_v59 = vunpack.c.l.bf16 %v6342_v7 }
  0x85   : > { %7913 = vst [vmem:[#allocation12_spill] sm:$0xff] %v6421_v55  ;;  %5173 = vmatprep.mubr.msk.bf16.mxu1 %vm502_vm2, %v5443_v38  ;;  %v6433_v24 = vsel %vm976_vm3, %v6405_v2, %v2252_v50  ;;  %v7915_v38 = vunpack.c.l.bf16 %v6142_v63  ;;  %v2254_v26 = vrot.slane %v2214_v15, 2  ;;  %v2260_v21 = vrot.slane %v7916_v13, 2  ;;  %v5444_v55 = vld [vmem:[%s5649_s11 + $0x18] sm:$0xff]  }
  0x86   : > { %v2255_v36 = vrot.slane %v7914_v41, 2  ;;  %v7917_v50 = vunpack.c.l.bf16 %v6153_v1  ;;  %v2216_v2 = vunpack.c.l.bf16 %v4574_v34  ;;  %v7918_v15 = vunpack.c.h.bf16 %v6168_v4  ;;  %v5445_v34 = vld [vmem:[%s5649_s11 + $0x24] sm:$0xff]   ;;  %v4576_v4 = vld [vmem:[%s5649_s11 + $0x54] sm:$0xe] }
  0x87   : > { %v2257_v46 = vrot.slane %v7915_v38, 2  ;;  %v7919_v41 = vunpack.c.l.bf16 %v6171_v29  ;;  %v7920_v1 = vpack.c.bf16 %v6191_v23, %v6187_v9  ;;  %v7921_v29 = vpack.c.bf16 %v6264_v37, %v6249_v32  ;;  %v4578_v32 = vld [vmem:[%s5649_s11 + $0x6c] sm:$0xe]  ;;  %v6640_v23 = vld [vmem:[%s5649_s11 + $0x20] sm:$0x1] }
  0x88   : > { %v2262_v35 = vrot.slane %v7917_v50, 2  ;;  %v2265_v5 = vrot.slane %v7918_v15, 2  ;;  %v6465_v13 = vsel %vm976_vm3, %v2254_v26, %v2255_v36  ;;  %v2264_v14 = vrot.slane %v2216_v2, 2 }
  0x89   : > { %v6453_v63 = vsel %vm976_vm3, %v2255_v36, %v2257_v46  ;;  %v2267_v38 = vrot.slane %v7919_v41, 2  ;;  %v2217_v50 = vunpack.c.l.bf16 %v4575_v57  ;;  %v6479_v26 = vsel %vm976_vm3, %v2259_v51, %v2260_v21 }
  0x8a   : > { %5208 = vmatmul.mubr.msk.bf16.vlgmr.msra.gmra.mxu0 %vm502_vm2, %v7920_v1  ;;  %v6468_v46 = vsel %vm976_vm3, %v2260_v21, %v2262_v35  ;;  %v7922_v2 = vunpack.c.h.bf16 %v6174_v8  ;;  %v4577_v35 = vld [vmem:[%s5649_s11 + $0x60] sm:$0xe]  ;;  %v6497_v37 = vsel %vm976_vm3, %v2264_v14, %v2265_v5  ;;  %v7923_v8 = vunpack.c.l.bf16 %v6180_v60 }
  0x8b   : > { %5274 = vmatpush3.bf16.msra.mxu0 %v6061_v49  ;;  %5211 = vmatprep.mubr.msk.bf16.mxu0 %vm502_vm2, %v7921_v29  ;;  %v6482_v36 = vsel %vm976_vm3, %v2265_v5, %v2267_v38  ;;  %v6490_v49 = vld [vmem:[%s7831_s1 + $0x1c] sm:$0xf]  ;;  %v2269_v21 = vrot.slane %v2217_v50, 2  ;;  %v2218_v41 = vunpack.c.l.bf16 %v4576_v4  ;;  %v7924_v38 = vunpack.c.h.bf16 %v6183_v25  ;;  %v4579_v50 = vld [vmem:[%s5649_s11 + $0x78] sm:$0xe] }
  0x8c   : > { %v2270_v57 = vrot.slane %v7922_v2, 2  ;;  %5386 = vmatprep.subr.msk.bf16.mxu0 %vm551_vm0, %v6450_v20  ;;  %v2272_v51 = vrot.slane %v7923_v8, 2  ;;  %5174 = vmatmul.mubr.msk.bf16.vlgmr.msra.gmra.mxu1 %vm502_vm2, %v5444_v55  ;;  %v7925_v29 = vunpack.c.l.bf16 %v6197_v17  ;;  %v2219_v5 = vunpack.c.l.bf16 %v4577_v35 }
  0x8d   : > { %v2275_v1 = vrot.slane %v7924_v38, 2  ;;  %5240 = vmatpush3.bf16.msra.mxu1 %v6054_v62  ;;  %5177 = vmatprep.mubr.msk.bf16.mxu1 %vm502_vm2, %v5445_v34  ;;  %v7926_v25 = vunpack.c.h.bf16 %v6204_v31  ;;  %v2274_v17 = vrot.slane %v2218_v41, 2  ;;  %v7927_v4 = vunpack.c.l.bf16 %v6207_v3 }
  0x8e   : > { %v2277_v2 = vrot.slane %v7925_v29, 2  ;;  %v6512_v60 = vsel %vm976_vm3, %v2269_v21, %v2270_v57  ;;  %v6515_v55 = vsel %vm976_vm3, %v2270_v57, %v2272_v51  ;;  %5385 = vmatprep.subr.msk.bf16.mxu1 %vm551_vm0, %v6490_v49  ;;  %v2279_v35 = vrot.slane %v2219_v5, 2  ;;  %v4580_v29 = vld [vmem:[%s5649_s11 + $0x84] sm:$0xe]  ;;  %v4581_v5 = vld [vmem:[%s5649_s11 + $0x90] sm:$0xe] }
  0x8f   : > { %v2280_v14 = vrot.slane %v7926_v25, 2  ;;  %v2282_v57 = vrot.slane %v7927_v4, 2  ;;  %v2220_v21 = vunpack.c.l.bf16 %v4578_v32  ;;  %v7928_v31 = vunpack.c.h.bf16 %v6229_v33  ;;  %v5446_v25 = vld [vmem:[%s5649_s11 + $0x30] sm:$0xff]  }
  0x90   : > { %v6525_v34 = vsel %vm976_vm3, %v2275_v1, %v2277_v2  ;;  %v7929_v51 = vunpack.c.l.bf16 %v6238_v45  ;;  %v6536_v62 = vsel %vm976_vm3, %v2274_v17, %v2275_v1  ;;  %v2221_v2 = vunpack.c.l.bf16 %v4579_v50  ;;  %v5447_v45 = vld [vmem:[%s5649_s11 + $0x3c] sm:$0xff]  }
  0x91   : > { %v2285_v8 = vrot.slane %v7928_v31, 2  ;;  %v6539_v41 = vsel %vm976_vm3, %v2280_v14, %v2282_v57  ;;  %v7930_v3 = vunpack.c.h.bf16 %v6261_v53  ;;  %v7931_v33 = vpack.c.bf16 %v6270_v43, %v6267_v22 }
  0x92   : > { %v2287_v38 = vrot.slane %v7929_v51, 2  ;;  %v6552_v1 = vsel %vm976_vm3, %v2279_v35, %v2280_v14  ;;  %v2284_v17 = vrot.slane %v2220_v21, 2  ;;  %v7932_v53 = vpack.c.bf16 %v6280_v40, %v6273_v44 }
  0x93   : > { %v2290_v4 = vrot.slane %v7930_v3, 2  ;;  %5212 = vmatmul.mubr.msk.bf16.gmra.mxu0 %vm502_vm2, %v7931_v33  ;;  %v2289_v22 = vrot.slane %v2221_v2, 2  ;;  %v7933_v57 = vunpack.c.l.bf16 %v6302_v6  ;;  %v2222_v51 = vunpack.c.l.bf16 %v4580_v29  ;;  %v4582_v3 = vld [vmem:[%s5649_s11 + $0x9c] sm:$0xe] }
  0x94   : > { %v6555_v50 = vsel %vm976_vm3, %v2285_v8, %v2287_v38  ;;  %5215 = vmatprep.mubr.msk.bf16.mxu0 %vm502_vm2, %v7932_v53  ;;  %v6566_v14 = vsel %vm976_vm3, %v2284_v17, %v2285_v8  ;;  %v7934_v35 = vunpack.c.h.bf16 %v6314_v47  ;;  %v7935_v38 = vunpack.c.l.bf16 %v6327_v10  ;;  %5178 = vmatmul.mubr.msk.bf16.gmra.mxu1 %vm502_vm2, %v5446_v25  ;;  %v4583_v17 = vld [vmem:[%s5649_s11 + $0xa8] sm:$0xe] }
  0x95   : > { %v2292_v31 = vrot.slane %v7933_v57, 2  ;;  %v2223_v44 = vunpack.c.l.bf16 %v4581_v5  ;;  %v6577_v33 = vsel %vm976_vm3, %v2289_v22, %v2290_v4  ;;  %v2294_v29 = vrot.slane %v2222_v51, 2  ;;  %5181 = vmatprep.mubr.msk.bf16.mxu1 %vm502_vm2, %v5447_v45  ;;  %v4584_v5 = vld [vmem:[%s5649_s11 + $0xb4] sm:$0xe] }
  0x96   : > { %v2295_v21 = vrot.slane %v7934_v35, 2  ;;  %v2297_v40 = vrot.slane %v7935_v38, 2  ;;  %v7936_v57 = vunpack.c.h.bf16 %v6339_v0  ;;  %v2224_v51 = vunpack.c.l.bf16 %v4582_v3 }
  0x97   : > { %v6580_v8 = vsel %vm976_vm3, %v2290_v4, %v2292_v31  ;;  %v2299_v25 = vrot.slane %v2223_v44, 2  ;;  %v7937_v4 = vunpack.c.l.bf16 %v6342_v7  ;;  %v7938_v45 = vunpack.c.h.bf16 %v6354_v28 }
  0x98   : > { %v6587_v53 = vsel %vm976_vm3, %v2295_v21, %v2297_v40  ;;  %v2300_v22 = vrot.slane %v7936_v57, 2  ;;  %v6592_v35 = vsel %vm976_vm3, %v2294_v29, %v2295_v21  ;;  %v7939_v57 = vunpack.c.l.bf16 %v6357_v54  ;;  %v5448_v29 = vld [vmem:[%s5649_s11 + $0x48] sm:$0xff]   ;;  %v4585_v40 = vld [vmem:[%s5649_s11 + $0xc0] sm:$0xe] }
  0x99   : > { %v2302_v31 = vrot.slane %v7937_v4, 2  ;;  %v2305_v38 = vrot.slane %v7938_v45, 2  ;;  %v2225_v21 = vunpack.c.l.bf16 %v4583_v17  ;;  %v2304_v3 = vrot.slane %v2224_v51, 2 }
  0x9a   : > { %v6602_v44 = vsel %vm976_vm3, %v2299_v25, %v2300_v22  ;;  %v2307_v2 = vrot.slane %v7939_v57, 2  ;;  %v7940_v4 = vunpack.c.h.bf16 %v6370_v16  ;;  %v7941_v32 = vunpack.c.l.bf16 %v6373_v42  ;;  %v5449_v57 = vld [vmem:[%s5649_s11 + $0x54] sm:$0xff]  }
  0x9b   : > { %v6608_v43 = vsel %vm976_vm3, %v2300_v22, %v2302_v31  ;;  %v7942_v25 = vpack.c.bf16 %v6286_v27, %v6283_v11  ;;  %v2309_v31 = vrot.slane %v2225_v21, 2  ;;  %v2226_v51 = vunpack.c.l.bf16 %v4584_v5  ;;  %v7954_v5 = vld [vmem:[#allocation7_spill] sm:$0xff] }
  0x9c   : > { %v2310_v45 = vrot.slane %v7940_v4, 2  ;;  %v2312_v15 = vrot.slane %v7941_v32, 2  ;;  %v6623_v22 = vsel %vm976_vm3, %v2305_v38, %v2307_v2  ;;  %v7943_v4 = vpack.c.bf16 %v6296_v12, %v6289_v52  ;;  %5182 = vmatmul.mubr.msk.bf16.gmra.mxu1 %vm502_vm2, %v5448_v29 }
  0x9d   : > { %5216 = vmatmul.mubr.msk.bf16.gmra.mxu0 %vm502_vm2, %v7942_v25  ;;  %v6630_v32 = vsel %vm976_vm3, %v2304_v3, %v2305_v38  ;;  %v7944_v27 = vunpack.c.h.bf16 %v6379_v39  ;;  %v7945_v17 = vunpack.c.l.bf16 %v6390_v56  ;;  %v2314_v12 = vrot.slane %v2226_v51, 2  ;;  %5185 = vmatprep.mubr.msk.bf16.mxu1 %vm502_vm2, %v5449_v57 }
  0x9e   : > { %5219 = vmatprep.mubr.msk.bf16.mxu0 %vm502_vm2, %v7943_v4  ;;  %v6633_v11 = vsel %vm976_vm3, %v2310_v45, %v2312_v15  ;;  %v6645_v52 = vsel %vm976_vm3, %v2309_v31, %v2310_v45  ;;  %v2227_v38 = vunpack.c.l.bf16 %v4585_v40  ;;  %v7946_v3 = vunpack.c.h.bf16 %v6393_v19 }
  0x9f   : > { %v2315_v25 = vrot.slane %v7944_v27, 2  ;;  %v2317_v2 = vrot.slane %v7945_v17, 2  ;;  %v7947_v4 = vunpack.c.l.bf16 %v6396_v30  ;;  %v7948_v45 = vunpack.c.l.bf16 %v6302_v6 }
  0xa0   : > { %v2320_v17 = vrot.slane %v7946_v3, 2  ;;  %v2319_v31 = vrot.slane %v2227_v38, 2  ;;  %v7878_v51 = vunpack.c.l.bf16 %v6640_v23  ;;  %v7949_v3 = vunpack.c.l.bf16 %v6314_v47 }
  0xa1   : > { %v6651_v21 = vsel %vm976_vm3, %v2315_v25, %v2317_v2  ;;  %v2322_v27 = vrot.slane %v7947_v4, 2  ;;  %v1870_v40 = vrot.slane %v7948_v45, 1  ;;  %v6661_v29 = vsel %vm976_vm3, %v2314_v12, %v2315_v25  ;;  %v7953_v4 = vld [vmem:[#allocation8_spill] sm:$0xff] }
  0xa2   : > { %v1942_v2 = vpack.c.bf16 %v6361_v48, %v6348_v61  ;;  %v1872_v15 = vrot.slane %v7949_v3, 1  ;;  %v7950_v6 = vunpack.c.h.bf16 %v6314_v47  ;;  %v7951_v25 = vunpack.c.l.bf16 %v6327_v10  ;;  %v5450_v61 = vld [vmem:[%s5649_s11 + $0x60] sm:$0xff]   ;;  %v5451_v47 = vld [vmem:[%s5649_s11 + $0x6c] sm:$0xff]  }
  0xa3   : > { %v6671_v57 = vsel %vm976_vm3, %v2320_v17, %v2322_v27  ;;  %v6678_v38 = vsel %vm976_vm3, %v2319_v31, %v2320_v17  ;;  %v3092_v48 = vrot.slane %v7878_v51, 1  ;;  %v7955_v27 = vpack.c.bf16 %v7953_v4, %v7954_v5  ;;  %v7958_v17 = vld [vmem:[#allocation10_spill] sm:$0xff]  ;;  %v7959_v31 = vld [vmem:[#allocation9_spill] sm:$0xff] }
  0xa4   : > { %v1873_v45 = vrot.slane %v7950_v6, 1  ;;  %v1875_v12 = vrot.slane %v7951_v25, 1  ;;  %7952 = vst [vmem:[#allocation13_spill] sm:$0xff] %v6678_v38  ;;  %v7956_v6 = vld [vmem:[#allocation5_spill] sm:$0xff]  ;;  %v1869_v25 = vsel %vm371_vm1, %v7959_v31, %v7958_v17  ;;  %v1871_v51 = vsel %vm371_vm1, %v7958_v17, %v1870_v40  ;;  %5186 = vmatmul.mubr.msk.bf16.gmra.mxu1 %vm502_vm2, %v5450_v61  ;;  %v5452_v38 = vld [vmem:[%s5649_s11 + $0x78] sm:$0xff]  }
  0xa5   : > { %5220 = vmatmul.mubr.msk.bf16.gmra.mxu0 %vm502_vm2, %v7955_v27  ;;  %v6692_v10 = vsel %vm371_vm1, %v7956_v6, %v3092_v48  ;;  %v4858_v3 = vunpack.c.l.bf16 %v6339_v0  ;;  %5189 = vmatprep.mubr.msk.bf16.mxu1 %vm502_vm2, %v5451_v47  ;;  %v1943_v27 = vpack.c.bf16 %v1871_v51, %v1869_v25  ;;  %v7960_v17 = vunpack.c.h.bf16 %v6339_v0  ;;  %v5453_v61 = vld [vmem:[%s5649_s11 + $0x84] sm:$0xff]  }
  0xa6   : > { %7957 = vst [vmem:[#allocation8_spill] sm:$0xff] %v6692_v10  ;;  %5223 = vmatprep.mubr.msk.bf16.mxu0 %vm502_vm2, %v1942_v2  ;;  %v1874_v4 = vsel %vm371_vm1, %v1872_v15, %v1873_v45  ;;  %v1876_v48 = vsel %vm371_vm1, %v1873_v45, %v1875_v12  ;;  %v1762_v2 = vunpack.c.l.bf16 %v6354_v28  ;;  %v1880_v5 = vrot.slane %v7961_v59, 1 }
  0xa7   : > { %v1944_v6 = vpack.c.bf16 %v1876_v48, %v1874_v4  ;;  %v1877_v40 = vrot.slane %v4858_v3, 1  ;;  %v1878_v31 = vrot.slane %v7960_v17, 1  ;;  %v7962_v15 = vunpack.c.h.bf16 %v6354_v28  ;;  %v5454_v17 = vld [vmem:[%s5649_s11 + $0x90] sm:$0xff]  }
  0xa8   : > { %v1882_v9 = vrot.slane %v1762_v2, 1  ;;  %v7963_v45 = vunpack.c.l.bf16 %v6357_v54  ;;  %v4862_v7 = vunpack.c.l.bf16 %v6370_v16  ;;  %v1768_v54 = vunpack.c.l.bf16 %v6379_v39 }
  0xa9   : > { %v1883_v10 = vrot.slane %v7962_v15, 1  ;;  %v1879_v51 = vsel %vm371_vm1, %v1877_v40, %v1878_v31  ;;  %v1881_v0 = vsel %vm371_vm1, %v1878_v31, %v1880_v5  ;;  %v7964_v4 = vunpack.c.h.bf16 %v6370_v16 }
  0xaa   : > { %v1885_v12 = vrot.slane %v7963_v45, 1  ;;  %v1945_v3 = vpack.c.bf16 %v1881_v0, %v1879_v51  ;;  %v1887_v25 = vrot.slane %v4862_v7, 1  ;;  %v7965_v5 = vunpack.c.l.bf16 %v6373_v42 }
  0xab   : > { %v1884_v28 = vsel %vm371_vm1, %v1882_v9, %v1883_v10  ;;  %v1888_v48 = vrot.slane %v7964_v4, 1  ;;  %v7966_v9 = vunpack.c.h.bf16 %v6379_v39  ;;  %v4866_v31 = vunpack.c.l.bf16 %v6393_v19 }
  0xac   : > { %v1886_v59 = vsel %vm371_vm1, %v1883_v10, %v1885_v12  ;;  %5190 = vmatmul.mubr.msk.bf16.gmra.mxu1 %vm502_vm2, %v5452_v38  ;;  %v1890_v2 = vrot.slane %v7965_v5, 1  ;;  %v7967_v10 = vunpack.c.l.bf16 %v6390_v56  ;;  %v5455_v38 = vld [vmem:[%s5649_s11 + $0x9c] sm:$0xff]   ;;  %v7969_v0 = vunpack.c.l.bf16 %v6396_v30  ;;  %v5461_v5 = vld [vmem:[%s5649_s11 + $0x30] sm:$0xff]  }
  0xad   : > { %5224 = vmatmul.mubr.msk.bf16.gmra.mxu0 %vm502_vm2, %v1943_v27  ;;  %5193 = vmatprep.mubr.msk.bf16.mxu1 %vm502_vm2, %v5453_v61  ;;  %v1946_v47 = vpack.c.bf16 %v1886_v59, %v1884_v28  ;;  %v1892_v27 = vrot.slane %v1768_v54, 1  ;;  %v1889_v16 = vsel %vm371_vm1, %v1887_v25, %v1888_v48  ;;  %v1897_v12 = vrot.slane %v4866_v31, 1  ;;  %v5456_v28 = vld [vmem:[%s5649_s11 + $0xa8] sm:$0xff]   ;;  %v5457_v59 = vld [vmem:[%s5649_s11 + $0xb4] sm:$0xff]   ;;  %v5458_v30 = vld [vmem:[%s5649_s11 + $0xc0] sm:$0xff]  }
  0xae   : > { %5227 = vmatprep.mubr.msk.bf16.mxu0 %vm502_vm2, %v1944_v6  ;;  %v1893_v6 = vrot.slane %v7966_v9, 1  ;;  %v1895_v40 = vrot.slane %v7967_v10, 1  ;;  %v1891_v42 = vsel %vm371_vm1, %v1888_v48, %v1890_v2  ;;  %v7968_v61 = vunpack.c.h.bf16 %v6393_v19  ;;  %v7970_v25 = vld [vmem:[#allocation12_spill] sm:$0xff]  ;;  %v5460_v48 = vld [vmem:[%s5649_s11 + $0x24] sm:$0xff]   ;;  %v4733_v10 = vld [vmem:[%s5649_s11 + $0x18] sm:$0xe] }
  0xaf   : > { %v1947_v56 = vpack.c.bf16 %v1891_v42, %v1889_v16  ;;  %v1900_v7 = vrot.slane %v7969_v0, 1  ;;  %v7971_v4 = vpack.c.bf16 %v6410_v58, %v7970_v25  ;;  %v3690_v2 = vsel %vm551_vm0, %v6450_v20, 0  ;;  %v5462_v20 = vld [vmem:[%s5649_s11 + $0x3c] sm:$0xff]   ;;  %v4909_v0 = vld [vmem:[%s5649_s11 + $0x30] sm:$0xff]  }
  0xb0   : > { %v1894_v39 = vsel %vm371_vm1, %v1892_v27, %v1893_v6  ;;  %v1896_v15 = vsel %vm371_vm1, %v1893_v6, %v1895_v40  ;;  %v1898_v51 = vrot.slane %v7968_v61, 1  ;;  %v3268_v27 = vsel %vm551_vm0, %v6490_v49, 0  ;;  %v5463_v6 = vld [vmem:[%s5649_s11 + $0x48] sm:$0xff]   ;;  %v5470_v31 = vld [vmem:[%s5649_s11 + $0x9c] sm:$0xff]  }
  0xb1   : > { %v1948_v45 = vpack.c.bf16 %v1896_v15, %v1894_v39  ;;  %v7972_v58 = vpack.c.bf16 %v6433_v24, %v6429_v18  ;;  %v7973_v9 = vpack.c.bf16 %v6453_v63, %v6465_v13  ;;  %v7974_v18 = vpack.c.bf16 %v6468_v46, %v6479_v26  ;;  %v5464_v63 = vld [vmem:[%s5649_s11 + $0x54] sm:$0xff]   ;;  %v5465_v13 = vld [vmem:[%s5649_s11 + $0x60] sm:$0xff]   ;;  %v5466_v26 = vld [vmem:[%s5649_s11 + $0x6c] sm:$0xff]  }
  0xb2   : > { %v1899_v54 = vsel %vm371_vm1, %v1897_v12, %v1898_v51  ;;  %v7975_v24 = vpack.c.bf16 %v6482_v36, %v6497_v37  ;;  %v7976_v49 = vpack.c.bf16 %v6515_v55, %v6512_v60  ;;  %v7977_v46 = vpack.c.bf16 %v6525_v34, %v6536_v62  ;;  %v5467_v36 = vld [vmem:[%s5649_s11 + $0x78] sm:$0xff]   ;;  %v5468_v55 = vld [vmem:[%s5649_s11 + $0x84] sm:$0xff]   ;;  %v5469_v62 = vld [vmem:[%s5649_s11 + $0x90] sm:$0xff]  }
  0xb3   : > { %v7978_v37 = vpack.c.bf16 %v6539_v41, %v6552_v1  ;;  %v7979_v60 = vpack.c.bf16 %v6555_v50, %v6566_v14  ;;  %v3479_v50 = vunpack.c.l.bf16 %v4733_v10  ;;  %v7981_v42 = vpack.c.bf16 %v6587_v53, %v6592_v35  ;;  %v5471_v15 = vld [vmem:[%s5649_s11 + $0xa8] sm:$0xff]   ;;  %v4682_v10 = vld [vmem:[%s5649_s11 + $0x50] sm:$0x1] }
  0xb4   : > { %5194 = vmatmul.mubr.msk.bf16.gmra.mxu1 %vm502_vm2, %v5454_v17  ;;  %v7980_v17 = vpack.c.bf16 %v6580_v8, %v6577_v33  ;;  %v4671_v8 = vld [vmem:[%s5649_s11 + $0x24] sm:$0xff]   ;;  %v4673_v12 = vld [vmem:[%s5649_s11 + $0x2c] sm:$0x1]  ;;  %v4874_v25 = vunpack.c.l.bf16 %v4909_v0 }
  0xb5   : > { %5228 = vmatmul.mubr.msk.bf16.gmra.mxu0 %vm502_vm2, %v1945_v3  ;;  %5197 = vmatprep.mubr.msk.bf16.mxu1 %vm502_vm2, %v5455_v38  ;;  %v1901_v3 = vsel %vm371_vm1, %v1898_v51, %v1900_v7  ;;  %v4734_v51 = vld [vmem:[%s5649_s11 + $0x24] sm:$0xe]  ;;  %v4676_v7 = vld [vmem:[%s5649_s11 + $0x38] sm:$0x1]  ;;  %v2996_v35 = vunpack.c.l.bf16 %v4671_v8 }
  0xb6   : > { %5231 = vmatprep.mubr.msk.bf16.mxu0 %vm502_vm2, %v1946_v47  ;;  %v1949_v19 = vpack.c.bf16 %v1901_v3, %v1899_v54  ;;  %v5459_v47 = vld [vmem:[%s5649_s11 + $0x18] sm:$0xff]   ;;  %v2998_v54 = vunpack.c.l.bf16 %v4673_v12 }
  0xb7   : > { %v7983_v3 = vld [vmem:[#allocation11_spill] sm:$0xff] }
  0xbc   : > { %5198 = vmatmul.mubr.msk.bf16.gmra.mxu1 %vm502_vm2, %v5456_v28  ;;  %v4735_v28 = vld [vmem:[%s5649_s11 + $0x30] sm:$0xe] }
  0xbd   : > { %5232 = vmatmul.mubr.msk.bf16.gmra.mxu0 %vm502_vm2, %v1947_v56  ;;  %5201 = vmatprep.mubr.msk.bf16.mxu1 %vm502_vm2, %v5457_v59  ;;  %v3511_v56 = vrot.slane %v3479_v50, 2  ;;  %v2997_v59 = vunpack.c.h.bf16 %v4671_v8 }
  0xbe   : > { %5235 = vmatprep.mubr.msk.bf16.mxu0 %vm502_vm2, %v1948_v45  ;;  %v7982_v45 = vunpack.c.l.bf16 %v6640_v23 }
  0xc0   : > { %v3514_v33 = vrot.slane %v7982_v45, 2 }
  0xc4   : > { %5202 = vmatmul.mubr.msk.bf16.gmra.mxu1 %vm502_vm2, %v5458_v30  ;;  %v3480_v30 = vunpack.c.l.bf16 %v4734_v51 }
  0xc5   : > { %5236 = vmatmul.mubr.msk.bf16.gmra.mxu0 %vm502_vm2, %v1949_v19  ;;  %5241 = vmatprep.mubr.msk.bf16.mxu1 %vm502_vm2, %v7971_v4  ;;  %v6869_v19 = vsel %vm976_vm3, %v3511_v56, %v7983_v3 }
  0xc6   : > { %5275 = vmatprep.mubr.msk.bf16.mxu0 %vm502_vm2, %v5459_v47  ;;  %v6873_v47 = vsel %vm976_vm3, %v7983_v3, %v3514_v33 }
  0xcc   : > { %5242 = vmatmul.mubr.msk.bf16.vlgmr.msra.gmra.mxu1 %vm502_vm2, %v7972_v58  ;;  %v7984_v58 = vpack.c.bf16 %v6608_v43, %v6602_v44  ;;  %v3094_v43 = vrot.slane %v2996_v35, 1  ;;  %v3095_v44 = vrot.slane %v2997_v59, 1 }
  0xcd   : > { %5276 = vmatmul.mubr.msk.bf16.vlgmr.msra.gmra.mxu0 %vm502_vm2, %v5460_v48  ;;  %5308 = vmatpush3.bf16.msra.mxu1 %v3268_v27  ;;  %v5472_v48 = vld [vmem:[%s5649_s11 + $0xb4] sm:$0xff]   ;;  %v3481_v27 = vunpack.c.l.bf16 %v4735_v28 }
  0xce   : > { %5342 = vmatpush3.bf16.msra.mxu0 %v3690_v2  ;;  %5279 = vmatprep.mubr.msk.bf16.mxu0 %vm502_vm2, %v5461_v5  ;;  %v4875_v5 = vunpack.c.h.bf16 %v4909_v0  ;;  %v3001_v2 = vunpack.c.l.bf16 %v4676_v7  ;;  %v6907_v12 = vsel %vm371_vm1, %v3094_v43, %v3095_v44 }
  0xcf   : > { %5245 = vmatprep.mubr.msk.bf16.mxu1 %vm502_vm2, %v7973_v9 }
  0xd0   : > { %v3100_v50 = vrot.slane %v4875_v5, 1  ;;  %v3524_v56 = vrot.slane %v3001_v2, 2 }
  0xd4   : > { %5246 = vmatmul.mubr.msk.bf16.gmra.mxu1 %vm502_vm2, %v7974_v18  ;;  %v4679_v18 = vld [vmem:[%s5649_s11 + $0x44] sm:$0x1] }
  0xd5   : > { %5280 = vmatmul.mubr.msk.bf16.gmra.mxu0 %vm502_vm2, %v5462_v20  ;;  %5249 = vmatprep.mubr.msk.bf16.mxu1 %vm502_vm2, %v7975_v24  ;;  %v5473_v20 = vld [vmem:[%s5649_s11 + $0xc0] sm:$0xff]   ;;  %v3004_v8 = vunpack.c.l.bf16 %v4679_v18 }
  0xd6   : > { %5283 = vmatprep.mubr.msk.bf16.mxu0 %vm502_vm2, %v5463_v6  ;;  %v4677_v6 = vld [vmem:[%s5649_s11 + $0x3c] sm:$0xff]  }
  0xd7   : > { %v3002_v45 = vunpack.c.l.bf16 %v4677_v6  ;;  %v3003_v33 = vunpack.c.h.bf16 %v4677_v6  ;;  %v3107_v43 = vrot.slane %v3004_v8, 1 }
  0xd9   : > { %v3104_v18 = vrot.slane %v3002_v45, 1 }
  0xdc   : > { %5250 = vmatmul.mubr.msk.bf16.gmra.mxu1 %vm502_vm2, %v7976_v49  ;;  %v3097_v49 = vrot.slane %v2998_v54, 1 }
  0xdd   : > { %5284 = vmatmul.mubr.msk.bf16.gmra.mxu0 %vm502_vm2, %v5464_v63  ;;  %5253 = vmatprep.mubr.msk.bf16.mxu1 %vm502_vm2, %v7977_v46  ;;  %v7986_v63 = vpack.c.bf16 %v6623_v22, %v6630_v32  ;;  %v4736_v46 = vld [vmem:[%s5649_s11 + $0x3c] sm:$0xe]  ;;  %v3102_v22 = vrot.slane %v3001_v2, 1  ;;  %v3521_v32 = vrot.slane %v3481_v27, 2 }
  0xde   : > { %5287 = vmatprep.mubr.msk.bf16.mxu0 %vm502_vm2, %v5465_v13  ;;  %v3623_v13 = vpack.c.bf16 %v6873_v47, %v6869_v19  ;;  %v6910_v51 = vsel %vm371_vm1, %v3095_v44, %v3097_v49  ;;  %v3482_v0 = vunpack.c.l.bf16 %v4736_v46  ;;  %v4683_v44 = vld [vmem:[%s5649_s11 + $0x54] sm:$0xff]   ;;  %v4685_v49 = vld [vmem:[%s5649_s11 + $0x5c] sm:$0x1] }
  0xdf   : > { %v6928_v2 = vsel %vm371_vm1, %v3100_v50, %v3102_v22  ;;  %v3009_v45 = vunpack.c.h.bf16 %v4683_v44 }
  0xe4   : > { %5254 = vmatmul.mubr.msk.bf16.gmra.mxu1 %vm502_vm2, %v7978_v37  ;;  %v3516_v37 = vrot.slane %v3480_v30, 2 }
  0xe5   : > { %5288 = vmatmul.mubr.msk.bf16.gmra.mxu0 %vm502_vm2, %v5466_v26  ;;  %5257 = vmatprep.mubr.msk.bf16.mxu1 %vm502_vm2, %v7979_v60  ;;  %v4910_v26 = vld [vmem:[%s5649_s11 + $0x48] sm:$0xff]   ;;  %v3517_v60 = vrot.slane %v2997_v59, 2 }
  0xe6   : > { %5291 = vmatprep.mubr.msk.bf16.mxu0 %vm502_vm2, %v5467_v36  ;;  %v4878_v7 = vunpack.c.l.bf16 %v4910_v26  ;;  %v4879_v59 = vunpack.c.h.bf16 %v4910_v26  ;;  %v7992_v26 = vpack.c.bf16 %v6651_v21, %v6661_v29  ;;  %v3010_v21 = vunpack.c.l.bf16 %v4685_v49 }
  0xe7   : > { %v6822_v34 = vpop.f32.mrf.mxu0  ;;  %v6916_v35 = vsel %vm976_vm3, %v3516_v37, %v3517_v60  ;;  %v3529_v37 = vrot.slane %v3004_v8, 2  ;;  %v4740_v8 = vld [vmem:[%s5649_s11 + $0x6c] sm:$0xe] }
  0xe8   : > { %v3117_v49 = vrot.slane %v3010_v21, 1 }
  0xe9   : > { %v6825_v40 = vpop.f32.mrf.mxu1  ;;  %v6828_v41 = vpop.f32.mrf.mxu0 }
  0xeb   : > { %v6830_v1 = vpop.f32.mrf.mxu1  ;;  %v6833_v14 = vpop.f32.mrf.mxu0 }
  0xec   : > { %5258 = vmatmul.mubr.msk.bf16.gmra.mxu1 %vm502_vm2, %v7980_v17  ;;  %v3522_v17 = vrot.slane %v4875_v5, 2 }
  0xed   : > { %5292 = vmatmul.mubr.msk.bf16.gmra.mxu0 %vm502_vm2, %v5468_v55  ;;  %v6839_v38 = vpop.f32.mrf.mxu1  ;;  %v6841_v16 = vpop.f32.mrf.mxu0  ;;  %5261 = vmatprep.mubr.msk.bf16.mxu1 %vm502_vm2, %v7981_v42  ;;  %v3519_v55 = vrot.slane %v2998_v54, 2  ;;  %v4737_v42 = vld [vmem:[%s5649_s11 + $0x48] sm:$0xe]  ;;  %v3007_v54 = vunpack.c.l.bf16 %v4682_v10  ;;  %v3110_v10 = vrot.slane %v4879_v59, 1 }
  0xee   : > { %5295 = vmatprep.mubr.msk.bf16.mxu0 %vm502_vm2, %v5469_v62  ;;  %v3099_v62 = vrot.slane %v4874_v25, 1  ;;  %v3483_v3 = vunpack.c.l.bf16 %v4737_v42  ;;  %v5474_v25 = vld [vmem:[%s5649_s11 + $0xcc] sm:$0xff]   ;;  %v6931_v27 = vsel %vm976_vm3, %v3521_v32, %v3522_v17  ;;  %v6940_v6 = vsel %vm976_vm3, %v3522_v17, %v3524_v56 }
  0xef   : > { %v6848_v39 = vpop.f32.mrf.mxu1  ;;  %v3532_v32 = vrot.slane %v4879_v59, 2  ;;  %v3534_v42 = vrot.slane %v3007_v54, 2  ;;  %v3008_v56 = vunpack.c.l.bf16 %v4683_v44 }
  0xf0   : > { %v6855_v61 = vpop.f32.mrf.mxu0  ;;  %v6925_v5 = vsel %vm371_vm1, %v3099_v62, %v3100_v50  ;;  %v3112_v50 = vrot.slane %v3007_v54, 1  ;;  %v3531_v22 = vrot.slane %v3483_v3, 2  ;;  %v3625_v54 = vpack.c.bf16 %v6940_v6, %v6931_v27 }
  0xf1   : > { %v6999_v19 = vsel %vm976_vm3, %v3532_v32, %v3534_v42  ;;  %v3114_v47 = vrot.slane %v3008_v56, 1  ;;  %v7999_v42 = vld [vmem:[#allocation6_spill] sm:$0xff] }
  0xf2   : > { %v6862_v53 = vpop.f32.mrf.mxu0  ;;  %v6864_v23 = vpop.f32.mrf.mxu1  ;;  %v6989_v6 = vsel %vm371_vm1, %v3110_v10, %v3112_v50  ;;  %v3539_v50 = vrot.slane %v3010_v21, 2 }
  0xf4   : > { %v6875_v4 = vpop.f32.mrf.mxu0  ;;  %5262 = vmatmul.mubr.msk.bf16.gmra.mxu1 %vm502_vm2, %v7984_v58  ;;  %v6882_v9 = vpop.f32.mrf.mxu1  ;;  %v7990_v58 = vpack.c.bf16 %v6633_v11, %v6645_v52  ;;  %v3526_v11 = vrot.slane %v3482_v0, 2  ;;  %v3527_v52 = vrot.slane %v3003_v33, 2 }
  0xf5   : > { %5296 = vmatmul.mubr.msk.bf16.gmra.mxu0 %vm502_vm2, %v5470_v31  ;;  %7985 = vst [vmem:[#allocation7_spill] sm:$0xff] %v6882_v9  ;;  %5265 = vmatprep.mubr.msk.bf16.mxu1 %vm502_vm2, %v7986_v63  ;;  %v3105_v63 = vrot.slane %v3003_v33, 1  ;;  %v4741_v9 = vld [vmem:[%s5649_s11 + $0x78] sm:$0xe] }
  0xf6   : > { %5299 = vmatprep.mubr.msk.bf16.mxu0 %vm502_vm2, %v5471_v15  ;;  %v6887_v24 = vpop.f32.mrf.mxu0  ;;  %v6897_v36 = vpop.f32.mrf.mxu1 }
  0xf7   : > { %7987 = vst [vmem:[#allocation5_spill] sm:$0xff] %v6897_v36  ;;  %v6969_v3 = vsel %vm371_vm1, %v3104_v18, %v3105_v63  ;;  %v6992_v18 = vsel %vm976_vm3, %v3531_v22, %v3532_v32  ;;  %v7998_v32 = vld [vmem:[#allocation8_spill] sm:$0xff] }
  0xf8   : > { %v6901_v31 = vpop.f32.mrf.mxu1  ;;  %v8000_v56 = vpack.c.bf16 %v7998_v32, %v7999_v42 }
  0xf9   : > { %7988 = vst [vmem:[#allocation10_spill] sm:$0xff] %v6901_v31  ;;  %v6903_v15 = vpop.f32.mrf.mxu0 }
  0xfb   : > { %v6912_v28 = vpop.f32.mrf.mxu0  ;;  %v6918_v30 = vpop.f32.mrf.mxu1 }
  0xfc   : > { %7989 = vst [vmem:[#allocation9_spill] sm:$0xff] %v6918_v30  ;;  %5266 = vmatmul.mubr.msk.bf16.gmra.mxu1 %vm502_vm2, %v7990_v58  ;;  %v4911_v58 = vld [vmem:[%s5649_s11 + $0x60] sm:$0xff]  }
  0xfd   : > { %5300 = vmatmul.mubr.msk.bf16.gmra.mxu0 %vm502_vm2, %v5472_v48  ;;  %v6922_v48 = vsel %vm976_vm3, %v3517_v60, %v3519_v55  ;;  %v6944_v46 = vpop.f32.mrf.mxu1  ;;  %5269 = vmatprep.mubr.msk.bf16.mxu1 %vm502_vm2, %v7992_v26  ;;  %v3109_v60 = vrot.slane %v4878_v7, 1  ;;  %v4738_v55 = vld [vmem:[%s5649_s11 + $0x54] sm:$0xe]  ;;  %v4689_v26 = vld [vmem:[%s5649_s11 + $0x6c] sm:$0xff]   ;;  %v4882_v22 = vunpack.c.l.bf16 %v4911_v58 }
  0xfe   : > { %5303 = vmatprep.mubr.msk.bf16.mxu0 %vm502_vm2, %v5473_v20  ;;  %v6937_v20 = vpop.f32.mrf.mxu0  ;;  %7991 = vst [vmem:[#allocation12_spill] sm:$0xff] %v6944_v46  ;;  %v3624_v33 = vpack.c.bf16 %v6922_v48, %v6916_v35  ;;  %v3484_v0 = vunpack.c.l.bf16 %v4738_v55  ;;  %v6972_v35 = vsel %vm371_vm1, %v3105_v63, %v3107_v43  ;;  %v6975_v48 = vsel %vm976_vm3, %v3526_v11, %v3527_v52  ;;  %v4688_v63 = vld [vmem:[%s5649_s11 + $0x68] sm:$0x1]  ;;  %v4739_v43 = vld [vmem:[%s5649_s11 + $0x60] sm:$0xe] }
  0xff   : > { %v6953_v17 = vpop.f32.mrf.mxu1  ;;  %v6986_v27 = vsel %vm371_vm1, %v3109_v60, %v3110_v10  ;;  %v4691_v11 = vld [vmem:[%s5649_s11 + $0x74] sm:$0x1]  ;;  %v3537_v10 = vrot.slane %v3009_v45, 2  ;;  %v3014_v21 = vunpack.c.l.bf16 %v4689_v26  ;;  %v3119_v32 = vrot.slane %v4882_v22, 1 }
 0x100   : > { %v6951_v62 = vpop.f32.mrf.mxu0  ;;  %7993 = vst [vmem:[#allocation11_spill] sm:$0xff] %v6953_v17  ;;  %v3536_v55 = vrot.slane %v3484_v0, 2  ;;  %v3013_v17 = vunpack.c.l.bf16 %v4688_v63  ;;  %v3015_v0 = vunpack.c.h.bf16 %v4689_v26 }
 0x101   : > { %v6961_v7 = vpop.f32.mrf.mxu1 }
 0x102   : > { %7994 = vst [vmem:[#allocation14_spill] sm:$0xff] %v6961_v7  ;;  %v6963_v59 = vpop.f32.mrf.mxu0  ;;  %v4883_v7 = vunpack.c.h.bf16 %v4911_v58  ;;  %v7037_v26 = vsel %vm976_vm3, %v3536_v55, %v3537_v10  ;;  %v3124_v55 = vrot.slane %v3014_v21, 1  ;;  %v3547_v31 = vrot.slane %v3015_v0, 2 }
 0x104   : > { %v6996_v44 = vpop.f32.mrf.mxu0 }
 0x105   : > { %5304 = vmatmul.mubr.msk.bf16.gmra.mxu0 %vm502_vm2, %v5474_v25  ;;  %v6983_v25 = vsel %vm976_vm3, %v3527_v52, %v3529_v37  ;;  %v7003_v52 = vpop.f32.mrf.mxu1  ;;  %v7996_v37 = vld [vmem:[#allocation13_spill] sm:$0xff] }
 0x106   : > { %5343 = vmatprep.mubr.msk.bf16.mxu0 %vm502_vm2, %v3623_v13  ;;  %v3115_v13 = vrot.slane %v3009_v45, 1  ;;  %7995 = vst [vmem:[#allocation15_spill] sm:$0xff] %v7003_v52  ;;  %v7997_v60 = vpack.c.bf16 %v6671_v57, %v7996_v37  ;;  %v7010_v29 = vpop.f32.mrf.mxu0  ;;  %v3485_v57 = vunpack.c.l.bf16 %v4739_v43  ;;  %v3486_v43 = vunpack.c.l.bf16 %v4740_v8  ;;  %v7043_v52 = vld [vmem:[%s5649_s11 + $0x78] sm:$0xff]  }
 0x107   : > { %v7018_v37 = vpop.f32.mrf.mxu1  ;;  %v3122_v8 = vrot.slane %v3013_v17, 1  ;;  %v4887_v21 = vunpack.c.h.bf16 %v7043_v52 }
 0x108   : > { %5270 = vmatmul.mubr.msk.bf16.gmra.mxu1 %vm502_vm2, %v7997_v60  ;;  %8001 = vst [vmem:[#allocation13_spill] sm:$0xff] %v7018_v37  ;;  %v3016_v60 = vunpack.c.l.bf16 %v4691_v11  ;;  %v7022_v46 = vpop.f32.mrf.mxu0  ;;  %v7029_v63 = vsel %vm371_vm1, %v3114_v47, %v3115_v13  ;;  %v7040_v11 = vsel %vm976_vm3, %v3537_v10, %v3539_v50  ;;  %v3120_v47 = vrot.slane %v4883_v7, 1  ;;  %v7047_v37 = vld [vmem:[%s5649_s11 + $0x80] sm:$0x1] }
 0x109   : > { %5309 = vmatprep.mubr.msk.bf16.mxu1 %vm502_vm2, %v8000_v56  ;;  %v7031_v42 = vpop.f32.mrf.mxu1  ;;  %v7034_v56 = vsel %vm371_vm1, %v3115_v13, %v3117_v49  ;;  %v3541_v58 = vrot.slane %v3485_v57, 2  ;;  %v3544_v49 = vrot.slane %v3013_v17, 2  ;;  %v3125_v10 = vrot.slane %v3015_v0, 1 }
 0x10a   : > { %8002 = vst [vmem:[#allocation8_spill] sm:$0xff] %v7031_v42  ;;  %v5141_v45 = vpop.f32.mrf.mxu0  ;;  %v3542_v42 = vrot.slane %v4883_v7, 2  ;;  %v3127_v50 = vrot.slane %v3016_v60, 1  ;;  %v3549_v36 = vrot.slane %v3016_v60, 2  ;;  %v8003_v7 = vpack.c.bf16 %v6910_v51, %v6907_v12 }
 0x10b   : > { %v7049_v13 = vpop.f32.mrf.mxu1  ;;  %v3019_v30 = vunpack.c.l.bf16 %v7047_v37  ;;  %v7070_v12 = vsel %vm371_vm1, %v3119_v32, %v3120_v47  ;;  %v7073_v51 = vsel %vm371_vm1, %v3120_v47, %v3122_v8 }
 0x10c   : > { %v1192_v22 = vpop.f32.mrf.mxu0  ;;  %v7079_v37 = vsel %vm976_vm3, %v3542_v42, %v3544_v49  ;;  %v4697_v49 = vld [vmem:[%s5649_s11 + $0x8c] sm:$0x1] }
 0x10d   : > { %5344 = vmatmul.mubr.msk.bf16.vlgmr.msra.gmra.mxu0 %vm502_vm2, %v3624_v33  ;;  %v3546_v33 = vrot.slane %v3486_v43, 2  ;;  %v5107_v57 = vpop.f32.mrf.mxu1  ;;  %v8004_v43 = vpack.c.bf16 %v6928_v2, %v6925_v5  ;;  %v7085_v5 = vsel %vm371_vm1, %v3125_v10, %v3127_v50  ;;  %v3487_v2 = vunpack.c.l.bf16 %v4741_v9 }
 0x10e   : > { %5347 = vmatprep.mubr.msk.bf16.mxu0 %vm502_vm2, %v3625_v54  ;;  %v4886_v54 = vunpack.c.l.bf16 %v7043_v52  ;;  %v810_v0 = vadd.f32 %v5107_v57, %v6822_v34  ;;  %v5142_v60 = vpop.f32.mrf.mxu0  ;;  %v7082_v34 = vsel %vm371_vm1, %v3124_v55, %v3125_v10  ;;  %v4695_v57 = vld [vmem:[%s5649_s11 + $0x84] sm:$0xff]   ;;  %v3130_v9 = vrot.slane %v4887_v21, 1 }
 0x10f   : > { %v801_v52 = vpop.f32.mrf.mxu1 }
 0x110   : > { %5310 = vmatmul.mubr.msk.bf16.vlgmr.msra.gmra.mxu1 %vm502_vm2, %v8003_v7  ;;  %v7076_v7 = vsel %vm976_vm3, %v3541_v58, %v3542_v42  ;;  %v7088_v32 = vadd.f32 %v5141_v45, %v810_v0  ;;  %v802_v47 = vadd.f32 %v801_v52, %v6828_v41  ;;  %v1195_v8 = vpop.f32.mrf.mxu0  ;;  %v7092_v58 = vsel %vm976_vm3, %v3546_v33, %v3547_v31  ;;  %v4742_v52 = vld [vmem:[%s5649_s11 + $0x84] sm:$0xe] }
 0x111   : > { %5313 = vmatprep.mubr.msk.bf16.mxu1 %vm502_vm2, %v8004_v43  ;;  %v7095_v42 = vsel %vm976_vm3, %v3547_v31, %v3549_v36  ;;  %v5108_v55 = vpop.f32.mrf.mxu1  ;;  %v3129_v50 = vrot.slane %v4886_v54, 1  ;;  %v3132_v43 = vrot.slane %v3019_v30, 1  ;;  %v8005_v33 = vpack.c.bf16 %v6983_v25, %v6975_v48 }
 0x112   : > { %v7100_v45 = vadd.f32 %v1192_v22, %v802_v47  ;;  %v813_v41 = vadd.f32 %v5108_v55, %v6833_v14  ;;  %v5145_v0 = vpop.f32.mrf.mxu0  ;;  %v3020_v36 = vunpack.c.l.bf16 %v4695_v57  ;;  %v3021_v31 = vunpack.c.h.bf16 %v4695_v57 }
 0x113   : > { %v804_v17 = vpop.f32.mrf.mxu1  ;;  %v8006_v54 = vpack.c.bf16 %v6999_v19, %v6992_v18  ;;  %v3629_v14 = vpack.c.bf16 %v7079_v37, %v7076_v7  ;;  %v3022_v25 = vunpack.c.l.bf16 %v4697_v49  ;;  %v3552_v18 = vrot.slane %v4887_v21, 2  ;;  %v4913_v19 = vld [vmem:[%s5649_s11 + $0x90] sm:$0xff]  }
 0x114   : > { %v7118_v47 = vadd.f32 %v5142_v60, %v813_v41  ;;  %v805_v57 = vadd.f32 %v804_v17, %v6841_v16  ;;  %v1208_v55 = vpop.f32.mrf.mxu0  ;;  %v8007_v7 = vpack.c.bf16 %v6972_v35, %v6969_v3  ;;  %v7128_v37 = vsel %vm371_vm1, %v3129_v50, %v3130_v9  ;;  %v4743_v16 = vld [vmem:[%s5649_s11 + $0x90] sm:$0xe] }
 0x115   : > { %5348 = vmatmul.mubr.msk.bf16.gmra.mxu0 %vm502_vm2, %v8005_v33  ;;  %v3551_v33 = vrot.slane %v3487_v2, 2  ;;  %v5111_v10 = vpop.f32.mrf.mxu1  ;;  %v7131_v49 = vsel %vm371_vm1, %v3130_v9, %v3132_v43  ;;  %v3554_v60 = vrot.slane %v3019_v30, 2  ;;  %v3488_v41 = vunpack.c.l.bf16 %v4742_v52 }
 0x116   : > { %5351 = vmatprep.mubr.msk.bf16.mxu0 %vm502_vm2, %v8006_v54  ;;  %v4700_v54 = vld [vmem:[%s5649_s11 + $0x98] sm:$0x1]  ;;  %v7134_v17 = vadd.f32 %v1195_v8, %v805_v57  ;;  %v826_v21 = vadd.f32 %v5111_v10, %v6855_v61  ;;  %v5146_v2 = vpop.f32.mrf.mxu0  ;;  %v8008_v22 = vpack.c.bf16 %v6989_v6, %v6986_v27  ;;  %v3134_v3 = vrot.slane %v3020_v36, 1 }
 0x117   : > { %v3135_v35 = vrot.slane %v3021_v31, 1  ;;  %v817_v50 = vpop.f32.mrf.mxu1  ;;  %v4890_v48 = vunpack.c.l.bf16 %v4913_v19  ;;  %v4891_v9 = vunpack.c.h.bf16 %v4913_v19  ;;  %v3025_v43 = vunpack.c.l.bf16 %v4700_v54 }
 0x118   : > { %5314 = vmatmul.mubr.msk.bf16.gmra.mxu1 %vm502_vm2, %v8007_v7  ;;  %v3137_v7 = vrot.slane %v3022_v25, 1  ;;  %v7141_v30 = vadd.f32 %v5145_v0, %v826_v21  ;;  %v818_v8 = vadd.f32 %v817_v50, %v6862_v53  ;;  %v1211_v61 = vpop.f32.mrf.mxu0  ;;  %v3209_v10 = vpack.c.bf16 %v7131_v49, %v7128_v37  ;;  %v4701_v50 = vld [vmem:[%s5649_s11 + $0x9c] sm:$0xff]  }
 0x119   : > { %5317 = vmatprep.mubr.msk.bf16.mxu1 %vm502_vm2, %v8008_v22  ;;  %v3489_v27 = vunpack.c.l.bf16 %v4743_v16  ;;  %v5112_v6 = vpop.f32.mrf.mxu1  ;;  %v3553_v36 = vsel %vm976_vm3, %v3551_v33, %v3552_v18  ;;  %v3555_v52 = vsel %vm976_vm3, %v3552_v18, %v3554_v60  ;;  %v3556_v22 = vrot.slane %v3488_v41, 2  ;;  %v7160_v33 = vld [vmem:[%s5649_s11 + $0xa4] sm:$0x1] }
 0x11a   : > { %v3557_v57 = vrot.slane %v3021_v31, 2  ;;  %v7148_v19 = vadd.f32 %v1208_v55, %v818_v8  ;;  %v829_v0 = vadd.f32 %v5112_v6, %v6875_v4  ;;  %v5149_v54 = vpop.f32.mrf.mxu0  ;;  %v8009_v53 = vpack.c.bf16 %v7040_v11, %v7037_v26 }
 0x11b   : > { %v7156_v21 = vsel %vm371_vm1, %v3134_v3, %v3135_v35  ;;  %v3559_v16 = vrot.slane %v3022_v25, 2  ;;  %v820_v18 = vpop.f32.mrf.mxu1  ;;  %v7164_v31 = vsel %vm371_vm1, %v3135_v35, %v3137_v7  ;;  %v3139_v4 = vrot.slane %v4890_v48, 1 }
 0x11c   : > { %v3140_v55 = vrot.slane %v4891_v9, 1  ;;  %v3142_v60 = vrot.slane %v3025_v43, 1  ;;  %v7166_v26 = vadd.f32 %v5146_v2, %v829_v0  ;;  %v821_v11 = vadd.f32 %v820_v18, %v6887_v24  ;;  %v1224_v41 = vpop.f32.mrf.mxu0  ;;  %v4706_v18 = vld [vmem:[%s5649_s11 + $0xb0] sm:$0x1] }
 0x11d   : > { %5352 = vmatmul.mubr.msk.bf16.gmra.mxu0 %vm502_vm2, %v8009_v53  ;;  %v3561_v3 = vrot.slane %v3489_v27, 2  ;;  %v3562_v25 = vrot.slane %v4891_v9, 2  ;;  %v5115_v8 = vpop.f32.mrf.mxu1  ;;  %v8010_v6 = vpack.c.bf16 %v7034_v56, %v7029_v63  ;;  %v3026_v35 = vunpack.c.l.bf16 %v4701_v50  ;;  %v4744_v53 = vld [vmem:[%s5649_s11 + $0x9c] sm:$0xe] }
 0x11e   : > { %5355 = vmatprep.mubr.msk.bf16.mxu0 %vm502_vm2, %v3629_v14  ;;  %v3564_v14 = vrot.slane %v3025_v43, 2  ;;  %v3027_v7 = vunpack.c.h.bf16 %v4701_v50  ;;  %v3028_v48 = vunpack.c.l.bf16 %v7160_v33  ;;  %v7175_v2 = vadd.f32 %v1211_v61, %v821_v11  ;;  %v5150_v27 = vpop.f32.mrf.mxu0  ;;  %v4745_v11 = vld [vmem:[%s5649_s11 + $0xa8] sm:$0xe] }
 0x11f   : > { %v842_v24 = vadd.f32 %v5115_v8, %v6903_v15  ;;  %v8011_v9 = vpack.c.bf16 %v7073_v51, %v7070_v12  ;;  %v3631_v63 = vpack.c.bf16 %v3555_v52, %v3553_v36  ;;  %v3210_v56 = vpack.c.bf16 %v7164_v31, %v7156_v21  ;;  %v833_v43 = vpop.f32.mrf.mxu1  ;;  %v4914_v12 = vld [vmem:[%s5649_s11 + $0xa8] sm:$0xff]  }
 0x120   : > { %5318 = vmatmul.mubr.msk.bf16.gmra.mxu1 %vm502_vm2, %v8010_v6  ;;  %v7185_v0 = vsel %vm976_vm3, %v3556_v22, %v3557_v57  ;;  %v7188_v61 = vsel %vm976_vm3, %v3557_v57, %v3559_v16  ;;  %v7191_v15 = vsel %vm371_vm1, %v3139_v4, %v3140_v55  ;;  %v7194_v50 = vsel %vm371_vm1, %v3140_v55, %v3142_v60  ;;  %v1227_v52 = vpop.f32.mrf.mxu0 }
 0x121   : > { %5321 = vmatprep.mubr.msk.bf16.mxu1 %vm502_vm2, %v8011_v9  ;;  %v7197_v51 = vadd.f32 %v5149_v54, %v842_v24  ;;  %v834_v36 = vadd.f32 %v833_v43, %v6912_v28  ;;  %v7201_v33 = vsel %vm976_vm3, %v3561_v3, %v3562_v25  ;;  %v3490_v22 = vunpack.c.l.bf16 %v4744_v53  ;;  %v5116_v57 = vpop.f32.mrf.mxu1 }
 0x122   : > { %v3565_v16 = vsel %vm976_vm3, %v3562_v25, %v3564_v14  ;;  %v3144_v4 = vrot.slane %v3026_v35, 1  ;;  %v3145_v8 = vrot.slane %v3027_v7, 1  ;;  %v3147_v6 = vrot.slane %v3028_v48, 1  ;;  %v5153_v60 = vpop.f32.mrf.mxu0 }
 0x123   : > { %v7206_v55 = vadd.f32 %v1224_v41, %v834_v36  ;;  %v845_v54 = vadd.f32 %v5116_v57, %v6937_v20  ;;  %v8012_v28 = vpack.c.bf16 %v7095_v42, %v7092_v58  ;;  %v4894_v3 = vunpack.c.l.bf16 %v4914_v12  ;;  %v836_v24 = vpop.f32.mrf.mxu1  ;;  %v4707_v36 = vld [vmem:[%s5649_s11 + $0xb4] sm:$0xff]  }
 0x124   : > { %v4895_v53 = vunpack.c.h.bf16 %v4914_v12  ;;  %v3632_v25 = vpack.c.bf16 %v7188_v61, %v7185_v0  ;;  %v3211_v41 = vpack.c.bf16 %v7194_v50, %v7191_v15  ;;  %v3031_v14 = vunpack.c.l.bf16 %v4706_v18  ;;  %v1240_v42 = vpop.f32.mrf.mxu0  ;;  %v4715_v50 = vld [vmem:[%s5649_s11 + $0xd4] sm:$0x1] }
 0x125   : > { %5356 = vmatmul.mubr.msk.bf16.gmra.mxu0 %vm502_vm2, %v8012_v28  ;;  %v3491_v20 = vunpack.c.l.bf16 %v4745_v11  ;;  %v7218_v35 = vadd.f32 %v5150_v27, %v845_v54  ;;  %v837_v58 = vadd.f32 %v836_v24, %v6951_v62  ;;  %v3566_v9 = vrot.slane %v3490_v22, 2  ;;  %v5119_v12 = vpop.f32.mrf.mxu1  ;;  %v4746_v11 = vld [vmem:[%s5649_s11 + $0xb4] sm:$0xe] }
 0x126   : > { %5359 = vmatprep.mubr.msk.bf16.mxu0 %vm502_vm2, %v3631_v63  ;;  %v3567_v43 = vrot.slane %v3027_v7, 2  ;;  %v8013_v63 = vpack.c.bf16 %v7085_v5, %v7082_v34  ;;  %v3633_v0 = vpack.c.bf16 %v3565_v16, %v7201_v33  ;;  %v7227_v61 = vsel %vm371_vm1, %v3144_v4, %v3145_v8  ;;  %v5154_v22 = vpop.f32.mrf.mxu0  ;;  %v7241_v33 = vld [vmem:[%s5649_s11 + $0xbc] sm:$0x1] }
 0x127   : > { %v7230_v27 = vsel %vm371_vm1, %v3145_v8, %v3147_v6  ;;  %v3569_v62 = vrot.slane %v3028_v48, 2  ;;  %v7233_v18 = vadd.f32 %v1227_v52, %v837_v58  ;;  %v858_v7 = vadd.f32 %v5119_v12, %v6963_v59  ;;  %v849_v57 = vpop.f32.mrf.mxu1  ;;  %v4747_v6 = vld [vmem:[%s5649_s11 + $0xc0] sm:$0xe] }
 0x128   : > { %5322 = vmatmul.mubr.msk.bf16.gmra.mxu1 %vm502_vm2, %v8013_v63  ;;  %v3149_v34 = vrot.slane %v4894_v3, 1  ;;  %v3150_v5 = vrot.slane %v4895_v53, 1  ;;  %v3152_v48 = vrot.slane %v3031_v14, 1  ;;  %v3571_v52 = vrot.slane %v3491_v20, 2  ;;  %v1243_v37 = vpop.f32.mrf.mxu0 }
 0x129   : > { %5325 = vmatprep.mubr.msk.bf16.mxu1 %vm502_vm2, %v3209_v10  ;;  %v3572_v16 = vrot.slane %v4895_v53, 2  ;;  %v3574_v4 = vrot.slane %v3031_v14, 2  ;;  %v7244_v59 = vadd.f32 %v5153_v60, %v858_v7  ;;  %v850_v8 = vadd.f32 %v849_v57, %v6996_v44  ;;  %v5120_v54 = vpop.f32.mrf.mxu1  ;;  %v4915_v53 = vld [vmem:[%s5649_s11 + $0xc0] sm:$0xff]   ;;  %v4712_v14 = vld [vmem:[%s5649_s11 + $0xc8] sm:$0x1] }
 0x12a   : > { %v3212_v49 = vpack.c.bf16 %v7230_v27, %v7227_v61  ;;  %v3568_v10 = vsel %vm976_vm3, %v3566_v9, %v3567_v43  ;;  %v3570_v28 = vsel %vm976_vm3, %v3567_v43, %v3569_v62  ;;  %v3033_v3 = vunpack.c.h.bf16 %v4707_v36  ;;  %v5157_v58 = vpop.f32.mrf.mxu0 }
 0x12b   : > { %v3034_v24 = vunpack.c.l.bf16 %v7241_v33  ;;  %v3492_v20 = vunpack.c.l.bf16 %v4746_v11  ;;  %v7255_v60 = vadd.f32 %v1240_v42, %v850_v8  ;;  %v861_v44 = vadd.f32 %v5120_v54, %v7010_v29  ;;  %v852_v63 = vpop.f32.mrf.mxu1 }
 0x12c   : > { %v7260_v12 = vsel %vm371_vm1, %v3149_v34, %v3150_v5  ;;  %v3032_v9 = vunpack.c.l.bf16 %v4707_v36  ;;  %v7264_v43 = vsel %vm371_vm1, %v3150_v5, %v3152_v48  ;;  %v3573_v62 = vsel %vm976_vm3, %v3571_v52, %v3572_v16 }
 0x12d   : > { %5360 = vmatmul.mubr.msk.bf16.gmra.mxu0 %vm502_vm2, %v3632_v25  ;;  %v3575_v42 = vsel %vm976_vm3, %v3572_v16, %v3574_v4  ;;  %v3493_v7 = vunpack.c.l.bf16 %v4747_v6  ;;  %v7268_v33 = vadd.f32 %v5154_v22, %v861_v44  ;;  %v853_v29 = vadd.f32 %v852_v63, %v7022_v46  ;;  %v1256_v25 = vpop.f32.mrf.mxu0  ;;  %v5123_v57 = vpop.f32.mrf.mxu1  ;;  %v4713_v6 = vld [vmem:[%s5649_s11 + $0xcc] sm:$0xff]  }
 0x12e   : > { %5363 = vmatprep.mubr.msk.bf16.mxu0 %vm502_vm2, %v3633_v0  ;;  %v4899_v11 = vunpack.c.h.bf16 %v4915_v53  ;;  %v3037_v34 = vunpack.c.l.bf16 %v4712_v14  ;;  %v3576_v0 = vrot.slane %v3492_v20, 2  ;;  %v3577_v36 = vrot.slane %v3033_v3, 2  ;;  %v4748_v14 = vld [vmem:[%s5649_s11 + $0xcc] sm:$0xe] }
 0x12f   : > { %v3579_v5 = vrot.slane %v3034_v24, 2  ;;  %v4898_v48 = vunpack.c.l.bf16 %v4915_v53  ;;  %v7275_v52 = vadd.f32 %v1243_v37, %v853_v29  ;;  %v874_v22 = vadd.f32 %v5123_v57, %v6825_v40  ;;  %v5158_v46 = vpop.f32.mrf.mxu0 }
 0x130   : > { %5326 = vmatmul.mubr.msk.bf16.gmra.mxu1 %vm502_vm2, %v3210_v56  ;;  %v3634_v21 = vpack.c.bf16 %v3570_v28, %v3568_v10  ;;  %v3213_v31 = vpack.c.bf16 %v7264_v43, %v7260_v12  ;;  %v865_v56 = vpop.f32.mrf.mxu1  ;;  %v3635_v16 = vpack.c.bf16 %v3575_v42, %v3573_v62  ;;  %v3154_v4 = vrot.slane %v3032_v9, 1 }
 0x131   : > { %5329 = vmatprep.mubr.msk.bf16.mxu1 %vm502_vm2, %v3211_v41  ;;  %v3155_v8 = vrot.slane %v3033_v3, 1  ;;  %v3581_v37 = vrot.slane %v3493_v7, 2  ;;  %v7285_v54 = vadd.f32 %v5157_v58, %v874_v22  ;;  %v866_v40 = vadd.f32 %v865_v56, %v6830_v1  ;;  %v1259_v20 = vpop.f32.mrf.mxu0 }
 0x132   : > { %v3582_v53 = vrot.slane %v4899_v11, 2  ;;  %v3584_v15 = vrot.slane %v3037_v34, 2  ;;  %v5124_v41 = vpop.f32.mrf.mxu1  ;;  %v3157_v10 = vrot.slane %v3034_v24, 1  ;;  %v3578_v28 = vsel %vm976_vm3, %v3576_v0, %v3577_v36 }
 0x133   : > { %v3580_v44 = vsel %vm976_vm3, %v3577_v36, %v3579_v5  ;;  %v3159_v12 = vrot.slane %v4898_v48, 1  ;;  %v7292_v9 = vadd.f32 %v1256_v25, %v866_v40  ;;  %v877_v3 = vadd.f32 %v5124_v41, %v6839_v38  ;;  %v5161_v58 = vpop.f32.mrf.mxu0 }
 0x134   : > { %v3160_v1 = vrot.slane %v4899_v11, 1  ;;  %v3162_v63 = vrot.slane %v3037_v34, 1  ;;  %v868_v43 = vpop.f32.mrf.mxu1  ;;  %v3039_v62 = vunpack.c.h.bf16 %v4713_v6  ;;  %v3040_v42 = vunpack.c.l.bf16 %v4715_v50 }
 0x135   : > { %5364 = vmatmul.mubr.msk.bf16.gmra.mxu0 %vm502_vm2, %v3634_v21  ;;  %v3494_v24 = vunpack.c.l.bf16 %v4748_v14  ;;  %v7297_v7 = vadd.f32 %v5158_v46, %v877_v3  ;;  %v869_v29 = vadd.f32 %v868_v43, %v6848_v39  ;;  %v1272_v57 = vpop.f32.mrf.mxu0  ;;  %v3583_v25 = vsel %vm976_vm3, %v3581_v37, %v3582_v53 }
 0x136   : > { %5367 = vmatprep.mubr.msk.bf16.mxu0 %vm502_vm2, %v3635_v16  ;;  %v3585_v38 = vsel %vm976_vm3, %v3582_v53, %v3584_v15  ;;  %v5127_v0 = vpop.f32.mrf.mxu1  ;;  %v3156_v11 = vsel %vm371_vm1, %v3154_v4, %v3155_v8  ;;  %v3158_v34 = vsel %vm371_vm1, %v3155_v8, %v3157_v10  ;;  %v3636_v36 = vpack.c.bf16 %v3580_v44, %v3578_v28  ;;  %v8014_v8 = vld [vmem:[#allocation7_spill] sm:$0xff] }
 0x137   : > { %v3038_v5 = vunpack.c.l.bf16 %v4713_v6  ;;  %v7308_v48 = vadd.f32 %v1259_v20, %v869_v29  ;;  %v890_v39 = vadd.f32 %v5127_v0, %v6864_v23  ;;  %v5162_v22 = vpop.f32.mrf.mxu0  ;;  %v3161_v46 = vsel %vm371_vm1, %v3159_v12, %v3160_v1 }
 0x138   : > { %5330 = vmatmul.mubr.msk.bf16.gmra.mxu1 %vm502_vm2, %v3212_v49  ;;  %v3163_v21 = vsel %vm371_vm1, %v3160_v1, %v3162_v63  ;;  %v881_v61 = vpop.f32.mrf.mxu1  ;;  %v3637_v27 = vpack.c.bf16 %v3585_v38, %v3583_v25  ;;  %v3586_v49 = vrot.slane %v3494_v24, 2  ;;  %v3587_v56 = vrot.slane %v3039_v62, 2 }
 0x139   : > { %5333 = vmatprep.mubr.msk.bf16.mxu1 %vm502_vm2, %v3213_v31  ;;  %v3589_v16 = vrot.slane %v3040_v42, 2  ;;  %v7314_v4 = vadd.f32 %v5161_v58, %v890_v39  ;;  %v882_v37 = vadd.f32 %v881_v61, %v8014_v8  ;;  %v1275_v6 = vpop.f32.mrf.mxu0  ;;  %v3214_v20 = vpack.c.bf16 %v3158_v34, %v3156_v11  ;;  %v8015_v31 = vld [vmem:[#allocation5_spill] sm:$0xff]  ;;  %v8016_v58 = vld [vmem:[#allocation10_spill] sm:$0xff]  ;;  %v8018_v34 = vld [vmem:[#allocation12_spill] sm:$0xff] }
 0x13a   : > { %v5128_v40 = vpop.f32.mrf.mxu1  ;;  %v3164_v23 = vrot.slane %v3038_v5, 1  ;;  %v3165_v53 = vrot.slane %v3039_v62, 1  ;;  %v3215_v41 = vpack.c.bf16 %v3163_v21, %v3161_v46  ;;  %v3167_v10 = vrot.slane %v3040_v42, 1  ;;  %v8017_v42 = vld [vmem:[#allocation9_spill] sm:$0xff]  ;;  %v8019_v21 = vld [vmem:[#allocation11_spill] sm:$0xff] }
 0x13b   : > { %v7317_v15 = vadd.f32 %v1272_v57, %v882_v37  ;;  %v893_v50 = vadd.f32 %v5128_v40, %v8015_v31  ;;  %v5165_v14 = vpop.f32.mrf.mxu0  ;;  %v3588_v44 = vsel %vm976_vm3, %v3586_v49, %v3587_v56  ;;  %v3590_v12 = vsel %vm976_vm3, %v3587_v56, %v3589_v16  ;;  %v8020_v16 = vld [vmem:[#allocation14_spill] sm:$0xff] }
 0x13c   : > { %v884_v28 = vpop.f32.mrf.mxu1  ;;  %v3166_v62 = vsel %vm371_vm1, %v3164_v23, %v3165_v53  ;;  %v3168_v25 = vsel %vm371_vm1, %v3165_v53, %v3167_v10  ;;  %v3638_v38 = vpack.c.bf16 %v3590_v12, %v3588_v44  ;;  %v8023_v12 = vld [vmem:[#allocation8_spill] sm:$0xff] }
 0x13d   : > { %5368 = vmatmul.mubr.msk.bf16.gmra.mxu0 %vm502_vm2, %v3636_v36  ;;  %v7324_v3 = vadd.f32 %v5162_v22, %v893_v50  ;;  %v885_v1 = vadd.f32 %v884_v28, %v8016_v58  ;;  %v1288_v63 = vpop.f32.mrf.mxu0  ;;  %v3216_v22 = vpack.c.bf16 %v3168_v25, %v3166_v62 }
 0x13e   : > { %5371 = vmatprep.mubr.msk.bf16.mxu0 %vm502_vm2, %v3637_v27  ;;  %v5131_v43 = vpop.f32.mrf.mxu1 }
 0x13f   : > { %v7329_v24 = vadd.f32 %v1275_v6, %v885_v1  ;;  %v906_v29 = vadd.f32 %v5131_v43, %v8017_v42  ;;  %v5166_v57 = vpop.f32.mrf.mxu0 }
 0x140   : > { %5334 = vmatmul.mubr.msk.bf16.gmra.mxu1 %vm502_vm2, %v3214_v20  ;;  %v897_v0 = vpop.f32.mrf.mxu1  ;;  %v8021_v20 = vld [vmem:[#allocation15_spill] sm:$0xff] }
 0x141   : > { %5337 = vmatprep.mubr.msk.bf16.mxu1 %vm502_vm2, %v3215_v41  ;;  %v7334_v11 = vadd.f32 %v5165_v14, %v906_v29  ;;  %v898_v36 = vadd.f32 %v897_v0, %v8018_v34  ;;  %v1291_v5 = vpop.f32.mrf.mxu0  ;;  %v8022_v14 = vld [vmem:[#allocation13_spill] sm:$0xff] }
 0x142   : > { %v5132_v39 = vpop.f32.mrf.mxu1 }
 0x143   : > { %v7337_v46 = vadd.f32 %v1288_v63, %v898_v36  ;;  %v909_v61 = vadd.f32 %v5132_v39, %v8019_v21  ;;  %v5169_v27 = vpop.f32.mrf.mxu0 }
 0x144   : > { %v900_v49 = vpop.f32.mrf.mxu1 }
 0x145   : > { %5372 = vmatmul.mubr.msk.bf16.gmra.mxu0 %vm502_vm2, %v3638_v38  ;;  %v7341_v56 = vadd.f32 %v5166_v57, %v909_v61  ;;  %v901_v8 = vadd.f32 %v900_v49, %v8020_v16  ;;  %v1304_v37 = vpop.f32.mrf.mxu0 }
 0x146   : > { %v5135_v6 = vpop.f32.mrf.mxu1 }
 0x147   : > { %v7345_v40 = vadd.f32 %v1291_v5, %v901_v8  ;;  %v922_v23 = vadd.f32 %v5135_v6, %v8021_v20  ;;  %v5170_v53 = vpop.f32.mrf.mxu0 }
 0x148   : > { %5338 = vmatmul.mubr.msk.bf16.gmra.mxu1 %vm502_vm2, %v3216_v22  ;;  %v913_v31 = vpop.f32.mrf.mxu1 }
 0x149   : > { %v7348_v50 = vadd.f32 %v5169_v27, %v922_v23  ;;  %v914_v41 = vadd.f32 %v913_v31, %v8022_v14  ;;  %v1307_v10 = vpop.f32.mrf.mxu0 }
 0x14a   : > { %v5136_v28 = vpop.f32.mrf.mxu1 }
 0x14b   : > { %v7351_v44 = vadd.f32 %v1304_v37, %v914_v41  ;;  %v925_v58 = vadd.f32 %v5136_v28, %v8023_v12  ;;  %v5209_v1 = vpop.f32.mrf.mxu0 }
 0x14c   : > { %v916_v63 = vpop.f32.mrf.mxu1 }
 0x14d   : > { %v7354_v43 = vadd.f32 %v5170_v53, %v925_v58  ;;  %v917_v62 = vadd.f32 %v916_v63, %v7049_v13  ;;  %v2037_v42 = vpop.f32.mrf.mxu0 }
 0x14e   : > { %v5175_v29 = vpop.f32.mrf.mxu1 }
 0x14f   : > { %v7357_v57 = vadd.f32 %v1307_v10, %v917_v62  ;;  %v1648_v25 = vadd.f32 %v5175_v29, %v7088_v32  ;;  %v5210_v38 = vpop.f32.mrf.mxu0 }
 0x150   : > { %v1519_v0 = vpop.f32.mrf.mxu1 }
 0x151   : > { %v7360_v34 = vadd.f32 %v5209_v1, %v1648_v25  ;;  %v1646_v36 = vadd.f32 %v1519_v0, %v7100_v45  ;;  %v2040_v5 = vpop.f32.mrf.mxu0 }
 0x152   : > { %v5176_v39 = vpop.f32.mrf.mxu1 }
 0x153   : > { %v7363_v22 = vadd.f32 %v2037_v42, %v1646_v36  ;;  %v1649_v21 = vadd.f32 %v5176_v39, %v7118_v47  ;;  %v5213_v61 = vpop.f32.mrf.mxu0 }
 0x154   : > { %v1522_v13 = vpop.f32.mrf.mxu1 }
 0x155   : > { %v7366_v27 = vadd.f32 %v5210_v38, %v1649_v21  ;;  %v1647_v49 = vadd.f32 %v1522_v13, %v7134_v17  ;;  %v2053_v16 = vpop.f32.mrf.mxu0 }
 0x156   : > { %v5179_v32 = vpop.f32.mrf.mxu1 }
 0x157   : > { %v7369_v8 = vadd.f32 %v2040_v5, %v1647_v49  ;;  %v1652_v37 = vadd.f32 %v5179_v32, %v7141_v30  ;;  %v5214_v6 = vpop.f32.mrf.mxu0 }
 0x158   : > { %v1535_v45 = vpop.f32.mrf.mxu1 }
 0x159   : > { %v7372_v20 = vadd.f32 %v5213_v61, %v1652_v37  ;;  %v1650_v23 = vadd.f32 %v1535_v45, %v7148_v19  ;;  %v2056_v53 = vpop.f32.mrf.mxu0 }
 0x15a   : > { %v5180_v47 = vpop.f32.mrf.mxu1 }
 0x15b   : > { %v7375_v31 = vadd.f32 %v2053_v16, %v1650_v23  ;;  %v1653_v14 = vadd.f32 %v5180_v47, %v7166_v26 }
 0x15c   : > { %v1538_v17 = vpop.f32.mrf.mxu1 }
 0x15d   : > { %v5217_v41 = vpop.f32.mrf.mxu0  ;;  %v7378_v10 = vadd.f32 %v5214_v6, %v1653_v14  ;;  %v1651_v28 = vadd.f32 %v1538_v17, %v7175_v2 }
 0x15e   : > { %v5183_v30 = vpop.f32.mrf.mxu1 }
 0x15f   : > { %v2069_v12 = vpop.f32.mrf.mxu0  ;;  %v7381_v58 = vadd.f32 %v2056_v53, %v1651_v28  ;;  %v1656_v1 = vadd.f32 %v5183_v30, %v7197_v51 }
 0x160   : > { %v1551_v19 = vpop.f32.mrf.mxu1 }
 0x161   : > { %v5218_v63 = vpop.f32.mrf.mxu0  ;;  %v7384_v62 = vadd.f32 %v5217_v41, %v1656_v1  ;;  %v1654_v42 = vadd.f32 %v1551_v19, %v7206_v55 }
 0x162   : > { %v5184_v26 = vpop.f32.mrf.mxu1 }
 0x163   : > { %v2072_v29 = vpop.f32.mrf.mxu0  ;;  %v7387_v25 = vadd.f32 %v2069_v12, %v1654_v42  ;;  %v1657_v38 = vadd.f32 %v5184_v26, %v7218_v35 }
 0x164   : > { %v1554_v2 = vpop.f32.mrf.mxu1 }
 0x165   : > { %v5221_v0 = vpop.f32.mrf.mxu0  ;;  %v7390_v36 = vadd.f32 %v5218_v63, %v1657_v38  ;;  %v1655_v5 = vadd.f32 %v1554_v2, %v7233_v18 }
 0x166   : > { %v5187_v51 = vpop.f32.mrf.mxu1 }
 0x167   : > { %v2085_v39 = vpop.f32.mrf.mxu0  ;;  %v7393_v21 = vadd.f32 %v2072_v29, %v1655_v5  ;;  %v1660_v61 = vadd.f32 %v5187_v51, %v7244_v59 }
 0x168   : > { %v1567_v55 = vpop.f32.mrf.mxu1 }
 0x169   : > { %8024 = vst [vmem:[#allocation6_spill] sm:$0xff] %v7393_v21  ;;  %v5222_v13 = vpop.f32.mrf.mxu0  ;;  %v7396_v49 = vadd.f32 %v5221_v0, %v1660_v61  ;;  %v1658_v16 = vadd.f32 %v1567_v55, %v7255_v60 }
 0x16a   : > { %v5188_v35 = vpop.f32.mrf.mxu1 }
 0x16b   : > { %v2088_v32 = vpop.f32.mrf.mxu0  ;;  %v7399_v37 = vadd.f32 %v2085_v39, %v1658_v16  ;;  %v1661_v6 = vadd.f32 %v5188_v35, %v7268_v33 }
 0x16c   : > { %v1570_v18 = vpop.f32.mrf.mxu1 }
 0x16d   : > { %v5225_v45 = vpop.f32.mrf.mxu0  ;;  %v7402_v23 = vadd.f32 %v5222_v13, %v1661_v6  ;;  %v1659_v53 = vadd.f32 %v1570_v18, %v7275_v52 }
 0x16e   : > { %v5191_v59 = vpop.f32.mrf.mxu1 }
 0x16f   : > { %v2101_v47 = vpop.f32.mrf.mxu0  ;;  %v7405_v14 = vadd.f32 %v2088_v32, %v1659_v53  ;;  %v1664_v41 = vadd.f32 %v5191_v59, %v7285_v54 }
 0x170   : > { %v1583_v60 = vpop.f32.mrf.mxu1 }
 0x171   : > { %v5226_v17 = vpop.f32.mrf.mxu0  ;;  %v7408_v28 = vadd.f32 %v5225_v45, %v1664_v41  ;;  %v1662_v12 = vadd.f32 %v1583_v60, %v7292_v9 }
 0x172   : > { %v5192_v33 = vpop.f32.mrf.mxu1 }
 0x173   : > { %v2104_v30 = vpop.f32.mrf.mxu0  ;;  %v7411_v1 = vadd.f32 %v2101_v47, %v1662_v12  ;;  %v1665_v63 = vadd.f32 %v5192_v33, %v7297_v7 }
 0x174   : > { %v1586_v52 = vpop.f32.mrf.mxu1 }
 0x175   : > { %v5229_v19 = vpop.f32.mrf.mxu0  ;;  %v7414_v42 = vadd.f32 %v5226_v17, %v1665_v63  ;;  %v1663_v29 = vadd.f32 %v1586_v52, %v7308_v48 }
 0x176   : > { %v5195_v54 = vpop.f32.mrf.mxu1 }
 0x177   : > { %v2117_v26 = vpop.f32.mrf.mxu0  ;;  %v7417_v38 = vadd.f32 %v2104_v30, %v1663_v29  ;;  %v1668_v0 = vadd.f32 %v5195_v54, %v7314_v4 }
 0x178   : > { %v1599_v9 = vpop.f32.mrf.mxu1 }
 0x179   : > { %v5230_v2 = vpop.f32.mrf.mxu0  ;;  %v7420_v5 = vadd.f32 %v5229_v19, %v1668_v0  ;;  %v1666_v39 = vadd.f32 %v1599_v9, %v7317_v15 }
 0x17a   : > { %v5196_v7 = vpop.f32.mrf.mxu1 }
 0x17b   : > { %v2120_v51 = vpop.f32.mrf.mxu0  ;;  %v7423_v61 = vadd.f32 %v2117_v26, %v1666_v39  ;;  %v1669_v13 = vadd.f32 %v5196_v7, %v7324_v3 }
 0x17c   : > { %v1602_v48 = vpop.f32.mrf.mxu1 }
 0x17d   : > { %v5233_v55 = vpop.f32.mrf.mxu0  ;;  %v7426_v16 = vadd.f32 %v5230_v2, %v1669_v13  ;;  %v1667_v32 = vadd.f32 %v1602_v48, %v7329_v24 }
 0x17e   : > { %v5199_v4 = vpop.f32.mrf.mxu1 }
 0x17f   : > { %v2133_v35 = vpop.f32.mrf.mxu0  ;;  %v7429_v6 = vadd.f32 %v2120_v51, %v1667_v32  ;;  %v1672_v45 = vadd.f32 %v5199_v4, %v7334_v11 }
 0x180   : > { %v1615_v15 = vpop.f32.mrf.mxu1 }
 0x181   : > { %v5234_v18 = vpop.f32.mrf.mxu0  ;;  %v7432_v53 = vadd.f32 %v5233_v55, %v1672_v45  ;;  %v1670_v47 = vadd.f32 %v1615_v15, %v7337_v46 }
 0x182   : > { %v5200_v3 = vpop.f32.mrf.mxu1 }
 0x183   : > { %v2136_v59 = vpop.f32.mrf.mxu0  ;;  %v7435_v41 = vadd.f32 %v2133_v35, %v1670_v47  ;;  %v1673_v17 = vadd.f32 %v5200_v3, %v7341_v56 }
 0x184   : > { %v1618_v24 = vpop.f32.mrf.mxu1 }
 0x185   : > { %v5237_v60 = vpop.f32.mrf.mxu0  ;;  %v7438_v12 = vadd.f32 %v5234_v18, %v1673_v17  ;;  %v1671_v30 = vadd.f32 %v1618_v24, %v7345_v40 }
 0x186   : > { %v5203_v11 = vpop.f32.mrf.mxu1 }
 0x187   : > { %v2149_v33 = vpop.f32.mrf.mxu0  ;;  %v7441_v63 = vadd.f32 %v2136_v59, %v1671_v30  ;;  %v1676_v19 = vadd.f32 %v5203_v11, %v7348_v50 }
 0x188   : > { %v1631_v46 = vpop.f32.mrf.mxu1 }
 0x189   : > { %v5238_v52 = vpop.f32.mrf.mxu0  ;;  %v7444_v29 = vadd.f32 %v5237_v60, %v1676_v19  ;;  %v1674_v26 = vadd.f32 %v1631_v46, %v7351_v44 }
 0x18a   : > { %v5204_v56 = vpop.f32.mrf.mxu1 }
 0x18b   : > { %v2152_v54 = vpop.f32.mrf.mxu0  ;;  %v7447_v0 = vadd.f32 %v2149_v33, %v1674_v26  ;;  %v1677_v2 = vadd.f32 %v5204_v56, %v7354_v43 }
 0x18c   : > { %v1634_v40 = vpop.f32.mrf.mxu1 }
 0x18d   : > { %v7450_v9 = vpop.f32.mrf.mxu0  ;;  %v7452_v39 = vadd.f32 %v5238_v52, %v1677_v2  ;;  %v1675_v51 = vadd.f32 %v1634_v40, %v7357_v57 }
 0x18e   : > { %v7457_v7 = vpop.f32.mrf.mxu1 }
 0x18f   : > { %v7455_v50 = vpop.f32.mrf.mxu0  ;;  %v7459_v13 = vadd.f32 %v2152_v54, %v1675_v51 }
 0x190   : > { %v7463_v55 = vpop.f32.mrf.mxu1 }
 0x191   : > { %v7461_v44 = vpop.f32.mrf.mxu0 }
 0x192   : > { %v7467_v43 = vpop.f32.mrf.mxu1 }
 0x193   : > { %v7465_v48 = vpop.f32.mrf.mxu0 }
 0x194   : > { %v7471_v35 = vpop.f32.mrf.mxu1 }
 0x195   : > { %v7469_v32 = vpop.f32.mrf.mxu0 }
 0x196   : > { %v7475_v57 = vpop.f32.mrf.mxu1 }
 0x197   : > { %v7473_v4 = vpop.f32.mrf.mxu0 }
 0x198   : > { %v7479_v18 = vpop.f32.mrf.mxu1 }
 0x199   : > { %v7477_v45 = vpop.f32.mrf.mxu0 }
 0x19a   : > { %v7483_v47 = vpop.f32.mrf.mxu1 }
 0x19b   : > { %v7481_v15 = vpop.f32.mrf.mxu0 }
 0x19c   : > { %v7485_v3 = vpop.f32.mrf.mxu1 }
 0x19d   : > { %v5285_v59 = vpop.f32.mrf.mxu0 }
 0x19e   : > { %v5251_v60 = vpop.f32.mrf.mxu1 }
 0x19f   : > { %v7487_v17 = vpop.f32.mrf.mxu0  ;;  %v2596_v24 = vadd.f32 %v5251_v60, %v7384_v62 }
 0x1a0   : > { %v7490_v33 = vpop.f32.mrf.mxu1 }
 0x1a1   : > { %v5286_v30 = vpop.f32.mrf.mxu0  ;;  %v7492_v11 = vadd.f32 %v5285_v59, %v2596_v24 }
 0x1a2   : > { %v5252_v52 = vpop.f32.mrf.mxu1 }
 0x1a3   : > { %8025 = vst [vmem:[#allocation7_spill] sm:$0xff] %v7492_v11  ;;  %v7494_v19 = vpop.f32.mrf.mxu0  ;;  %v2597_v46 = vadd.f32 %v5252_v52, %v7390_v36 }
 0x1a4   : > { %8026 = vst [vmem:[#allocation5_spill] sm:$0xff] %v7494_v19  ;;  %v7497_v54 = vpop.f32.mrf.mxu1 }
 0x1a5   : > { %v5289_v26 = vpop.f32.mrf.mxu0  ;;  %8027 = vst [vmem:[#allocation10_spill] sm:$0xff] %v7497_v54  ;;  %v7499_v56 = vadd.f32 %v5286_v30, %v2597_v46 }
 0x1a6   : > { %v5255_v40 = vpop.f32.mrf.mxu1 }
 0x1a7   : > { %8028 = vst [vmem:[#allocation9_spill] sm:$0xff] %v7499_v56  ;;  %v2834_v2 = vpop.f32.mrf.mxu0  ;;  %v2600_v51 = vadd.f32 %v5255_v40, %v7396_v49 }
 0x1a8   : > { %v2507_v60 = vpop.f32.mrf.mxu1 }
 0x1a9   : > { %v5290_v62 = vpop.f32.mrf.mxu0  ;;  %v7502_v21 = vadd.f32 %v5289_v26, %v2600_v51  ;;  %v2598_v59 = vadd.f32 %v2507_v60, %v7399_v37 }
 0x1aa   : > { %v5256_v11 = vpop.f32.mrf.mxu1 }
 0x1ab   : > { %v2837_v24 = vpop.f32.mrf.mxu0  ;;  %v7505_v19 = vadd.f32 %v2834_v2, %v2598_v59  ;;  %v2601_v36 = vadd.f32 %v5256_v11, %v7402_v23 }
 0x1ac   : > { %v2510_v54 = vpop.f32.mrf.mxu1 }
 0x1ad   : > { %v5293_v52 = vpop.f32.mrf.mxu0  ;;  %v7508_v30 = vadd.f32 %v5290_v62, %v2601_v36  ;;  %v2599_v46 = vadd.f32 %v2510_v54, %v7405_v14 }
 0x1ae   : > { %v5259_v49 = vpop.f32.mrf.mxu1 }
 0x1af   : > { %v2850_v56 = vpop.f32.mrf.mxu0  ;;  %v7511_v40 = vadd.f32 %v2837_v24, %v2599_v46  ;;  %v2604_v26 = vadd.f32 %v5259_v49, %v7408_v28 }
 0x1b0   : > { %v2523_v37 = vpop.f32.mrf.mxu1 }
 0x1b1   : > { %v5294_v51 = vpop.f32.mrf.mxu0  ;;  %v7514_v60 = vadd.f32 %v5293_v52, %v2604_v26  ;;  %v2602_v2 = vadd.f32 %v2523_v37, %v7411_v1 }
 0x1b2   : > { %v5260_v23 = vpop.f32.mrf.mxu1 }
 0x1b3   : > { %v2853_v59 = vpop.f32.mrf.mxu0  ;;  %v7517_v11 = vadd.f32 %v2850_v56, %v2602_v2  ;;  %v2605_v62 = vadd.f32 %v5260_v23, %v7414_v42 }
 0x1b4   : > { %v2526_v14 = vpop.f32.mrf.mxu1 }
 0x1b5   : > { %v5297_v36 = vpop.f32.mrf.mxu0  ;;  %v7520_v54 = vadd.f32 %v5294_v51, %v2605_v62  ;;  %v2603_v24 = vadd.f32 %v2526_v14, %v7417_v38 }
 0x1b6   : > { %v5263_v28 = vpop.f32.mrf.mxu1 }
 0x1b7   : > { %v2866_v46 = vpop.f32.mrf.mxu0  ;;  %v7523_v49 = vadd.f32 %v2853_v59, %v2603_v24  ;;  %v2608_v52 = vadd.f32 %v5263_v28, %v7420_v5 }
 0x1b8   : > { %v2539_v1 = vpop.f32.mrf.mxu1 }
 0x1b9   : > { %v5298_v26 = vpop.f32.mrf.mxu0  ;;  %v7526_v37 = vadd.f32 %v5297_v36, %v2608_v52  ;;  %v2606_v56 = vadd.f32 %v2539_v1, %v7423_v61 }
 0x1ba   : > { %v5264_v42 = vpop.f32.mrf.mxu1 }
 0x1bb   : > { %v2869_v2 = vpop.f32.mrf.mxu0  ;;  %v7529_v23 = vadd.f32 %v2866_v46, %v2606_v56  ;;  %v2609_v51 = vadd.f32 %v5264_v42, %v7426_v16 }
 0x1bc   : > { %v2542_v38 = vpop.f32.mrf.mxu1 }
 0x1bd   : > { %v5301_v62 = vpop.f32.mrf.mxu0  ;;  %v7532_v14 = vadd.f32 %v5298_v26, %v2609_v51  ;;  %v2607_v59 = vadd.f32 %v2542_v38, %v7429_v6 }
 0x1be   : > { %v5267_v5 = vpop.f32.mrf.mxu1 }
 0x1bf   : > { %v2882_v24 = vpop.f32.mrf.mxu0  ;;  %v7535_v28 = vadd.f32 %v2869_v2, %v2607_v59  ;;  %v2612_v36 = vadd.f32 %v5267_v5, %v7432_v53 }
 0x1c0   : > { %v2555_v61 = vpop.f32.mrf.mxu1 }
 0x1c1   : > { %v5302_v52 = vpop.f32.mrf.mxu0  ;;  %v7538_v1 = vadd.f32 %v5301_v62, %v2612_v36  ;;  %v2610_v46 = vadd.f32 %v2555_v61, %v7435_v41 }
 0x1c2   : > { %v5268_v16 = vpop.f32.mrf.mxu1 }
 0x1c3   : > { %v2885_v56 = vpop.f32.mrf.mxu0  ;;  %v7541_v42 = vadd.f32 %v2882_v24, %v2610_v46  ;;  %v2613_v26 = vadd.f32 %v5268_v16, %v7438_v12  ;;  %v2588_v24 = vadd.f32 %v7457_v7, %v7360_v34  ;;  %v2589_v34 = vadd.f32 %v7467_v43, %v7366_v27 }
 0x1c4   : > { %v2558_v6 = vpop.f32.mrf.mxu1 }
 0x1c5   : > { %v5305_v51 = vpop.f32.mrf.mxu0  ;;  %v7544_v38 = vadd.f32 %v5302_v52, %v2613_v26  ;;  %v2611_v2 = vadd.f32 %v2558_v6, %v7441_v63  ;;  %v2586_v63 = vadd.f32 %v7463_v55, %v7363_v22  ;;  %v2915_v6 = vadd.f32 %v7450_v9, %v2588_v24  ;;  %v7574_v9 = vld [vmem:[%s7832_s2] ss:$0 sm:$0xff] }
 0x1c6   : > { %v2916_v43 = vadd.f32 %v7461_v44, %v2589_v34  ;;  %v2590_v24 = vadd.f32 %v7479_v18, %v7375_v31  ;;  %v2593_v44 = vadd.f32 %v7483_v47, %v7378_v10  ;;  %v2591_v31 = vadd.f32 %v7485_v3, %v7381_v58 }
 0x1c7   : > { %v2898_v59 = vpop.f32.mrf.mxu0  ;;  %v7547_v5 = vadd.f32 %v2885_v56, %v2611_v2  ;;  %v2913_v22 = vadd.f32 %v7455_v50, %v2586_v63  ;;  %v2592_v50 = vadd.f32 %v7475_v57, %v7372_v20  ;;  %v2594_v57 = vadd.f32 %v7490_v33, %v7387_v25 }
 0x1c8   : > { %v5271_v53 = vpop.f32.mrf.mxu1  ;;  %v2920_v3 = vadd.f32 %v7477_v45, %v2593_v44 }
 0x1c9   : > { %v2616_v62 = vadd.f32 %v5271_v53, %v7444_v29  ;;  %v5306_v36 = vpop.f32.mrf.mxu0  ;;  %v2587_v53 = vadd.f32 %v7471_v35, %v7369_v8  ;;  %v2919_v10 = vadd.f32 %v7469_v32, %v2592_v50  ;;  %v2918_v32 = vadd.f32 %v7481_v15, %v2591_v31 }
 0x1ca   : > { %v2571_v41 = vpop.f32.mrf.mxu1 }
 0x1cb   : > { %v7552_v61 = vadd.f32 %v5305_v51, %v2616_v62  ;;  %v2614_v12 = vadd.f32 %v2571_v41, %v7447_v0  ;;  %v2901_v46 = vpop.f32.mrf.mxu0 }
 0x1cc   : > { %v5272_v52 = vpop.f32.mrf.mxu1 }
 0x1cd   : > { %v7557_v16 = vadd.f32 %v2898_v59, %v2614_v12  ;;  %v2617_v56 = vadd.f32 %v5272_v52, %v7452_v39  ;;  %v5345_v26 = vpop.f32.mrf.mxu0  ;;  %v2914_v52 = vadd.f32 %v7465_v48, %v2587_v53 }
 0x1ce   : > { %v2574_v29 = vpop.f32.mrf.mxu1 }
 0x1cf   : > { %v7563_v7 = vadd.f32 %v5306_v36, %v2617_v56  ;;  %v2615_v0 = vadd.f32 %v2574_v29, %v7459_v13  ;;  %v3726_v51 = vpop.f32.mrf.mxu0  ;;  %v2917_v29 = vadd.f32 %v7473_v4, %v2590_v24 }
 0x1d0   : > { %v5311_v2 = vpop.f32.mrf.mxu1 }
 0x1d1   : > { %v7567_v55 = vadd.f32 %v2901_v46, %v2615_v0  ;;  %v3433_v59 = vadd.f32 %v5311_v2, %v2915_v6  ;;  %v5346_v39 = vpop.f32.mrf.mxu0  ;;  %v8029_v2 = vld [vmem:[#allocation6_spill] sm:$0xff] }
 0x1d2   : > { %v3304_v27 = vpop.f32.mrf.mxu1 }
 0x1d3   : > { %v3855_v13 = vadd.f32 %v5345_v26, %v3433_v59  ;;  %v3431_v62 = vadd.f32 %v3304_v27, %v2913_v22  ;;  %v3729_v36 = vpop.f32.mrf.mxu0  ;;  %v8030_v22 = vld [vmem:[#allocation10_spill] sm:$0xff] }
 0x1d4   : > { %v5312_v41 = vpop.f32.mrf.mxu1  ;;  %v2595_v4 = vadd.f32 %v8030_v22, %v8029_v2 }
 0x1d5   : > { %v3894_v8 = vadd.f32 %v7574_v9, %v3855_v13  ;;  %v3853_v35 = vadd.f32 %v3726_v51, %v3431_v62  ;;  %v3434_v12 = vadd.f32 %v5312_v41, %v2916_v43  ;;  %v5349_v46 = vpop.f32.mrf.mxu0  ;;  %v2921_v51 = vadd.f32 %v7487_v17, %v2594_v57 }
 0x1d6   : > { %v3307_v20 = vpop.f32.mrf.mxu1 }
 0x1d7   : > { %v4806_v18 = vpack.c.bf16 %v3894_v8, %v3894_v8  ;;  %v3892_v48 = vadd.f32 %v7574_v9, %v3853_v35  ;;  %v3742_v63 = vpop.f32.mrf.mxu0  ;;  %v3856_v47 = vadd.f32 %v5346_v39, %v3434_v12  ;;  %v3432_v56 = vadd.f32 %v3307_v20, %v2914_v52 }
 0x1d8   : > { %v5315_v26 = vpop.f32.mrf.mxu1  ;;  %v4089_v53 = vsel %vm4085_vm5, %v3894_v8, 0.0  ;;  %v4157_v62 = vmul.f32 %v3894_v8, %v3894_v8 }
 0x1d9   : > { %4055 = vst.msk [vmem:[%s7589_s12 + $0x8] sm:$0xf] %vm4052_vm4, %v4806_v18  ;;  %v4804_v6 = vpack.c.bf16 %v3892_v48, %v3892_v48  ;;  %v5350_v58 = vpop.f32.mrf.mxu0  ;;  %v3895_v25 = vadd.f32 %v7574_v9, %v3856_v47  ;;  %v3854_v33 = vadd.f32 %v3729_v36, %v3432_v56  ;;  %v3437_v34 = vadd.f32 %v5315_v26, %v2919_v10  ;;  %v8031_v47 = vld [vmem:[#allocation5_spill] sm:$0xff] }
 0x1da   : > { %v3320_v0 = vpop.f32.mrf.mxu1  ;;  %v4155_v45 = vmul.f32 %v3892_v48, %v3892_v48  ;;  %v4086_v41 = vsel %vm4085_vm5, %v3892_v48, 0.0  ;;  %v2922_v56 = vadd.f32 %v8031_v47, %v2595_v4 }
 0x1db   : > { %4053 = vst.msk [vmem:[%s7589_s12] sm:$0xf] %vm4052_vm4, %v4804_v6  ;;  %v3435_v59 = vadd.f32 %v3320_v0, %v2917_v29  ;;  %v3745_v39 = vpop.f32.mrf.mxu0  ;;  %v4807_v27 = vpack.c.bf16 %v3895_v25, %v3895_v25  ;;  %v3893_v43 = vadd.f32 %v7574_v9, %v3854_v33  ;;  %v3859_v36 = vadd.f32 %v5349_v46, %v3437_v34 }
 0x1dc   : > { %v5316_v13 = vpop.f32.mrf.mxu1  ;;  %v4187_v57 = vsel %vm4085_vm5, %v4155_v45, 0.0  ;;  %v4158_v18 = vmul.f32 %v3895_v25, %v3895_v25  ;;  %v4091_v33 = vsel %vm4085_vm5, %v3895_v25, 0.0 }
 0x1dd   : > { %v3857_v15 = vadd.f32 %v3742_v63, %v3435_v59  ;;  %v3438_v17 = vadd.f32 %v5316_v13, %v2920_v3  ;;  %v5353_v50 = vpop.f32.mrf.mxu0  ;;  %4056 = vst.msk [vmem:[%s7589_s12 + $0xc] sm:$0xf] %vm4052_vm4, %v4807_v27  ;;  %v4805_v24 = vpack.c.bf16 %v3893_v43, %v3893_v43  ;;  %v4087_v35 = vsel %vm4085_vm5, %v3893_v43, 0.0 }
 0x1de   : > { %v4156_v12 = vmul.f32 %v3893_v43, %v3893_v43  ;;  %v3323_v52 = vpop.f32.mrf.mxu1  ;;  %v4088_v44 = vadd.f32 %v4087_v35, %v4086_v41  ;;  %v3898_v20 = vadd.f32 %v7574_v9, %v3859_v36  ;;  %v8032_v43 = vld [vmem:[#allocation7_spill] sm:$0xff] }
 0x1df   : > { %v3896_v31 = vadd.f32 %v7574_v9, %v3857_v15  ;;  %v3860_v8 = vadd.f32 %v5350_v58, %v3438_v17  ;;  %v3758_v46 = vpop.f32.mrf.mxu0  ;;  %4054 = vst.msk [vmem:[%s7589_s12 + $0x4] sm:$0xf] %vm4052_vm4, %v4805_v24  ;;  %v3436_v63 = vadd.f32 %v3323_v52, %v2918_v32  ;;  %v4190_v58 = vsel %vm4085_vm5, %v4157_v62, 0.0 }
 0x1e0   : > { %v4188_v48 = vsel %vm4085_vm5, %v4156_v12, 0.0  ;;  %v5319_v10 = vpop.f32.mrf.mxu1  ;;  %v4090_v26 = vadd.f32 %v4089_v53, %v4088_v44  ;;  %v4810_v6 = vpack.c.bf16 %v3898_v20, %v3898_v20  ;;  %v4192_v53 = vsel %vm4085_vm5, %v4158_v18, 0.0 }
 0x1e1   : > { %v4189_v29 = vadd.f32 %v4188_v48, %v4187_v57  ;;  %v5354_v3 = vpop.f32.mrf.mxu0  ;;  %v4808_v34 = vpack.c.bf16 %v3896_v31, %v3896_v31  ;;  %v4159_v0 = vmul.f32 %v3896_v31, %v3896_v31  ;;  %v3899_v32 = vadd.f32 %v7574_v9, %v3860_v8 }
 0x1e2   : > { %v3336_v2 = vpop.f32.mrf.mxu1  ;;  %4059 = vst.msk [vmem:[%s7589_s12 + $0x18] sm:$0xf] %vm4052_vm4, %v4810_v6  ;;  %v4092_v59 = vadd.f32 %v4091_v33, %v4090_v26  ;;  %v3858_v45 = vadd.f32 %v3745_v39, %v3436_v63  ;;  %v4093_v27 = vsel %vm4085_vm5, %v3896_v31, 0.0  ;;  %v3441_v25 = vadd.f32 %v5319_v10, %v8032_v43 }
 0x1e3   : > { %v4191_v22 = vadd.f32 %v4190_v58, %v4189_v29  ;;  %v3761_v4 = vpop.f32.mrf.mxu0  ;;  %4057 = vst.msk [vmem:[%s7589_s12 + $0x10] sm:$0xf] %vm4052_vm4, %v4808_v34  ;;  %v3439_v13 = vadd.f32 %v3336_v2, %v2921_v51  ;;  %v4161_v36 = vmul.f32 %v3898_v20, %v3898_v20  ;;  %v4811_v41 = vpack.c.bf16 %v3899_v32, %v3899_v32  ;;  %v8033_v51 = vld [vmem:[#allocation9_spill] sm:$0xff] }
 0x1e4   : > { %v5320_v62 = vpop.f32.mrf.mxu1  ;;  %v4094_v15 = vadd.f32 %v4093_v27, %v4092_v59  ;;  %v4194_v35 = vsel %vm4085_vm5, %v4159_v0, 0.0  ;;  %v3897_v39 = vadd.f32 %v7574_v9, %v3858_v45  ;;  %v3863_v12 = vadd.f32 %v5353_v50, %v3441_v25 }
 0x1e5   : > { %v4193_v17 = vadd.f32 %v4192_v53, %v4191_v22  ;;  %v5357_v24 = vpop.f32.mrf.mxu0  ;;  %v3861_v52 = vadd.f32 %v3758_v46, %v3439_v13  ;;  %v4097_v8 = vsel %vm4085_vm5, %v3898_v20, 0.0  ;;  %4060 = vst.msk [vmem:[%s7589_s12 + $0x1c] sm:$0xf] %vm4052_vm4, %v4811_v41  ;;  %v3442_v57 = vadd.f32 %v5320_v62, %v8033_v51 }
 0x1e6   : > { %v3339_v44 = vpop.f32.mrf.mxu1  ;;  %v4162_v63 = vmul.f32 %v3899_v32, %v3899_v32  ;;  %v4809_v10 = vpack.c.bf16 %v3897_v39, %v3897_v39  ;;  %v4095_v47 = vsel %vm4085_vm5, %v3897_v39, 0.0  ;;  %v4160_v26 = vmul.f32 %v3897_v39, %v3897_v39 }
 0x1e7   : > { %v4195_v31 = vadd.f32 %v4194_v35, %v4193_v17  ;;  %v3440_v18 = vadd.f32 %v3339_v44, %v2922_v56  ;;  %v3774_v48 = vpop.f32.mrf.mxu0  ;;  %v4096_v6 = vadd.f32 %v4095_v47, %v4094_v15  ;;  %v3902_v50 = vadd.f32 %v7574_v9, %v3863_v12 }
 0x1e8   : > { %v5323_v29 = vpop.f32.mrf.mxu1  ;;  %v3900_v46 = vadd.f32 %v7574_v9, %v3861_v52  ;;  %v3864_v20 = vadd.f32 %v5354_v3, %v3442_v57  ;;  %v4198_v33 = vsel %vm4085_vm5, %v4161_v36, 0.0  ;;  %4058 = vst.msk [vmem:[%s7589_s12 + $0x14] sm:$0xf] %vm4052_vm4, %v4809_v10  ;;  %v4196_v56 = vsel %vm4085_vm5, %v4160_v26, 0.0 }
 0x1e9   : > { %v5358_v58 = vpop.f32.mrf.mxu0  ;;  %v3862_v34 = vadd.f32 %v3761_v4, %v3440_v18  ;;  %v3445_v0 = vadd.f32 %v5323_v29, %v7502_v21  ;;  %v4099_v22 = vsel %vm4085_vm5, %v3899_v32, 0.0  ;;  %v4098_v59 = vadd.f32 %v4097_v8, %v4096_v6 }
 0x1ea   : > { %v3352_v2 = vpop.f32.mrf.mxu1  ;;  %v4197_v45 = vadd.f32 %v4196_v56, %v4195_v31  ;;  %v4814_v53 = vpack.c.bf16 %v3902_v50, %v3902_v50  ;;  %v4200_v3 = vsel %vm4085_vm5, %v4162_v63, 0.0  ;;  %v4105_v43 = vsel %vm4085_vm5, %v3902_v50, 0.0 }
 0x1eb   : > { %v3777_v27 = vpop.f32.mrf.mxu0  ;;  %v4812_v25 = vpack.c.bf16 %v3900_v46, %v3900_v46  ;;  %v4163_v13 = vmul.f32 %v3900_v46, %v3900_v46  ;;  %v4100_v4 = vadd.f32 %v4099_v22, %v4098_v59  ;;  %v3903_v21 = vadd.f32 %v7574_v9, %v3864_v20 }
 0x1ec   : > { %v5324_v62 = vpop.f32.mrf.mxu1  ;;  %v4199_v36 = vadd.f32 %v4198_v33, %v4197_v45  ;;  %4063 = vst.msk [vmem:[%s7589_s12 + $0x28] sm:$0xf] %vm4052_vm4, %v4814_v53  ;;  %v3901_v32 = vadd.f32 %v7574_v9, %v3862_v34  ;;  %v4165_v17 = vmul.f32 %v3902_v50, %v3902_v50  ;;  %v4101_v41 = vsel %vm4085_vm5, %v3900_v46, 0.0 }
 0x1ed   : > { %v5361_v15 = vpop.f32.mrf.mxu0  ;;  %4061 = vst.msk [vmem:[%s7589_s12 + $0x20] sm:$0xf] %vm4052_vm4, %v4812_v25  ;;  %v3867_v35 = vadd.f32 %v5357_v24, %v3445_v0  ;;  %v3443_v39 = vadd.f32 %v3352_v2, %v7505_v19  ;;  %v4102_v52 = vadd.f32 %v4101_v41, %v4100_v4  ;;  %v4202_v8 = vsel %vm4085_vm5, %v4163_v13, 0.0 }
 0x1ee   : > { %v3355_v12 = vpop.f32.mrf.mxu1  ;;  %v4201_v44 = vadd.f32 %v4200_v3, %v4199_v36  ;;  %v4815_v31 = vpack.c.bf16 %v3903_v21, %v3903_v21  ;;  %v4166_v57 = vmul.f32 %v3903_v21, %v3903_v21  ;;  %v4813_v18 = vpack.c.bf16 %v3901_v32, %v3901_v32 }
 0x1ef   : > { %v3790_v51 = vpop.f32.mrf.mxu0  ;;  %v4103_v63 = vsel %vm4085_vm5, %v3901_v32, 0.0  ;;  %v4164_v10 = vmul.f32 %v3901_v32, %v3901_v32  ;;  %v3906_v19 = vadd.f32 %v7574_v9, %v3867_v35  ;;  %v3865_v29 = vadd.f32 %v3774_v48, %v3443_v39 }
 0x1f0   : > { %v5327_v47 = vpop.f32.mrf.mxu1  ;;  %v4203_v26 = vadd.f32 %v4202_v8, %v4201_v44  ;;  %4064 = vst.msk [vmem:[%s7589_s12 + $0x2c] sm:$0xf] %vm4052_vm4, %v4815_v31  ;;  %v4104_v24 = vadd.f32 %v4103_v63, %v4102_v52  ;;  %v4206_v50 = vsel %vm4085_vm5, %v4165_v17, 0.0  ;;  %4062 = vst.msk [vmem:[%s7589_s12 + $0x24] sm:$0xf] %vm4052_vm4, %v4813_v18  ;;  %v3446_v20 = vadd.f32 %v5324_v62, %v7508_v30 }
 0x1f1   : > { %v5362_v6 = vpop.f32.mrf.mxu0  ;;  %v4204_v46 = vsel %vm4085_vm5, %v4164_v10, 0.0  ;;  %v3444_v33 = vadd.f32 %v3355_v12, %v7511_v40  ;;  %v4107_v34 = vsel %vm4085_vm5, %v3903_v21, 0.0  ;;  %v4818_v22 = vpack.c.bf16 %v3906_v19, %v3906_v19 }
 0x1f2   : > { %v3368_v56 = vpop.f32.mrf.mxu1  ;;  %v4106_v0 = vadd.f32 %v4105_v43, %v4104_v24  ;;  %v4205_v2 = vadd.f32 %v4204_v46, %v4203_v26  ;;  %v4208_v48 = vsel %vm4085_vm5, %v4166_v57, 0.0  ;;  %v3904_v45 = vadd.f32 %v7574_v9, %v3865_v29 }
 0x1f3   : > { %v7668_v59 = vpop.f32.mrf.mxu0  ;;  %v3868_v53 = vadd.f32 %v5358_v58, %v3446_v20  ;;  %v3866_v3 = vadd.f32 %v3777_v27, %v3444_v33  ;;  %4067 = vst.msk [vmem:[%s7589_s12 + $0x38] sm:$0xf] %vm4052_vm4, %v4818_v22  ;;  %v3449_v40 = vadd.f32 %v5327_v47, %v7514_v60  ;;  %v3447_v43 = vadd.f32 %v3368_v56, %v7517_v11 }
 0x1f4   : > { %v5328_v25 = vpop.f32.mrf.mxu1  ;;  %v4207_v13 = vadd.f32 %v4206_v50, %v4205_v2  ;;  %v4108_v30 = vadd.f32 %v4107_v34, %v4106_v0  ;;  %v4169_v36 = vmul.f32 %v3906_v19, %v3906_v19  ;;  %v4816_v4 = vpack.c.bf16 %v3904_v45, %v3904_v45 }
 0x1f5   : > { %v5365_v62 = vpop.f32.mrf.mxu0  ;;  %v4109_v21 = vsel %vm4085_vm5, %v3904_v45, 0.0  ;;  %v4167_v32 = vmul.f32 %v3904_v45, %v3904_v45  ;;  %v3907_v27 = vadd.f32 %v7574_v9, %v3868_v53  ;;  %v3905_v35 = vadd.f32 %v7574_v9, %v3866_v3 }
 0x1f6   : > { %v3371_v17 = vpop.f32.mrf.mxu1  ;;  %v4110_v41 = vadd.f32 %v4109_v21, %v4108_v30  ;;  %v4209_v58 = vadd.f32 %v4208_v48, %v4207_v13  ;;  %4065 = vst.msk [vmem:[%s7589_s12 + $0x30] sm:$0xf] %vm4052_vm4, %v4816_v4  ;;  %v3871_v11 = vadd.f32 %v5361_v15, %v3449_v40  ;;  %v3869_v12 = vadd.f32 %v3790_v51, %v3447_v43 }
 0x1f7   : > { %v3806_v39 = vpop.f32.mrf.mxu0  ;;  %v4210_v60 = vsel %vm4085_vm5, %v4167_v32, 0.0  ;;  %v3450_v52 = vadd.f32 %v5328_v25, %v7520_v54  ;;  %v4819_v31 = vpack.c.bf16 %v3907_v27, %v3907_v27  ;;  %v4817_v18 = vpack.c.bf16 %v3905_v35, %v3905_v35 }
 0x1f8   : > { %v5331_v44 = vpop.f32.mrf.mxu1  ;;  %v4211_v8 = vadd.f32 %v4210_v60, %v4209_v58  ;;  %v4111_v63 = vsel %vm4085_vm5, %v3905_v35, 0.0  ;;  %v4168_v10 = vmul.f32 %v3905_v35, %v3905_v35  ;;  %v3910_v47 = vadd.f32 %v7574_v9, %v3871_v11 }
 0x1f9   : > { %v5366_v57 = vpop.f32.mrf.mxu0  ;;  %v4113_v24 = vsel %vm4085_vm5, %v3906_v19, 0.0  ;;  %4068 = vst.msk [vmem:[%s7589_s12 + $0x3c] sm:$0xf] %vm4052_vm4, %v4819_v31  ;;  %v4112_v15 = vadd.f32 %v4111_v63, %v4110_v41  ;;  %v3908_v54 = vadd.f32 %v7574_v9, %v3869_v12  ;;  %v3872_v51 = vadd.f32 %v5362_v6, %v3450_v52  ;;  %4066 = vst.msk [vmem:[%s7589_s12 + $0x34] sm:$0xf] %vm4052_vm4, %v4817_v18 }
 0x1fa   : > { %v3384_v26 = vpop.f32.mrf.mxu1  ;;  %v4214_v50 = vsel %vm4085_vm5, %v4169_v36, 0.0  ;;  %v4170_v46 = vmul.f32 %v3907_v27, %v3907_v27  ;;  %v4212_v20 = vsel %vm4085_vm5, %v4168_v10, 0.0  ;;  %v4822_v33 = vpack.c.bf16 %v3910_v47, %v3910_v47 }
 0x1fb   : > { %v3809_v29 = vpop.f32.mrf.mxu0  ;;  %v4115_v19 = vsel %vm4085_vm5, %v3907_v27, 0.0  ;;  %v4114_v34 = vadd.f32 %v4113_v24, %v4112_v15  ;;  %v4213_v0 = vadd.f32 %v4212_v20, %v4211_v8  ;;  %v4820_v2 = vpack.c.bf16 %v3908_v54, %v3908_v54 }
 0x1fc   : > { %v5332_v56 = vpop.f32.mrf.mxu1  ;;  %4071 = vst.msk [vmem:[%s7589_s12 + $0x48] sm:$0xf] %vm4052_vm4, %v4822_v33  ;;  %v4173_v6 = vmul.f32 %v3910_v47, %v3910_v47  ;;  %v4171_v48 = vmul.f32 %v3908_v54, %v3908_v54  ;;  %v3911_v45 = vadd.f32 %v7574_v9, %v3872_v51  ;;  %v3448_v53 = vadd.f32 %v3371_v17, %v7523_v49 }
 0x1fd   : > { %v7694_v22 = vpop.f32.mrf.mxu0  ;;  %v4215_v25 = vadd.f32 %v4214_v50, %v4213_v0  ;;  %4069 = vst.msk [vmem:[%s7589_s12 + $0x40] sm:$0xf] %vm4052_vm4, %v4820_v2  ;;  %v4116_v13 = vadd.f32 %v4115_v19, %v4114_v34  ;;  %v3453_v30 = vadd.f32 %v5331_v44, %v7526_v37  ;;  %v3451_v40 = vadd.f32 %v3384_v26, %v7529_v23 }
 0x1fe   : > { %v3387_v3 = vpop.f32.mrf.mxu1  ;;  %v4216_v36 = vsel %vm4085_vm5, %v4170_v46, 0.0  ;;  %v4121_v4 = vsel %vm4085_vm5, %v3910_v47, 0.0  ;;  %v4117_v21 = vsel %vm4085_vm5, %v3908_v54, 0.0  ;;  %v4823_v32 = vpack.c.bf16 %v3911_v45, %v3911_v45 }
 0x1ff   : > { %v3822_v43 = vpop.f32.mrf.mxu0  ;;  %v4118_v49 = vadd.f32 %v4117_v21, %v4116_v13  ;;  %v4217_v17 = vadd.f32 %v4216_v36, %v4215_v25  ;;  %v3870_v58 = vadd.f32 %v7668_v59, %v3448_v53  ;;  %v3875_v27 = vadd.f32 %v5365_v62, %v3453_v30 }
 0x200   : > { %v5335_v41 = vpop.f32.mrf.mxu1  ;;  %v4218_v35 = vsel %vm4085_vm5, %v4171_v48, 0.0  ;;  %4072 = vst.msk [vmem:[%s7589_s12 + $0x4c] sm:$0xf] %vm4052_vm4, %v4823_v32  ;;  %v3873_v37 = vadd.f32 %v3806_v39, %v3451_v40  ;;  %v3454_v23 = vadd.f32 %v5332_v56, %v7532_v14  ;;  %v3452_v60 = vadd.f32 %v3387_v3, %v7535_v28 }
 0x201   : > { %v4222_v12 = vsel %vm4085_vm5, %v4173_v6, 0.0  ;;  %v4219_v52 = vadd.f32 %v4218_v35, %v4217_v17  ;;  %v3909_v44 = vadd.f32 %v7574_v9, %v3870_v58  ;;  %v3914_v8 = vadd.f32 %v7574_v9, %v3875_v27  ;;  %v5370_v59 = vpop.f32.mrf.mxu0 }
 0x202   : > { %v3400_v11 = vpop.f32.mrf.mxu1  ;;  %v4174_v62 = vmul.f32 %v3911_v45, %v3911_v45  ;;  %v3912_v31 = vadd.f32 %v7574_v9, %v3873_v37  ;;  %v3876_v18 = vadd.f32 %v5366_v57, %v3454_v23  ;;  %v3874_v39 = vadd.f32 %v3809_v29, %v3452_v60 }
 0x203   : > { %v4821_v14 = vpack.c.bf16 %v3909_v44, %v3909_v44  ;;  %v4119_v28 = vsel %vm4085_vm5, %v3909_v44, 0.0  ;;  %v4172_v10 = vmul.f32 %v3909_v44, %v3909_v44  ;;  %v4826_v47 = vpack.c.bf16 %v3914_v8, %v3914_v8  ;;  %v3825_v20 = vpop.f32.mrf.mxu0 }
 0x204   : > { %v5336_v63 = vpop.f32.mrf.mxu1  ;;  %v4123_v26 = vsel %vm4085_vm5, %v3911_v45, 0.0  ;;  %v4120_v24 = vadd.f32 %v4119_v28, %v4118_v49  ;;  %v4824_v15 = vpack.c.bf16 %v3912_v31, %v3912_v31  ;;  %v3457_v54 = vadd.f32 %v5335_v41, %v7538_v1 }
 0x205   : > { %4070 = vst.msk [vmem:[%s7589_s12 + $0x44] sm:$0xf] %vm4052_vm4, %v4821_v14  ;;  %v4220_v50 = vsel %vm4085_vm5, %v4172_v10, 0.0  ;;  %4075 = vst.msk [vmem:[%s7589_s12 + $0x58] sm:$0xf] %vm4052_vm4, %v4826_v47  ;;  %v4175_v57 = vmul.f32 %v3912_v31, %v3912_v31  ;;  %v3915_v29 = vadd.f32 %v7574_v9, %v3876_v18  ;;  %v3455_v46 = vadd.f32 %v3400_v11, %v7541_v42  ;;  %v5373_v36 = vpop.f32.mrf.mxu0 }
 0x206   : > { %v3403_v51 = vpop.f32.mrf.mxu1  ;;  %v4224_v33 = vsel %vm4085_vm5, %v4174_v62, 0.0  ;;  %v4122_v56 = vadd.f32 %v4121_v4, %v4120_v24  ;;  %v4221_v19 = vadd.f32 %v4220_v50, %v4219_v52  ;;  %4073 = vst.msk [vmem:[%s7589_s12 + $0x50] sm:$0xf] %vm4052_vm4, %v4824_v15  ;;  %v3913_v1 = vadd.f32 %v7574_v9, %v3874_v39 }
 0x207   : > { %v4177_v0 = vmul.f32 %v3914_v8, %v3914_v8  ;;  %v4125_v2 = vsel %vm4085_vm5, %v3912_v31, 0.0  ;;  %v4226_v6 = vsel %vm4085_vm5, %v4175_v57, 0.0  ;;  %v4827_v48 = vpack.c.bf16 %v3915_v29, %v3915_v29 }
 0x208   : > { %v5339_v34 = vpop.f32.mrf.mxu1  ;;  %v4223_v45 = vadd.f32 %v4222_v12, %v4221_v19  ;;  %v4124_v42 = vadd.f32 %v4123_v26, %v4122_v56  ;;  %v4178_v53 = vmul.f32 %v3915_v29, %v3915_v29  ;;  %v4825_v3 = vpack.c.bf16 %v3913_v1, %v3913_v1  ;;  %v3838_v12 = vpop.f32.mrf.mxu0 }
 0x209   : > { %4076 = vst.msk [vmem:[%s7589_s12 + $0x5c] sm:$0xf] %vm4052_vm4, %v4827_v48  ;;  %v4127_v25 = vsel %vm4085_vm5, %v3913_v1, 0.0  ;;  %v4176_v13 = vmul.f32 %v3913_v1, %v3913_v1  ;;  %v3879_v30 = vadd.f32 %v7694_v22, %v3457_v54  ;;  %v3877_v40 = vadd.f32 %v3822_v43, %v3455_v46 }
 0x20a   : > { %v3416_v4 = vpop.f32.mrf.mxu1  ;;  %v4126_v21 = vadd.f32 %v4125_v2, %v4124_v42  ;;  %v4225_v32 = vadd.f32 %v4224_v33, %v4223_v45  ;;  %4074 = vst.msk [vmem:[%s7589_s12 + $0x54] sm:$0xf] %vm4052_vm4, %v4825_v3  ;;  %v3458_v41 = vadd.f32 %v5336_v63, %v7544_v38  ;;  %v3456_v49 = vadd.f32 %v3403_v51, %v7547_v5  ;;  %v5374_v15 = vpop.f32.mrf.mxu0 }
 0x20b   : > { %v4228_v17 = vsel %vm4085_vm5, %v4176_v13, 0.0  ;;  %v3918_v58 = vadd.f32 %v7574_v9, %v3879_v30  ;;  %v3916_v27 = vadd.f32 %v7574_v9, %v3877_v40  ;;  %v3461_v22 = vadd.f32 %v5339_v34, %v7552_v61 }
 0x20c   : > { %v4227_v43 = vadd.f32 %v4226_v6, %v4225_v32  ;;  %v4128_v35 = vadd.f32 %v4127_v25, %v4126_v21  ;;  %v3880_v37 = vadd.f32 %v5370_v59, %v3458_v41  ;;  %v3878_v23 = vadd.f32 %v3825_v20, %v3456_v49  ;;  %v5340_v5 = vpop.f32.mrf.mxu1  ;;  %v3841_v45 = vpop.f32.mrf.mxu0 }
 0x20d   : > { %v4129_v60 = vsel %vm4085_vm5, %v3914_v8, 0.0  ;;  %v4830_v11 = vpack.c.bf16 %v3918_v58, %v3918_v58  ;;  %v4828_v38 = vpack.c.bf16 %v3916_v27, %v3916_v27  ;;  %v4230_v52 = vsel %vm4085_vm5, %v4177_v0, 0.0 }
 0x20e   : > { %v4131_v44 = vsel %vm4085_vm5, %v3915_v29, 0.0  ;;  %v4130_v62 = vadd.f32 %v4129_v60, %v4128_v35  ;;  %v4229_v31 = vadd.f32 %v4228_v17, %v4227_v43  ;;  %v4179_v61 = vmul.f32 %v3916_v27, %v3916_v27  ;;  %v3419_v54 = vpop.f32.mrf.mxu1 }
 0x20f   : > { %4079 = vst.msk [vmem:[%s7589_s12 + $0x68] sm:$0xf] %vm4052_vm4, %v4830_v11  ;;  %4077 = vst.msk [vmem:[%s7589_s12 + $0x60] sm:$0xf] %vm4052_vm4, %v4828_v38  ;;  %v3919_v59 = vadd.f32 %v7574_v9, %v3880_v37  ;;  %v3917_v18 = vadd.f32 %v7574_v9, %v3878_v23  ;;  %v3883_v8 = vadd.f32 %v5373_v36, %v3461_v22  ;;  %v4232_v39 = vsel %vm4085_vm5, %v4178_v53, 0.0 }
 0x210   : > { %v4231_v63 = vadd.f32 %v4230_v52, %v4229_v31  ;;  %v4132_v14 = vadd.f32 %v4131_v44, %v4130_v62  ;;  %v3459_v28 = vadd.f32 %v3416_v4, %v7557_v16  ;;  %v4181_v10 = vmul.f32 %v3918_v58, %v3918_v58 }
 0x211   : > { %v4133_v47 = vsel %vm4085_vm5, %v3916_v27, 0.0  ;;  %v4831_v26 = vpack.c.bf16 %v3919_v59, %v3919_v59  ;;  %v4829_v24 = vpack.c.bf16 %v3917_v18, %v3917_v18  ;;  %v4135_v57 = vsel %vm4085_vm5, %v3917_v18, 0.0 }
 0x212   : > { %v4134_v51 = vadd.f32 %v4133_v47, %v4132_v14  ;;  %v4233_v50 = vadd.f32 %v4232_v39, %v4231_v63  ;;  %v4180_v29 = vmul.f32 %v3917_v18, %v3917_v18  ;;  %v4234_v46 = vsel %vm4085_vm5, %v4179_v61, 0.0 }
 0x213   : > { %4080 = vst.msk [vmem:[%s7589_s12 + $0x6c] sm:$0xf] %vm4052_vm4, %v4831_v26  ;;  %4078 = vst.msk [vmem:[%s7589_s12 + $0x64] sm:$0xf] %vm4052_vm4, %v4829_v24  ;;  %v3922_v16 = vadd.f32 %v7574_v9, %v3883_v8  ;;  %v3881_v20 = vadd.f32 %v3838_v12, %v3459_v28  ;;  %v3462_v33 = vadd.f32 %v5340_v5, %v7563_v7  ;;  %v4137_v0 = vsel %vm4085_vm5, %v3918_v58, 0.0 }
 0x214   : > { %v4235_v56 = vadd.f32 %v4234_v46, %v4233_v50  ;;  %v4136_v19 = vadd.f32 %v4135_v57, %v4134_v51  ;;  %v4236_v1 = vsel %vm4085_vm5, %v4180_v29, 0.0  ;;  %v3460_v34 = vadd.f32 %v3419_v54, %v7567_v55 }
 0x215   : > { %v4182_v2 = vmul.f32 %v3919_v59, %v3919_v59  ;;  %v4834_v6 = vpack.c.bf16 %v3922_v16, %v3922_v16  ;;  %v3920_v48 = vadd.f32 %v7574_v9, %v3881_v20  ;;  %v3884_v3 = vadd.f32 %v5374_v15, %v3462_v33 }
 0x216   : > { %v4138_v42 = vadd.f32 %v4137_v0, %v4136_v19  ;;  %v4237_v53 = vadd.f32 %v4236_v1, %v4235_v56  ;;  %v3882_v25 = vadd.f32 %v3841_v45, %v3460_v34  ;;  %v4238_v7 = vsel %vm4085_vm5, %v4181_v10, 0.0 }
 0x217   : > { %v4139_v13 = vsel %vm4085_vm5, %v3919_v59, 0.0  ;;  %4083 = vst.msk [vmem:[%s7589_s12 + $0x78] sm:$0xf] %vm4052_vm4, %v4834_v6  ;;  %v4832_v30 = vpack.c.bf16 %v3920_v48, %v3920_v48  ;;  %v4183_v55 = vmul.f32 %v3920_v48, %v3920_v48  ;;  %v3923_v4 = vadd.f32 %v7574_v9, %v3884_v3 }
 0x218   : > { %v4239_v40 = vadd.f32 %v4238_v7, %v4237_v53  ;;  %v4140_v36 = vadd.f32 %v4139_v13, %v4138_v42  ;;  %v3921_v21 = vadd.f32 %v7574_v9, %v3882_v25  ;;  %v4240_v32 = vsel %vm4085_vm5, %v4182_v2, 0.0 }
 0x219   : > { %4081 = vst.msk [vmem:[%s7589_s12 + $0x70] sm:$0xf] %vm4052_vm4, %v4832_v30  ;;  %v4141_v41 = vsel %vm4085_vm5, %v3920_v48, 0.0  ;;  %v4185_v49 = vmul.f32 %v3922_v16, %v3922_v16  ;;  %v4835_v27 = vpack.c.bf16 %v3923_v4, %v3923_v4  ;;  %v4242_v22 = vsel %vm4085_vm5, %v4183_v55, 0.0 }
 0x21a   : > { %v4142_v17 = vadd.f32 %v4141_v41, %v4140_v36  ;;  %v4241_v58 = vadd.f32 %v4240_v32, %v4239_v40  ;;  %v4833_v43 = vpack.c.bf16 %v3921_v21, %v3921_v21  ;;  %v4143_v35 = vsel %vm4085_vm5, %v3921_v21, 0.0 }
 0x21b   : > { %v4184_v37 = vmul.f32 %v3921_v21, %v3921_v21  ;;  %4084 = vst.msk [vmem:[%s7589_s12 + $0x7c] sm:$0xf] %vm4052_vm4, %v4835_v27  ;;  %v4145_v60 = vsel %vm4085_vm5, %v3922_v16, 0.0  ;;  %v4186_v11 = vmul.f32 %v3923_v4, %v3923_v4  ;;  %v4246_v52 = vsel %vm4085_vm5, %v4185_v49, 0.0 }
 0x21c   : > { %v4243_v23 = vadd.f32 %v4242_v22, %v4241_v58  ;;  %v4144_v9 = vadd.f32 %v4143_v35, %v4142_v17  ;;  %4082 = vst.msk [vmem:[%s7589_s12 + $0x74] sm:$0xf] %vm4052_vm4, %v4833_v43  ;;  %v4147_v44 = vsel %vm4085_vm5, %v3923_v4, 0.0 }
 0x21d   : > { %v4244_v38 = vsel %vm4085_vm5, %v4184_v37, 0.0  ;;  %v4248_v61 = vsel %vm4085_vm5, %v4186_v11, 0.0 }
 0x21e   : > { %v4146_v12 = vadd.f32 %v4145_v60, %v4144_v9  ;;  %v4245_v5 = vadd.f32 %v4244_v38, %v4243_v23 }
 0x220   : > { %v4148_v62 = vadd.f32 %v4147_v44, %v4146_v12  ;;  %v4247_v31 = vadd.f32 %v4246_v52, %v4245_v5 }
 0x222   : > { %v4149_v59 = vrot.slane %v4148_v62, 4  ;;  %v4249_v18 = vadd.f32 %v4248_v61, %v4247_v31 }
 0x224   : > { %v4150_v8 = vadd.f32 %v4149_v59, %v4148_v62  ;;  %v4250_v39 = vrot.slane %v4249_v18, 4 }
 0x226   : > { %v4151_v63 = vrot.slane %v4150_v8, 2  ;;  %v4251_v14 = vadd.f32 %v4250_v39, %v4249_v18 }
 0x228   : > { %v4152_v28 = vadd.f32 %v4151_v63, %v4150_v8  ;;  %v4252_v10 = vrot.slane %v4251_v14, 2 }
 0x22a   : > { %v4153_v47 = vrot.slane %v4152_v28, 1  ;;  %v4253_v26 = vadd.f32 %v4252_v10, %v4251_v14 }
 0x22c   : > { %v4254_v24 = vrot.slane %v4253_v26, 1  ;;  %v4154_v15 = vadd.f32 %v4153_v47, %v4152_v28 }
 0x22e   : > { %v4255_v54 = vadd.f32 %v4254_v24, %v4253_v26 }
 0x230   : > { %v4257_v51 = vsel %vm4256_vm6, %v4154_v15, %v4255_v54 }
 0x231   : > { %4259 = vst.msk [vmem:[%s198_s22] sm:$0x3] %vm4258_vm7, %v4257_v51 }
 0x232   : > { %5504 = shalt.err (!%p5501_p3)
}
 0x233   : > { %s5505_s9 = scalar_lea.hbm %s7795_s29, 32  ;;  %s5509_s11 = scalar_lea.hbm %s7834_s4, 64 }
 0x234   : > { %p5506_p4 = scmp.ne.s32.totalorder %s7795_s29, %s5505_s9  ;;  %p5510_p9 = scmp.lt.s32.totalorder %s7795_s29, %s7834_s4 }
 0x235   : > { %p5511_p10 = scmp.lt.s32.totalorder %s5509_s11, %s5505_s9 }
 0x236   : > { %p5507_p7 = pnand %p5506_p4, %p5617_p5 }
 0x237   : > { %p5512_p11 = por %p5511_p10, %p5510_p9 }
 0x238   : > { %p5508_p8 = pneg %p5507_p7 }
 0x23a   : > { %p5513_p12 = pnand %p5512_p11, %p5508_p8 }
 0x23c   : > { %5516 = shalt.err (!%p5513_p12)
}
 0x23d   : > { %5388 = dma.vmem_to_hbm [thread:$0]  (%p5617_p5), %s4283_s23, 32, %s7795_s29, %s4266_s30  }
 0x23e PF: > { %p5394_p13 = scmp.ge.s32.totalorder %s5551_s18, 2  ;;  %s4302_s14 = sand.u32 1, %s5539_s15  }
 0x23f   : > { %s4303_s20 = scalar_lea.sflag [#allocation3], %s4302_s14 }
 0x240   : > { %p5391_p0 = pnand %p5394_p13, %p5621_p6 }
 0x242   : > { %p5392_p1 = pneg %p5391_p0 }
 0x244   : > { %5534 = dma.done.wait (%p5392_p1), %s4303_s20, 32  }
 0x245   : > { %5536 = vsyncadd (%p5392_p1), %s4303_s20, 4294967264  ;;  %p15_p2 = scmp.ge.s32.totalorder %s5604_s21, 4   ;;  %s8034_s15 = smov %s5543_s16 }
 0x246   : > { %s8035_s16 = smov %s5547_s17  ;;  %s8036_s17 = smov %s5615_s24 }
 0x247   : > { %s8037_s18 = smov %s5604_s21  ;;  %17 = sbr.rel (!%p15_p2) target bundleno = 3 (0x3), region = 89 }
 0x24c   :  { %4308 = vsyncpa [#allocation3], 1 }
 0x24d   :  { %4310 = vsyncpa [#allocation3 + $0x1], 1 }

</bundles_post_ra>
